<compile_context>
chip_gen: v6e
topology: v6e:2x2x1
jax: 0.10.0
libtpu: 0.0.40
codegen_flags: <defaults>
</compile_context>

<pallas_src>
import jax
import jax.numpy as jnp
from jax.experimental import pallas as pl
from jax.experimental.pallas import tpu as pltpu

# ---- hyper-parameters from the source module's globals ----
HIDDEN_DIM = 256
LATENT_DIM = 64
OBS_SIZE = 28 * 28          # 784
OBS_PAD = 896               # 7 * 128 — lane-dense padding of the obs dimension
PRIOR_SIZE = 64
INFERENCE_LR = 0.9
INFERENCE_STEPS = 20

# Flip to True on v6e/v7x for bf16 MXU feeds (halves weight VMEM/DMA).  Default
# False preserves exact f32 dynamics of the reference (see perf-review concern).
USE_BF16_WEIGHTS = False

_VMEM = pl.BlockSpec(memory_space=pltpu.MemorySpace.VMEM)


# ----------------------------- kernel helpers ------------------------------ #

def _dot(a, b):
    """MXU matmul; optionally feed bf16 activations when weights are bf16."""
    if USE_BF16_WEIGHTS:
        a = a.astype(jnp.bfloat16)
    return jnp.dot(a, b, preferred_element_type=jnp.float32)


def _decoder_fwd(z, w0t_ref, w1t_ref, wmt_ref):
    """3-layer decoder with pre-transposed (in, out) weights -> (a0, a1, pred)."""
    a0 = jnp.maximum(_dot(z, w0t_ref[...]), 0.0)
    a1 = jnp.maximum(_dot(a0, w1t_ref[...]), 0.0)
    pred = _dot(a1, wmt_ref[...])
    return a0, a1, pred


def _pc_update(mu, target, dec_refs, x_dim):
    """One latent-state GD step: mu -= lr * d/dmu [ sum_b mean_j (pred-target)^2 ].

    Hand-derived VJP of the decoder forward.  ReLU masks come from the
    post-activations (a>0 == h>0).  The mathematically-zero 0.1*(mu - mu_TD)
    term is dropped; the 2/x_dim scale is folded into the lr multiply.
    """
    w0t, w1t, wmt, w0, w1, wm = dec_refs
    a0, a1, pred = _decoder_fwd(mu, w0t, w1t, wmt)
    err = pred - target
    g_a1 = _dot(err, wm[...])
    g_h1 = jnp.where(a1 > 0.0, g_a1, 0.0)
    g_a0 = _dot(g_h1, w1[...])
    g_h0 = jnp.where(a0 > 0.0, g_a0, 0.0)
    g_mu = _dot(g_h0, w0[...])
    return mu - (INFERENCE_LR * 2.0 / x_dim) * g_mu


# ------------------------------ fused kernel ------------------------------- #

def pc_fused_kernel(prior_ref, x_ref, *refs):
    # refs = 18 weight refs (3 decoders x [W0^T, W1^T, Wmu^T, W0, W1, Wmu]) + 7 outputs
    dec = tuple(tuple(refs[6 * i + j] for j in range(6)) for i in range(3))
    (mu1_out, mu2_out, mu3_out,
     pp1_out, pp2_out, pp3_out, pg_out) = refs[18:]

    x_pad = x_ref[...]       # (B, OBS_PAD) — zeros past column OBS_SIZE-1
    prior = prior_ref[...]   # (B, PRIOR_SIZE) — filled with 1e-5

    # initial top-down pass: mus = [x, dec2(dec3(prior)), dec3(prior), prior]
    mu3 = prior
    mu2 = _decoder_fwd(mu3, *dec[2][:3])[2]
    mu1 = _decoder_fwd(mu2, *dec[1][:3])[2]

    def step(_, carry):
        m1, m2, m3 = carry
        # Sequential updates: layer l's target is mus[l] *after* this step's
        # earlier updates — exactly the in-place PyTorch `-=` behaviour.
        m1 = _pc_update(m1, x_pad, dec[0], OBS_SIZE)
        m2 = _pc_update(m2, m1, dec[1], LATENT_DIM)
        m3 = _pc_update(m3, m2, dec[2], LATENT_DIM)
        return (m1, m2, m3)

    mu1, mu2, mu3 = jax.lax.fori_loop(0, INFERENCE_STEPS, step, (mu1, mu2, mu3))

    mu1_out[...] = mu1
    mu2_out[...] = mu2
    mu3_out[...] = mu3

    # posterior predictions per layer + global top-down reconstruction
    pp1_out[...] = _decoder_fwd(mu1, *dec[0][:3])[2]
    pp2_out[...] = _decoder_fwd(mu2, *dec[1][:3])[2]
    t3 = _decoder_fwd(mu3, *dec[2][:3])[2]
    pp3_out[...] = t3
    t2 = _decoder_fwd(t3, *dec[1][:3])[2]
    pg_out[...] = _decoder_fwd(t2, *dec[0][:3])[2]


# ----------------------------- kernel wrapper ------------------------------ #

def _prep_decoder_weights(w0, w1, wmu, pad_out_to=None):
    """Stage both orientations of a decoder's weights: (W0^T, W1^T, Wmu^T, W0, W1, Wmu)."""
    if pad_out_to is not None and wmu.shape[0] != pad_out_to:
        wmu = jnp.pad(wmu, ((0, pad_out_to - wmu.shape[0]), (0, 0)))
    ws = (w0.T, w1.T, wmu.T, w0, w1, wmu)
    if USE_BF16_WEIGHTS:
        ws = tuple(w.astype(jnp.bfloat16) for w in ws)
    return ws


@jax.jit
def pc_forward(x, prior, params):
    dec1, dec2, dec3 = params
    x = x.astype(jnp.float32)
    batch = x.shape[0]

    prior = (prior * 0 + 1e-5).astype(jnp.float32)
    x_pad = jnp.pad(x, ((0, 0), (0, OBS_PAD - OBS_SIZE)))

    w_flat = (_prep_decoder_weights(*dec1, pad_out_to=OBS_PAD)
              + _prep_decoder_weights(*dec2)
              + _prep_decoder_weights(*dec3))

    out_shape = (
        jax.ShapeDtypeStruct((batch, LATENT_DIM), jnp.float32),   # mu1
        jax.ShapeDtypeStruct((batch, LATENT_DIM), jnp.float32),   # mu2
        jax.ShapeDtypeStruct((batch, PRIOR_SIZE), jnp.float32),   # mu3
        jax.ShapeDtypeStruct((batch, OBS_PAD), jnp.float32),      # pred_post[0] (padded)
        jax.ShapeDtypeStruct((batch, LATENT_DIM), jnp.float32),   # pred_post[1]
        jax.ShapeDtypeStruct((batch, LATENT_DIM), jnp.float32),   # pred_post[2]
        jax.ShapeDtypeStruct((batch, OBS_PAD), jnp.float32),      # pred_global (padded)
    )

    outs = pl.pallas_call(
        pc_fused_kernel,
        out_shape=out_shape,
        in_specs=[_VMEM] * (2 + len(w_flat)),
        out_specs=tuple(_VMEM for _ in out_shape),
    )(prior, x_pad, *w_flat)

    mu1, mu2, mu3, pp1, pp2, pp3, pg = outs
    pred_post = [pp1[:, :OBS_SIZE], pp2, pp3]
    pred_global = pg[:, :OBS_SIZE]
    mus = [x, mu1, mu2, mu3]
    return pred_post, pred_post[0], pred_global, mus


# ------------------------- parameter initialization ------------------------ #

def _xavier_normal(key, out_dim, in_dim):
    std = (2.0 / (in_dim + out_dim)) ** 0.5
    return std * jax.random.normal(key, (out_dim, in_dim), jnp.float32)


def init_decoder(key, z_dim, x_dim, h_dim):
    k0, k1, k2 = jax.random.split(key, 3)
    return (_xavier_normal(k0, h_dim, z_dim),    # linear_hidden0: (h, z)
            _xavier_normal(k1, h_dim, h_dim),    # linear_hidden1: (h, h)
            _xavier_normal(k2, x_dim, h_dim))    # linear_mu:      (x, h)


def init_pc(key, obs_size=OBS_SIZE, prior_size=PRIOR_SIZE):
    k1, k2, k3 = jax.random.split(key, 3)
    dec1 = init_decoder(k1, LATENT_DIM, obs_size, HIDDEN_DIM)
    dec2 = init_decoder(k2, LATENT_DIM, LATENT_DIM, HIDDEN_DIM)
    dec3 = init_decoder(k3, prior_size, LATENT_DIM, HIDDEN_DIM)
    return (dec1, dec2, dec3)   # same ordering as self.decoders = [dec1, dec2, dec3]


# ----------------------------------- main ----------------------------------- #

if __name__ == "__main__":
    key = jax.random.PRNGKey(0)
    kp, kx, kprior = jax.random.split(key, 3)

    params = init_pc(kp)

    BATCH = 8
    x = jax.random.normal(kx, (BATCH, OBS_SIZE), jnp.float32)
    prior = jax.random.normal(kprior, (BATCH, PRIOR_SIZE), jnp.float32)

    pred_post, recon, pred_global, mus = pc_forward(x, prior, params)
    jax.block_until_ready((pred_post, recon, pred_global, mus))

    assert recon.shape == (BATCH, OBS_SIZE)
    assert pred_global.shape == (BATCH, OBS_SIZE)
    assert pred_post[0].shape == (BATCH, OBS_SIZE)
    assert pred_post[1].shape == (BATCH, LATENT_DIM)
    assert pred_post[2].shape == (BATCH, LATENT_DIM)
    assert [tuple(m.shape) for m in mus] == [(BATCH, OBS_SIZE),
                                             (BATCH, LATENT_DIM),
                                             (BATCH, LATENT_DIM),
                                             (BATCH, PRIOR_SIZE)]
    assert all(bool(jnp.all(jnp.isfinite(m))) for m in mus)
    assert bool(jnp.all(jnp.isfinite(pred_global)))
    assert bool(jnp.all(jnp.isfinite(recon)))

    print("KERNEL_OK")
</pallas_src>

<mosaic_0001>
module attributes {stable_mosaic.version = 11 : i64} {
  func.func @pc_fused_kernel(%arg0: memref<8x64xf32, #tpu.memory_space<vmem>>, %arg1: memref<8x896xf32, #tpu.memory_space<vmem>>, %arg2: memref<64x256xf32, #tpu.memory_space<vmem>>, %arg3: memref<256x256xf32, #tpu.memory_space<vmem>>, %arg4: memref<256x896xf32, #tpu.memory_space<vmem>>, %arg5: memref<256x64xf32, #tpu.memory_space<vmem>>, %arg6: memref<256x256xf32, #tpu.memory_space<vmem>>, %arg7: memref<896x256xf32, #tpu.memory_space<vmem>>, %arg8: memref<64x256xf32, #tpu.memory_space<vmem>>, %arg9: memref<256x256xf32, #tpu.memory_space<vmem>>, %arg10: memref<256x64xf32, #tpu.memory_space<vmem>>, %arg11: memref<256x64xf32, #tpu.memory_space<vmem>>, %arg12: memref<256x256xf32, #tpu.memory_space<vmem>>, %arg13: memref<64x256xf32, #tpu.memory_space<vmem>>, %arg14: memref<64x256xf32, #tpu.memory_space<vmem>>, %arg15: memref<256x256xf32, #tpu.memory_space<vmem>>, %arg16: memref<256x64xf32, #tpu.memory_space<vmem>>, %arg17: memref<256x64xf32, #tpu.memory_space<vmem>>, %arg18: memref<256x256xf32, #tpu.memory_space<vmem>>, %arg19: memref<64x256xf32, #tpu.memory_space<vmem>>, %arg20: memref<8x64xf32, #tpu.memory_space<vmem>>, %arg21: memref<8x64xf32, #tpu.memory_space<vmem>>, %arg22: memref<8x64xf32, #tpu.memory_space<vmem>>, %arg23: memref<8x896xf32, #tpu.memory_space<vmem>>, %arg24: memref<8x64xf32, #tpu.memory_space<vmem>>, %arg25: memref<8x64xf32, #tpu.memory_space<vmem>>, %arg26: memref<8x896xf32, #tpu.memory_space<vmem>>) attributes {dimension_semantics = [], scalar_prefetch = 0 : i64, scratch_operands = 0 : i64, tpu.core_type = #tpu.core_type<tc>} {
    %c0 = arith.constant 0 : index
    %c0_0 = arith.constant 0 : index
    %0 = vector.load %arg1[%c0, %c0_0] : memref<8x896xf32, #tpu.memory_space<vmem>>, vector<8x896xf32>
    %c0_1 = arith.constant 0 : index
    %c0_2 = arith.constant 0 : index
    %1 = vector.load %arg0[%c0_1, %c0_2] : memref<8x64xf32, #tpu.memory_space<vmem>>, vector<8x64xf32>
    %c0_3 = arith.constant 0 : index
    %c0_4 = arith.constant 0 : index
    %2 = vector.load %arg14[%c0_3, %c0_4] : memref<64x256xf32, #tpu.memory_space<vmem>>, vector<64x256xf32>
    %cst = arith.constant dense<0.000000e+00> : vector<8x256xf32>
    %3 = tpu.matmul %1, %2, %cst {dimension_numbers = #tpu.dot_dimension_numbers<[1], [0], [0], [1], [0, 0, 1, 1], [], []>} : vector<8x64xf32>, vector<64x256xf32>, vector<8x256xf32> -> vector<8x256xf32>
    %cst_5 = arith.constant 0.000000e+00 : f32
    %4 = vector.broadcast %cst_5 : f32 to vector<8x256xf32>
    %5 = arith.maximumf %3, %4 : vector<8x256xf32>
    %c0_6 = arith.constant 0 : index
    %c0_7 = arith.constant 0 : index
    %6 = vector.load %arg15[%c0_6, %c0_7] : memref<256x256xf32, #tpu.memory_space<vmem>>, vector<256x256xf32>
    %cst_8 = arith.constant dense<0.000000e+00> : vector<8x256xf32>
    %7 = tpu.matmul %5, %6, %cst_8 {dimension_numbers = #tpu.dot_dimension_numbers<[1], [0], [0], [1], [0, 0, 1, 1], [], []>} : vector<8x256xf32>, vector<256x256xf32>, vector<8x256xf32> -> vector<8x256xf32>
    %cst_9 = arith.constant 0.000000e+00 : f32
    %8 = vector.broadcast %cst_9 : f32 to vector<8x256xf32>
    %9 = arith.maximumf %7, %8 : vector<8x256xf32>
    %c0_10 = arith.constant 0 : index
    %c0_11 = arith.constant 0 : index
    %10 = vector.load %arg16[%c0_10, %c0_11] : memref<256x64xf32, #tpu.memory_space<vmem>>, vector<256x64xf32>
    %cst_12 = arith.constant dense<0.000000e+00> : vector<8x64xf32>
    %11 = tpu.matmul %9, %10, %cst_12 {dimension_numbers = #tpu.dot_dimension_numbers<[1], [0], [0], [1], [0, 0, 1, 1], [], []>} : vector<8x256xf32>, vector<256x64xf32>, vector<8x64xf32> -> vector<8x64xf32>
    %c0_13 = arith.constant 0 : index
    %c0_14 = arith.constant 0 : index
    %12 = vector.load %arg8[%c0_13, %c0_14] : memref<64x256xf32, #tpu.memory_space<vmem>>, vector<64x256xf32>
    %cst_15 = arith.constant dense<0.000000e+00> : vector<8x256xf32>
    %13 = tpu.matmul %11, %12, %cst_15 {dimension_numbers = #tpu.dot_dimension_numbers<[1], [0], [0], [1], [0, 0, 1, 1], [], []>} : vector<8x64xf32>, vector<64x256xf32>, vector<8x256xf32> -> vector<8x256xf32>
    %cst_16 = arith.constant 0.000000e+00 : f32
    %14 = vector.broadcast %cst_16 : f32 to vector<8x256xf32>
    %15 = arith.maximumf %13, %14 : vector<8x256xf32>
    %c0_17 = arith.constant 0 : index
    %c0_18 = arith.constant 0 : index
    %16 = vector.load %arg9[%c0_17, %c0_18] : memref<256x256xf32, #tpu.memory_space<vmem>>, vector<256x256xf32>
    %cst_19 = arith.constant dense<0.000000e+00> : vector<8x256xf32>
    %17 = tpu.matmul %15, %16, %cst_19 {dimension_numbers = #tpu.dot_dimension_numbers<[1], [0], [0], [1], [0, 0, 1, 1], [], []>} : vector<8x256xf32>, vector<256x256xf32>, vector<8x256xf32> -> vector<8x256xf32>
    %cst_20 = arith.constant 0.000000e+00 : f32
    %18 = vector.broadcast %cst_20 : f32 to vector<8x256xf32>
    %19 = arith.maximumf %17, %18 : vector<8x256xf32>
    %c0_21 = arith.constant 0 : index
    %c0_22 = arith.constant 0 : index
    %20 = vector.load %arg10[%c0_21, %c0_22] : memref<256x64xf32, #tpu.memory_space<vmem>>, vector<256x64xf32>
    %cst_23 = arith.constant dense<0.000000e+00> : vector<8x64xf32>
    %21 = tpu.matmul %19, %20, %cst_23 {dimension_numbers = #tpu.dot_dimension_numbers<[1], [0], [0], [1], [0, 0, 1, 1], [], []>} : vector<8x256xf32>, vector<256x64xf32>, vector<8x64xf32> -> vector<8x64xf32>
    %c0_i32 = arith.constant 0 : i32
    %c20_i32 = arith.constant 20 : i32
    %22 = arith.addi %c0_i32, %c20_i32 : i32
    %c1_i32 = arith.constant 1 : i32
    %23:3 = scf.for %arg27 = %c0_i32 to %22 step %c1_i32 iter_args(%arg28 = %21, %arg29 = %11, %arg30 = %1) -> (vector<8x64xf32>, vector<8x64xf32>, vector<8x64xf32>)  : i32 {
      %c0_93 = arith.constant 0 : index
      %c0_94 = arith.constant 0 : index
      %81 = vector.load %arg2[%c0_93, %c0_94] : memref<64x256xf32, #tpu.memory_space<vmem>>, vector<64x256xf32>
      %cst_95 = arith.constant dense<0.000000e+00> : vector<8x256xf32>
      %82 = tpu.matmul %arg28, %81, %cst_95 {dimension_numbers = #tpu.dot_dimension_numbers<[1], [0], [0], [1], [0, 0, 1, 1], [], []>} : vector<8x64xf32>, vector<64x256xf32>, vector<8x256xf32> -> vector<8x256xf32>
      %cst_96 = arith.constant 0.000000e+00 : f32
      %83 = vector.broadcast %cst_96 : f32 to vector<8x256xf32>
      %84 = arith.maximumf %82, %83 : vector<8x256xf32>
      %c0_97 = arith.constant 0 : index
      %c0_98 = arith.constant 0 : index
      %85 = vector.load %arg3[%c0_97, %c0_98] : memref<256x256xf32, #tpu.memory_space<vmem>>, vector<256x256xf32>
      %cst_99 = arith.constant dense<0.000000e+00> : vector<8x256xf32>
      %86 = tpu.matmul %84, %85, %cst_99 {dimension_numbers = #tpu.dot_dimension_numbers<[1], [0], [0], [1], [0, 0, 1, 1], [], []>} : vector<8x256xf32>, vector<256x256xf32>, vector<8x256xf32> -> vector<8x256xf32>
      %cst_100 = arith.constant 0.000000e+00 : f32
      %87 = vector.broadcast %cst_100 : f32 to vector<8x256xf32>
      %88 = arith.maximumf %86, %87 : vector<8x256xf32>
      %c0_101 = arith.constant 0 : index
      %c0_102 = arith.constant 0 : index
      %89 = vector.load %arg4[%c0_101, %c0_102] : memref<256x896xf32, #tpu.memory_space<vmem>>, vector<256x896xf32>
      %cst_103 = arith.constant dense<0.000000e+00> : vector<8x896xf32>
      %90 = tpu.matmul %88, %89, %cst_103 {dimension_numbers = #tpu.dot_dimension_numbers<[1], [0], [0], [1], [0, 0, 1, 1], [], []>} : vector<8x256xf32>, vector<256x896xf32>, vector<8x896xf32> -> vector<8x896xf32>
      %91 = arith.subf %90, %0 : vector<8x896xf32>
      %c0_104 = arith.constant 0 : index
      %c0_105 = arith.constant 0 : index
      %92 = vector.load %arg7[%c0_104, %c0_105] : memref<896x256xf32, #tpu.memory_space<vmem>>, vector<896x256xf32>
      %cst_106 = arith.constant dense<0.000000e+00> : vector<8x256xf32>
      %93 = tpu.matmul %91, %92, %cst_106 {dimension_numbers = #tpu.dot_dimension_numbers<[1], [0], [0], [1], [0, 0, 1, 1], [], []>} : vector<8x896xf32>, vector<896x256xf32>, vector<8x256xf32> -> vector<8x256xf32>
      %cst_107 = arith.constant 0.000000e+00 : f32
      %94 = vector.broadcast %cst_107 : f32 to vector<8x256xf32>
      %95 = arith.cmpf ogt, %88, %94 : vector<8x256xf32>
      %cst_108 = arith.constant 0.000000e+00 : f32
      %96 = vector.broadcast %cst_108 : f32 to vector<8x256xf32>
      %97 = arith.select %95, %93, %96 : vector<8x256xi1>, vector<8x256xf32>
      %c0_109 = arith.constant 0 : index
      %c0_110 = arith.constant 0 : index
      %98 = vector.load %arg6[%c0_109, %c0_110] : memref<256x256xf32, #tpu.memory_space<vmem>>, vector<256x256xf32>
      %cst_111 = arith.constant dense<0.000000e+00> : vector<8x256xf32>
      %99 = tpu.matmul %97, %98, %cst_111 {dimension_numbers = #tpu.dot_dimension_numbers<[1], [0], [0], [1], [0, 0, 1, 1], [], []>} : vector<8x256xf32>, vector<256x256xf32>, vector<8x256xf32> -> vector<8x256xf32>
      %cst_112 = arith.constant 0.000000e+00 : f32
      %100 = vector.broadcast %cst_112 : f32 to vector<8x256xf32>
      %101 = arith.cmpf ogt, %84, %100 : vector<8x256xf32>
      %cst_113 = arith.constant 0.000000e+00 : f32
      %102 = vector.broadcast %cst_113 : f32 to vector<8x256xf32>
      %103 = arith.select %101, %99, %102 : vector<8x256xi1>, vector<8x256xf32>
      %c0_114 = arith.constant 0 : index
      %c0_115 = arith.constant 0 : index
      %104 = vector.load %arg5[%c0_114, %c0_115] : memref<256x64xf32, #tpu.memory_space<vmem>>, vector<256x64xf32>
      %cst_116 = arith.constant dense<0.000000e+00> : vector<8x64xf32>
      %105 = tpu.matmul %103, %104, %cst_116 {dimension_numbers = #tpu.dot_dimension_numbers<[1], [0], [0], [1], [0, 0, 1, 1], [], []>} : vector<8x256xf32>, vector<256x64xf32>, vector<8x64xf32> -> vector<8x64xf32>
      %cst_117 = arith.constant 0.0022959183 : f32
      %106 = vector.broadcast %cst_117 : f32 to vector<8x64xf32>
      %107 = arith.mulf %106, %105 : vector<8x64xf32>
      %108 = arith.subf %arg28, %107 : vector<8x64xf32>
      %c0_118 = arith.constant 0 : index
      %c0_119 = arith.constant 0 : index
      %109 = vector.load %arg8[%c0_118, %c0_119] : memref<64x256xf32, #tpu.memory_space<vmem>>, vector<64x256xf32>
      %cst_120 = arith.constant dense<0.000000e+00> : vector<8x256xf32>
      %110 = tpu.matmul %arg29, %109, %cst_120 {dimension_numbers = #tpu.dot_dimension_numbers<[1], [0], [0], [1], [0, 0, 1, 1], [], []>} : vector<8x64xf32>, vector<64x256xf32>, vector<8x256xf32> -> vector<8x256xf32>
      %cst_121 = arith.constant 0.000000e+00 : f32
      %111 = vector.broadcast %cst_121 : f32 to vector<8x256xf32>
      %112 = arith.maximumf %110, %111 : vector<8x256xf32>
      %c0_122 = arith.constant 0 : index
      %c0_123 = arith.constant 0 : index
      %113 = vector.load %arg9[%c0_122, %c0_123] : memref<256x256xf32, #tpu.memory_space<vmem>>, vector<256x256xf32>
      %cst_124 = arith.constant dense<0.000000e+00> : vector<8x256xf32>
      %114 = tpu.matmul %112, %113, %cst_124 {dimension_numbers = #tpu.dot_dimension_numbers<[1], [0], [0], [1], [0, 0, 1, 1], [], []>} : vector<8x256xf32>, vector<256x256xf32>, vector<8x256xf32> -> vector<8x256xf32>
      %cst_125 = arith.constant 0.000000e+00 : f32
      %115 = vector.broadcast %cst_125 : f32 to vector<8x256xf32>
      %116 = arith.maximumf %114, %115 : vector<8x256xf32>
      %c0_126 = arith.constant 0 : index
      %c0_127 = arith.constant 0 : index
      %117 = vector.load %arg10[%c0_126, %c0_127] : memref<256x64xf32, #tpu.memory_space<vmem>>, vector<256x64xf32>
      %cst_128 = arith.constant dense<0.000000e+00> : vector<8x64xf32>
      %118 = tpu.matmul %116, %117, %cst_128 {dimension_numbers = #tpu.dot_dimension_numbers<[1], [0], [0], [1], [0, 0, 1, 1], [], []>} : vector<8x256xf32>, vector<256x64xf32>, vector<8x64xf32> -> vector<8x64xf32>
      %119 = arith.subf %118, %108 : vector<8x64xf32>
      %c0_129 = arith.constant 0 : index
      %c0_130 = arith.constant 0 : index
      %120 = vector.load %arg13[%c0_129, %c0_130] : memref<64x256xf32, #tpu.memory_space<vmem>>, vector<64x256xf32>
      %cst_131 = arith.constant dense<0.000000e+00> : vector<8x256xf32>
      %121 = tpu.matmul %119, %120, %cst_131 {dimension_numbers = #tpu.dot_dimension_numbers<[1], [0], [0], [1], [0, 0, 1, 1], [], []>} : vector<8x64xf32>, vector<64x256xf32>, vector<8x256xf32> -> vector<8x256xf32>
      %cst_132 = arith.constant 0.000000e+00 : f32
      %122 = vector.broadcast %cst_132 : f32 to vector<8x256xf32>
      %123 = arith.cmpf ogt, %116, %122 : vector<8x256xf32>
      %cst_133 = arith.constant 0.000000e+00 : f32
      %124 = vector.broadcast %cst_133 : f32 to vector<8x256xf32>
      %125 = arith.select %123, %121, %124 : vector<8x256xi1>, vector<8x256xf32>
      %c0_134 = arith.constant 0 : index
      %c0_135 = arith.constant 0 : index
      %126 = vector.load %arg12[%c0_134, %c0_135] : memref<256x256xf32, #tpu.memory_space<vmem>>, vector<256x256xf32>
      %cst_136 = arith.constant dense<0.000000e+00> : vector<8x256xf32>
      %127 = tpu.matmul %125, %126, %cst_136 {dimension_numbers = #tpu.dot_dimension_numbers<[1], [0], [0], [1], [0, 0, 1, 1], [], []>} : vector<8x256xf32>, vector<256x256xf32>, vector<8x256xf32> -> vector<8x256xf32>
      %cst_137 = arith.constant 0.000000e+00 : f32
      %128 = vector.broadcast %cst_137 : f32 to vector<8x256xf32>
      %129 = arith.cmpf ogt, %112, %128 : vector<8x256xf32>
      %cst_138 = arith.constant 0.000000e+00 : f32
      %130 = vector.broadcast %cst_138 : f32 to vector<8x256xf32>
      %131 = arith.select %129, %127, %130 : vector<8x256xi1>, vector<8x256xf32>
      %c0_139 = arith.constant 0 : index
      %c0_140 = arith.constant 0 : index
      %132 = vector.load %arg11[%c0_139, %c0_140] : memref<256x64xf32, #tpu.memory_space<vmem>>, vector<256x64xf32>
      %cst_141 = arith.constant dense<0.000000e+00> : vector<8x64xf32>
      %133 = tpu.matmul %131, %132, %cst_141 {dimension_numbers = #tpu.dot_dimension_numbers<[1], [0], [0], [1], [0, 0, 1, 1], [], []>} : vector<8x256xf32>, vector<256x64xf32>, vector<8x64xf32> -> vector<8x64xf32>
      %cst_142 = arith.constant 2.812500e-02 : f32
      %134 = vector.broadcast %cst_142 : f32 to vector<8x64xf32>
      %135 = arith.mulf %134, %133 : vector<8x64xf32>
      %136 = arith.subf %arg29, %135 : vector<8x64xf32>
      %c0_143 = arith.constant 0 : index
      %c0_144 = arith.constant 0 : index
      %137 = vector.load %arg14[%c0_143, %c0_144] : memref<64x256xf32, #tpu.memory_space<vmem>>, vector<64x256xf32>
      %cst_145 = arith.constant dense<0.000000e+00> : vector<8x256xf32>
      %138 = tpu.matmul %arg30, %137, %cst_145 {dimension_numbers = #tpu.dot_dimension_numbers<[1], [0], [0], [1], [0, 0, 1, 1], [], []>} : vector<8x64xf32>, vector<64x256xf32>, vector<8x256xf32> -> vector<8x256xf32>
      %cst_146 = arith.constant 0.000000e+00 : f32
      %139 = vector.broadcast %cst_146 : f32 to vector<8x256xf32>
      %140 = arith.maximumf %138, %139 : vector<8x256xf32>
      %c0_147 = arith.constant 0 : index
      %c0_148 = arith.constant 0 : index
      %141 = vector.load %arg15[%c0_147, %c0_148] : memref<256x256xf32, #tpu.memory_space<vmem>>, vector<256x256xf32>
      %cst_149 = arith.constant dense<0.000000e+00> : vector<8x256xf32>
      %142 = tpu.matmul %140, %141, %cst_149 {dimension_numbers = #tpu.dot_dimension_numbers<[1], [0], [0], [1], [0, 0, 1, 1], [], []>} : vector<8x256xf32>, vector<256x256xf32>, vector<8x256xf32> -> vector<8x256xf32>
      %cst_150 = arith.constant 0.000000e+00 : f32
      %143 = vector.broadcast %cst_150 : f32 to vector<8x256xf32>
      %144 = arith.maximumf %142, %143 : vector<8x256xf32>
      %c0_151 = arith.constant 0 : index
      %c0_152 = arith.constant 0 : index
      %145 = vector.load %arg16[%c0_151, %c0_152] : memref<256x64xf32, #tpu.memory_space<vmem>>, vector<256x64xf32>
      %cst_153 = arith.constant dense<0.000000e+00> : vector<8x64xf32>
      %146 = tpu.matmul %144, %145, %cst_153 {dimension_numbers = #tpu.dot_dimension_numbers<[1], [0], [0], [1], [0, 0, 1, 1], [], []>} : vector<8x256xf32>, vector<256x64xf32>, vector<8x64xf32> -> vector<8x64xf32>
      %147 = arith.subf %146, %136 : vector<8x64xf32>
      %c0_154 = arith.constant 0 : index
      %c0_155 = arith.constant 0 : index
      %148 = vector.load %arg19[%c0_154, %c0_155] : memref<64x256xf32, #tpu.memory_space<vmem>>, vector<64x256xf32>
      %cst_156 = arith.constant dense<0.000000e+00> : vector<8x256xf32>
      %149 = tpu.matmul %147, %148, %cst_156 {dimension_numbers = #tpu.dot_dimension_numbers<[1], [0], [0], [1], [0, 0, 1, 1], [], []>} : vector<8x64xf32>, vector<64x256xf32>, vector<8x256xf32> -> vector<8x256xf32>
      %cst_157 = arith.constant 0.000000e+00 : f32
      %150 = vector.broadcast %cst_157 : f32 to vector<8x256xf32>
      %151 = arith.cmpf ogt, %144, %150 : vector<8x256xf32>
      %cst_158 = arith.constant 0.000000e+00 : f32
      %152 = vector.broadcast %cst_158 : f32 to vector<8x256xf32>
      %153 = arith.select %151, %149, %152 : vector<8x256xi1>, vector<8x256xf32>
      %c0_159 = arith.constant 0 : index
      %c0_160 = arith.constant 0 : index
      %154 = vector.load %arg18[%c0_159, %c0_160] : memref<256x256xf32, #tpu.memory_space<vmem>>, vector<256x256xf32>
      %cst_161 = arith.constant dense<0.000000e+00> : vector<8x256xf32>
      %155 = tpu.matmul %153, %154, %cst_161 {dimension_numbers = #tpu.dot_dimension_numbers<[1], [0], [0], [1], [0, 0, 1, 1], [], []>} : vector<8x256xf32>, vector<256x256xf32>, vector<8x256xf32> -> vector<8x256xf32>
      %cst_162 = arith.constant 0.000000e+00 : f32
      %156 = vector.broadcast %cst_162 : f32 to vector<8x256xf32>
      %157 = arith.cmpf ogt, %140, %156 : vector<8x256xf32>
      %cst_163 = arith.constant 0.000000e+00 : f32
      %158 = vector.broadcast %cst_163 : f32 to vector<8x256xf32>
      %159 = arith.select %157, %155, %158 : vector<8x256xi1>, vector<8x256xf32>
      %c0_164 = arith.constant 0 : index
      %c0_165 = arith.constant 0 : index
      %160 = vector.load %arg17[%c0_164, %c0_165] : memref<256x64xf32, #tpu.memory_space<vmem>>, vector<256x64xf32>
      %cst_166 = arith.constant dense<0.000000e+00> : vector<8x64xf32>
      %161 = tpu.matmul %159, %160, %cst_166 {dimension_numbers = #tpu.dot_dimension_numbers<[1], [0], [0], [1], [0, 0, 1, 1], [], []>} : vector<8x256xf32>, vector<256x64xf32>, vector<8x64xf32> -> vector<8x64xf32>
      %cst_167 = arith.constant 2.812500e-02 : f32
      %162 = vector.broadcast %cst_167 : f32 to vector<8x64xf32>
      %163 = arith.mulf %162, %161 : vector<8x64xf32>
      %164 = arith.subf %arg30, %163 : vector<8x64xf32>
      scf.yield %108, %136, %164 : vector<8x64xf32>, vector<8x64xf32>, vector<8x64xf32>
    }
    %c0_24 = arith.constant 0 : index
    %c0_25 = arith.constant 0 : index
    %24 = vector.load %arg20[%c0_24, %c0_25] : memref<8x64xf32, #tpu.memory_space<vmem>>, vector<8x64xf32>
    tpu.vector_store %arg20[%c0_24, %c0_25], %23#0 {strides = array<i32>} : memref<8x64xf32, #tpu.memory_space<vmem>>, vector<8x64xf32>,
    %c0_26 = arith.constant 0 : index
    %c0_27 = arith.constant 0 : index
    %25 = vector.load %arg21[%c0_26, %c0_27] : memref<8x64xf32, #tpu.memory_space<vmem>>, vector<8x64xf32>
    tpu.vector_store %arg21[%c0_26, %c0_27], %23#1 {strides = array<i32>} : memref<8x64xf32, #tpu.memory_space<vmem>>, vector<8x64xf32>,
    %c0_28 = arith.constant 0 : index
    %c0_29 = arith.constant 0 : index
    %26 = vector.load %arg22[%c0_28, %c0_29] : memref<8x64xf32, #tpu.memory_space<vmem>>, vector<8x64xf32>
    tpu.vector_store %arg22[%c0_28, %c0_29], %23#2 {strides = array<i32>} : memref<8x64xf32, #tpu.memory_space<vmem>>, vector<8x64xf32>,
    %c0_30 = arith.constant 0 : index
    %c0_31 = arith.constant 0 : index
    %27 = vector.load %arg2[%c0_30, %c0_31] : memref<64x256xf32, #tpu.memory_space<vmem>>, vector<64x256xf32>
    %cst_32 = arith.constant dense<0.000000e+00> : vector<8x256xf32>
    %28 = tpu.matmul %23#0, %27, %cst_32 {dimension_numbers = #tpu.dot_dimension_numbers<[1], [0], [0], [1], [0, 0, 1, 1], [], []>} : vector<8x64xf32>, vector<64x256xf32>, vector<8x256xf32> -> vector<8x256xf32>
    %cst_33 = arith.constant 0.000000e+00 : f32
    %29 = vector.broadcast %cst_33 : f32 to vector<8x256xf32>
    %30 = arith.maximumf %28, %29 : vector<8x256xf32>
    %c0_34 = arith.constant 0 : index
    %c0_35 = arith.constant 0 : index
    %31 = vector.load %arg3[%c0_34, %c0_35] : memref<256x256xf32, #tpu.memory_space<vmem>>, vector<256x256xf32>
    %cst_36 = arith.constant dense<0.000000e+00> : vector<8x256xf32>
    %32 = tpu.matmul %30, %31, %cst_36 {dimension_numbers = #tpu.dot_dimension_numbers<[1], [0], [0], [1], [0, 0, 1, 1], [], []>} : vector<8x256xf32>, vector<256x256xf32>, vector<8x256xf32> -> vector<8x256xf32>
    %cst_37 = arith.constant 0.000000e+00 : f32
    %33 = vector.broadcast %cst_37 : f32 to vector<8x256xf32>
    %34 = arith.maximumf %32, %33 : vector<8x256xf32>
    %c0_38 = arith.constant 0 : index
    %c0_39 = arith.constant 0 : index
    %35 = vector.load %arg4[%c0_38, %c0_39] : memref<256x896xf32, #tpu.memory_space<vmem>>, vector<256x896xf32>
    %cst_40 = arith.constant dense<0.000000e+00> : vector<8x896xf32>
    %36 = tpu.matmul %34, %35, %cst_40 {dimension_numbers = #tpu.dot_dimension_numbers<[1], [0], [0], [1], [0, 0, 1, 1], [], []>} : vector<8x256xf32>, vector<256x896xf32>, vector<8x896xf32> -> vector<8x896xf32>
    %c0_41 = arith.constant 0 : index
    %c0_42 = arith.constant 0 : index
    %37 = vector.load %arg23[%c0_41, %c0_42] : memref<8x896xf32, #tpu.memory_space<vmem>>, vector<8x896xf32>
    tpu.vector_store %arg23[%c0_41, %c0_42], %36 {strides = array<i32>} : memref<8x896xf32, #tpu.memory_space<vmem>>, vector<8x896xf32>,
    %c0_43 = arith.constant 0 : index
    %c0_44 = arith.constant 0 : index
    %38 = vector.load %arg8[%c0_43, %c0_44] : memref<64x256xf32, #tpu.memory_space<vmem>>, vector<64x256xf32>
    %cst_45 = arith.constant dense<0.000000e+00> : vector<8x256xf32>
    %39 = tpu.matmul %23#1, %38, %cst_45 {dimension_numbers = #tpu.dot_dimension_numbers<[1], [0], [0], [1], [0, 0, 1, 1], [], []>} : vector<8x64xf32>, vector<64x256xf32>, vector<8x256xf32> -> vector<8x256xf32>
    %cst_46 = arith.constant 0.000000e+00 : f32
    %40 = vector.broadcast %cst_46 : f32 to vector<8x256xf32>
    %41 = arith.maximumf %39, %40 : vector<8x256xf32>
    %c0_47 = arith.constant 0 : index
    %c0_48 = arith.constant 0 : index
    %42 = vector.load %arg9[%c0_47, %c0_48] : memref<256x256xf32, #tpu.memory_space<vmem>>, vector<256x256xf32>
    %cst_49 = arith.constant dense<0.000000e+00> : vector<8x256xf32>
    %43 = tpu.matmul %41, %42, %cst_49 {dimension_numbers = #tpu.dot_dimension_numbers<[1], [0], [0], [1], [0, 0, 1, 1], [], []>} : vector<8x256xf32>, vector<256x256xf32>, vector<8x256xf32> -> vector<8x256xf32>
    %cst_50 = arith.constant 0.000000e+00 : f32
    %44 = vector.broadcast %cst_50 : f32 to vector<8x256xf32>
    %45 = arith.maximumf %43, %44 : vector<8x256xf32>
    %c0_51 = arith.constant 0 : index
    %c0_52 = arith.constant 0 : index
    %46 = vector.load %arg10[%c0_51, %c0_52] : memref<256x64xf32, #tpu.memory_space<vmem>>, vector<256x64xf32>
    %cst_53 = arith.constant dense<0.000000e+00> : vector<8x64xf32>
    %47 = tpu.matmul %45, %46, %cst_53 {dimension_numbers = #tpu.dot_dimension_numbers<[1], [0], [0], [1], [0, 0, 1, 1], [], []>} : vector<8x256xf32>, vector<256x64xf32>, vector<8x64xf32> -> vector<8x64xf32>
    %c0_54 = arith.constant 0 : index
    %c0_55 = arith.constant 0 : index
    %48 = vector.load %arg24[%c0_54, %c0_55] : memref<8x64xf32, #tpu.memory_space<vmem>>, vector<8x64xf32>
    tpu.vector_store %arg24[%c0_54, %c0_55], %47 {strides = array<i32>} : memref<8x64xf32, #tpu.memory_space<vmem>>, vector<8x64xf32>,
    %c0_56 = arith.constant 0 : index
    %c0_57 = arith.constant 0 : index
    %49 = vector.load %arg14[%c0_56, %c0_57] : memref<64x256xf32, #tpu.memory_space<vmem>>, vector<64x256xf32>
    %cst_58 = arith.constant dense<0.000000e+00> : vector<8x256xf32>
    %50 = tpu.matmul %23#2, %49, %cst_58 {dimension_numbers = #tpu.dot_dimension_numbers<[1], [0], [0], [1], [0, 0, 1, 1], [], []>} : vector<8x64xf32>, vector<64x256xf32>, vector<8x256xf32> -> vector<8x256xf32>
    %cst_59 = arith.constant 0.000000e+00 : f32
    %51 = vector.broadcast %cst_59 : f32 to vector<8x256xf32>
    %52 = arith.maximumf %50, %51 : vector<8x256xf32>
    %c0_60 = arith.constant 0 : index
    %c0_61 = arith.constant 0 : index
    %53 = vector.load %arg15[%c0_60, %c0_61] : memref<256x256xf32, #tpu.memory_space<vmem>>, vector<256x256xf32>
    %cst_62 = arith.constant dense<0.000000e+00> : vector<8x256xf32>
    %54 = tpu.matmul %52, %53, %cst_62 {dimension_numbers = #tpu.dot_dimension_numbers<[1], [0], [0], [1], [0, 0, 1, 1], [], []>} : vector<8x256xf32>, vector<256x256xf32>, vector<8x256xf32> -> vector<8x256xf32>
    %cst_63 = arith.constant 0.000000e+00 : f32
    %55 = vector.broadcast %cst_63 : f32 to vector<8x256xf32>
    %56 = arith.maximumf %54, %55 : vector<8x256xf32>
    %c0_64 = arith.constant 0 : index
    %c0_65 = arith.constant 0 : index
    %57 = vector.load %arg16[%c0_64, %c0_65] : memref<256x64xf32, #tpu.memory_space<vmem>>, vector<256x64xf32>
    %cst_66 = arith.constant dense<0.000000e+00> : vector<8x64xf32>
    %58 = tpu.matmul %56, %57, %cst_66 {dimension_numbers = #tpu.dot_dimension_numbers<[1], [0], [0], [1], [0, 0, 1, 1], [], []>} : vector<8x256xf32>, vector<256x64xf32>, vector<8x64xf32> -> vector<8x64xf32>
    %c0_67 = arith.constant 0 : index
    %c0_68 = arith.constant 0 : index
    %59 = vector.load %arg25[%c0_67, %c0_68] : memref<8x64xf32, #tpu.memory_space<vmem>>, vector<8x64xf32>
    tpu.vector_store %arg25[%c0_67, %c0_68], %58 {strides = array<i32>} : memref<8x64xf32, #tpu.memory_space<vmem>>, vector<8x64xf32>,
    %c0_69 = arith.constant 0 : index
    %c0_70 = arith.constant 0 : index
    %60 = vector.load %arg8[%c0_69, %c0_70] : memref<64x256xf32, #tpu.memory_space<vmem>>, vector<64x256xf32>
    %cst_71 = arith.constant dense<0.000000e+00> : vector<8x256xf32>
    %61 = tpu.matmul %58, %60, %cst_71 {dimension_numbers = #tpu.dot_dimension_numbers<[1], [0], [0], [1], [0, 0, 1, 1], [], []>} : vector<8x64xf32>, vector<64x256xf32>, vector<8x256xf32> -> vector<8x256xf32>
    %cst_72 = arith.constant 0.000000e+00 : f32
    %62 = vector.broadcast %cst_72 : f32 to vector<8x256xf32>
    %63 = arith.maximumf %61, %62 : vector<8x256xf32>
    %c0_73 = arith.constant 0 : index
    %c0_74 = arith.constant 0 : index
    %64 = vector.load %arg9[%c0_73, %c0_74] : memref<256x256xf32, #tpu.memory_space<vmem>>, vector<256x256xf32>
    %cst_75 = arith.constant dense<0.000000e+00> : vector<8x256xf32>
    %65 = tpu.matmul %63, %64, %cst_75 {dimension_numbers = #tpu.dot_dimension_numbers<[1], [0], [0], [1], [0, 0, 1, 1], [], []>} : vector<8x256xf32>, vector<256x256xf32>, vector<8x256xf32> -> vector<8x256xf32>
    %cst_76 = arith.constant 0.000000e+00 : f32
    %66 = vector.broadcast %cst_76 : f32 to vector<8x256xf32>
    %67 = arith.maximumf %65, %66 : vector<8x256xf32>
    %c0_77 = arith.constant 0 : index
    %c0_78 = arith.constant 0 : index
    %68 = vector.load %arg10[%c0_77, %c0_78] : memref<256x64xf32, #tpu.memory_space<vmem>>, vector<256x64xf32>
    %cst_79 = arith.constant dense<0.000000e+00> : vector<8x64xf32>
    %69 = tpu.matmul %67, %68, %cst_79 {dimension_numbers = #tpu.dot_dimension_numbers<[1], [0], [0], [1], [0, 0, 1, 1], [], []>} : vector<8x256xf32>, vector<256x64xf32>, vector<8x64xf32> -> vector<8x64xf32>
    %c0_80 = arith.constant 0 : index
    %c0_81 = arith.constant 0 : index
    %70 = vector.load %arg2[%c0_80, %c0_81] : memref<64x256xf32, #tpu.memory_space<vmem>>, vector<64x256xf32>
    %cst_82 = arith.constant dense<0.000000e+00> : vector<8x256xf32>
    %71 = tpu.matmul %69, %70, %cst_82 {dimension_numbers = #tpu.dot_dimension_numbers<[1], [0], [0], [1], [0, 0, 1, 1], [], []>} : vector<8x64xf32>, vector<64x256xf32>, vector<8x256xf32> -> vector<8x256xf32>
    %cst_83 = arith.constant 0.000000e+00 : f32
    %72 = vector.broadcast %cst_83 : f32 to vector<8x256xf32>
    %73 = arith.maximumf %71, %72 : vector<8x256xf32>
    %c0_84 = arith.constant 0 : index
    %c0_85 = arith.constant 0 : index
    %74 = vector.load %arg3[%c0_84, %c0_85] : memref<256x256xf32, #tpu.memory_space<vmem>>, vector<256x256xf32>
    %cst_86 = arith.constant dense<0.000000e+00> : vector<8x256xf32>
    %75 = tpu.matmul %73, %74, %cst_86 {dimension_numbers = #tpu.dot_dimension_numbers<[1], [0], [0], [1], [0, 0, 1, 1], [], []>} : vector<8x256xf32>, vector<256x256xf32>, vector<8x256xf32> -> vector<8x256xf32>
    %cst_87 = arith.constant 0.000000e+00 : f32
    %76 = vector.broadcast %cst_87 : f32 to vector<8x256xf32>
    %77 = arith.maximumf %75, %76 : vector<8x256xf32>
    %c0_88 = arith.constant 0 : index
    %c0_89 = arith.constant 0 : index
    %78 = vector.load %arg4[%c0_88, %c0_89] : memref<256x896xf32, #tpu.memory_space<vmem>>, vector<256x896xf32>
    %cst_90 = arith.constant dense<0.000000e+00> : vector<8x896xf32>
    %79 = tpu.matmul %77, %78, %cst_90 {dimension_numbers = #tpu.dot_dimension_numbers<[1], [0], [0], [1], [0, 0, 1, 1], [], []>} : vector<8x256xf32>, vector<256x896xf32>, vector<8x896xf32> -> vector<8x896xf32>
    %c0_91 = arith.constant 0 : index
    %c0_92 = arith.constant 0 : index
    %80 = vector.load %arg26[%c0_91, %c0_92] : memref<8x896xf32, #tpu.memory_space<vmem>>, vector<8x896xf32>
    tpu.vector_store %arg26[%c0_91, %c0_92], %79 {strides = array<i32>} : memref<8x896xf32, #tpu.memory_space<vmem>>, vector<8x896xf32>,
    return
  }
}

</mosaic_0001>

<bundles_post_ra>
// kernel: pc_forward.1
= control target key start
LH: loop header
LB: loop body
LE: loop exit
PB: predicated region body
PF: predicated region fallthrough
CT: control target
= control target key end

     0   :  { %s14100_s0 = inlined_call_operand.vmem [shape: f32[8,64], index: 0, kind: input, shape index: {}]   ;;  %s14101_s1 = inlined_call_operand.vmem [shape: f32[8,896], index: 1, kind: input, shape index: {}]   ;;  %s14102_s2 = inlined_call_operand.vmem [shape: f32[64,256], index: 2, kind: input, shape index: {}]   ;;  %s14103_s3 = inlined_call_operand.vmem [shape: f32[256,256], index: 3, kind: input, shape index: {}]   ;;  %s14104_s4 = inlined_call_operand.vmem [shape: f32[256,896], index: 4, kind: input, shape index: {}]   ;;  %s14105_s5 = inlined_call_operand.vmem [shape: f32[256,64], index: 5, kind: input, shape index: {}]   ;;  %s14106_s6 = inlined_call_operand.vmem [shape: f32[256,256], index: 6, kind: input, shape index: {}]   ;;  %s14107_s7 = inlined_call_operand.vmem [shape: f32[896,256], index: 7, kind: input, shape index: {}]   ;;  %s14108_s8 = inlined_call_operand.vmem [shape: f32[64,256], index: 8, kind: input, shape index: {}]   ;;  %s14109_s9 = inlined_call_operand.vmem [shape: f32[256,256], index: 9, kind: input, shape index: {}]   ;;  %s14110_s10 = inlined_call_operand.vmem [shape: f32[256,64], index: 10, kind: input, shape index: {}]   ;;  %s14111_s11 = inlined_call_operand.vmem [shape: f32[256,64], index: 11, kind: input, shape index: {}]   ;;  %s14112_s12 = inlined_call_operand.vmem [shape: f32[256,256], index: 12, kind: input, shape index: {}]   ;;  %s14113_s13 = inlined_call_operand.vmem [shape: f32[64,256], index: 13, kind: input, shape index: {}]   ;;  %s14114_s14 = inlined_call_operand.vmem [shape: f32[64,256], index: 14, kind: input, shape index: {}]   ;;  %s14115_s15 = inlined_call_operand.vmem [shape: f32[256,256], index: 15, kind: input, shape index: {}]   ;;  %s14116_s16 = inlined_call_operand.vmem [shape: f32[256,64], index: 16, kind: input, shape index: {}]   ;;  %s14117_s17 = inlined_call_operand.vmem [shape: f32[256,64], index: 17, kind: input, shape index: {}]   ;;  %s14118_s18 = inlined_call_operand.vmem [shape: f32[256,256], index: 18, kind: input, shape index: {}]   ;;  %s14119_s19 = inlined_call_operand.vmem [shape: f32[64,256], index: 19, kind: input, shape index: {}]   ;;  %s14120_s20 = inlined_call_operand.hbm [shape: f32[8,64], index: 20, kind: output, shape index: {0}]   ;;  %s14121_s21 = inlined_call_operand.hbm [shape: f32[8,64], index: 21, kind: output, shape index: {1}]   ;;  %s14122_s22 = inlined_call_operand.hbm [shape: f32[8,64], index: 22, kind: output, shape index: {2}]   ;;  %s14123_s23 = inlined_call_operand.vmem [shape: f32[8,896], index: 23, kind: output, shape index: {3}]   ;;  %s14124_s24 = inlined_call_operand.hbm [shape: f32[8,64], index: 24, kind: output, shape index: {4}]   ;;  %s14125_s25 = inlined_call_operand.hbm [shape: f32[8,64], index: 25, kind: output, shape index: {5}]   ;;  %s14126_s26 = inlined_call_operand.hbm [shape: f32[8,896], index: 26, kind: output, shape index: {6}]  }
   0x1   :  { %14185 = sst [smem:[#allocation52_spill]] %s14100_s0 }
   0x2   :  { %14186 = sst [smem:[#allocation53_spill]] %s14101_s1 }
   0x3   :  { %14187 = sst [smem:[#allocation54_spill]] %s14102_s2 }
   0x4   :  { %14188 = sst [smem:[#allocation55_spill]] %s14103_s3 }
   0x5   :  { %14189 = sst [smem:[#allocation56_spill]] %s14104_s4 }
   0x6   :  { %14190 = sst [smem:[#allocation57_spill]] %s14105_s5 }
   0x7   :  { %14191 = sst [smem:[#allocation58_spill]] %s14106_s6 }
   0x8   :  { %14192 = sst [smem:[#allocation59_spill]] %s14107_s7 }
   0x9   :  { %14193 = sst [smem:[#allocation60_spill]] %s14108_s8 }
   0xa   :  { %14194 = sst [smem:[#allocation61_spill]] %s14109_s9 }
   0xb   :  { %14195 = sst [smem:[#allocation62_spill]] %s14110_s10 }
   0xc   :  { %32 = vsyncpa [#allocation3], 0 }
   0xd   :  { %33 = vsyncpa [#allocation5], 0 }
   0xe   :  { %34 = vsyncpa [#allocation8], 0 }
   0xf   :  { %35 = vsyncpa [#allocation11], 0  ;;  %s14196_s7 = sld [smem:[#allocation53_spill]]  ;;  %v14147_v5 = vmov 0.0   ;;  %v99_v8 = vld [vmem:[%s14114_s14 + $0x78] sm:$0xff]  ;;  %v98_v9 = vld [vmem:[%s14114_s14 + $0x70] sm:$0xff] }
  0x10   :  { %168 = vmatprep.mubr.f32.mxu1 %v14147_v5  ;;  %120 = vmatprep.subr.mxu1 %v99_v8  ;;  %v97_v10 = vld [vmem:[%s14114_s14 + $0x68] sm:$0xff]  ;;  %v96_v11 = vld [vmem:[%s14114_s14 + $0x60] sm:$0xff]  ;;  %v95_v12 = vld [vmem:[%s14114_s14 + $0x58] sm:$0xff]  ;;  %s14197_s4 = sld [smem:[#allocation52_spill]]  ;;  %vm100_vm0 = vcmask 523264  }
  0x11   :  { %121 = vmatpush1.msra.mxu1 %v98_v9  ;;  %v94_v13 = vld [vmem:[%s14114_s14 + $0x50] sm:$0xff]  ;;  %v93_v14 = vld [vmem:[%s14114_s14 + $0x48] sm:$0xff]  ;;  %v92_v15 = vld [vmem:[%s14114_s14 + $0x40] sm:$0xff]  ;;  %s14199_s30 = sld [smem:[#allocation61_spill]] }
  0x12   :  { %122 = vmatprep.subr.mxu1 %v97_v10  ;;  %v91_v16 = vld [vmem:[%s14114_s14 + $0x38] sm:$0xff]  ;;  %v90_v17 = vld [vmem:[%s14114_s14 + $0x30] sm:$0xff]  ;;  %v89_v18 = vld [vmem:[%s14114_s14 + $0x28] sm:$0xff]  ;;  %s14200_s10 = sld [smem:[#allocation62_spill]] }
  0x13   :  { %123 = vmatpush1.msra.mxu1 %v96_v11  ;;  %v88_v19 = vld [vmem:[%s14114_s14 + $0x20] sm:$0xff]  ;;  %v87_v20 = vld [vmem:[%s14114_s14 + $0x18] sm:$0xff]  ;;  %v86_v21 = vld [vmem:[%s14114_s14 + $0x10] sm:$0xff] }
  0x14   :  { %124 = vmatprep.subr.mxu1 %v95_v12  ;;  %v85_v22 = vld [vmem:[%s14114_s14 + $0x8] sm:$0xff]  ;;  %v84_v23 = vld [vmem:[%s14114_s14] sm:$0xff]  ;;  %v208_v25 = vld [vmem:[%s14115_s15 + $0xf8] sm:$0xff] }
  0x15   :  { %v7024_v0 = vld [vmem:[%s14196_s7] sm:$0xff]  ;;  %v7029_v1 = vld [vmem:[%s14196_s7 + $0x8] sm:$0xff]  ;;  %v7034_v2 = vld [vmem:[%s14196_s7 + $0x10] sm:$0xff]  ;;  %125 = vmatpush1.msra.mxu1 %v94_v13 }
  0x16   :  { %v7039_v3 = vld [vmem:[%s14196_s7 + $0x18] sm:$0xff]  ;;  %v7044_v4 = vld [vmem:[%s14196_s7 + $0x20] sm:$0xff]  ;;  %v7050_v6 = vld [vmem:[%s14196_s7 + $0x28] sm:$0xff]  ;;  %126 = vmatprep.subr.mxu1 %v93_v14 }
  0x17   :  { %v7055_v7 = vld [vmem:[%s14196_s7 + $0x30] sm:$0xff]  ;;  %127 = vmatpush1.msra.mxu1 %v92_v15  ;;  %v7108_v24 = vld [vmem:[%s14197_s4] sm:$0xff]   ;;  %v206_v27 = vld [vmem:[%s14115_s15 + $0xe8] sm:$0xff]  ;;  %s14198_s4 = sld [smem:[#allocation60_spill]] }
  0x18   :  { %128 = vmatprep.subr.mxu1 %v91_v16  ;;  %v207_v26 = vld [vmem:[%s14115_s15 + $0xf0] sm:$0xff]  ;;  %v205_v28 = vld [vmem:[%s14115_s15 + $0xe0] sm:$0xff]  ;;  %v204_v29 = vld [vmem:[%s14115_s15 + $0xd8] sm:$0xff] }
  0x19   :  { %129 = vmatpush1.msra.mxu1 %v90_v17  ;;  %v203_v30 = vld [vmem:[%s14115_s15 + $0xd0] sm:$0xff]  ;;  %v202_v31 = vld [vmem:[%s14115_s15 + $0xc8] sm:$0xff]  ;;  %v201_v32 = vld [vmem:[%s14115_s15 + $0xc0] sm:$0xff] }
  0x1a   :  { %130 = vmatprep.subr.mxu1 %v89_v18  ;;  %v200_v33 = vld [vmem:[%s14115_s15 + $0xb8] sm:$0xff]  ;;  %v199_v34 = vld [vmem:[%s14115_s15 + $0xb0] sm:$0xff]  ;;  %v198_v35 = vld [vmem:[%s14115_s15 + $0xa8] sm:$0xff] }
  0x1b   :  { %131 = vmatpush1.msra.mxu1 %v88_v19  ;;  %v197_v36 = vld [vmem:[%s14115_s15 + $0xa0] sm:$0xff]  ;;  %v196_v37 = vld [vmem:[%s14115_s15 + $0x98] sm:$0xff]  ;;  %v195_v38 = vld [vmem:[%s14115_s15 + $0x90] sm:$0xff] }
  0x1c   :  { %132 = vmatprep.subr.mxu1 %v87_v20  ;;  %v194_v39 = vld [vmem:[%s14115_s15 + $0x88] sm:$0xff]  ;;  %v193_v40 = vld [vmem:[%s14115_s15 + $0x80] sm:$0xff]  ;;  %v192_v41 = vld [vmem:[%s14115_s15 + $0x78] sm:$0xff] }
  0x1d   :  { %133 = vmatpush1.msra.mxu1 %v86_v21  ;;  %v191_v42 = vld [vmem:[%s14115_s15 + $0x70] sm:$0xff]  ;;  %v190_v43 = vld [vmem:[%s14115_s15 + $0x68] sm:$0xff]  ;;  %v189_v44 = vld [vmem:[%s14115_s15 + $0x60] sm:$0xff] }
  0x1e   :  { %134 = vmatprep.subr.mxu1 %v85_v22  ;;  %v188_v45 = vld [vmem:[%s14115_s15 + $0x58] sm:$0xff]  ;;  %v187_v46 = vld [vmem:[%s14115_s15 + $0x50] sm:$0xff]  ;;  %v186_v47 = vld [vmem:[%s14115_s15 + $0x48] sm:$0xff] }
  0x1f   :  { %135 = vmatpush1.msra.mxu1 %v84_v23  ;;  %v185_v48 = vld [vmem:[%s14115_s15 + $0x40] sm:$0xff]  ;;  %v184_v49 = vld [vmem:[%s14115_s15 + $0x38] sm:$0xff]  ;;  %v183_v50 = vld [vmem:[%s14115_s15 + $0x30] sm:$0xff] }
  0x20   :  { %6176 = vmatmul.mubr.msk.f32.vlgmr.msra.gmra.mxu1 %vm100_vm0, %v7108_v24  ;;  %241 = vmatprep.subr.mxu1 %v208_v25  ;;  %v182_v51 = vld [vmem:[%s14115_s15 + $0x28] sm:$0xff]  ;;  %v181_v52 = vld [vmem:[%s14115_s15 + $0x20] sm:$0xff]  ;;  %v180_v53 = vld [vmem:[%s14115_s15 + $0x18] sm:$0xff] }
  0x21   :  { %242 = vmatpush1.msra.mxu1 %v207_v26  ;;  %v179_v54 = vld [vmem:[%s14115_s15 + $0x10] sm:$0xff]  ;;  %v178_v55 = vld [vmem:[%s14115_s15 + $0x8] sm:$0xff]  ;;  %v177_v56 = vld [vmem:[%s14115_s15] sm:$0xff] }
  0x22   :  { %243 = vmatprep.subr.mxu1 %v206_v27  ;;  %v240_v57 = vld [vmem:[%s14115_s15 + $0x1f8] sm:$0xff]  ;;  %v239_v58 = vld [vmem:[%s14115_s15 + $0x1f0] sm:$0xff]  ;;  %v238_v59 = vld [vmem:[%s14115_s15 + $0x1e8] sm:$0xff] }
  0x23   :  { %244 = vmatpush1.msra.mxu1 %v205_v28  ;;  %v237_v60 = vld [vmem:[%s14115_s15 + $0x1e0] sm:$0xff]  ;;  %v236_v61 = vld [vmem:[%s14115_s15 + $0x1d8] sm:$0xff]  ;;  %v235_v62 = vld [vmem:[%s14115_s15 + $0x1d0] sm:$0xff] }
  0x24   :  { %245 = vmatprep.subr.mxu1 %v204_v29  ;;  %v234_v63 = vld [vmem:[%s14115_s15 + $0x1c8] sm:$0xff]  ;;  %v233_v8 = vld [vmem:[%s14115_s15 + $0x1c0] sm:$0xff]  ;;  %v232_v9 = vld [vmem:[%s14115_s15 + $0x1b8] sm:$0xff] }
  0x25   :  { %246 = vmatpush1.msra.mxu1 %v203_v30  ;;  %v231_v10 = vld [vmem:[%s14115_s15 + $0x1b0] sm:$0xff]  ;;  %v230_v11 = vld [vmem:[%s14115_s15 + $0x1a8] sm:$0xff]  ;;  %v229_v12 = vld [vmem:[%s14115_s15 + $0x1a0] sm:$0xff] }
  0x26   :  { %247 = vmatprep.subr.mxu1 %v202_v31  ;;  %v228_v13 = vld [vmem:[%s14115_s15 + $0x198] sm:$0xff]  ;;  %v227_v14 = vld [vmem:[%s14115_s15 + $0x190] sm:$0xff]  ;;  %v226_v15 = vld [vmem:[%s14115_s15 + $0x188] sm:$0xff] }
  0x27   :  { %248 = vmatpush1.msra.mxu1 %v201_v32  ;;  %v225_v16 = vld [vmem:[%s14115_s15 + $0x180] sm:$0xff]  ;;  %v224_v17 = vld [vmem:[%s14115_s15 + $0x178] sm:$0xff]  ;;  %v223_v18 = vld [vmem:[%s14115_s15 + $0x170] sm:$0xff] }
  0x28   :  { %249 = vmatprep.subr.mxu1 %v200_v33  ;;  %v222_v19 = vld [vmem:[%s14115_s15 + $0x168] sm:$0xff]  ;;  %v221_v20 = vld [vmem:[%s14115_s15 + $0x160] sm:$0xff]  ;;  %v220_v21 = vld [vmem:[%s14115_s15 + $0x158] sm:$0xff] }
  0x29   :  { %250 = vmatpush1.msra.mxu1 %v199_v34  ;;  %v219_v22 = vld [vmem:[%s14115_s15 + $0x150] sm:$0xff]  ;;  %v218_v23 = vld [vmem:[%s14115_s15 + $0x148] sm:$0xff]  ;;  %v217_v25 = vld [vmem:[%s14115_s15 + $0x140] sm:$0xff] }
  0x2a   :  { %251 = vmatprep.subr.mxu1 %v198_v35  ;;  %v216_v26 = vld [vmem:[%s14115_s15 + $0x138] sm:$0xff]  ;;  %v215_v27 = vld [vmem:[%s14115_s15 + $0x130] sm:$0xff]  ;;  %v214_v28 = vld [vmem:[%s14115_s15 + $0x128] sm:$0xff] }
  0x2b   :  { %252 = vmatpush1.msra.mxu1 %v197_v36  ;;  %v213_v29 = vld [vmem:[%s14115_s15 + $0x120] sm:$0xff]  ;;  %v212_v30 = vld [vmem:[%s14115_s15 + $0x118] sm:$0xff]  ;;  %v211_v31 = vld [vmem:[%s14115_s15 + $0x110] sm:$0xff] }
  0x2c   :  { %253 = vmatprep.subr.mxu1 %v196_v37  ;;  %v210_v32 = vld [vmem:[%s14115_s15 + $0x108] sm:$0xff]  ;;  %v209_v33 = vld [vmem:[%s14115_s15 + $0x100] sm:$0xff]  ;;  %v345_v34 = vld [vmem:[%s14116_s16 + $0xf8] sm:$0xff] }
  0x2d   :  { %254 = vmatpush1.msra.mxu1 %v195_v38  ;;  %v329_v35 = vld [vmem:[%s14116_s16 + $0x78] sm:$0xff]  ;;  %v344_v36 = vld [vmem:[%s14116_s16 + $0xf0] sm:$0xff]  ;;  %6200 = vmatprep.subr.mxu0 %v345_v34  ;;  %v343_v38 = vld [vmem:[%s14116_s16 + $0xe8] sm:$0xff] }
  0x2e   :  { %255 = vmatprep.subr.mxu1 %v194_v39  ;;  %v328_v37 = vld [vmem:[%s14116_s16 + $0x70] sm:$0xff]  ;;  %6201 = vmatpush3.msra.mxu0 %v329_v35  ;;  %v327_v39 = vld [vmem:[%s14116_s16 + $0x68] sm:$0xff]  ;;  %v416_v34 = vld [vmem:[%s14198_s4] sm:$0xff] }
  0x2f   :  { %256 = vmatpush1.msra.mxu1 %v193_v40  ;;  %6202 = vmatprep.subr.mxu0 %v344_v36  ;;  %v342_v40 = vld [vmem:[%s14116_s16 + $0xe0] sm:$0xff]  ;;  %v539_v35 = vld [vmem:[%s14199_s30 + $0xf8] sm:$0xff] }
  0x30   :  { %257 = vmatprep.subr.mxu1 %v192_v41  ;;  %6203 = vmatpush3.msra.mxu0 %v328_v37  ;;  %v326_v41 = vld [vmem:[%s14116_s16 + $0x60] sm:$0xff] }
  0x31   :  { %258 = vmatpush1.msra.mxu1 %v191_v42  ;;  %6204 = vmatprep.subr.mxu0 %v343_v38  ;;  %v341_v42 = vld [vmem:[%s14116_s16 + $0xd8] sm:$0xff] }
  0x32   :  { %259 = vmatprep.subr.mxu1 %v190_v43  ;;  %6205 = vmatpush3.msra.mxu0 %v327_v39  ;;  %v325_v43 = vld [vmem:[%s14116_s16 + $0x58] sm:$0xff]  ;;  %v538_v39 = vld [vmem:[%s14199_s30 + $0xf0] sm:$0xff] }
  0x33   :  { %260 = vmatpush1.msra.mxu1 %v189_v44  ;;  %6206 = vmatprep.subr.mxu0 %v342_v40  ;;  %v340_v44 = vld [vmem:[%s14116_s16 + $0xd0] sm:$0xff]  ;;  %v537_v40 = vld [vmem:[%s14199_s30 + $0xe8] sm:$0xff] }
  0x34   :  { %261 = vmatprep.subr.mxu1 %v188_v45  ;;  %6207 = vmatpush3.msra.mxu0 %v326_v41  ;;  %v324_v45 = vld [vmem:[%s14116_s16 + $0x50] sm:$0xff]  ;;  %v536_v41 = vld [vmem:[%s14199_s30 + $0xe0] sm:$0xff] }
  0x35   :  { %262 = vmatpush1.msra.mxu1 %v187_v46  ;;  %6208 = vmatprep.subr.mxu0 %v341_v42  ;;  %v339_v46 = vld [vmem:[%s14116_s16 + $0xc8] sm:$0xff]  ;;  %v535_v42 = vld [vmem:[%s14199_s30 + $0xd8] sm:$0xff] }
  0x36   :  { %263 = vmatprep.subr.mxu1 %v186_v47  ;;  %6209 = vmatpush3.msra.mxu0 %v325_v43  ;;  %v323_v47 = vld [vmem:[%s14116_s16 + $0x48] sm:$0xff]  ;;  %v534_v43 = vld [vmem:[%s14199_s30 + $0xd0] sm:$0xff] }
  0x37   :  { %264 = vmatpush1.msra.mxu1 %v185_v48  ;;  %6210 = vmatprep.subr.mxu0 %v340_v44  ;;  %v338_v48 = vld [vmem:[%s14116_s16 + $0xc0] sm:$0xff]  ;;  %v533_v44 = vld [vmem:[%s14199_s30 + $0xc8] sm:$0xff] }
  0x38   :  { %265 = vmatprep.subr.mxu1 %v184_v49  ;;  %6211 = vmatpush3.msra.mxu0 %v324_v45  ;;  %v322_v49 = vld [vmem:[%s14116_s16 + $0x40] sm:$0xff] }
  0x39   :  { %266 = vmatpush1.msra.mxu1 %v183_v50  ;;  %6212 = vmatprep.subr.mxu0 %v339_v46  ;;  %v337_v50 = vld [vmem:[%s14116_s16 + $0xb8] sm:$0xff]  ;;  %v532_v45 = vld [vmem:[%s14199_s30 + $0xc0] sm:$0xff] }
  0x3a   :  { %267 = vmatprep.subr.mxu1 %v182_v51  ;;  %6213 = vmatpush3.msra.mxu0 %v323_v47  ;;  %v321_v51 = vld [vmem:[%s14116_s16 + $0x38] sm:$0xff]  ;;  %v530_v47 = vld [vmem:[%s14199_s30 + $0xb0] sm:$0xff] }
  0x3b   :  { %268 = vmatpush1.msra.mxu1 %v181_v52  ;;  %6214 = vmatprep.subr.mxu0 %v338_v48  ;;  %v336_v52 = vld [vmem:[%s14116_s16 + $0xb0] sm:$0xff]  ;;  %v531_v46 = vld [vmem:[%s14199_s30 + $0xb8] sm:$0xff]  ;;  %v529_v48 = vld [vmem:[%s14199_s30 + $0xa8] sm:$0xff] }
  0x3c   :  { %269 = vmatprep.subr.mxu1 %v180_v53  ;;  %6215 = vmatpush3.msra.mxu0 %v322_v49  ;;  %v320_v53 = vld [vmem:[%s14116_s16 + $0x30] sm:$0xff]  ;;  %v528_v49 = vld [vmem:[%s14199_s30 + $0xa0] sm:$0xff] }
  0x3d   :  { %270 = vmatpush1.msra.mxu1 %v179_v54  ;;  %6216 = vmatprep.subr.mxu0 %v337_v50  ;;  %v335_v54 = vld [vmem:[%s14116_s16 + $0xa8] sm:$0xff]  ;;  %v527_v50 = vld [vmem:[%s14199_s30 + $0x98] sm:$0xff] }
  0x3e   :  { %271 = vmatprep.subr.mxu1 %v178_v55  ;;  %6217 = vmatpush3.msra.mxu0 %v321_v51  ;;  %v319_v55 = vld [vmem:[%s14116_s16 + $0x28] sm:$0xff]  ;;  %v526_v51 = vld [vmem:[%s14199_s30 + $0x90] sm:$0xff] }
  0x3f   :  { %272 = vmatpush1.msra.mxu1 %v177_v56  ;;  %6218 = vmatprep.subr.mxu0 %v336_v52  ;;  %v334_v56 = vld [vmem:[%s14116_s16 + $0xa0] sm:$0xff]  ;;  %v525_v52 = vld [vmem:[%s14199_s30 + $0x88] sm:$0xff] }
  0x40   :  { %273 = vmatprep.subr.mxu1 %v240_v57  ;;  %6219 = vmatpush3.msra.mxu0 %v320_v53  ;;  %v318_v57 = vld [vmem:[%s14116_s16 + $0x20] sm:$0xff] }
  0x41   :  { %274 = vmatpush2.msra.mxu1 %v239_v58  ;;  %6220 = vmatprep.subr.mxu0 %v335_v54  ;;  %v333_v58 = vld [vmem:[%s14116_s16 + $0x98] sm:$0xff]  ;;  %v524_v53 = vld [vmem:[%s14199_s30 + $0x80] sm:$0xff] }
  0x42   :  { %275 = vmatprep.subr.mxu1 %v238_v59  ;;  %6221 = vmatpush3.msra.mxu0 %v319_v55  ;;  %v317_v59 = vld [vmem:[%s14116_s16 + $0x18] sm:$0xff]  ;;  %v522_v55 = vld [vmem:[%s14199_s30 + $0x70] sm:$0xff] }
  0x43   :  { %276 = vmatpush2.msra.mxu1 %v237_v60  ;;  %6222 = vmatprep.subr.mxu0 %v334_v56  ;;  %v523_v54 = vld [vmem:[%s14199_s30 + $0x78] sm:$0xff]  ;;  %v521_v56 = vld [vmem:[%s14199_s30 + $0x68] sm:$0xff] }
  0x44   :  { %277 = vmatprep.subr.mxu1 %v236_v61  ;;  %6223 = vmatpush3.msra.mxu0 %v318_v57  ;;  %v520_v57 = vld [vmem:[%s14199_s30 + $0x60] sm:$0xff] }
  0x45   :  { %278 = vmatpush2.msra.mxu1 %v235_v62  ;;  %6224 = vmatprep.subr.mxu0 %v333_v58  ;;  %v519_v58 = vld [vmem:[%s14199_s30 + $0x58] sm:$0xff] }
  0x46   :  { %279 = vmatprep.subr.mxu1 %v234_v63  ;;  %6225 = vmatpush3.msra.mxu0 %v317_v59  ;;  %v518_v59 = vld [vmem:[%s14199_s30 + $0x50] sm:$0xff] }
  0x47   :  { %280 = vmatpush2.msra.mxu1 %v233_v8  ;;  %v332_v8 = vld [vmem:[%s14116_s16 + $0x90] sm:$0xff] }
  0x48   :  { %281 = vmatprep.subr.mxu1 %v232_v9  ;;  %6226 = vmatprep.subr.mxu0 %v332_v8  ;;  %v316_v9 = vld [vmem:[%s14116_s16 + $0x10] sm:$0xff]  ;;  %v513_v8 = vld [vmem:[%s14199_s30 + $0x28] sm:$0xff] }
  0x49   :  { %282 = vmatpush2.msra.mxu1 %v231_v10  ;;  %6227 = vmatpush3.msra.mxu0 %v316_v9  ;;  %v331_v10 = vld [vmem:[%s14116_s16 + $0x88] sm:$0xff]  ;;  %v512_v9 = vld [vmem:[%s14199_s30 + $0x20] sm:$0xff] }
  0x4a   :  { %283 = vmatprep.subr.mxu1 %v230_v11  ;;  %6228 = vmatprep.subr.mxu0 %v331_v10  ;;  %v315_v11 = vld [vmem:[%s14116_s16 + $0x8] sm:$0xff]  ;;  %v511_v10 = vld [vmem:[%s14199_s30 + $0x18] sm:$0xff] }
  0x4b   :  { %284 = vmatpush2.msra.mxu1 %v229_v12  ;;  %v330_v12 = vld [vmem:[%s14116_s16 + $0x80] sm:$0xff]  ;;  %6229 = vmatpush3.msra.mxu0 %v315_v11  ;;  %v510_v11 = vld [vmem:[%s14199_s30 + $0x10] sm:$0xff] }
  0x4c   :  { %285 = vmatprep.subr.mxu1 %v228_v13  ;;  %v314_v13 = vld [vmem:[%s14116_s16] sm:$0xff]  ;;  %6230 = vmatprep.subr.mxu0 %v330_v12  ;;  %v509_v12 = vld [vmem:[%s14199_s30 + $0x8] sm:$0xff] }
  0x4d   :  { %286 = vmatpush2.msra.mxu1 %v227_v14  ;;  %6231 = vmatpush3.msra.mxu0 %v314_v13  ;;  %v431_v14 = vld [vmem:[%s14198_s4 + $0x78] sm:$0xff]  ;;  %v508_v13 = vld [vmem:[%s14199_s30] sm:$0xff] }
  0x4e   :  { %287 = vmatprep.subr.mxu1 %v226_v15  ;;  %451 = vmatprep.subr.mxu0 %v431_v14  ;;  %v571_v14 = vld [vmem:[%s14199_s30 + $0x1f8] sm:$0xff] }
  0x4f   :  { %288 = vmatpush2.msra.mxu1 %v225_v16 }
  0x50   :  { %289 = vmatprep.subr.mxu1 %v224_v17 }
  0x51   :  { %290 = vmatpush2.msra.mxu1 %v223_v18 }
  0x52   :  { %291 = vmatprep.subr.mxu1 %v222_v19  ;;  %v430_v19 = vld [vmem:[%s14198_s4 + $0x70] sm:$0xff] }
  0x53   :  { %292 = vmatpush2.msra.mxu1 %v221_v20  ;;  %v429_v20 = vld [vmem:[%s14198_s4 + $0x68] sm:$0xff] }
  0x54   :  { %293 = vmatprep.subr.mxu1 %v220_v21  ;;  %v428_v21 = vld [vmem:[%s14198_s4 + $0x60] sm:$0xff] }
  0x55   :  { %294 = vmatpush2.msra.mxu1 %v219_v22  ;;  %v427_v22 = vld [vmem:[%s14198_s4 + $0x58] sm:$0xff] }
  0x56   :  { %295 = vmatprep.subr.mxu1 %v218_v23  ;;  %v426_v23 = vld [vmem:[%s14198_s4 + $0x50] sm:$0xff] }
  0x57   :  { %296 = vmatpush2.msra.mxu1 %v217_v25  ;;  %v425_v25 = vld [vmem:[%s14198_s4 + $0x48] sm:$0xff] }
  0x58   :  { %297 = vmatprep.subr.mxu1 %v216_v26  ;;  %v424_v26 = vld [vmem:[%s14198_s4 + $0x40] sm:$0xff] }
  0x59   :  { %298 = vmatpush2.msra.mxu1 %v215_v27  ;;  %v423_v27 = vld [vmem:[%s14198_s4 + $0x38] sm:$0xff] }
  0x5a   :  { %299 = vmatprep.subr.mxu1 %v214_v28  ;;  %v422_v28 = vld [vmem:[%s14198_s4 + $0x30] sm:$0xff] }
  0x5b   :  { %300 = vmatpush2.msra.mxu1 %v213_v29  ;;  %v421_v29 = vld [vmem:[%s14198_s4 + $0x28] sm:$0xff] }
  0x5c   :  { %301 = vmatprep.subr.mxu1 %v212_v30  ;;  %v420_v30 = vld [vmem:[%s14198_s4 + $0x20] sm:$0xff] }
  0x5d   :  { %302 = vmatpush2.msra.mxu1 %v211_v31  ;;  %v419_v31 = vld [vmem:[%s14198_s4 + $0x18] sm:$0xff] }
  0x5e   :  { %303 = vmatprep.subr.mxu1 %v210_v32  ;;  %v418_v32 = vld [vmem:[%s14198_s4 + $0x10] sm:$0xff] }
  0x5f   :  { %304 = vmatpush2.msra.mxu1 %v209_v33  ;;  %v417_v33 = vld [vmem:[%s14198_s4 + $0x8] sm:$0xff] }
  0xe0   :  { %v170_v60 = vpop.f32.mrf.mxu1 }
  0xe1   :  { %v175_v63 = vmax.f32 %v170_v60, 0.0  ;;  %v517_v60 = vld [vmem:[%s14199_s30 + $0x48] sm:$0xff] }
  0xe2   :  { %v172_v61 = vpop.f32.mrf.mxu1 }
  0xe3   :  { %v176_v62 = vmax.f32 %v172_v61, 0.0  ;;  %v516_v61 = vld [vmem:[%s14199_s30 + $0x40] sm:$0xff] }
  0xe5   :  { %305 = vmatprep.mubr.f32.mxu1 %v176_v62  ;;  %v515_v62 = vld [vmem:[%s14199_s30 + $0x38] sm:$0xff] }
  0xe6   :  { %306 = vmatmul.mubr.f32.vlgmr.msra.gmra.mxu1 %v175_v63  ;;  %v514_v63 = vld [vmem:[%s14199_s30 + $0x30] sm:$0xff] }
 0x1a6   :  { %v307_v15 = vpop.f32.mrf.mxu1 }
 0x1a7   :  { %v312_v18 = vmax.f32 %v307_v15, 0.0  ;;  %v570_v15 = vld [vmem:[%s14199_s30 + $0x1f0] sm:$0xff] }
 0x1a8   :  { %v309_v16 = vpop.f32.mrf.mxu1 }
 0x1a9   :  { %v313_v17 = vmax.f32 %v309_v16, 0.0  ;;  %v569_v16 = vld [vmem:[%s14199_s30 + $0x1e8] sm:$0xff] }
 0x1ab   :  { %410 = vmatprep.mubr.f32.mxu0 %v313_v17  ;;  %v568_v17 = vld [vmem:[%s14199_s30 + $0x1e0] sm:$0xff] }
 0x1ac   :  { %411 = vmatmul.mubr.f32.vlgmr.msra.gmra.mxu0 %v312_v18  ;;  %v567_v18 = vld [vmem:[%s14199_s30 + $0x1d8] sm:$0xff] }
 0x1ad   :  { %452 = vmatpush1.msra.mxu0 %v430_v19  ;;  %499 = vmatprep.mubr.f32.mxu0 %v14147_v5  ;;  %v566_v19 = vld [vmem:[%s14199_s30 + $0x1d0] sm:$0xff] }
 0x1ae   :  { %453 = vmatprep.subr.mxu0 %v429_v20  ;;  %v565_v20 = vld [vmem:[%s14199_s30 + $0x1c8] sm:$0xff] }
 0x1af   :  { %454 = vmatpush1.msra.mxu0 %v428_v21  ;;  %v564_v21 = vld [vmem:[%s14199_s30 + $0x1c0] sm:$0xff] }
 0x1b0   :  { %455 = vmatprep.subr.mxu0 %v427_v22  ;;  %v563_v22 = vld [vmem:[%s14199_s30 + $0x1b8] sm:$0xff] }
 0x1b1   :  { %456 = vmatpush1.msra.mxu0 %v426_v23  ;;  %v562_v23 = vld [vmem:[%s14199_s30 + $0x1b0] sm:$0xff] }
 0x1b2   :  { %457 = vmatprep.subr.mxu0 %v425_v25  ;;  %v561_v25 = vld [vmem:[%s14199_s30 + $0x1a8] sm:$0xff] }
 0x1b3   :  { %458 = vmatpush1.msra.mxu0 %v424_v26  ;;  %v560_v26 = vld [vmem:[%s14199_s30 + $0x1a0] sm:$0xff] }
 0x1b4   :  { %459 = vmatprep.subr.mxu0 %v423_v27  ;;  %v559_v27 = vld [vmem:[%s14199_s30 + $0x198] sm:$0xff] }
 0x1b5   :  { %460 = vmatpush1.msra.mxu0 %v422_v28  ;;  %v558_v28 = vld [vmem:[%s14199_s30 + $0x190] sm:$0xff] }
 0x1b6   :  { %461 = vmatprep.subr.mxu0 %v421_v29  ;;  %v557_v29 = vld [vmem:[%s14199_s30 + $0x188] sm:$0xff] }
 0x1b7   :  { %462 = vmatpush1.msra.mxu0 %v420_v30  ;;  %v556_v30 = vld [vmem:[%s14199_s30 + $0x180] sm:$0xff] }
 0x1b8   :  { %463 = vmatprep.subr.mxu0 %v419_v31  ;;  %v555_v31 = vld [vmem:[%s14199_s30 + $0x178] sm:$0xff] }
 0x1b9   :  { %464 = vmatpush1.msra.mxu0 %v418_v32  ;;  %v554_v32 = vld [vmem:[%s14199_s30 + $0x170] sm:$0xff] }
 0x1ba   :  { %465 = vmatprep.subr.mxu0 %v417_v33  ;;  %v553_v33 = vld [vmem:[%s14199_s30 + $0x168] sm:$0xff] }
 0x1bb   :  { %466 = vmatpush1.msra.mxu0 %v416_v34  ;;  %v552_v34 = vld [vmem:[%s14199_s30 + $0x160] sm:$0xff] }
 0x1bc   :  { %572 = vmatprep.subr.mxu0 %v539_v35  ;;  %v551_v35 = vld [vmem:[%s14199_s30 + $0x158] sm:$0xff] }
 0x26c   :  { %v6232_v36 = vpop.f32.mrf.mxu0 }
 0x26e   :  { %v6233_v37 = vpop.f32.mrf.mxu0 }
 0x26f   :  { %v7452_v38 = vadd.f32 %v6233_v37, %v6232_v36   ;;  %v550_v36 = vld [vmem:[%s14199_s30 + $0x150] sm:$0xff]  ;;  %v549_v37 = vld [vmem:[%s14199_s30 + $0x148] sm:$0xff] }
 0x271   :  { %6177 = vmatmul.mubr.msk.f32.vlgmr.msra.gmra.mxu0 %vm100_vm0, %v7452_v38 }
 0x272   :  { %573 = vmatpush1.msra.mxu0 %v538_v39  ;;  %v548_v39 = vld [vmem:[%s14199_s30 + $0x140] sm:$0xff] }
 0x273   :  { %574 = vmatprep.subr.mxu0 %v537_v40  ;;  %v547_v40 = vld [vmem:[%s14199_s30 + $0x138] sm:$0xff] }
 0x274   :  { %575 = vmatpush1.msra.mxu0 %v536_v41  ;;  %v546_v41 = vld [vmem:[%s14199_s30 + $0x130] sm:$0xff] }
 0x275   :  { %576 = vmatprep.subr.mxu0 %v535_v42  ;;  %v545_v42 = vld [vmem:[%s14199_s30 + $0x128] sm:$0xff] }
 0x276   :  { %577 = vmatpush1.msra.mxu0 %v534_v43  ;;  %v544_v43 = vld [vmem:[%s14199_s30 + $0x120] sm:$0xff] }
 0x277   :  { %578 = vmatprep.subr.mxu0 %v533_v44  ;;  %v543_v44 = vld [vmem:[%s14199_s30 + $0x118] sm:$0xff] }
 0x278   :  { %579 = vmatpush1.msra.mxu0 %v532_v45  ;;  %v542_v45 = vld [vmem:[%s14199_s30 + $0x110] sm:$0xff] }
 0x279   :  { %580 = vmatprep.subr.mxu0 %v531_v46  ;;  %v541_v46 = vld [vmem:[%s14199_s30 + $0x108] sm:$0xff] }
 0x27a   :  { %581 = vmatpush1.msra.mxu0 %v530_v47  ;;  %v540_v47 = vld [vmem:[%s14199_s30 + $0x100] sm:$0xff] }
 0x27b   :  { %582 = vmatprep.subr.mxu0 %v529_v48  ;;  %v676_v48 = vld [vmem:[%s14200_s10 + $0xf8] sm:$0xff] }
 0x27c   :  { %583 = vmatpush1.msra.mxu0 %v528_v49  ;;  %v660_v49 = vld [vmem:[%s14200_s10 + $0x78] sm:$0xff]  ;;  %6235 = vmatprep.subr.mxu1 %v676_v48 }
 0x27d   :  { %584 = vmatprep.subr.mxu0 %v527_v50  ;;  %v675_v50 = vld [vmem:[%s14200_s10 + $0xf0] sm:$0xff]  ;;  %6236 = vmatpush3.msra.mxu1 %v660_v49 }
 0x27e   :  { %585 = vmatpush1.msra.mxu0 %v526_v51  ;;  %v659_v51 = vld [vmem:[%s14200_s10 + $0x70] sm:$0xff]  ;;  %6237 = vmatprep.subr.mxu1 %v675_v50 }
 0x27f   :  { %586 = vmatprep.subr.mxu0 %v525_v52  ;;  %v674_v52 = vld [vmem:[%s14200_s10 + $0xe8] sm:$0xff]  ;;  %6238 = vmatpush3.msra.mxu1 %v659_v51 }
 0x280   :  { %587 = vmatpush1.msra.mxu0 %v524_v53  ;;  %v658_v53 = vld [vmem:[%s14200_s10 + $0x68] sm:$0xff]  ;;  %6239 = vmatprep.subr.mxu1 %v674_v52 }
 0x281   :  { %588 = vmatprep.subr.mxu0 %v523_v54  ;;  %v673_v54 = vld [vmem:[%s14200_s10 + $0xe0] sm:$0xff]  ;;  %6240 = vmatpush3.msra.mxu1 %v658_v53 }
 0x282   :  { %589 = vmatpush1.msra.mxu0 %v522_v55  ;;  %v657_v55 = vld [vmem:[%s14200_s10 + $0x60] sm:$0xff]  ;;  %6241 = vmatprep.subr.mxu1 %v673_v54 }
 0x283   :  { %590 = vmatprep.subr.mxu0 %v521_v56  ;;  %v672_v56 = vld [vmem:[%s14200_s10 + $0xd8] sm:$0xff]  ;;  %6242 = vmatpush3.msra.mxu1 %v657_v55 }
 0x284   :  { %591 = vmatpush1.msra.mxu0 %v520_v57  ;;  %v656_v57 = vld [vmem:[%s14200_s10 + $0x58] sm:$0xff]  ;;  %6243 = vmatprep.subr.mxu1 %v672_v56 }
 0x285   :  { %592 = vmatprep.subr.mxu0 %v519_v58  ;;  %v671_v58 = vld [vmem:[%s14200_s10 + $0xd0] sm:$0xff]  ;;  %6244 = vmatpush3.msra.mxu1 %v656_v57 }
 0x286   :  { %593 = vmatpush1.msra.mxu0 %v518_v59  ;;  %v655_v59 = vld [vmem:[%s14200_s10 + $0x50] sm:$0xff]  ;;  %6245 = vmatprep.subr.mxu1 %v671_v58 }
 0x287   :  { %594 = vmatprep.subr.mxu0 %v517_v60  ;;  %v670_v60 = vld [vmem:[%s14200_s10 + $0xc8] sm:$0xff]  ;;  %6246 = vmatpush3.msra.mxu1 %v655_v59 }
 0x288   :  { %595 = vmatpush1.msra.mxu0 %v516_v61  ;;  %v654_v61 = vld [vmem:[%s14200_s10 + $0x48] sm:$0xff]  ;;  %6247 = vmatprep.subr.mxu1 %v670_v60 }
 0x289   :  { %596 = vmatprep.subr.mxu0 %v515_v62  ;;  %v669_v62 = vld [vmem:[%s14200_s10 + $0xc0] sm:$0xff]  ;;  %6248 = vmatpush3.msra.mxu1 %v654_v61 }
 0x28a   :  { %597 = vmatpush1.msra.mxu0 %v514_v63  ;;  %v653_v63 = vld [vmem:[%s14200_s10 + $0x40] sm:$0xff]  ;;  %6249 = vmatprep.subr.mxu1 %v669_v62 }
 0x28b   :  { %598 = vmatprep.subr.mxu0 %v513_v8  ;;  %v668_v8 = vld [vmem:[%s14200_s10 + $0xb8] sm:$0xff]  ;;  %6250 = vmatpush3.msra.mxu1 %v653_v63 }
 0x28c   :  { %599 = vmatpush1.msra.mxu0 %v512_v9  ;;  %v652_v9 = vld [vmem:[%s14200_s10 + $0x38] sm:$0xff]  ;;  %6251 = vmatprep.subr.mxu1 %v668_v8 }
 0x28d   :  { %600 = vmatprep.subr.mxu0 %v511_v10  ;;  %v667_v10 = vld [vmem:[%s14200_s10 + $0xb0] sm:$0xff]  ;;  %6252 = vmatpush3.msra.mxu1 %v652_v9 }
 0x28e   :  { %601 = vmatpush1.msra.mxu0 %v510_v11  ;;  %v651_v11 = vld [vmem:[%s14200_s10 + $0x30] sm:$0xff]  ;;  %6253 = vmatprep.subr.mxu1 %v667_v10 }
 0x28f   :  { %602 = vmatprep.subr.mxu0 %v509_v12  ;;  %v666_v12 = vld [vmem:[%s14200_s10 + $0xa8] sm:$0xff]  ;;  %6254 = vmatpush3.msra.mxu1 %v651_v11 }
 0x290   :  { %603 = vmatpush1.msra.mxu0 %v508_v13  ;;  %v650_v13 = vld [vmem:[%s14200_s10 + $0x28] sm:$0xff]  ;;  %6255 = vmatprep.subr.mxu1 %v666_v12 }
 0x291   :  { %604 = vmatprep.subr.mxu0 %v571_v14  ;;  %v665_v14 = vld [vmem:[%s14200_s10 + $0xa0] sm:$0xff]  ;;  %6256 = vmatpush3.msra.mxu1 %v650_v13 }
 0x292   :  { %605 = vmatpush2.msra.mxu0 %v570_v15  ;;  %v649_v15 = vld [vmem:[%s14200_s10 + $0x20] sm:$0xff]  ;;  %6257 = vmatprep.subr.mxu1 %v665_v14 }
 0x293   :  { %606 = vmatprep.subr.mxu0 %v569_v16  ;;  %v664_v16 = vld [vmem:[%s14200_s10 + $0x98] sm:$0xff]  ;;  %6258 = vmatpush3.msra.mxu1 %v649_v15 }
 0x294   :  { %607 = vmatpush2.msra.mxu0 %v568_v17  ;;  %v648_v17 = vld [vmem:[%s14200_s10 + $0x18] sm:$0xff]  ;;  %6259 = vmatprep.subr.mxu1 %v664_v16 }
 0x295   :  { %608 = vmatprep.subr.mxu0 %v567_v18  ;;  %6260 = vmatpush3.msra.mxu1 %v648_v17 }
 0x296   :  { %609 = vmatpush2.msra.mxu0 %v566_v19 }
 0x297   :  { %610 = vmatprep.subr.mxu0 %v565_v20 }
 0x298   :  { %611 = vmatpush2.msra.mxu0 %v564_v21 }
 0x299   :  { %612 = vmatprep.subr.mxu0 %v563_v22  ;;  %v663_v22 = vld [vmem:[%s14200_s10 + $0x90] sm:$0xff] }
 0x29a   :  { %613 = vmatpush2.msra.mxu0 %v562_v23  ;;  %6261 = vmatprep.subr.mxu1 %v663_v22  ;;  %v647_v23 = vld [vmem:[%s14200_s10 + $0x10] sm:$0xff] }
 0x29b   :  { %614 = vmatprep.subr.mxu0 %v561_v25  ;;  %6262 = vmatpush3.msra.mxu1 %v647_v23  ;;  %v662_v25 = vld [vmem:[%s14200_s10 + $0x88] sm:$0xff] }
 0x29c   :  { %615 = vmatpush2.msra.mxu0 %v560_v26  ;;  %6263 = vmatprep.subr.mxu1 %v662_v25  ;;  %v646_v26 = vld [vmem:[%s14200_s10 + $0x8] sm:$0xff] }
 0x29d   :  { %616 = vmatprep.subr.mxu0 %v559_v27  ;;  %6264 = vmatpush3.msra.mxu1 %v646_v26  ;;  %v661_v27 = vld [vmem:[%s14200_s10 + $0x80] sm:$0xff] }
 0x29e   :  { %617 = vmatpush2.msra.mxu0 %v558_v28  ;;  %v645_v28 = vld [vmem:[%s14200_s10] sm:$0xff]  ;;  %6265 = vmatprep.subr.mxu1 %v661_v27  ;;  %s7749_s10 = smov 0  }
 0x29f   :  { %618 = vmatprep.subr.mxu0 %v557_v29  ;;  %6266 = vmatpush3.msra.mxu1 %v645_v28 }
 0x2a0   :  { %619 = vmatpush2.msra.mxu0 %v556_v30 }
 0x2a1   :  { %620 = vmatprep.subr.mxu0 %v555_v31 }
 0x2a2   :  { %621 = vmatpush2.msra.mxu0 %v554_v32 }
 0x2a3   :  { %622 = vmatprep.subr.mxu0 %v553_v33 }
 0x2a4   :  { %623 = vmatpush2.msra.mxu0 %v552_v34 }
 0x2a5   :  { %624 = vmatprep.subr.mxu0 %v551_v35 }
 0x2a6   :  { %625 = vmatpush2.msra.mxu0 %v550_v36 }
 0x2a7   :  { %626 = vmatprep.subr.mxu0 %v549_v37 }
 0x2a8   :  { %627 = vmatpush2.msra.mxu0 %v548_v39 }
 0x2a9   :  { %628 = vmatprep.subr.mxu0 %v547_v40 }
 0x2aa   :  { %629 = vmatpush2.msra.mxu0 %v546_v41 }
 0x2ab   :  { %630 = vmatprep.subr.mxu0 %v545_v42 }
 0x2ac   :  { %631 = vmatpush2.msra.mxu0 %v544_v43 }
 0x2ad   :  { %632 = vmatprep.subr.mxu0 %v543_v44 }
 0x2ae   :  { %633 = vmatpush2.msra.mxu0 %v542_v45 }
 0x2af   :  { %634 = vmatprep.subr.mxu0 %v541_v46 }
 0x2b0   :  { %635 = vmatpush2.msra.mxu0 %v540_v47 }
 0x331   :  { %v501_v18 = vpop.f32.mrf.mxu0 }
 0x332   :  { %v506_v21 = vmax.f32 %v501_v18, 0.0 }
 0x333   :  { %v503_v19 = vpop.f32.mrf.mxu0 }
 0x334   :  { %v507_v20 = vmax.f32 %v503_v19, 0.0 }
 0x336   :  { %636 = vmatprep.mubr.f32.mxu0 %v507_v20 }
 0x337   :  { %637 = vmatmul.mubr.f32.vlgmr.msra.gmra.mxu0 %v506_v21 }
 0x3f7   :  { %v638_v29 = vpop.f32.mrf.mxu0 }
 0x3f8   :  { %v643_v32 = vmax.f32 %v638_v29, 0.0 }
 0x3f9   :  { %v640_v30 = vpop.f32.mrf.mxu0 }
 0x3fa   :  { %v644_v31 = vmax.f32 %v640_v30, 0.0 }
 0x3fc   :  { %741 = vmatprep.mubr.f32.mxu1 %v644_v31 }
 0x3fd   :  { %742 = vmatmul.mubr.f32.vlgmr.msra.gmra.mxu1 %v643_v32 }
 0x4bd   :  { %v6267_v33 = vpop.f32.mrf.mxu1 }
 0x4bf   :  { %v6268_v34 = vpop.f32.mrf.mxu1 }
 0x4c0   :  { %v6269_v35 = vadd.f32 %v6268_v34, %v6267_v33  }
 0x4c1 LB: > { %s14201_s29 = sld [smem:[#allocation54_spill]]  ;;  %v6879_v41 = vmov 0.0   ;;  %s752_s10 = sadd.s32 1, %s6876_s10   ;;  %s6876_s10 = sphi %s7749_s10, %s752_s10   ;;  %v6872_v35 = vphi %v6269_v35, %v14215_v35   ;;  %v6868_v38 = vphi %v7452_v38, %v14214_v38   ;;  %v6864_v24 = vphi %v7108_v24, %v14213_v24  }
 0x4c2   : > { %839 = vmatprep.mubr.f32.mxu0 %v6879_v41  ;;  %s14202_s2 = sld [smem:[#allocation55_spill]]  ;;  %p749_p0 = scmp.ge.s32.totalorder %s752_s10, 20  }
 0x4c3   : > { %s14204_s4 = sld [smem:[#allocation59_spill]] }
 0x4c4   : > { %s14205_s5 = sld [smem:[#allocation58_spill]] }
 0x4c5   : > { %s14206_s0 = sld [smem:[#allocation57_spill]] }
 0x4c6   : > { %s14207_s8 = sld [smem:[#allocation60_spill]] }
 0x4c7   : > { %v771_v36 = vld [vmem:[%s14201_s29 + $0x78] sm:$0xff]  ;;  %v770_v37 = vld [vmem:[%s14201_s29 + $0x70] sm:$0xff]  ;;  %v769_v39 = vld [vmem:[%s14201_s29 + $0x68] sm:$0xff]  ;;  %s14208_s9 = sld [smem:[#allocation61_spill]] }
 0x4c8   : > { %791 = vmatprep.subr.mxu0 %v771_v36  ;;  %v768_v40 = vld [vmem:[%s14201_s29 + $0x60] sm:$0xff]  ;;  %v767_v42 = vld [vmem:[%s14201_s29 + $0x58] sm:$0xff]  ;;  %v766_v43 = vld [vmem:[%s14201_s29 + $0x50] sm:$0xff]  ;;  %s14209_s28 = sld [smem:[#allocation62_spill]] }
 0x4c9   : > { %792 = vmatpush1.msra.mxu0 %v770_v37  ;;  %v765_v44 = vld [vmem:[%s14201_s29 + $0x48] sm:$0xff]  ;;  %v764_v45 = vld [vmem:[%s14201_s29 + $0x40] sm:$0xff]  ;;  %v879_v46 = vld [vmem:[%s14202_s2 + $0xf8] sm:$0xff]  ;;  %s14216_s27 = sld [smem:[#allocation54_spill]] (%p749_p0) }
 0x4ca   : > { %793 = vmatprep.subr.mxu0 %v769_v39  ;;  %v878_v47 = vld [vmem:[%s14202_s2 + $0xf0] sm:$0xff]  ;;  %v763_v48 = vld [vmem:[%s14201_s29 + $0x38] sm:$0xff]  ;;  %912 = vmatprep.subr.mxu1 %v879_v46  ;;  %v877_v49 = vld [vmem:[%s14202_s2 + $0xe8] sm:$0xff]  ;;  %s14217_s6 = sld [smem:[#allocation55_spill]] (%p749_p0) }
 0x4cb   : > { %794 = vmatpush1.msra.mxu0 %v768_v40  ;;  %v876_v50 = vld [vmem:[%s14202_s2 + $0xe0] sm:$0xff]  ;;  %v762_v51 = vld [vmem:[%s14201_s29 + $0x30] sm:$0xff]  ;;  %913 = vmatpush1.msra.mxu1 %v878_v47  ;;  %v875_v52 = vld [vmem:[%s14202_s2 + $0xd8] sm:$0xff] }
 0x4cc   : > { %795 = vmatprep.subr.mxu0 %v767_v42  ;;  %v761_v53 = vld [vmem:[%s14201_s29 + $0x28] sm:$0xff]  ;;  %914 = vmatprep.subr.mxu1 %v877_v49  ;;  %v874_v54 = vld [vmem:[%s14202_s2 + $0xd0] sm:$0xff]  ;;  %v760_v55 = vld [vmem:[%s14201_s29 + $0x20] sm:$0xff] }
 0x4cd   : > { %796 = vmatpush1.msra.mxu0 %v766_v43  ;;  %915 = vmatpush1.msra.mxu1 %v876_v50  ;;  %v873_v56 = vld [vmem:[%s14202_s2 + $0xc8] sm:$0xff]  ;;  %v759_v57 = vld [vmem:[%s14201_s29 + $0x18] sm:$0xff]  ;;  %v872_v58 = vld [vmem:[%s14202_s2 + $0xc0] sm:$0xff] }
 0x4ce   : > { %797 = vmatprep.subr.mxu0 %v765_v44  ;;  %916 = vmatprep.subr.mxu1 %v875_v52  ;;  %v758_v59 = vld [vmem:[%s14201_s29 + $0x10] sm:$0xff]  ;;  %v871_v60 = vld [vmem:[%s14202_s2 + $0xb8] sm:$0xff]  ;;  %v757_v61 = vld [vmem:[%s14201_s29 + $0x8] sm:$0xff] }
 0x4cf   : > { %798 = vmatpush1.msra.mxu0 %v764_v45  ;;  %917 = vmatpush1.msra.mxu1 %v874_v54  ;;  %v870_v62 = vld [vmem:[%s14202_s2 + $0xb0] sm:$0xff]  ;;  %v756_v63 = vld [vmem:[%s14201_s29] sm:$0xff]  ;;  %v869_v8 = vld [vmem:[%s14202_s2 + $0xa8] sm:$0xff]  ;;  %s14203_s29 = sld [smem:[#allocation56_spill]] }
 0x4d0   : > { %799 = vmatprep.subr.mxu0 %v763_v48  ;;  %918 = vmatprep.subr.mxu1 %v873_v56  ;;  %v868_v9 = vld [vmem:[%s14202_s2 + $0xa0] sm:$0xff]  ;;  %v867_v10 = vld [vmem:[%s14202_s2 + $0x98] sm:$0xff]  ;;  %v866_v11 = vld [vmem:[%s14202_s2 + $0x90] sm:$0xff] }
 0x4d1   : > { %800 = vmatpush1.msra.mxu0 %v762_v51  ;;  %919 = vmatpush1.msra.mxu1 %v872_v58  ;;  %v865_v12 = vld [vmem:[%s14202_s2 + $0x88] sm:$0xff]  ;;  %v864_v13 = vld [vmem:[%s14202_s2 + $0x80] sm:$0xff]  ;;  %v863_v14 = vld [vmem:[%s14202_s2 + $0x78] sm:$0xff] }
 0x4d2   : > { %801 = vmatprep.subr.mxu0 %v761_v53  ;;  %920 = vmatprep.subr.mxu1 %v871_v60  ;;  %v862_v15 = vld [vmem:[%s14202_s2 + $0x70] sm:$0xff]  ;;  %v861_v16 = vld [vmem:[%s14202_s2 + $0x68] sm:$0xff]  ;;  %v860_v17 = vld [vmem:[%s14202_s2 + $0x60] sm:$0xff] }
 0x4d3   : > { %802 = vmatpush1.msra.mxu0 %v760_v55  ;;  %921 = vmatpush1.msra.mxu1 %v870_v62  ;;  %v859_v18 = vld [vmem:[%s14202_s2 + $0x58] sm:$0xff]  ;;  %v858_v19 = vld [vmem:[%s14202_s2 + $0x50] sm:$0xff]  ;;  %v857_v20 = vld [vmem:[%s14202_s2 + $0x48] sm:$0xff] }
 0x4d4   : > { %803 = vmatprep.subr.mxu0 %v759_v57  ;;  %922 = vmatprep.subr.mxu1 %v869_v8  ;;  %v856_v21 = vld [vmem:[%s14202_s2 + $0x40] sm:$0xff]  ;;  %v855_v22 = vld [vmem:[%s14202_s2 + $0x38] sm:$0xff]  ;;  %v854_v23 = vld [vmem:[%s14202_s2 + $0x30] sm:$0xff] }
 0x4d5   : > { %804 = vmatpush1.msra.mxu0 %v758_v59  ;;  %923 = vmatpush1.msra.mxu1 %v868_v9  ;;  %v853_v25 = vld [vmem:[%s14202_s2 + $0x28] sm:$0xff]  ;;  %v852_v26 = vld [vmem:[%s14202_s2 + $0x20] sm:$0xff]  ;;  %v851_v27 = vld [vmem:[%s14202_s2 + $0x18] sm:$0xff] }
 0x4d6   : > { %805 = vmatprep.subr.mxu0 %v757_v61  ;;  %924 = vmatprep.subr.mxu1 %v867_v10  ;;  %v850_v28 = vld [vmem:[%s14202_s2 + $0x10] sm:$0xff]  ;;  %v849_v29 = vld [vmem:[%s14202_s2 + $0x8] sm:$0xff]  ;;  %v848_v30 = vld [vmem:[%s14202_s2] sm:$0xff] }
 0x4d7   : > { %806 = vmatpush1.msra.mxu0 %v756_v63  ;;  %925 = vmatpush1.msra.mxu1 %v866_v11  ;;  %v911_v31 = vld [vmem:[%s14202_s2 + $0x1f8] sm:$0xff]  ;;  %v910_v32 = vld [vmem:[%s14202_s2 + $0x1f0] sm:$0xff]  ;;  %v909_v33 = vld [vmem:[%s14202_s2 + $0x1e8] sm:$0xff] }
 0x4d8   : > { %6178 = vmatmul.mubr.msk.f32.vlgmr.msra.gmra.mxu0 %vm100_vm0, %v6872_v35  ;;  %926 = vmatprep.subr.mxu1 %v865_v12  ;;  %v908_v34 = vld [vmem:[%s14202_s2 + $0x1e0] sm:$0xff]  ;;  %v907_v36 = vld [vmem:[%s14202_s2 + $0x1d8] sm:$0xff]  ;;  %v906_v37 = vld [vmem:[%s14202_s2 + $0x1d0] sm:$0xff] }
 0x4d9   : > { %927 = vmatpush1.msra.mxu1 %v864_v13  ;;  %v905_v39 = vld [vmem:[%s14202_s2 + $0x1c8] sm:$0xff]  ;;  %v904_v40 = vld [vmem:[%s14202_s2 + $0x1c0] sm:$0xff]  ;;  %v903_v42 = vld [vmem:[%s14202_s2 + $0x1b8] sm:$0xff] }
 0x4da   : > { %928 = vmatprep.subr.mxu1 %v863_v14  ;;  %v902_v43 = vld [vmem:[%s14202_s2 + $0x1b0] sm:$0xff]  ;;  %v901_v44 = vld [vmem:[%s14202_s2 + $0x1a8] sm:$0xff]  ;;  %v900_v45 = vld [vmem:[%s14202_s2 + $0x1a0] sm:$0xff] }
 0x4db   : > { %929 = vmatpush1.msra.mxu1 %v862_v15  ;;  %v899_v46 = vld [vmem:[%s14202_s2 + $0x198] sm:$0xff]  ;;  %v898_v47 = vld [vmem:[%s14202_s2 + $0x190] sm:$0xff]  ;;  %v897_v48 = vld [vmem:[%s14202_s2 + $0x188] sm:$0xff] }
 0x4dc   : > { %930 = vmatprep.subr.mxu1 %v861_v16  ;;  %v896_v49 = vld [vmem:[%s14202_s2 + $0x180] sm:$0xff]  ;;  %v895_v50 = vld [vmem:[%s14202_s2 + $0x178] sm:$0xff]  ;;  %v894_v51 = vld [vmem:[%s14202_s2 + $0x170] sm:$0xff] }
 0x4dd   : > { %931 = vmatpush1.msra.mxu1 %v860_v17  ;;  %v893_v52 = vld [vmem:[%s14202_s2 + $0x168] sm:$0xff]  ;;  %v892_v53 = vld [vmem:[%s14202_s2 + $0x160] sm:$0xff]  ;;  %v891_v54 = vld [vmem:[%s14202_s2 + $0x158] sm:$0xff] }
 0x4de   : > { %932 = vmatprep.subr.mxu1 %v859_v18  ;;  %v890_v55 = vld [vmem:[%s14202_s2 + $0x150] sm:$0xff]  ;;  %v889_v56 = vld [vmem:[%s14202_s2 + $0x148] sm:$0xff]  ;;  %v888_v57 = vld [vmem:[%s14202_s2 + $0x140] sm:$0xff] }
 0x4df   : > { %933 = vmatpush1.msra.mxu1 %v858_v19  ;;  %v887_v58 = vld [vmem:[%s14202_s2 + $0x138] sm:$0xff]  ;;  %v886_v59 = vld [vmem:[%s14202_s2 + $0x130] sm:$0xff]  ;;  %v885_v60 = vld [vmem:[%s14202_s2 + $0x128] sm:$0xff] }
 0x4e0   : > { %934 = vmatprep.subr.mxu1 %v857_v20  ;;  %v884_v61 = vld [vmem:[%s14202_s2 + $0x120] sm:$0xff]  ;;  %v883_v62 = vld [vmem:[%s14202_s2 + $0x118] sm:$0xff]  ;;  %v882_v63 = vld [vmem:[%s14202_s2 + $0x110] sm:$0xff] }
 0x4e1   : > { %935 = vmatpush1.msra.mxu1 %v856_v21  ;;  %v881_v8 = vld [vmem:[%s14202_s2 + $0x108] sm:$0xff]  ;;  %v880_v9 = vld [vmem:[%s14202_s2 + $0x100] sm:$0xff]  ;;  %v1091_v10 = vld [vmem:[%s14203_s29 + $0x350] sm:$0xff] }
 0x4e2   : > { %936 = vmatprep.subr.mxu1 %v855_v22  ;;  %v1093_v11 = vld [vmem:[%s14203_s29 + $0x360] sm:$0xff]  ;;  %v1090_v12 = vld [vmem:[%s14203_s29 + $0x348] sm:$0xff]  ;;  %1209 = vmatprep.subr.mxu0 %v1091_v10  ;;  %v1084_v13 = vld [vmem:[%s14203_s29 + $0x318] sm:$0xff] }
 0x4e3   : > { %937 = vmatpush1.msra.mxu1 %v854_v23  ;;  %1210 = vmatpush1.msra.mxu0 %v1090_v12  ;;  %v1083_v14 = vld [vmem:[%s14203_s29 + $0x310] sm:$0xff]  ;;  %v1077_v15 = vld [vmem:[%s14203_s29 + $0x2e0] sm:$0xff]  ;;  %v1076_v16 = vld [vmem:[%s14203_s29 + $0x2d8] sm:$0xff] }
 0x4e4   : > { %938 = vmatprep.subr.mxu1 %v853_v25  ;;  %1211 = vmatprep.subr.mxu0 %v1084_v13  ;;  %v1070_v17 = vld [vmem:[%s14203_s29 + $0x2a8] sm:$0xff]  ;;  %v1069_v18 = vld [vmem:[%s14203_s29 + $0x2a0] sm:$0xff]  ;;  %v1063_v19 = vld [vmem:[%s14203_s29 + $0x270] sm:$0xff] }
 0x4e5   : > { %939 = vmatpush1.msra.mxu1 %v852_v26  ;;  %1212 = vmatpush1.msra.mxu0 %v1083_v14  ;;  %v1062_v20 = vld [vmem:[%s14203_s29 + $0x268] sm:$0xff]  ;;  %v1056_v21 = vld [vmem:[%s14203_s29 + $0x238] sm:$0xff]  ;;  %v1055_v22 = vld [vmem:[%s14203_s29 + $0x230] sm:$0xff] }
 0x4e6   : > { %940 = vmatprep.subr.mxu1 %v851_v27  ;;  %1213 = vmatprep.subr.mxu0 %v1077_v15  ;;  %v1049_v23 = vld [vmem:[%s14203_s29 + $0x200] sm:$0xff]  ;;  %v1048_v25 = vld [vmem:[%s14203_s29 + $0x1f8] sm:$0xff]  ;;  %v1042_v26 = vld [vmem:[%s14203_s29 + $0x1c8] sm:$0xff] }
 0x4e7   : > { %941 = vmatpush1.msra.mxu1 %v850_v28  ;;  %1214 = vmatpush1.msra.mxu0 %v1076_v16  ;;  %v1041_v27 = vld [vmem:[%s14203_s29 + $0x1c0] sm:$0xff]  ;;  %v1035_v28 = vld [vmem:[%s14203_s29 + $0x190] sm:$0xff]  ;;  %v1132_v12 = vld [vmem:[%s14203_s29 + $0x498] sm:$0xff] }
 0x4e8   : > { %942 = vmatprep.subr.mxu1 %v849_v29  ;;  %1215 = vmatprep.subr.mxu0 %v1070_v17  ;;  %v1034_v29 = vld [vmem:[%s14203_s29 + $0x188] sm:$0xff]  ;;  %v1139_v10 = vld [vmem:[%s14203_s29 + $0x4d0] sm:$0xff]  ;;  %v1125_v14 = vld [vmem:[%s14203_s29 + $0x460] sm:$0xff] }
 0x4e9   : > { %943 = vmatpush1.msra.mxu1 %v848_v30  ;;  %1216 = vmatpush1.msra.mxu0 %v1069_v18  ;;  %v1028_v30 = vld [vmem:[%s14203_s29 + $0x158] sm:$0xff]  ;;  %v1126_v13 = vld [vmem:[%s14203_s29 + $0x468] sm:$0xff]  ;;  %v1119_v15 = vld [vmem:[%s14203_s29 + $0x430] sm:$0xff] }
 0x4ea   : > { %944 = vmatprep.subr.mxu1 %v911_v31  ;;  %1217 = vmatprep.subr.mxu0 %v1063_v19  ;;  %v1027_v31 = vld [vmem:[%s14203_s29 + $0x150] sm:$0xff]  ;;  %v1118_v16 = vld [vmem:[%s14203_s29 + $0x428] sm:$0xff]  ;;  %v1112_v17 = vld [vmem:[%s14203_s29 + $0x3f8] sm:$0xff] }
 0x4eb   : > { %945 = vmatpush2.msra.mxu1 %v910_v32  ;;  %1218 = vmatpush1.msra.mxu0 %v1062_v20  ;;  %v1021_v32 = vld [vmem:[%s14203_s29 + $0x120] sm:$0xff] }
 0x4ec   : > { %946 = vmatprep.subr.mxu1 %v909_v33  ;;  %1219 = vmatprep.subr.mxu0 %v1056_v21  ;;  %v1020_v33 = vld [vmem:[%s14203_s29 + $0x118] sm:$0xff] }
 0x4ed   : > { %947 = vmatpush2.msra.mxu1 %v908_v34  ;;  %1220 = vmatpush1.msra.mxu0 %v1055_v22  ;;  %v1014_v34 = vld [vmem:[%s14203_s29 + $0xe8] sm:$0xff]  ;;  %v1092_v22 = vld [vmem:[%s14203_s29 + $0x358] sm:$0xff] }
 0x4ee   : > { %948 = vmatprep.subr.mxu1 %v907_v36  ;;  %1221 = vmatprep.subr.mxu0 %v1049_v23  ;;  %v1013_v36 = vld [vmem:[%s14203_s29 + $0xe0] sm:$0xff]  ;;  %v1086_v23 = vld [vmem:[%s14203_s29 + $0x328] sm:$0xff] }
 0x4ef   : > { %949 = vmatpush2.msra.mxu1 %v906_v37  ;;  %1222 = vmatpush1.msra.mxu0 %v1048_v25  ;;  %v1007_v37 = vld [vmem:[%s14203_s29 + $0xb0] sm:$0xff]  ;;  %v1085_v25 = vld [vmem:[%s14203_s29 + $0x320] sm:$0xff] }
 0x4f0   : > { %950 = vmatprep.subr.mxu1 %v905_v39  ;;  %1223 = vmatprep.subr.mxu0 %v1042_v26  ;;  %v1006_v39 = vld [vmem:[%s14203_s29 + $0xa8] sm:$0xff]  ;;  %v1079_v26 = vld [vmem:[%s14203_s29 + $0x2f0] sm:$0xff] }
 0x4f1   : > { %951 = vmatpush2.msra.mxu1 %v904_v40  ;;  %1224 = vmatpush1.msra.mxu0 %v1041_v27  ;;  %v1000_v40 = vld [vmem:[%s14203_s29 + $0x78] sm:$0xff]  ;;  %v1078_v27 = vld [vmem:[%s14203_s29 + $0x2e8] sm:$0xff] }
 0x4f2   : > { %952 = vmatprep.subr.mxu1 %v903_v42  ;;  %1225 = vmatprep.subr.mxu0 %v1035_v28  ;;  %v999_v42 = vld [vmem:[%s14203_s29 + $0x70] sm:$0xff]  ;;  %v1072_v28 = vld [vmem:[%s14203_s29 + $0x2b8] sm:$0xff] }
 0x4f3   : > { %953 = vmatpush2.msra.mxu1 %v902_v43  ;;  %1226 = vmatpush1.msra.mxu0 %v1034_v29  ;;  %v993_v43 = vld [vmem:[%s14203_s29 + $0x40] sm:$0xff]  ;;  %v1071_v29 = vld [vmem:[%s14203_s29 + $0x2b0] sm:$0xff] }
 0x4f4   : > { %954 = vmatprep.subr.mxu1 %v901_v44  ;;  %1227 = vmatprep.subr.mxu0 %v1028_v30  ;;  %v992_v44 = vld [vmem:[%s14203_s29 + $0x38] sm:$0xff]  ;;  %v1065_v30 = vld [vmem:[%s14203_s29 + $0x280] sm:$0xff] }
 0x4f5   : > { %955 = vmatpush2.msra.mxu1 %v900_v45  ;;  %1228 = vmatpush1.msra.mxu0 %v1027_v31  ;;  %v986_v45 = vld [vmem:[%s14203_s29 + $0x8] sm:$0xff]  ;;  %v1064_v31 = vld [vmem:[%s14203_s29 + $0x278] sm:$0xff] }
 0x4f6   : > { %956 = vmatprep.subr.mxu1 %v899_v46  ;;  %1229 = vmatprep.subr.mxu0 %v1021_v32  ;;  %v985_v46 = vld [vmem:[%s14203_s29] sm:$0xff]  ;;  %v1058_v32 = vld [vmem:[%s14203_s29 + $0x248] sm:$0xff] }
 0x4f7   : > { %957 = vmatpush2.msra.mxu1 %v898_v47  ;;  %1230 = vmatpush1.msra.mxu0 %v1020_v33  ;;  %v1203_v47 = vld [vmem:[%s14203_s29 + $0x6d0] sm:$0xff]  ;;  %v1057_v33 = vld [vmem:[%s14203_s29 + $0x240] sm:$0xff] }
 0x4f8   : > { %958 = vmatprep.subr.mxu1 %v897_v48  ;;  %1231 = vmatprep.subr.mxu0 %v1014_v34  ;;  %v1202_v48 = vld [vmem:[%s14203_s29 + $0x6c8] sm:$0xff]  ;;  %v1051_v34 = vld [vmem:[%s14203_s29 + $0x210] sm:$0xff] }
 0x4f9   : > { %959 = vmatpush2.msra.mxu1 %v896_v49  ;;  %1232 = vmatpush1.msra.mxu0 %v1013_v36  ;;  %v1196_v49 = vld [vmem:[%s14203_s29 + $0x698] sm:$0xff]  ;;  %v1050_v36 = vld [vmem:[%s14203_s29 + $0x208] sm:$0xff] }
 0x4fa   : > { %960 = vmatprep.subr.mxu1 %v895_v50  ;;  %1233 = vmatprep.subr.mxu0 %v1007_v37  ;;  %v1195_v50 = vld [vmem:[%s14203_s29 + $0x690] sm:$0xff]  ;;  %v1044_v37 = vld [vmem:[%s14203_s29 + $0x1d8] sm:$0xff] }
 0x4fb   : > { %961 = vmatpush2.msra.mxu1 %v894_v51  ;;  %1234 = vmatpush1.msra.mxu0 %v1006_v39  ;;  %v1189_v51 = vld [vmem:[%s14203_s29 + $0x660] sm:$0xff]  ;;  %v1043_v39 = vld [vmem:[%s14203_s29 + $0x1d0] sm:$0xff] }
 0x4fc   : > { %962 = vmatprep.subr.mxu1 %v893_v52  ;;  %1235 = vmatprep.subr.mxu0 %v1000_v40  ;;  %v1188_v52 = vld [vmem:[%s14203_s29 + $0x658] sm:$0xff]  ;;  %v1037_v40 = vld [vmem:[%s14203_s29 + $0x1a0] sm:$0xff] }
 0x4fd   : > { %963 = vmatpush2.msra.mxu1 %v892_v53  ;;  %1236 = vmatpush1.msra.mxu0 %v999_v42  ;;  %v1182_v53 = vld [vmem:[%s14203_s29 + $0x628] sm:$0xff]  ;;  %v1036_v42 = vld [vmem:[%s14203_s29 + $0x198] sm:$0xff] }
 0x4fe   : > { %964 = vmatprep.subr.mxu1 %v891_v54  ;;  %1237 = vmatprep.subr.mxu0 %v993_v43  ;;  %v1181_v54 = vld [vmem:[%s14203_s29 + $0x620] sm:$0xff]  ;;  %v1030_v43 = vld [vmem:[%s14203_s29 + $0x168] sm:$0xff] }
 0x4ff   : > { %965 = vmatpush2.msra.mxu1 %v890_v55  ;;  %1238 = vmatpush1.msra.mxu0 %v992_v44  ;;  %v1175_v55 = vld [vmem:[%s14203_s29 + $0x5f0] sm:$0xff]  ;;  %v1029_v44 = vld [vmem:[%s14203_s29 + $0x160] sm:$0xff] }
 0x500   : > { %966 = vmatprep.subr.mxu1 %v889_v56  ;;  %1239 = vmatprep.subr.mxu0 %v986_v45  ;;  %v1174_v56 = vld [vmem:[%s14203_s29 + $0x5e8] sm:$0xff]  ;;  %v1023_v45 = vld [vmem:[%s14203_s29 + $0x130] sm:$0xff] }
 0x501   : > { %967 = vmatpush2.msra.mxu1 %v888_v57  ;;  %1240 = vmatpush1.msra.mxu0 %v985_v46  ;;  %v1168_v57 = vld [vmem:[%s14203_s29 + $0x5b8] sm:$0xff]  ;;  %v1022_v46 = vld [vmem:[%s14203_s29 + $0x128] sm:$0xff] }
 0x502   : > { %968 = vmatprep.subr.mxu1 %v887_v58  ;;  %1241 = vmatprep.subr.mxu0 %v1203_v47  ;;  %v1167_v58 = vld [vmem:[%s14203_s29 + $0x5b0] sm:$0xff]  ;;  %v1016_v47 = vld [vmem:[%s14203_s29 + $0xf8] sm:$0xff] }
 0x503   : > { %969 = vmatpush2.msra.mxu1 %v886_v59  ;;  %1242 = vmatpush2.msra.mxu0 %v1202_v48  ;;  %v1161_v59 = vld [vmem:[%s14203_s29 + $0x580] sm:$0xff]  ;;  %v1015_v48 = vld [vmem:[%s14203_s29 + $0xf0] sm:$0xff] }
 0x504   : > { %970 = vmatprep.subr.mxu1 %v885_v60  ;;  %1243 = vmatprep.subr.mxu0 %v1196_v49  ;;  %v1160_v60 = vld [vmem:[%s14203_s29 + $0x578] sm:$0xff]  ;;  %v1009_v49 = vld [vmem:[%s14203_s29 + $0xc0] sm:$0xff] }
 0x505   : > { %971 = vmatpush2.msra.mxu1 %v884_v61  ;;  %1244 = vmatpush2.msra.mxu0 %v1195_v50  ;;  %v1154_v61 = vld [vmem:[%s14203_s29 + $0x548] sm:$0xff]  ;;  %v1008_v50 = vld [vmem:[%s14203_s29 + $0xb8] sm:$0xff] }
 0x506   : > { %972 = vmatprep.subr.mxu1 %v883_v62  ;;  %1245 = vmatprep.subr.mxu0 %v1189_v51  ;;  %v1153_v62 = vld [vmem:[%s14203_s29 + $0x540] sm:$0xff]  ;;  %v1002_v51 = vld [vmem:[%s14203_s29 + $0x88] sm:$0xff] }
 0x507   : > { %973 = vmatpush2.msra.mxu1 %v882_v63  ;;  %1246 = vmatpush2.msra.mxu0 %v1188_v52  ;;  %v1147_v63 = vld [vmem:[%s14203_s29 + $0x510] sm:$0xff]  ;;  %v1001_v52 = vld [vmem:[%s14203_s29 + $0x80] sm:$0xff] }
 0x508   : > { %974 = vmatprep.subr.mxu1 %v881_v8  ;;  %1247 = vmatprep.subr.mxu0 %v1182_v53  ;;  %v1146_v8 = vld [vmem:[%s14203_s29 + $0x508] sm:$0xff]  ;;  %v995_v53 = vld [vmem:[%s14203_s29 + $0x50] sm:$0xff] }
 0x509   : > { %975 = vmatpush2.msra.mxu1 %v880_v9  ;;  %1248 = vmatpush2.msra.mxu0 %v1181_v54  ;;  %v1140_v9 = vld [vmem:[%s14203_s29 + $0x4d8] sm:$0xff]  ;;  %v994_v54 = vld [vmem:[%s14203_s29 + $0x48] sm:$0xff] }
 0x50a   : > { %1280 = vmatprep.subr.mxu1 %v1093_v11  ;;  %1249 = vmatprep.subr.mxu0 %v1175_v55  ;;  %v1133_v11 = vld [vmem:[%s14203_s29 + $0x4a0] sm:$0xff]  ;;  %v988_v55 = vld [vmem:[%s14203_s29 + $0x18] sm:$0xff] }
 0x50b   : > { %1250 = vmatpush2.msra.mxu0 %v1174_v56  ;;  %v987_v56 = vld [vmem:[%s14203_s29 + $0x10] sm:$0xff] }
 0x50c   : > { %1251 = vmatprep.subr.mxu0 %v1168_v57  ;;  %v1205_v57 = vld [vmem:[%s14203_s29 + $0x6e0] sm:$0xff] }
 0x50d   : > { %1252 = vmatpush2.msra.mxu0 %v1167_v58  ;;  %v1204_v58 = vld [vmem:[%s14203_s29 + $0x6d8] sm:$0xff] }
 0x50e   : > { %1253 = vmatprep.subr.mxu0 %v1161_v59  ;;  %v1198_v59 = vld [vmem:[%s14203_s29 + $0x6a8] sm:$0xff] }
 0x50f   : > { %1254 = vmatpush2.msra.mxu0 %v1160_v60  ;;  %v1197_v60 = vld [vmem:[%s14203_s29 + $0x6a0] sm:$0xff] }
 0x510   : > { %1255 = vmatprep.subr.mxu0 %v1154_v61  ;;  %v1191_v61 = vld [vmem:[%s14203_s29 + $0x670] sm:$0xff] }
 0x511   : > { %1256 = vmatpush2.msra.mxu0 %v1153_v62  ;;  %v1190_v62 = vld [vmem:[%s14203_s29 + $0x668] sm:$0xff] }
 0x512   : > { %1257 = vmatprep.subr.mxu0 %v1147_v63  ;;  %v1184_v63 = vld [vmem:[%s14203_s29 + $0x638] sm:$0xff] }
 0x513   : > { %1258 = vmatpush2.msra.mxu0 %v1146_v8  ;;  %v1183_v8 = vld [vmem:[%s14203_s29 + $0x630] sm:$0xff] }
 0x514   : > { %1259 = vmatprep.subr.mxu0 %v1140_v9  ;;  %v1177_v9 = vld [vmem:[%s14203_s29 + $0x600] sm:$0xff] }
 0x515   : > { %1260 = vmatpush2.msra.mxu0 %v1139_v10  ;;  %v1176_v10 = vld [vmem:[%s14203_s29 + $0x5f8] sm:$0xff] }
 0x516   : > { %1261 = vmatprep.subr.mxu0 %v1133_v11  ;;  %v1170_v11 = vld [vmem:[%s14203_s29 + $0x5c8] sm:$0xff] }
 0x517   : > { %1262 = vmatpush2.msra.mxu0 %v1132_v12  ;;  %v1169_v12 = vld [vmem:[%s14203_s29 + $0x5c0] sm:$0xff] }
 0x518   : > { %1263 = vmatprep.subr.mxu0 %v1126_v13  ;;  %v1163_v13 = vld [vmem:[%s14203_s29 + $0x590] sm:$0xff] }
 0x519   : > { %1264 = vmatpush2.msra.mxu0 %v1125_v14  ;;  %v1162_v14 = vld [vmem:[%s14203_s29 + $0x588] sm:$0xff] }
 0x51a   : > { %1265 = vmatprep.subr.mxu0 %v1119_v15  ;;  %v1156_v15 = vld [vmem:[%s14203_s29 + $0x558] sm:$0xff] }
 0x51b   : > { %1266 = vmatpush2.msra.mxu0 %v1118_v16  ;;  %v1155_v16 = vld [vmem:[%s14203_s29 + $0x550] sm:$0xff] }
 0x51c   : > { %1267 = vmatprep.subr.mxu0 %v1112_v17  ;;  %v1149_v17 = vld [vmem:[%s14203_s29 + $0x520] sm:$0xff] }
 0x598   : > { %v8186_v18 = vpop.f32.mrf.mxu0 }
 0x599   : > { %v846_v21 = vmax.f32 %v8186_v18, 0.0  ;;  %v2264_v18 = vld [vmem:[%s14207_s8 + $0x50] sm:$0xff] }
 0x59a   : > { %v8188_v19 = vpop.f32.mrf.mxu0 }
 0x59b   : > { %v847_v20 = vmax.f32 %v8188_v19, 0.0  ;;  %vm2146_vm4 = vcmp.gt.f32.partialorder %v846_v21, 0.0  ;;  %v2265_v19 = vld [vmem:[%s14207_s8 + $0x58] sm:$0xff] }
 0x59d   : > { %976 = vmatprep.mubr.f32.mxu1 %v847_v20  ;;  %vm2147_vm3 = vcmp.gt.f32.partialorder %v847_v20, 0.0  ;;  %v2263_v20 = vld [vmem:[%s14207_s8 + $0x48] sm:$0xff] }
 0x59e   : > { %977 = vmatmul.mubr.f32.vlgmr.msra.gmra.mxu1 %v846_v21  ;;  %v2262_v21 = vld [vmem:[%s14207_s8 + $0x40] sm:$0xff] }
 0x59f   : > { %1281 = vmatpush1.msra.mxu1 %v1092_v22  ;;  %v1148_v22 = vld [vmem:[%s14203_s29 + $0x518] sm:$0xff] }
 0x5a0   : > { %1282 = vmatprep.subr.mxu1 %v1086_v23  ;;  %v1142_v23 = vld [vmem:[%s14203_s29 + $0x4e8] sm:$0xff] }
 0x5a1   : > { %1283 = vmatpush1.msra.mxu1 %v1085_v25  ;;  %v1141_v25 = vld [vmem:[%s14203_s29 + $0x4e0] sm:$0xff] }
 0x5a2   : > { %1284 = vmatprep.subr.mxu1 %v1079_v26  ;;  %v1135_v26 = vld [vmem:[%s14203_s29 + $0x4b0] sm:$0xff] }
 0x5a3   : > { %1285 = vmatpush1.msra.mxu1 %v1078_v27  ;;  %v1134_v27 = vld [vmem:[%s14203_s29 + $0x4a8] sm:$0xff] }
 0x5a4   : > { %1286 = vmatprep.subr.mxu1 %v1072_v28  ;;  %v1128_v28 = vld [vmem:[%s14203_s29 + $0x478] sm:$0xff] }
 0x5a5   : > { %1287 = vmatpush1.msra.mxu1 %v1071_v29  ;;  %v1127_v29 = vld [vmem:[%s14203_s29 + $0x470] sm:$0xff] }
 0x5a6   : > { %1288 = vmatprep.subr.mxu1 %v1065_v30  ;;  %v1121_v30 = vld [vmem:[%s14203_s29 + $0x440] sm:$0xff] }
 0x5a7   : > { %1289 = vmatpush1.msra.mxu1 %v1064_v31  ;;  %v1120_v31 = vld [vmem:[%s14203_s29 + $0x438] sm:$0xff] }
 0x5a8   : > { %1290 = vmatprep.subr.mxu1 %v1058_v32  ;;  %v1114_v32 = vld [vmem:[%s14203_s29 + $0x408] sm:$0xff] }
 0x5a9   : > { %1291 = vmatpush1.msra.mxu1 %v1057_v33  ;;  %v1111_v33 = vld [vmem:[%s14203_s29 + $0x3f0] sm:$0xff] }
 0x5aa   : > { %1292 = vmatprep.subr.mxu1 %v1051_v34  ;;  %v1113_v34 = vld [vmem:[%s14203_s29 + $0x400] sm:$0xff]  ;;  %1268 = vmatpush2.msra.mxu0 %v1111_v33  ;;  %v1038_v33 = vld [vmem:[%s14203_s29 + $0x1a8] sm:$0xff] }
 0x5ab   : > { %1293 = vmatpush1.msra.mxu1 %v1050_v36  ;;  %v1105_v36 = vld [vmem:[%s14203_s29 + $0x3c0] sm:$0xff] }
 0x5ac   : > { %1294 = vmatprep.subr.mxu1 %v1044_v37  ;;  %v1107_v37 = vld [vmem:[%s14203_s29 + $0x3d0] sm:$0xff]  ;;  %1269 = vmatprep.subr.mxu0 %v1105_v36  ;;  %v1032_v36 = vld [vmem:[%s14203_s29 + $0x178] sm:$0xff] }
 0x5ad   : > { %1295 = vmatpush1.msra.mxu1 %v1043_v39  ;;  %v1104_v39 = vld [vmem:[%s14203_s29 + $0x3b8] sm:$0xff] }
 0x5ae   : > { %1296 = vmatprep.subr.mxu1 %v1037_v40  ;;  %v1106_v40 = vld [vmem:[%s14203_s29 + $0x3c8] sm:$0xff]  ;;  %1270 = vmatpush2.msra.mxu0 %v1104_v39  ;;  %v1031_v39 = vld [vmem:[%s14203_s29 + $0x170] sm:$0xff] }
 0x5af   : > { %1297 = vmatpush1.msra.mxu1 %v1036_v42  ;;  %v1098_v42 = vld [vmem:[%s14203_s29 + $0x388] sm:$0xff] }
 0x5b0   : > { %1298 = vmatprep.subr.mxu1 %v1030_v43  ;;  %v1100_v43 = vld [vmem:[%s14203_s29 + $0x398] sm:$0xff]  ;;  %1271 = vmatprep.subr.mxu0 %v1098_v42  ;;  %v1025_v42 = vld [vmem:[%s14203_s29 + $0x140] sm:$0xff] }
 0x5b1   : > { %1299 = vmatpush1.msra.mxu1 %v1029_v44  ;;  %v1097_v44 = vld [vmem:[%s14203_s29 + $0x380] sm:$0xff] }
 0x5b2   : > { %1300 = vmatprep.subr.mxu1 %v1023_v45  ;;  %v1099_v45 = vld [vmem:[%s14203_s29 + $0x390] sm:$0xff]  ;;  %1272 = vmatpush2.msra.mxu0 %v1097_v44  ;;  %v1024_v44 = vld [vmem:[%s14203_s29 + $0x138] sm:$0xff] }
 0x5b3   : > { %1301 = vmatpush1.msra.mxu1 %v1022_v46  ;;  %v1095_v46 = vld [vmem:[%s14203_s29 + $0x370] sm:$0xff] }
 0x5b4   : > { %1302 = vmatprep.subr.mxu1 %v1016_v47  ;;  %v1208_v47 = vld [vmem:[%s14203_s29 + $0x6f8] sm:$0xff]  ;;  %1351 = vmatprep.subr.mxu0 %v1095_v46  ;;  %v1018_v46 = vld [vmem:[%s14203_s29 + $0x108] sm:$0xff] }
 0x5b5   : > { %1303 = vmatpush1.msra.mxu1 %v1015_v48 }
 0x5b6   : > { %1304 = vmatprep.subr.mxu1 %v1009_v49 }
 0x5b7   : > { %1305 = vmatpush1.msra.mxu1 %v1008_v50 }
 0x5b8   : > { %1306 = vmatprep.subr.mxu1 %v1002_v51 }
 0x5b9   : > { %1307 = vmatpush1.msra.mxu1 %v1001_v52  ;;  %v1094_v52 = vld [vmem:[%s14203_s29 + $0x368] sm:$0xff] }
 0x5ba   : > { %1308 = vmatprep.subr.mxu1 %v995_v53  ;;  %v1096_v53 = vld [vmem:[%s14203_s29 + $0x378] sm:$0xff] }
 0x5bb   : > { %1309 = vmatpush1.msra.mxu1 %v994_v54  ;;  %v1088_v54 = vld [vmem:[%s14203_s29 + $0x338] sm:$0xff] }
 0x5bc   : > { %1310 = vmatprep.subr.mxu1 %v988_v55  ;;  %v1201_v55 = vld [vmem:[%s14203_s29 + $0x6c0] sm:$0xff] }
 0x5bd   : > { %1311 = vmatpush1.msra.mxu1 %v987_v56  ;;  %v1087_v56 = vld [vmem:[%s14203_s29 + $0x330] sm:$0xff] }
 0x5be   : > { %1312 = vmatprep.subr.mxu1 %v1205_v57  ;;  %v1089_v57 = vld [vmem:[%s14203_s29 + $0x340] sm:$0xff] }
 0x5bf   : > { %1313 = vmatpush2.msra.mxu1 %v1204_v58  ;;  %v1081_v58 = vld [vmem:[%s14203_s29 + $0x300] sm:$0xff] }
 0x5c0   : > { %1314 = vmatprep.subr.mxu1 %v1198_v59  ;;  %v1194_v59 = vld [vmem:[%s14203_s29 + $0x688] sm:$0xff] }
 0x5c1   : > { %1315 = vmatpush2.msra.mxu1 %v1197_v60  ;;  %v1080_v60 = vld [vmem:[%s14203_s29 + $0x2f8] sm:$0xff] }
 0x5c2   : > { %1316 = vmatprep.subr.mxu1 %v1191_v61  ;;  %v1082_v61 = vld [vmem:[%s14203_s29 + $0x308] sm:$0xff] }
 0x5c3   : > { %1317 = vmatpush2.msra.mxu1 %v1190_v62  ;;  %v1074_v62 = vld [vmem:[%s14203_s29 + $0x2c8] sm:$0xff] }
 0x5c4   : > { %1318 = vmatprep.subr.mxu1 %v1184_v63  ;;  %v1187_v63 = vld [vmem:[%s14203_s29 + $0x650] sm:$0xff] }
 0x5c5   : > { %1319 = vmatpush2.msra.mxu1 %v1183_v8  ;;  %v1073_v8 = vld [vmem:[%s14203_s29 + $0x2c0] sm:$0xff] }
 0x5c6   : > { %1320 = vmatprep.subr.mxu1 %v1177_v9  ;;  %v1075_v9 = vld [vmem:[%s14203_s29 + $0x2d0] sm:$0xff] }
 0x5c7   : > { %1321 = vmatpush2.msra.mxu1 %v1176_v10  ;;  %v1067_v10 = vld [vmem:[%s14203_s29 + $0x290] sm:$0xff] }
 0x5c8   : > { %1322 = vmatprep.subr.mxu1 %v1170_v11  ;;  %v1180_v11 = vld [vmem:[%s14203_s29 + $0x618] sm:$0xff] }
 0x5c9   : > { %1323 = vmatpush2.msra.mxu1 %v1169_v12  ;;  %v1066_v12 = vld [vmem:[%s14203_s29 + $0x288] sm:$0xff] }
 0x5ca   : > { %1324 = vmatprep.subr.mxu1 %v1163_v13  ;;  %v1068_v13 = vld [vmem:[%s14203_s29 + $0x298] sm:$0xff] }
 0x5cb   : > { %1325 = vmatpush2.msra.mxu1 %v1162_v14  ;;  %v1060_v14 = vld [vmem:[%s14203_s29 + $0x258] sm:$0xff] }
 0x5cc   : > { %1326 = vmatprep.subr.mxu1 %v1156_v15  ;;  %v1173_v15 = vld [vmem:[%s14203_s29 + $0x5e0] sm:$0xff] }
 0x5cd   : > { %1327 = vmatpush2.msra.mxu1 %v1155_v16  ;;  %v1059_v16 = vld [vmem:[%s14203_s29 + $0x250] sm:$0xff] }
 0x5ce   : > { %1328 = vmatprep.subr.mxu1 %v1149_v17  ;;  %v1061_v17 = vld [vmem:[%s14203_s29 + $0x260] sm:$0xff] }
 0x5cf   : > { %1329 = vmatpush2.msra.mxu1 %v1148_v22  ;;  %v1053_v22 = vld [vmem:[%s14203_s29 + $0x220] sm:$0xff] }
 0x5d0   : > { %1330 = vmatprep.subr.mxu1 %v1142_v23  ;;  %v1166_v23 = vld [vmem:[%s14203_s29 + $0x5a8] sm:$0xff] }
 0x5d1   : > { %1331 = vmatpush2.msra.mxu1 %v1141_v25  ;;  %v1052_v25 = vld [vmem:[%s14203_s29 + $0x218] sm:$0xff] }
 0x5d2   : > { %1332 = vmatprep.subr.mxu1 %v1135_v26  ;;  %v1054_v26 = vld [vmem:[%s14203_s29 + $0x228] sm:$0xff] }
 0x5d3   : > { %1333 = vmatpush2.msra.mxu1 %v1134_v27  ;;  %v1046_v27 = vld [vmem:[%s14203_s29 + $0x1e8] sm:$0xff] }
 0x5d4   : > { %1334 = vmatprep.subr.mxu1 %v1128_v28  ;;  %v1159_v28 = vld [vmem:[%s14203_s29 + $0x570] sm:$0xff] }
 0x5d5   : > { %1335 = vmatpush2.msra.mxu1 %v1127_v29  ;;  %v1045_v29 = vld [vmem:[%s14203_s29 + $0x1e0] sm:$0xff] }
 0x5d6   : > { %1336 = vmatprep.subr.mxu1 %v1121_v30  ;;  %v1047_v30 = vld [vmem:[%s14203_s29 + $0x1f0] sm:$0xff] }
 0x5d7   : > { %1337 = vmatpush2.msra.mxu1 %v1120_v31  ;;  %v1039_v31 = vld [vmem:[%s14203_s29 + $0x1b0] sm:$0xff] }
 0x5d8   : > { %1338 = vmatprep.subr.mxu1 %v1114_v32  ;;  %v1152_v32 = vld [vmem:[%s14203_s29 + $0x538] sm:$0xff] }
 0x5d9   : > { %1339 = vmatpush2.msra.mxu1 %v1113_v34  ;;  %v1040_v34 = vld [vmem:[%s14203_s29 + $0x1b8] sm:$0xff] }
 0x5da   : > { %1340 = vmatprep.subr.mxu1 %v1107_v37  ;;  %v1145_v37 = vld [vmem:[%s14203_s29 + $0x500] sm:$0xff] }
 0x5db   : > { %1341 = vmatpush2.msra.mxu1 %v1106_v40  ;;  %v1033_v40 = vld [vmem:[%s14203_s29 + $0x180] sm:$0xff] }
 0x5dc   : > { %1342 = vmatprep.subr.mxu1 %v1100_v43  ;;  %v1138_v43 = vld [vmem:[%s14203_s29 + $0x4c8] sm:$0xff] }
 0x5dd   : > { %1343 = vmatpush2.msra.mxu1 %v1099_v45  ;;  %v1026_v45 = vld [vmem:[%s14203_s29 + $0x148] sm:$0xff] }
 0x5de   : > { %6270 = vmatprep.subr.mxu1 %v1208_v47  ;;  %v1131_v47 = vld [vmem:[%s14203_s29 + $0x490] sm:$0xff] }
 0x65e   : > { %v978_v48 = vpop.f32.mrf.mxu1 }
 0x65f   : > { %v8408_v51 = vmax.f32 %v978_v48, 0.0  ;;  %v1017_v48 = vld [vmem:[%s14203_s29 + $0x100] sm:$0xff] }
 0x660   : > { %v980_v49 = vpop.f32.mrf.mxu1 }
 0x661   : > { %v8406_v50 = vmax.f32 %v980_v49, 0.0  ;;  %v1019_v49 = vld [vmem:[%s14203_s29 + $0x110] sm:$0xff]  ;;  %vm2007_vm2 = vcmp.gt.f32.partialorder %v8408_v51, 0.0 }
 0x663   : > { %1273 = vmatprep.mubr.f32.mxu0 %v8406_v50  ;;  %1344 = vmatprep.mubr.f32.mxu1 %v8406_v50  ;;  %vm2008_vm1 = vcmp.gt.f32.partialorder %v8406_v50, 0.0 }
 0x664   : > { %1274 = vmatmul.mubr.f32.vlgmr.msra.gmra.mxu0 %v8408_v51  ;;  %1345 = vmatmul.mubr.f32.vlgmr.msra.gmra.mxu1 %v8408_v51 }
 0x665   : > { %1352 = vmatpush1.msra.mxu0 %v1094_v52  ;;  %6271 = vmatpush3.msra.mxu1 %v1096_v53  ;;  %v1011_v52 = vld [vmem:[%s14203_s29 + $0xd0] sm:$0xff]  ;;  %v1124_v53 = vld [vmem:[%s14203_s29 + $0x458] sm:$0xff] }
 0x666   : > { %1353 = vmatprep.subr.mxu0 %v1088_v54  ;;  %1415 = vmatprep.mubr.f32.mxu0 %v8406_v50  ;;  %v1010_v54 = vld [vmem:[%s14203_s29 + $0xc8] sm:$0xff] }
 0x667   : > { %6272 = vmatprep.subr.mxu1 %v1201_v55  ;;  %1486 = vmatprep.mubr.f32.mxu1 %v8406_v50  ;;  %v1012_v55 = vld [vmem:[%s14203_s29 + $0xd8] sm:$0xff] }
 0x668   : > { %1354 = vmatpush1.msra.mxu0 %v1087_v56  ;;  %6273 = vmatpush3.msra.mxu1 %v1089_v57  ;;  %v1004_v56 = vld [vmem:[%s14203_s29 + $0x98] sm:$0xff]  ;;  %v1117_v57 = vld [vmem:[%s14203_s29 + $0x420] sm:$0xff] }
 0x669   : > { %1355 = vmatprep.subr.mxu0 %v1081_v58  ;;  %6274 = vmatprep.subr.mxu1 %v1194_v59  ;;  %v1003_v58 = vld [vmem:[%s14203_s29 + $0x90] sm:$0xff]  ;;  %v1005_v59 = vld [vmem:[%s14203_s29 + $0xa0] sm:$0xff]  ;;  %v2269_v50 = vld [vmem:[%s14207_s8 + $0x78] sm:$0xff] }
 0x66a   : > { %1356 = vmatpush1.msra.mxu0 %v1080_v60  ;;  %6275 = vmatpush3.msra.mxu1 %v1082_v61  ;;  %v997_v60 = vld [vmem:[%s14203_s29 + $0x60] sm:$0xff]  ;;  %v1110_v61 = vld [vmem:[%s14203_s29 + $0x3e8] sm:$0xff] }
 0x66b   : > { %1357 = vmatprep.subr.mxu0 %v1074_v62  ;;  %6276 = vmatprep.subr.mxu1 %v1187_v63  ;;  %v996_v62 = vld [vmem:[%s14203_s29 + $0x58] sm:$0xff]  ;;  %v998_v63 = vld [vmem:[%s14203_s29 + $0x68] sm:$0xff] }
 0x66c   : > { %1358 = vmatpush1.msra.mxu0 %v1073_v8  ;;  %6277 = vmatpush3.msra.mxu1 %v1075_v9  ;;  %v990_v8 = vld [vmem:[%s14203_s29 + $0x28] sm:$0xff]  ;;  %v1103_v9 = vld [vmem:[%s14203_s29 + $0x3b0] sm:$0xff] }
 0x66d   : > { %1359 = vmatprep.subr.mxu0 %v1067_v10  ;;  %6278 = vmatprep.subr.mxu1 %v1180_v11  ;;  %v989_v10 = vld [vmem:[%s14203_s29 + $0x20] sm:$0xff]  ;;  %v991_v11 = vld [vmem:[%s14203_s29 + $0x30] sm:$0xff] }
 0x66e   : > { %1360 = vmatpush1.msra.mxu0 %v1066_v12  ;;  %6279 = vmatpush3.msra.mxu1 %v1068_v13  ;;  %v1207_v12 = vld [vmem:[%s14203_s29 + $0x6f0] sm:$0xff]  ;;  %v1206_v13 = vld [vmem:[%s14203_s29 + $0x6e8] sm:$0xff] }
 0x66f   : > { %1361 = vmatprep.subr.mxu0 %v1060_v14  ;;  %6280 = vmatprep.subr.mxu1 %v1173_v15  ;;  %v1594_v14 = vld [vmem:[%s14204_s4 + $0x2f8] sm:$0xff] }
 0x670   : > { %1362 = vmatpush1.msra.mxu0 %v1059_v16  ;;  %6281 = vmatpush3.msra.mxu1 %v1061_v17  ;;  %v1200_v15 = vld [vmem:[%s14203_s29 + $0x6b8] sm:$0xff]  ;;  %v1593_v16 = vld [vmem:[%s14204_s4 + $0x2f0] sm:$0xff] }
 0x671   : > { %1363 = vmatprep.subr.mxu0 %v1053_v22  ;;  %6282 = vmatprep.subr.mxu1 %v1166_v23  ;;  %v1199_v17 = vld [vmem:[%s14203_s29 + $0x6b0] sm:$0xff]  ;;  %v1592_v22 = vld [vmem:[%s14204_s4 + $0x2e8] sm:$0xff]  ;;  %v1193_v23 = vld [vmem:[%s14203_s29 + $0x680] sm:$0xff] }
 0x672   : > { %1364 = vmatpush1.msra.mxu0 %v1052_v25  ;;  %6283 = vmatpush3.msra.mxu1 %v1054_v26  ;;  %v1591_v25 = vld [vmem:[%s14204_s4 + $0x2e0] sm:$0xff]  ;;  %v1192_v26 = vld [vmem:[%s14203_s29 + $0x678] sm:$0xff] }
 0x673   : > { %1365 = vmatprep.subr.mxu0 %v1046_v27  ;;  %6284 = vmatprep.subr.mxu1 %v1159_v28  ;;  %v1590_v27 = vld [vmem:[%s14204_s4 + $0x2d8] sm:$0xff]  ;;  %v1186_v28 = vld [vmem:[%s14203_s29 + $0x648] sm:$0xff] }
 0x674   : > { %1366 = vmatpush1.msra.mxu0 %v1045_v29  ;;  %6285 = vmatpush3.msra.mxu1 %v1047_v30  ;;  %v1589_v29 = vld [vmem:[%s14204_s4 + $0x2d0] sm:$0xff]  ;;  %v1185_v30 = vld [vmem:[%s14203_s29 + $0x640] sm:$0xff] }
 0x675   : > { %1367 = vmatprep.subr.mxu0 %v1039_v31  ;;  %6286 = vmatprep.subr.mxu1 %v1152_v32  ;;  %v1588_v31 = vld [vmem:[%s14204_s4 + $0x2c8] sm:$0xff]  ;;  %v1179_v32 = vld [vmem:[%s14203_s29 + $0x610] sm:$0xff] }
 0x676   : > { %1368 = vmatpush1.msra.mxu0 %v1038_v33  ;;  %6287 = vmatpush3.msra.mxu1 %v1040_v34  ;;  %v1587_v33 = vld [vmem:[%s14204_s4 + $0x2c0] sm:$0xff]  ;;  %v1178_v34 = vld [vmem:[%s14203_s29 + $0x608] sm:$0xff] }
 0x677   : > { %1369 = vmatprep.subr.mxu0 %v1032_v36  ;;  %6288 = vmatprep.subr.mxu1 %v1145_v37  ;;  %v1586_v36 = vld [vmem:[%s14204_s4 + $0x2b8] sm:$0xff] }
 0x678   : > { %1370 = vmatpush1.msra.mxu0 %v1031_v39  ;;  %6289 = vmatpush3.msra.mxu1 %v1033_v40  ;;  %v1172_v37 = vld [vmem:[%s14203_s29 + $0x5d8] sm:$0xff]  ;;  %v1585_v39 = vld [vmem:[%s14204_s4 + $0x2b0] sm:$0xff] }
 0x679   : > { %1371 = vmatprep.subr.mxu0 %v1025_v42  ;;  %6290 = vmatprep.subr.mxu1 %v1138_v43  ;;  %v1171_v40 = vld [vmem:[%s14203_s29 + $0x5d0] sm:$0xff]  ;;  %v1584_v42 = vld [vmem:[%s14204_s4 + $0x2a8] sm:$0xff]  ;;  %v1165_v43 = vld [vmem:[%s14203_s29 + $0x5a0] sm:$0xff] }
 0x67a   : > { %1372 = vmatpush1.msra.mxu0 %v1024_v44  ;;  %6291 = vmatpush3.msra.mxu1 %v1026_v45  ;;  %v1583_v44 = vld [vmem:[%s14204_s4 + $0x2a0] sm:$0xff]  ;;  %v1164_v45 = vld [vmem:[%s14203_s29 + $0x598] sm:$0xff] }
 0x67b   : > { %1373 = vmatprep.subr.mxu0 %v1018_v46  ;;  %6292 = vmatprep.subr.mxu1 %v1131_v47  ;;  %v1582_v46 = vld [vmem:[%s14204_s4 + $0x298] sm:$0xff]  ;;  %v1158_v47 = vld [vmem:[%s14203_s29 + $0x568] sm:$0xff] }
 0x67c   : > { %1374 = vmatpush1.msra.mxu0 %v1017_v48  ;;  %6293 = vmatpush3.msra.mxu1 %v1019_v49  ;;  %v1581_v48 = vld [vmem:[%s14204_s4 + $0x290] sm:$0xff]  ;;  %v1157_v49 = vld [vmem:[%s14203_s29 + $0x560] sm:$0xff] }
 0x67d   : > { %1375 = vmatprep.subr.mxu0 %v1011_v52  ;;  %6294 = vmatprep.subr.mxu1 %v1124_v53  ;;  %v1580_v52 = vld [vmem:[%s14204_s4 + $0x288] sm:$0xff]  ;;  %v1151_v53 = vld [vmem:[%s14203_s29 + $0x530] sm:$0xff] }
 0x67e   : > { %1376 = vmatpush1.msra.mxu0 %v1010_v54  ;;  %6295 = vmatpush3.msra.mxu1 %v1012_v55  ;;  %v1579_v54 = vld [vmem:[%s14204_s4 + $0x280] sm:$0xff]  ;;  %v1150_v55 = vld [vmem:[%s14203_s29 + $0x528] sm:$0xff] }
 0x67f   : > { %1377 = vmatprep.subr.mxu0 %v1004_v56  ;;  %6296 = vmatprep.subr.mxu1 %v1117_v57  ;;  %v1578_v56 = vld [vmem:[%s14204_s4 + $0x278] sm:$0xff] }
 0x680   : > { %1378 = vmatpush1.msra.mxu0 %v1003_v58  ;;  %6297 = vmatpush3.msra.mxu1 %v1005_v59  ;;  %v1144_v57 = vld [vmem:[%s14203_s29 + $0x4f8] sm:$0xff]  ;;  %v1577_v58 = vld [vmem:[%s14204_s4 + $0x270] sm:$0xff] }
 0x681   : > { %1379 = vmatprep.subr.mxu0 %v997_v60  ;;  %6298 = vmatprep.subr.mxu1 %v1110_v61  ;;  %v1143_v59 = vld [vmem:[%s14203_s29 + $0x4f0] sm:$0xff]  ;;  %v1576_v60 = vld [vmem:[%s14204_s4 + $0x268] sm:$0xff]  ;;  %v1137_v61 = vld [vmem:[%s14203_s29 + $0x4c0] sm:$0xff] }
 0x682   : > { %1380 = vmatpush1.msra.mxu0 %v996_v62  ;;  %6299 = vmatpush3.msra.mxu1 %v998_v63  ;;  %v1575_v62 = vld [vmem:[%s14204_s4 + $0x260] sm:$0xff]  ;;  %v1136_v63 = vld [vmem:[%s14203_s29 + $0x4b8] sm:$0xff] }
 0x683   : > { %1381 = vmatprep.subr.mxu0 %v990_v8  ;;  %6300 = vmatprep.subr.mxu1 %v1103_v9  ;;  %v1574_v8 = vld [vmem:[%s14204_s4 + $0x258] sm:$0xff]  ;;  %v1130_v9 = vld [vmem:[%s14203_s29 + $0x488] sm:$0xff] }
 0x684   : > { %1382 = vmatpush1.msra.mxu0 %v989_v10  ;;  %6301 = vmatpush3.msra.mxu1 %v991_v11  ;;  %v1573_v10 = vld [vmem:[%s14204_s4 + $0x250] sm:$0xff]  ;;  %v1129_v11 = vld [vmem:[%s14203_s29 + $0x480] sm:$0xff] }
 0x685   : > { %1383 = vmatprep.subr.mxu0 %v1207_v12  ;;  %1487 = vmatmul.mubr.f32.vlgmr.msra.gmra.mxu1 %v8408_v51  ;;  %v1572_v12 = vld [vmem:[%s14204_s4 + $0x248] sm:$0xff] }
 0x686   : > { %1384 = vmatpush2.msra.mxu0 %v1206_v13  ;;  %1794 = vmatprep.subr.mxu1 %v1594_v14  ;;  %v1123_v13 = vld [vmem:[%s14203_s29 + $0x450] sm:$0xff]  ;;  %v1571_v14 = vld [vmem:[%s14204_s4 + $0x240] sm:$0xff] }
 0x687   : > { %1385 = vmatprep.subr.mxu0 %v1200_v15  ;;  %1795 = vmatpush1.msra.mxu1 %v1593_v16  ;;  %v1122_v15 = vld [vmem:[%s14203_s29 + $0x448] sm:$0xff]  ;;  %v1570_v16 = vld [vmem:[%s14204_s4 + $0x238] sm:$0xff] }
 0x688   : > { %1386 = vmatpush2.msra.mxu0 %v1199_v17  ;;  %1796 = vmatprep.subr.mxu1 %v1592_v22  ;;  %v1116_v17 = vld [vmem:[%s14203_s29 + $0x418] sm:$0xff]  ;;  %v1569_v22 = vld [vmem:[%s14204_s4 + $0x230] sm:$0xff] }
 0x689   : > { %1387 = vmatprep.subr.mxu0 %v1193_v23  ;;  %1797 = vmatpush1.msra.mxu1 %v1591_v25  ;;  %v1115_v23 = vld [vmem:[%s14203_s29 + $0x410] sm:$0xff]  ;;  %v1568_v25 = vld [vmem:[%s14204_s4 + $0x228] sm:$0xff] }
 0x68a   : > { %1388 = vmatpush2.msra.mxu0 %v1192_v26  ;;  %1798 = vmatprep.subr.mxu1 %v1590_v27  ;;  %v1109_v26 = vld [vmem:[%s14203_s29 + $0x3e0] sm:$0xff] }
 0x68b   : > { %1389 = vmatprep.subr.mxu0 %v1186_v28  ;;  %1799 = vmatpush1.msra.mxu1 %v1589_v29  ;;  %v1567_v27 = vld [vmem:[%s14204_s4 + $0x220] sm:$0xff]  ;;  %v1108_v28 = vld [vmem:[%s14203_s29 + $0x3d8] sm:$0xff] }
 0x68c   : > { %1390 = vmatpush2.msra.mxu0 %v1185_v30  ;;  %1800 = vmatprep.subr.mxu1 %v1588_v31  ;;  %v1566_v29 = vld [vmem:[%s14204_s4 + $0x218] sm:$0xff]  ;;  %v1102_v30 = vld [vmem:[%s14203_s29 + $0x3a8] sm:$0xff]  ;;  %v1565_v31 = vld [vmem:[%s14204_s4 + $0x210] sm:$0xff] }
 0x68d   : > { %1391 = vmatprep.subr.mxu0 %v1179_v32  ;;  %1801 = vmatpush1.msra.mxu1 %v1587_v33  ;;  %v1101_v32 = vld [vmem:[%s14203_s29 + $0x3a0] sm:$0xff]  ;;  %v1564_v33 = vld [vmem:[%s14204_s4 + $0x208] sm:$0xff]  ;;  %s6881_s29 = smov (%p749_p0), [#allocation7]  }
 0x68e   : > { %1392 = vmatpush2.msra.mxu0 %v1178_v34  ;;  %1802 = vmatprep.subr.mxu1 %v1586_v36  ;;  %v1530_v34 = vld [vmem:[%s14204_s4 + $0xf8] sm:$0xff]  ;;  %v1529_v36 = vld [vmem:[%s14204_s4 + $0xf0] sm:$0xff] }
 0x68f   : > { %1393 = vmatprep.subr.mxu0 %v1172_v37  ;;  %1803 = vmatpush1.msra.mxu1 %v1585_v39  ;;  %v1563_v37 = vld [vmem:[%s14204_s4 + $0x200] sm:$0xff]  ;;  %v1528_v39 = vld [vmem:[%s14204_s4 + $0xe8] sm:$0xff] }
 0x690   : > { %1394 = vmatpush2.msra.mxu0 %v1171_v40  ;;  %1804 = vmatprep.subr.mxu1 %v1584_v42  ;;  %v1626_v40 = vld [vmem:[%s14204_s4 + $0x3f8] sm:$0xff]  ;;  %v1527_v42 = vld [vmem:[%s14204_s4 + $0xe0] sm:$0xff] }
 0x691   : > { %1395 = vmatprep.subr.mxu0 %v1165_v43  ;;  %1805 = vmatpush1.msra.mxu1 %v1583_v44  ;;  %v1625_v43 = vld [vmem:[%s14204_s4 + $0x3f0] sm:$0xff]  ;;  %v1526_v44 = vld [vmem:[%s14204_s4 + $0xd8] sm:$0xff] }
 0x692   : > { %1396 = vmatpush2.msra.mxu0 %v1164_v45  ;;  %1806 = vmatprep.subr.mxu1 %v1582_v46  ;;  %v1624_v45 = vld [vmem:[%s14204_s4 + $0x3e8] sm:$0xff]  ;;  %v1525_v46 = vld [vmem:[%s14204_s4 + $0xd0] sm:$0xff] }
 0x693   : > { %1397 = vmatprep.subr.mxu0 %v1158_v47  ;;  %1807 = vmatpush1.msra.mxu1 %v1581_v48  ;;  %v1623_v47 = vld [vmem:[%s14204_s4 + $0x3e0] sm:$0xff]  ;;  %v1524_v48 = vld [vmem:[%s14204_s4 + $0xc8] sm:$0xff] }
 0x694   : > { %1398 = vmatpush2.msra.mxu0 %v1157_v49  ;;  %1808 = vmatprep.subr.mxu1 %v1580_v52  ;;  %v1622_v49 = vld [vmem:[%s14204_s4 + $0x3d8] sm:$0xff]  ;;  %v1523_v52 = vld [vmem:[%s14204_s4 + $0xc0] sm:$0xff] }
 0x695   : > { %1399 = vmatprep.subr.mxu0 %v1151_v53  ;;  %1809 = vmatpush1.msra.mxu1 %v1579_v54  ;;  %v1621_v53 = vld [vmem:[%s14204_s4 + $0x3d0] sm:$0xff]  ;;  %v1522_v54 = vld [vmem:[%s14204_s4 + $0xb8] sm:$0xff] }
 0x696   : > { %1400 = vmatpush2.msra.mxu0 %v1150_v55  ;;  %1810 = vmatprep.subr.mxu1 %v1578_v56  ;;  %v1620_v55 = vld [vmem:[%s14204_s4 + $0x3c8] sm:$0xff]  ;;  %v1521_v56 = vld [vmem:[%s14204_s4 + $0xb0] sm:$0xff] }
 0x697   : > { %1401 = vmatprep.subr.mxu0 %v1144_v57  ;;  %1811 = vmatpush1.msra.mxu1 %v1577_v58  ;;  %v1619_v57 = vld [vmem:[%s14204_s4 + $0x3c0] sm:$0xff]  ;;  %v1520_v58 = vld [vmem:[%s14204_s4 + $0xa8] sm:$0xff] }
 0x698   : > { %1402 = vmatpush2.msra.mxu0 %v1143_v59  ;;  %1812 = vmatprep.subr.mxu1 %v1576_v60  ;;  %v1618_v59 = vld [vmem:[%s14204_s4 + $0x3b8] sm:$0xff]  ;;  %v1519_v60 = vld [vmem:[%s14204_s4 + $0xa0] sm:$0xff] }
 0x699   : > { %1403 = vmatprep.subr.mxu0 %v1137_v61  ;;  %1813 = vmatpush1.msra.mxu1 %v1575_v62  ;;  %v1617_v61 = vld [vmem:[%s14204_s4 + $0x3b0] sm:$0xff]  ;;  %v1518_v62 = vld [vmem:[%s14204_s4 + $0x98] sm:$0xff] }
 0x69a   : > { %1404 = vmatpush2.msra.mxu0 %v1136_v63  ;;  %1814 = vmatprep.subr.mxu1 %v1574_v8  ;;  %v1616_v63 = vld [vmem:[%s14204_s4 + $0x3a8] sm:$0xff]  ;;  %v1517_v8 = vld [vmem:[%s14204_s4 + $0x90] sm:$0xff] }
 0x69b   : > { %1405 = vmatprep.subr.mxu0 %v1130_v9  ;;  %1815 = vmatpush1.msra.mxu1 %v1573_v10  ;;  %v1615_v9 = vld [vmem:[%s14204_s4 + $0x3a0] sm:$0xff]  ;;  %v1516_v10 = vld [vmem:[%s14204_s4 + $0x88] sm:$0xff] }
 0x69c   : > { %1406 = vmatpush2.msra.mxu0 %v1129_v11  ;;  %1816 = vmatprep.subr.mxu1 %v1572_v12  ;;  %v1614_v11 = vld [vmem:[%s14204_s4 + $0x398] sm:$0xff]  ;;  %v1515_v12 = vld [vmem:[%s14204_s4 + $0x80] sm:$0xff] }
 0x69d   : > { %1407 = vmatprep.subr.mxu0 %v1123_v13  ;;  %1817 = vmatpush1.msra.mxu1 %v1571_v14  ;;  %v1613_v13 = vld [vmem:[%s14204_s4 + $0x390] sm:$0xff]  ;;  %v1514_v14 = vld [vmem:[%s14204_s4 + $0x78] sm:$0xff] }
 0x69e   : > { %1408 = vmatpush2.msra.mxu0 %v1122_v15  ;;  %1818 = vmatprep.subr.mxu1 %v1570_v16  ;;  %v1612_v15 = vld [vmem:[%s14204_s4 + $0x388] sm:$0xff]  ;;  %v1513_v16 = vld [vmem:[%s14204_s4 + $0x70] sm:$0xff] }
 0x69f   : > { %1409 = vmatprep.subr.mxu0 %v1116_v17  ;;  %1819 = vmatpush1.msra.mxu1 %v1569_v22  ;;  %v1611_v17 = vld [vmem:[%s14204_s4 + $0x380] sm:$0xff]  ;;  %v1512_v22 = vld [vmem:[%s14204_s4 + $0x68] sm:$0xff] }
 0x6a0   : > { %1410 = vmatpush2.msra.mxu0 %v1115_v23  ;;  %1820 = vmatprep.subr.mxu1 %v1568_v25  ;;  %v1610_v23 = vld [vmem:[%s14204_s4 + $0x378] sm:$0xff]  ;;  %v1511_v25 = vld [vmem:[%s14204_s4 + $0x60] sm:$0xff] }
 0x6a1   : > { %1411 = vmatprep.subr.mxu0 %v1109_v26  ;;  %1821 = vmatpush1.msra.mxu1 %v1567_v27  ;;  %v1609_v26 = vld [vmem:[%s14204_s4 + $0x370] sm:$0xff]  ;;  %v1510_v27 = vld [vmem:[%s14204_s4 + $0x58] sm:$0xff] }
 0x6a2   : > { %1412 = vmatpush2.msra.mxu0 %v1108_v28  ;;  %1822 = vmatprep.subr.mxu1 %v1566_v29  ;;  %v1608_v28 = vld [vmem:[%s14204_s4 + $0x368] sm:$0xff]  ;;  %v1509_v29 = vld [vmem:[%s14204_s4 + $0x50] sm:$0xff] }
 0x6a3   : > { %1413 = vmatprep.subr.mxu0 %v1102_v30  ;;  %1823 = vmatpush1.msra.mxu1 %v1565_v31  ;;  %v1607_v30 = vld [vmem:[%s14204_s4 + $0x360] sm:$0xff]  ;;  %v1508_v31 = vld [vmem:[%s14204_s4 + $0x48] sm:$0xff] }
 0x6a4   : > { %1414 = vmatpush2.msra.mxu0 %v1101_v32  ;;  %1824 = vmatprep.subr.mxu1 %v1564_v33  ;;  %v1606_v32 = vld [vmem:[%s14204_s4 + $0x358] sm:$0xff]  ;;  %v1507_v33 = vld [vmem:[%s14204_s4 + $0x40] sm:$0xff] }
 0x6a5   : > { %1416 = vmatmul.mubr.f32.vlgmr.msra.gmra.mxu0 %v8408_v51  ;;  %1723 = vmatprep.subr.mxu0 %v1530_v34  ;;  %v1605_v34 = vld [vmem:[%s14204_s4 + $0x350] sm:$0xff] }
 0x6a6   : > { %1724 = vmatpush1.msra.mxu0 %v1529_v36  ;;  %1825 = vmatpush1.msra.mxu1 %v1563_v37  ;;  %v1506_v36 = vld [vmem:[%s14204_s4 + $0x38] sm:$0xff]  ;;  %v1604_v37 = vld [vmem:[%s14204_s4 + $0x348] sm:$0xff] }
 0x6a7   : > { %1725 = vmatprep.subr.mxu0 %v1528_v39  ;;  %1826 = vmatprep.subr.mxu1 %v1626_v40  ;;  %v1505_v39 = vld [vmem:[%s14204_s4 + $0x30] sm:$0xff]  ;;  %v1603_v40 = vld [vmem:[%s14204_s4 + $0x340] sm:$0xff] }
 0x6a8   : > { %1726 = vmatpush1.msra.mxu0 %v1527_v42  ;;  %1827 = vmatpush2.msra.mxu1 %v1625_v43  ;;  %v1504_v42 = vld [vmem:[%s14204_s4 + $0x28] sm:$0xff]  ;;  %v1602_v43 = vld [vmem:[%s14204_s4 + $0x338] sm:$0xff] }
 0x6a9   : > { %1727 = vmatprep.subr.mxu0 %v1526_v44  ;;  %1828 = vmatprep.subr.mxu1 %v1624_v45  ;;  %v1503_v44 = vld [vmem:[%s14204_s4 + $0x20] sm:$0xff]  ;;  %v1601_v45 = vld [vmem:[%s14204_s4 + $0x330] sm:$0xff] }
 0x6aa   : > { %1728 = vmatpush1.msra.mxu0 %v1525_v46  ;;  %1829 = vmatpush2.msra.mxu1 %v1623_v47  ;;  %v1502_v46 = vld [vmem:[%s14204_s4 + $0x18] sm:$0xff]  ;;  %v1600_v47 = vld [vmem:[%s14204_s4 + $0x328] sm:$0xff] }
 0x6ab   : > { %1729 = vmatprep.subr.mxu0 %v1524_v48  ;;  %1830 = vmatprep.subr.mxu1 %v1622_v49  ;;  %v1501_v48 = vld [vmem:[%s14204_s4 + $0x10] sm:$0xff]  ;;  %v1599_v49 = vld [vmem:[%s14204_s4 + $0x320] sm:$0xff] }
 0x6ac   : > { %1730 = vmatpush1.msra.mxu0 %v1523_v52  ;;  %1831 = vmatpush2.msra.mxu1 %v1621_v53  ;;  %v1500_v52 = vld [vmem:[%s14204_s4 + $0x8] sm:$0xff]  ;;  %v1598_v53 = vld [vmem:[%s14204_s4 + $0x318] sm:$0xff] }
 0x6ad   : > { %1731 = vmatprep.subr.mxu0 %v1522_v54  ;;  %1832 = vmatprep.subr.mxu1 %v1620_v55  ;;  %v1499_v54 = vld [vmem:[%s14204_s4] sm:$0xff]  ;;  %v1597_v55 = vld [vmem:[%s14204_s4 + $0x310] sm:$0xff] }
 0x6ae   : > { %1732 = vmatpush1.msra.mxu0 %v1521_v56  ;;  %1833 = vmatpush2.msra.mxu1 %v1619_v57  ;;  %v1562_v56 = vld [vmem:[%s14204_s4 + $0x1f8] sm:$0xff]  ;;  %v1596_v57 = vld [vmem:[%s14204_s4 + $0x308] sm:$0xff] }
 0x6af   : > { %1733 = vmatprep.subr.mxu0 %v1520_v58  ;;  %1834 = vmatprep.subr.mxu1 %v1618_v59  ;;  %v1561_v58 = vld [vmem:[%s14204_s4 + $0x1f0] sm:$0xff]  ;;  %v1595_v59 = vld [vmem:[%s14204_s4 + $0x300] sm:$0xff] }
 0x6b0   : > { %1734 = vmatpush1.msra.mxu0 %v1519_v60  ;;  %1835 = vmatpush2.msra.mxu1 %v1617_v61  ;;  %v1560_v60 = vld [vmem:[%s14204_s4 + $0x1e8] sm:$0xff]  ;;  %v1722_v61 = vld [vmem:[%s14204_s4 + $0x6f8] sm:$0xff] }
 0x6b1   : > { %1735 = vmatprep.subr.mxu0 %v1518_v62  ;;  %1836 = vmatprep.subr.mxu1 %v1616_v63  ;;  %v1559_v62 = vld [vmem:[%s14204_s4 + $0x1e0] sm:$0xff]  ;;  %v1558_v63 = vld [vmem:[%s14204_s4 + $0x1d8] sm:$0xff] }
 0x6b2   : > { %1736 = vmatpush1.msra.mxu0 %v1517_v8  ;;  %1837 = vmatpush2.msra.mxu1 %v1615_v9  ;;  %v1557_v8 = vld [vmem:[%s14204_s4 + $0x1d0] sm:$0xff]  ;;  %v1556_v9 = vld [vmem:[%s14204_s4 + $0x1c8] sm:$0xff] }
 0x6b3   : > { %1737 = vmatprep.subr.mxu0 %v1516_v10  ;;  %1838 = vmatprep.subr.mxu1 %v1614_v11  ;;  %v1555_v10 = vld [vmem:[%s14204_s4 + $0x1c0] sm:$0xff]  ;;  %v1554_v11 = vld [vmem:[%s14204_s4 + $0x1b8] sm:$0xff] }
 0x6b4   : > { %1738 = vmatpush1.msra.mxu0 %v1515_v12  ;;  %1839 = vmatpush2.msra.mxu1 %v1613_v13  ;;  %v1553_v12 = vld [vmem:[%s14204_s4 + $0x1b0] sm:$0xff]  ;;  %v1552_v13 = vld [vmem:[%s14204_s4 + $0x1a8] sm:$0xff] }
 0x6b5   : > { %1739 = vmatprep.subr.mxu0 %v1514_v14  ;;  %1840 = vmatprep.subr.mxu1 %v1612_v15  ;;  %v1551_v14 = vld [vmem:[%s14204_s4 + $0x1a0] sm:$0xff]  ;;  %v1550_v15 = vld [vmem:[%s14204_s4 + $0x198] sm:$0xff] }
 0x6b6   : > { %1740 = vmatpush1.msra.mxu0 %v1513_v16  ;;  %1841 = vmatpush2.msra.mxu1 %v1611_v17  ;;  %v1549_v16 = vld [vmem:[%s14204_s4 + $0x190] sm:$0xff]  ;;  %v1548_v17 = vld [vmem:[%s14204_s4 + $0x188] sm:$0xff] }
 0x6b7   : > { %1741 = vmatprep.subr.mxu0 %v1512_v22  ;;  %1842 = vmatprep.subr.mxu1 %v1610_v23  ;;  %v1547_v22 = vld [vmem:[%s14204_s4 + $0x180] sm:$0xff]  ;;  %v1546_v23 = vld [vmem:[%s14204_s4 + $0x178] sm:$0xff] }
 0x6b8   : > { %1742 = vmatpush1.msra.mxu0 %v1511_v25  ;;  %1843 = vmatpush2.msra.mxu1 %v1609_v26  ;;  %v1545_v25 = vld [vmem:[%s14204_s4 + $0x170] sm:$0xff]  ;;  %v1544_v26 = vld [vmem:[%s14204_s4 + $0x168] sm:$0xff] }
 0x6b9   : > { %1743 = vmatprep.subr.mxu0 %v1510_v27  ;;  %1844 = vmatprep.subr.mxu1 %v1608_v28  ;;  %v1543_v27 = vld [vmem:[%s14204_s4 + $0x160] sm:$0xff]  ;;  %v1542_v28 = vld [vmem:[%s14204_s4 + $0x158] sm:$0xff] }
 0x6ba   : > { %1744 = vmatpush1.msra.mxu0 %v1509_v29  ;;  %1845 = vmatpush2.msra.mxu1 %v1607_v30  ;;  %v1541_v29 = vld [vmem:[%s14204_s4 + $0x150] sm:$0xff]  ;;  %v1540_v30 = vld [vmem:[%s14204_s4 + $0x148] sm:$0xff] }
 0x6bb   : > { %1745 = vmatprep.subr.mxu0 %v1508_v31  ;;  %1846 = vmatprep.subr.mxu1 %v1606_v32  ;;  %v1539_v31 = vld [vmem:[%s14204_s4 + $0x140] sm:$0xff]  ;;  %v1538_v32 = vld [vmem:[%s14204_s4 + $0x138] sm:$0xff] }
 0x6bc   : > { %1746 = vmatpush1.msra.mxu0 %v1507_v33  ;;  %1847 = vmatpush2.msra.mxu1 %v1605_v34  ;;  %v1537_v33 = vld [vmem:[%s14204_s4 + $0x130] sm:$0xff]  ;;  %v1536_v34 = vld [vmem:[%s14204_s4 + $0x128] sm:$0xff] }
 0x6bd   : > { %1747 = vmatprep.subr.mxu0 %v1506_v36  ;;  %1848 = vmatprep.subr.mxu1 %v1604_v37  ;;  %v1535_v36 = vld [vmem:[%s14204_s4 + $0x120] sm:$0xff]  ;;  %v1534_v37 = vld [vmem:[%s14204_s4 + $0x118] sm:$0xff] }
 0x6be   : > { %1748 = vmatpush1.msra.mxu0 %v1505_v39  ;;  %1849 = vmatpush2.msra.mxu1 %v1603_v40  ;;  %v1533_v39 = vld [vmem:[%s14204_s4 + $0x110] sm:$0xff]  ;;  %v1532_v40 = vld [vmem:[%s14204_s4 + $0x108] sm:$0xff] }
 0x6bf   : > { %1749 = vmatprep.subr.mxu0 %v1504_v42  ;;  %1850 = vmatprep.subr.mxu1 %v1602_v43  ;;  %v1531_v42 = vld [vmem:[%s14204_s4 + $0x100] sm:$0xff]  ;;  %v1658_v43 = vld [vmem:[%s14204_s4 + $0x4f8] sm:$0xff] }
 0x6c0   : > { %1750 = vmatpush1.msra.mxu0 %v1503_v44  ;;  %1851 = vmatpush2.msra.mxu1 %v1601_v45 }
 0x6c1   : > { %1751 = vmatprep.subr.mxu0 %v1502_v46  ;;  %1852 = vmatprep.subr.mxu1 %v1600_v47 }
 0x6c2   : > { %1752 = vmatpush1.msra.mxu0 %v1501_v48  ;;  %1853 = vmatpush2.msra.mxu1 %v1599_v49 }
 0x6c3   : > { %1753 = vmatprep.subr.mxu0 %v1500_v52  ;;  %1854 = vmatprep.subr.mxu1 %v1598_v53 }
 0x6c4   : > { %1754 = vmatpush1.msra.mxu0 %v1499_v54  ;;  %1855 = vmatpush2.msra.mxu1 %v1597_v55  ;;  %v1657_v54 = vld [vmem:[%s14204_s4 + $0x4f0] sm:$0xff] }
 0x6c5   : > { %1755 = vmatprep.subr.mxu0 %v1562_v56  ;;  %1856 = vmatprep.subr.mxu1 %v1596_v57  ;;  %v1721_v55 = vld [vmem:[%s14204_s4 + $0x6f0] sm:$0xff]  ;;  %v1656_v56 = vld [vmem:[%s14204_s4 + $0x4e8] sm:$0xff] }
 0x6c6   : > { %1756 = vmatpush2.msra.mxu0 %v1561_v58  ;;  %1857 = vmatpush2.msra.mxu1 %v1595_v59  ;;  %v1720_v57 = vld [vmem:[%s14204_s4 + $0x6e8] sm:$0xff]  ;;  %v1655_v58 = vld [vmem:[%s14204_s4 + $0x4e0] sm:$0xff] }
 0x6c7   : > { %1757 = vmatprep.subr.mxu0 %v1560_v60  ;;  %1936 = vmatprep.subr.mxu1 %v1722_v61  ;;  %v1719_v59 = vld [vmem:[%s14204_s4 + $0x6e0] sm:$0xff]  ;;  %v1654_v60 = vld [vmem:[%s14204_s4 + $0x4d8] sm:$0xff] }
 0x6c8   : > { %1758 = vmatpush2.msra.mxu0 %v1559_v62  ;;  %v1718_v61 = vld [vmem:[%s14204_s4 + $0x6d8] sm:$0xff]  ;;  %v1653_v62 = vld [vmem:[%s14204_s4 + $0x4d0] sm:$0xff] }
 0x6c9   : > { %1759 = vmatprep.subr.mxu0 %v1558_v63  ;;  %v1717_v63 = vld [vmem:[%s14204_s4 + $0x6d0] sm:$0xff] }
 0x6ca   : > { %1760 = vmatpush2.msra.mxu0 %v1557_v8  ;;  %v1652_v8 = vld [vmem:[%s14204_s4 + $0x4c8] sm:$0xff] }
 0x6cb   : > { %1761 = vmatprep.subr.mxu0 %v1556_v9  ;;  %v1716_v9 = vld [vmem:[%s14204_s4 + $0x6c8] sm:$0xff] }
 0x6cc   : > { %1762 = vmatpush2.msra.mxu0 %v1555_v10  ;;  %v1651_v10 = vld [vmem:[%s14204_s4 + $0x4c0] sm:$0xff] }
 0x6cd   : > { %1763 = vmatprep.subr.mxu0 %v1554_v11  ;;  %v1715_v11 = vld [vmem:[%s14204_s4 + $0x6c0] sm:$0xff] }
 0x6ce   : > { %1764 = vmatpush2.msra.mxu0 %v1553_v12  ;;  %v1650_v12 = vld [vmem:[%s14204_s4 + $0x4b8] sm:$0xff] }
 0x6cf   : > { %1765 = vmatprep.subr.mxu0 %v1552_v13  ;;  %v1714_v13 = vld [vmem:[%s14204_s4 + $0x6b8] sm:$0xff] }
 0x6d0   : > { %1766 = vmatpush2.msra.mxu0 %v1551_v14  ;;  %v1649_v14 = vld [vmem:[%s14204_s4 + $0x4b0] sm:$0xff] }
 0x6d1   : > { %1767 = vmatprep.subr.mxu0 %v1550_v15  ;;  %v1713_v15 = vld [vmem:[%s14204_s4 + $0x6b0] sm:$0xff] }
 0x6d2   : > { %1768 = vmatpush2.msra.mxu0 %v1549_v16  ;;  %v1648_v16 = vld [vmem:[%s14204_s4 + $0x4a8] sm:$0xff] }
 0x6d3   : > { %1769 = vmatprep.subr.mxu0 %v1548_v17  ;;  %v1712_v17 = vld [vmem:[%s14204_s4 + $0x6a8] sm:$0xff] }
 0x6d4   : > { %1770 = vmatpush2.msra.mxu0 %v1547_v22  ;;  %v1647_v22 = vld [vmem:[%s14204_s4 + $0x4a0] sm:$0xff] }
 0x6d5   : > { %1771 = vmatprep.subr.mxu0 %v1546_v23  ;;  %v1711_v23 = vld [vmem:[%s14204_s4 + $0x6a0] sm:$0xff] }
 0x6d6   : > { %1772 = vmatpush2.msra.mxu0 %v1545_v25  ;;  %v1646_v25 = vld [vmem:[%s14204_s4 + $0x498] sm:$0xff] }
 0x6d7   : > { %1773 = vmatprep.subr.mxu0 %v1544_v26  ;;  %v1710_v26 = vld [vmem:[%s14204_s4 + $0x698] sm:$0xff] }
 0x6d8   : > { %1774 = vmatpush2.msra.mxu0 %v1543_v27  ;;  %v1645_v27 = vld [vmem:[%s14204_s4 + $0x490] sm:$0xff] }
 0x6d9   : > { %1775 = vmatprep.subr.mxu0 %v1542_v28  ;;  %v1709_v28 = vld [vmem:[%s14204_s4 + $0x690] sm:$0xff] }
 0x6da   : > { %1776 = vmatpush2.msra.mxu0 %v1541_v29  ;;  %v1644_v29 = vld [vmem:[%s14204_s4 + $0x488] sm:$0xff] }
 0x6db   : > { %1777 = vmatprep.subr.mxu0 %v1540_v30  ;;  %v1708_v30 = vld [vmem:[%s14204_s4 + $0x688] sm:$0xff] }
 0x6dc   : > { %1778 = vmatpush2.msra.mxu0 %v1539_v31  ;;  %v1643_v31 = vld [vmem:[%s14204_s4 + $0x480] sm:$0xff] }
 0x6dd   : > { %1779 = vmatprep.subr.mxu0 %v1538_v32  ;;  %v1707_v32 = vld [vmem:[%s14204_s4 + $0x680] sm:$0xff] }
 0x6de   : > { %1780 = vmatpush2.msra.mxu0 %v1537_v33  ;;  %v1642_v33 = vld [vmem:[%s14204_s4 + $0x478] sm:$0xff] }
 0x6df   : > { %1781 = vmatprep.subr.mxu0 %v1536_v34  ;;  %v1706_v34 = vld [vmem:[%s14204_s4 + $0x678] sm:$0xff] }
 0x6e0   : > { %1782 = vmatpush2.msra.mxu0 %v1535_v36  ;;  %v1641_v36 = vld [vmem:[%s14204_s4 + $0x470] sm:$0xff] }
 0x6e1   : > { %1783 = vmatprep.subr.mxu0 %v1534_v37  ;;  %v1705_v37 = vld [vmem:[%s14204_s4 + $0x670] sm:$0xff] }
 0x6e2   : > { %1784 = vmatpush2.msra.mxu0 %v1533_v39  ;;  %v1640_v39 = vld [vmem:[%s14204_s4 + $0x468] sm:$0xff] }
 0x6e3   : > { %1785 = vmatprep.subr.mxu0 %v1532_v40  ;;  %v1704_v40 = vld [vmem:[%s14204_s4 + $0x668] sm:$0xff] }
 0x6e4   : > { %1786 = vmatpush2.msra.mxu0 %v1531_v42  ;;  %v1639_v42 = vld [vmem:[%s14204_s4 + $0x460] sm:$0xff] }
 0x6e5   : > { %1865 = vmatprep.subr.mxu0 %v1658_v43  ;;  %v1703_v43 = vld [vmem:[%s14204_s4 + $0x660] sm:$0xff] }
 0x724   : > { %v1275_v44 = vpop.f32.mrf.mxu0  ;;  %v1346_v45 = vpop.f32.mrf.mxu1 }
 0x725   : > { %v1492_v52 = vsub.f32 %v1275_v44, %v7024_v0  ;;  %v1494_v53 = vsub.f32 %v1346_v45, %v7034_v2  ;;  %v1638_v44 = vld [vmem:[%s14204_s4 + $0x458] sm:$0xff]  ;;  %v3607_v0 = vld [vmem:[%s14216_s27 + $0x60] sm:$0xff] (%p749_p0)  ;;  %v3605_v2 = vld [vmem:[%s14216_s27 + $0x50] sm:$0xff] (%p749_p0) }
 0x726   : > { %v1277_v46 = vpop.f32.mrf.mxu0  ;;  %v1348_v47 = vpop.f32.mrf.mxu1  ;;  %v1702_v45 = vld [vmem:[%s14204_s4 + $0x658] sm:$0xff] }
 0x727   : > { %v1493_v48 = vsub.f32 %v1277_v46, %v7029_v1  ;;  %v1495_v49 = vsub.f32 %v1348_v47, %v7039_v3  ;;  %v1637_v46 = vld [vmem:[%s14204_s4 + $0x450] sm:$0xff]  ;;  %v3606_v1 = vld [vmem:[%s14216_s27 + $0x58] sm:$0xff] (%p749_p0)  ;;  %v3604_v3 = vld [vmem:[%s14216_s27 + $0x48] sm:$0xff] (%p749_p0) }
 0x728   : > { %v1701_v47 = vld [vmem:[%s14204_s4 + $0x650] sm:$0xff] }
 0x729   : > { %1787 = vmatprep.mubr.f32.mxu0 %v1493_v48  ;;  %1858 = vmatprep.mubr.f32.mxu1 %v1495_v49  ;;  %v1636_v48 = vld [vmem:[%s14204_s4 + $0x448] sm:$0xff] }
 0x72a   : > { %1788 = vmatmul.mubr.f32.vlgmr.msra.gmra.mxu0 %v1492_v52  ;;  %1859 = vmatmul.mubr.f32.vlgmr.msra.gmra.mxu1 %v1494_v53  ;;  %v1700_v49 = vld [vmem:[%s14204_s4 + $0x648] sm:$0xff]  ;;  %v1635_v52 = vld [vmem:[%s14204_s4 + $0x440] sm:$0xff] }
 0x72b   : > { %1866 = vmatpush1.msra.mxu0 %v1657_v54  ;;  %1937 = vmatpush1.msra.mxu1 %v1721_v55  ;;  %v1699_v53 = vld [vmem:[%s14204_s4 + $0x640] sm:$0xff]  ;;  %v1634_v54 = vld [vmem:[%s14204_s4 + $0x438] sm:$0xff] }
 0x72c   : > { %1867 = vmatprep.subr.mxu0 %v1656_v56  ;;  %1938 = vmatprep.subr.mxu1 %v1720_v57  ;;  %v1698_v55 = vld [vmem:[%s14204_s4 + $0x638] sm:$0xff]  ;;  %v1633_v56 = vld [vmem:[%s14204_s4 + $0x430] sm:$0xff] }
 0x72d   : > { %1868 = vmatpush1.msra.mxu0 %v1655_v58  ;;  %1939 = vmatpush1.msra.mxu1 %v1719_v59  ;;  %v1697_v57 = vld [vmem:[%s14204_s4 + $0x630] sm:$0xff]  ;;  %v1632_v58 = vld [vmem:[%s14204_s4 + $0x428] sm:$0xff] }
 0x72e   : > { %1869 = vmatprep.subr.mxu0 %v1654_v60  ;;  %1940 = vmatprep.subr.mxu1 %v1718_v61  ;;  %v1696_v59 = vld [vmem:[%s14204_s4 + $0x628] sm:$0xff]  ;;  %v1631_v60 = vld [vmem:[%s14204_s4 + $0x420] sm:$0xff] }
 0x72f   : > { %1870 = vmatpush1.msra.mxu0 %v1653_v62  ;;  %1941 = vmatpush1.msra.mxu1 %v1717_v63  ;;  %v1695_v61 = vld [vmem:[%s14204_s4 + $0x620] sm:$0xff]  ;;  %v1630_v62 = vld [vmem:[%s14204_s4 + $0x418] sm:$0xff] }
 0x730   : > { %1871 = vmatprep.subr.mxu0 %v1652_v8  ;;  %1942 = vmatprep.subr.mxu1 %v1716_v9  ;;  %v1694_v63 = vld [vmem:[%s14204_s4 + $0x618] sm:$0xff]  ;;  %v1629_v8 = vld [vmem:[%s14204_s4 + $0x410] sm:$0xff] }
 0x731   : > { %1872 = vmatpush1.msra.mxu0 %v1651_v10  ;;  %1943 = vmatpush1.msra.mxu1 %v1715_v11  ;;  %v1693_v9 = vld [vmem:[%s14204_s4 + $0x610] sm:$0xff]  ;;  %v1628_v11 = vld [vmem:[%s14204_s4 + $0x408] sm:$0xff] }
 0x732   : > { %1873 = vmatprep.subr.mxu0 %v1650_v12  ;;  %1944 = vmatprep.subr.mxu1 %v1714_v13  ;;  %v1692_v12 = vld [vmem:[%s14204_s4 + $0x608] sm:$0xff]  ;;  %v1627_v13 = vld [vmem:[%s14204_s4 + $0x400] sm:$0xff] }
 0x733   : > { %1874 = vmatpush1.msra.mxu0 %v1649_v14  ;;  %1945 = vmatpush1.msra.mxu1 %v1713_v15  ;;  %v1691_v14 = vld [vmem:[%s14204_s4 + $0x600] sm:$0xff] }
 0x734   : > { %1875 = vmatprep.subr.mxu0 %v1648_v16  ;;  %1946 = vmatprep.subr.mxu1 %v1712_v17  ;;  %v1690_v16 = vld [vmem:[%s14204_s4 + $0x5f8] sm:$0xff] }
 0x735   : > { %1876 = vmatpush1.msra.mxu0 %v1647_v22  ;;  %1947 = vmatpush1.msra.mxu1 %v1711_v23  ;;  %v1689_v22 = vld [vmem:[%s14204_s4 + $0x5f0] sm:$0xff]  ;;  %v1688_v23 = vld [vmem:[%s14204_s4 + $0x5e8] sm:$0xff] }
 0x736   : > { %1877 = vmatprep.subr.mxu0 %v1646_v25  ;;  %1948 = vmatprep.subr.mxu1 %v1710_v26  ;;  %v1687_v26 = vld [vmem:[%s14204_s4 + $0x5e0] sm:$0xff] }
 0x737   : > { %1878 = vmatpush1.msra.mxu0 %v1645_v27  ;;  %1949 = vmatpush1.msra.mxu1 %v1709_v28  ;;  %v1686_v27 = vld [vmem:[%s14204_s4 + $0x5d8] sm:$0xff]  ;;  %v1685_v28 = vld [vmem:[%s14204_s4 + $0x5d0] sm:$0xff] }
 0x738   : > { %1879 = vmatprep.subr.mxu0 %v1644_v29  ;;  %1950 = vmatprep.subr.mxu1 %v1708_v30  ;;  %v1684_v29 = vld [vmem:[%s14204_s4 + $0x5c8] sm:$0xff]  ;;  %v1683_v30 = vld [vmem:[%s14204_s4 + $0x5c0] sm:$0xff] }
 0x739   : > { %1880 = vmatpush1.msra.mxu0 %v1643_v31  ;;  %1951 = vmatpush1.msra.mxu1 %v1707_v32  ;;  %v1682_v31 = vld [vmem:[%s14204_s4 + $0x5b8] sm:$0xff]  ;;  %v1681_v32 = vld [vmem:[%s14204_s4 + $0x5b0] sm:$0xff] }
 0x73a   : > { %1881 = vmatprep.subr.mxu0 %v1642_v33  ;;  %1952 = vmatprep.subr.mxu1 %v1706_v34  ;;  %v1680_v33 = vld [vmem:[%s14204_s4 + $0x5a8] sm:$0xff]  ;;  %v1679_v34 = vld [vmem:[%s14204_s4 + $0x5a0] sm:$0xff] }
 0x73b   : > { %1882 = vmatpush1.msra.mxu0 %v1641_v36  ;;  %1953 = vmatpush1.msra.mxu1 %v1705_v37  ;;  %v1678_v36 = vld [vmem:[%s14204_s4 + $0x598] sm:$0xff]  ;;  %v1677_v37 = vld [vmem:[%s14204_s4 + $0x590] sm:$0xff] }
 0x73c   : > { %1883 = vmatprep.subr.mxu0 %v1640_v39  ;;  %1954 = vmatprep.subr.mxu1 %v1704_v40  ;;  %v1676_v39 = vld [vmem:[%s14204_s4 + $0x588] sm:$0xff]  ;;  %v1675_v40 = vld [vmem:[%s14204_s4 + $0x580] sm:$0xff] }
 0x73d   : > { %1884 = vmatpush1.msra.mxu0 %v1639_v42  ;;  %1955 = vmatpush1.msra.mxu1 %v1703_v43  ;;  %v1674_v42 = vld [vmem:[%s14204_s4 + $0x578] sm:$0xff]  ;;  %v1673_v43 = vld [vmem:[%s14204_s4 + $0x570] sm:$0xff] }
 0x73e   : > { %1885 = vmatprep.subr.mxu0 %v1638_v44  ;;  %1956 = vmatprep.subr.mxu1 %v1702_v45  ;;  %v1672_v44 = vld [vmem:[%s14204_s4 + $0x568] sm:$0xff]  ;;  %v1671_v45 = vld [vmem:[%s14204_s4 + $0x560] sm:$0xff] }
 0x73f   : > { %1886 = vmatpush1.msra.mxu0 %v1637_v46  ;;  %1957 = vmatpush1.msra.mxu1 %v1701_v47  ;;  %v1670_v46 = vld [vmem:[%s14204_s4 + $0x558] sm:$0xff]  ;;  %v1669_v47 = vld [vmem:[%s14204_s4 + $0x550] sm:$0xff] }
 0x740   : > { %1887 = vmatprep.subr.mxu0 %v1636_v48  ;;  %1958 = vmatprep.subr.mxu1 %v1700_v49  ;;  %v1668_v48 = vld [vmem:[%s14204_s4 + $0x548] sm:$0xff]  ;;  %v1667_v49 = vld [vmem:[%s14204_s4 + $0x540] sm:$0xff] }
 0x741   : > { %1888 = vmatpush1.msra.mxu0 %v1635_v52  ;;  %1959 = vmatpush1.msra.mxu1 %v1699_v53  ;;  %v1666_v52 = vld [vmem:[%s14204_s4 + $0x538] sm:$0xff]  ;;  %v1665_v53 = vld [vmem:[%s14204_s4 + $0x530] sm:$0xff] }
 0x742   : > { %1889 = vmatprep.subr.mxu0 %v1634_v54  ;;  %1960 = vmatprep.subr.mxu1 %v1698_v55  ;;  %v1664_v54 = vld [vmem:[%s14204_s4 + $0x528] sm:$0xff]  ;;  %v1663_v55 = vld [vmem:[%s14204_s4 + $0x520] sm:$0xff] }
 0x743   : > { %1890 = vmatpush1.msra.mxu0 %v1633_v56  ;;  %1961 = vmatpush1.msra.mxu1 %v1697_v57  ;;  %v1662_v56 = vld [vmem:[%s14204_s4 + $0x518] sm:$0xff]  ;;  %v1661_v57 = vld [vmem:[%s14204_s4 + $0x510] sm:$0xff] }
 0x744   : > { %1891 = vmatprep.subr.mxu0 %v1632_v58  ;;  %1962 = vmatprep.subr.mxu1 %v1696_v59  ;;  %v1660_v59 = vld [vmem:[%s14204_s4 + $0x508] sm:$0xff] }
 0x745   : > { %v6302_v10 = vpop.f32.mrf.mxu1  ;;  %1892 = vmatpush1.msra.mxu0 %v1631_v60  ;;  %1963 = vmatpush1.msra.mxu1 %v1695_v61  ;;  %v1659_v60 = vld [vmem:[%s14204_s4 + $0x500] sm:$0xff] }
 0x746   : > { %1893 = vmatprep.subr.mxu0 %v1630_v62  ;;  %1964 = vmatprep.subr.mxu1 %v1694_v63 }
 0x747   : > { %v6303_v15 = vpop.f32.mrf.mxu1  ;;  %1894 = vmatpush1.msra.mxu0 %v1629_v8  ;;  %1965 = vmatpush1.msra.mxu1 %v1693_v9  ;;  %v2042_v8 = vld [vmem:[%s14205_s5 + $0xf8] sm:$0xff]  ;;  %v2041_v9 = vld [vmem:[%s14205_s5 + $0xf0] sm:$0xff] }
 0x748   : > { %v6304_v17 = vadd.f32 %v6303_v15, %v6302_v10  ;;  %1895 = vmatprep.subr.mxu0 %v1628_v11  ;;  %1966 = vmatprep.subr.mxu1 %v1692_v12  ;;  %v2040_v10 = vld [vmem:[%s14205_s5 + $0xe8] sm:$0xff]  ;;  %v2039_v11 = vld [vmem:[%s14205_s5 + $0xe0] sm:$0xff]  ;;  %v2038_v12 = vld [vmem:[%s14205_s5 + $0xd8] sm:$0xff] }
 0x749   : > { %1896 = vmatpush1.msra.mxu0 %v1627_v13  ;;  %1967 = vmatpush1.msra.mxu1 %v1691_v14  ;;  %v2037_v13 = vld [vmem:[%s14205_s5 + $0xd0] sm:$0xff]  ;;  %v2036_v14 = vld [vmem:[%s14205_s5 + $0xc8] sm:$0xff]  ;;  %v2035_v15 = vld [vmem:[%s14205_s5 + $0xc0] sm:$0xff] }
 0x74a   : > { %v1498_v25 = vsub.f32 %v6304_v17, %v7055_v7  ;;  %1897 = vmatprep.subr.mxu0 %v1690_v16  ;;  %2000 = vmatprep.mubr.f32.mxu1 %v6879_v41  ;;  %v2034_v16 = vld [vmem:[%s14205_s5 + $0xb8] sm:$0xff]  ;;  %v2033_v17 = vld [vmem:[%s14205_s5 + $0xb0] sm:$0xff] }
 0x74b   : > { %1898 = vmatpush2.msra.mxu0 %v1689_v22  ;;  %2075 = vmatprep.subr.mxu1 %v2042_v8  ;;  %v2032_v22 = vld [vmem:[%s14205_s5 + $0xa8] sm:$0xff]  ;;  %v3717_v7 = vld [vmem:[%s14217_s6 + $0xf0] sm:$0xff] (%p749_p0) }
 0x74c   : > { %2001 = vmatmul.mubr.f32.vlgmr.msra.gmra.mxu1 %v1498_v25  ;;  %1899 = vmatprep.subr.mxu0 %v1688_v23  ;;  %v2031_v23 = vld [vmem:[%s14205_s5 + $0xa0] sm:$0xff]  ;;  %v2030_v25 = vld [vmem:[%s14205_s5 + $0x98] sm:$0xff]  ;;  %v2060_v8 = vld [vmem:[%s14205_s5 + $0x188] sm:$0xff] }
 0x74d   : > { %1900 = vmatpush2.msra.mxu0 %v1687_v26  ;;  %2076 = vmatpush1.msra.mxu1 %v2041_v9  ;;  %v2029_v26 = vld [vmem:[%s14205_s5 + $0x90] sm:$0xff]  ;;  %v2059_v9 = vld [vmem:[%s14205_s5 + $0x180] sm:$0xff] }
 0x74e   : > { %1901 = vmatprep.subr.mxu0 %v1686_v27  ;;  %2077 = vmatprep.subr.mxu1 %v2040_v10  ;;  %v2028_v27 = vld [vmem:[%s14205_s5 + $0x88] sm:$0xff]  ;;  %v2058_v10 = vld [vmem:[%s14205_s5 + $0x178] sm:$0xff] }
 0x74f   : > { %1902 = vmatpush2.msra.mxu0 %v1685_v28  ;;  %2078 = vmatpush1.msra.mxu1 %v2039_v11  ;;  %v2027_v28 = vld [vmem:[%s14205_s5 + $0x80] sm:$0xff]  ;;  %v2057_v11 = vld [vmem:[%s14205_s5 + $0x170] sm:$0xff] }
 0x750   : > { %1903 = vmatprep.subr.mxu0 %v1684_v29  ;;  %2079 = vmatprep.subr.mxu1 %v2038_v12  ;;  %v2026_v29 = vld [vmem:[%s14205_s5 + $0x78] sm:$0xff]  ;;  %v2056_v12 = vld [vmem:[%s14205_s5 + $0x168] sm:$0xff] }
 0x751   : > { %1904 = vmatpush2.msra.mxu0 %v1683_v30  ;;  %2080 = vmatpush1.msra.mxu1 %v2037_v13  ;;  %v2025_v30 = vld [vmem:[%s14205_s5 + $0x70] sm:$0xff]  ;;  %v2055_v13 = vld [vmem:[%s14205_s5 + $0x160] sm:$0xff] }
 0x752   : > { %1905 = vmatprep.subr.mxu0 %v1682_v31  ;;  %2081 = vmatprep.subr.mxu1 %v2036_v14  ;;  %v2024_v31 = vld [vmem:[%s14205_s5 + $0x68] sm:$0xff]  ;;  %v2054_v14 = vld [vmem:[%s14205_s5 + $0x158] sm:$0xff] }
 0x753   : > { %1906 = vmatpush2.msra.mxu0 %v1681_v32  ;;  %2082 = vmatpush1.msra.mxu1 %v2035_v15  ;;  %v2023_v32 = vld [vmem:[%s14205_s5 + $0x60] sm:$0xff]  ;;  %v2053_v15 = vld [vmem:[%s14205_s5 + $0x150] sm:$0xff] }
 0x754   : > { %1907 = vmatprep.subr.mxu0 %v1680_v33  ;;  %2083 = vmatprep.subr.mxu1 %v2034_v16  ;;  %v2022_v33 = vld [vmem:[%s14205_s5 + $0x58] sm:$0xff]  ;;  %v2052_v16 = vld [vmem:[%s14205_s5 + $0x148] sm:$0xff] }
 0x755   : > { %1908 = vmatpush2.msra.mxu0 %v1679_v34  ;;  %2084 = vmatpush1.msra.mxu1 %v2033_v17  ;;  %v2021_v34 = vld [vmem:[%s14205_s5 + $0x50] sm:$0xff]  ;;  %v2051_v17 = vld [vmem:[%s14205_s5 + $0x140] sm:$0xff] }
 0x756   : > { %1909 = vmatprep.subr.mxu0 %v1678_v36  ;;  %2085 = vmatprep.subr.mxu1 %v2032_v22  ;;  %v2020_v36 = vld [vmem:[%s14205_s5 + $0x48] sm:$0xff]  ;;  %v2050_v22 = vld [vmem:[%s14205_s5 + $0x138] sm:$0xff] }
 0x757   : > { %1910 = vmatpush2.msra.mxu0 %v1677_v37  ;;  %2086 = vmatpush1.msra.mxu1 %v2031_v23  ;;  %v2019_v37 = vld [vmem:[%s14205_s5 + $0x40] sm:$0xff]  ;;  %v2049_v23 = vld [vmem:[%s14205_s5 + $0x130] sm:$0xff] }
 0x758   : > { %1911 = vmatprep.subr.mxu0 %v1676_v39  ;;  %2087 = vmatprep.subr.mxu1 %v2030_v25  ;;  %v2018_v39 = vld [vmem:[%s14205_s5 + $0x38] sm:$0xff]  ;;  %v2048_v25 = vld [vmem:[%s14205_s5 + $0x128] sm:$0xff] }
 0x759   : > { %1912 = vmatpush2.msra.mxu0 %v1675_v40  ;;  %2088 = vmatpush1.msra.mxu1 %v2029_v26  ;;  %v2017_v40 = vld [vmem:[%s14205_s5 + $0x30] sm:$0xff]  ;;  %v2047_v26 = vld [vmem:[%s14205_s5 + $0x120] sm:$0xff] }
 0x75a   : > { %1913 = vmatprep.subr.mxu0 %v1674_v42  ;;  %2089 = vmatprep.subr.mxu1 %v2028_v27  ;;  %v2016_v42 = vld [vmem:[%s14205_s5 + $0x28] sm:$0xff]  ;;  %v2046_v27 = vld [vmem:[%s14205_s5 + $0x118] sm:$0xff] }
 0x75b   : > { %1914 = vmatpush2.msra.mxu0 %v1673_v43  ;;  %2090 = vmatpush1.msra.mxu1 %v2027_v28  ;;  %v2015_v43 = vld [vmem:[%s14205_s5 + $0x20] sm:$0xff]  ;;  %v2045_v28 = vld [vmem:[%s14205_s5 + $0x110] sm:$0xff] }
 0x75c   : > { %1915 = vmatprep.subr.mxu0 %v1672_v44  ;;  %2091 = vmatprep.subr.mxu1 %v2026_v29  ;;  %v2014_v44 = vld [vmem:[%s14205_s5 + $0x18] sm:$0xff]  ;;  %v2044_v29 = vld [vmem:[%s14205_s5 + $0x108] sm:$0xff] }
 0x75d   : > { %1916 = vmatpush2.msra.mxu0 %v1671_v45  ;;  %2092 = vmatpush1.msra.mxu1 %v2025_v30  ;;  %v2013_v45 = vld [vmem:[%s14205_s5 + $0x10] sm:$0xff]  ;;  %v2043_v30 = vld [vmem:[%s14205_s5 + $0x100] sm:$0xff] }
 0x75e   : > { %1917 = vmatprep.subr.mxu0 %v1670_v46  ;;  %2093 = vmatprep.subr.mxu1 %v2024_v31  ;;  %v2012_v46 = vld [vmem:[%s14205_s5 + $0x8] sm:$0xff]  ;;  %v2181_v31 = vld [vmem:[%s14206_s0 + $0xf8] sm:$0xff] }
 0x75f   : > { %1918 = vmatpush2.msra.mxu0 %v1669_v47  ;;  %2094 = vmatpush1.msra.mxu1 %v2023_v32  ;;  %v2011_v47 = vld [vmem:[%s14205_s5] sm:$0xff]  ;;  %v2165_v32 = vld [vmem:[%s14206_s0 + $0x78] sm:$0xff] }
 0x760   : > { %1919 = vmatprep.subr.mxu0 %v1668_v48  ;;  %2095 = vmatprep.subr.mxu1 %v2022_v33  ;;  %v2074_v48 = vld [vmem:[%s14205_s5 + $0x1f8] sm:$0xff]  ;;  %v2180_v33 = vld [vmem:[%s14206_s0 + $0xf0] sm:$0xff] }
 0x761   : > { %1920 = vmatpush2.msra.mxu0 %v1667_v49  ;;  %2096 = vmatpush1.msra.mxu1 %v2021_v34  ;;  %v2073_v49 = vld [vmem:[%s14205_s5 + $0x1f0] sm:$0xff] }
 0x762   : > { %1921 = vmatprep.subr.mxu0 %v1666_v52  ;;  %2097 = vmatprep.subr.mxu1 %v2020_v36  ;;  %v2072_v52 = vld [vmem:[%s14205_s5 + $0x1e8] sm:$0xff]  ;;  %v2164_v34 = vld [vmem:[%s14206_s0 + $0x70] sm:$0xff] }
 0x763   : > { %1922 = vmatpush2.msra.mxu0 %v1665_v53  ;;  %2098 = vmatpush1.msra.mxu1 %v2019_v37  ;;  %v2071_v53 = vld [vmem:[%s14205_s5 + $0x1e0] sm:$0xff]  ;;  %v2179_v36 = vld [vmem:[%s14206_s0 + $0xe8] sm:$0xff] }
 0x764   : > { %1923 = vmatprep.subr.mxu0 %v1664_v54  ;;  %2099 = vmatprep.subr.mxu1 %v2018_v39  ;;  %v2070_v54 = vld [vmem:[%s14205_s5 + $0x1d8] sm:$0xff]  ;;  %v2163_v37 = vld [vmem:[%s14206_s0 + $0x68] sm:$0xff]  ;;  %v2178_v39 = vld [vmem:[%s14206_s0 + $0xe0] sm:$0xff] }
 0x765   : > { %v1417_v58 = vpop.f32.mrf.mxu0  ;;  %1924 = vmatpush2.msra.mxu0 %v1663_v55  ;;  %2100 = vmatpush1.msra.mxu1 %v2017_v40  ;;  %v2069_v55 = vld [vmem:[%s14205_s5 + $0x1d0] sm:$0xff]  ;;  %v2162_v40 = vld [vmem:[%s14206_s0 + $0x60] sm:$0xff] }
 0x766   : > { %1925 = vmatprep.subr.mxu0 %v1662_v56  ;;  %v1496_v63 = vsub.f32 %v1417_v58, %v7044_v4  ;;  %2101 = vmatprep.subr.mxu1 %v2016_v42  ;;  %v2068_v56 = vld [vmem:[%s14205_s5 + $0x1c8] sm:$0xff]  ;;  %v2066_v58 = vld [vmem:[%s14205_s5 + $0x1b8] sm:$0xff]  ;;  %v3603_v4 = vld [vmem:[%s14216_s27 + $0x40] sm:$0xff] (%p749_p0) }
 0x767   : > { %v1419_v61 = vpop.f32.mrf.mxu0  ;;  %1926 = vmatpush2.msra.mxu0 %v1661_v57  ;;  %2102 = vmatpush1.msra.mxu1 %v2015_v43  ;;  %v2067_v57 = vld [vmem:[%s14205_s5 + $0x1c0] sm:$0xff]  ;;  %v2177_v42 = vld [vmem:[%s14206_s0 + $0xd8] sm:$0xff] }
 0x768   : > { %v1497_v62 = vsub.f32 %v1419_v61, %v7050_v6  ;;  %1927 = vmatprep.subr.mxu0 %v1660_v59  ;;  %2103 = vmatprep.subr.mxu1 %v2014_v44  ;;  %v2065_v59 = vld [vmem:[%s14205_s5 + $0x1b0] sm:$0xff]  ;;  %v2063_v61 = vld [vmem:[%s14205_s5 + $0x1a0] sm:$0xff]  ;;  %v2161_v43 = vld [vmem:[%s14206_s0 + $0x58] sm:$0xff] }
 0x769   : > { %1928 = vmatpush2.msra.mxu0 %v1659_v60  ;;  %2104 = vmatpush1.msra.mxu1 %v2013_v45  ;;  %v2064_v60 = vld [vmem:[%s14205_s5 + $0x1a8] sm:$0xff]  ;;  %v2176_v44 = vld [vmem:[%s14206_s0 + $0xd0] sm:$0xff]  ;;  %v3718_v6 = vld [vmem:[%s14217_s6 + $0xf8] sm:$0xff] (%p749_p0) }
 0x76a   : > { %1929 = vmatprep.mubr.f32.mxu0 %v1497_v62  ;;  %2105 = vmatprep.subr.mxu1 %v2012_v46  ;;  %v2062_v62 = vld [vmem:[%s14205_s5 + $0x198] sm:$0xff]  ;;  %v2160_v45 = vld [vmem:[%s14206_s0 + $0x50] sm:$0xff]  ;;  %v2175_v46 = vld [vmem:[%s14206_s0 + $0xc8] sm:$0xff] }
 0x76b   : > { %1930 = vmatmul.mubr.f32.vlgmr.msra.gmra.mxu0 %v1496_v63  ;;  %2106 = vmatpush1.msra.mxu1 %v2011_v47  ;;  %v2061_v63 = vld [vmem:[%s14205_s5 + $0x190] sm:$0xff]  ;;  %v2159_v47 = vld [vmem:[%s14206_s0 + $0x48] sm:$0xff]  ;;  %s6880_s5 = smov (%p749_p0), [#allocation4]  }
 0x76c   : > { %2107 = vmatprep.subr.mxu1 %v2074_v48  ;;  %6305 = vmatprep.subr.mxu0 %v2181_v31  ;;  %v2174_v48 = vld [vmem:[%s14206_s0 + $0xc0] sm:$0xff] }
 0x76d   : > { %2108 = vmatpush2.msra.mxu1 %v2073_v49  ;;  %6306 = vmatpush3.msra.mxu0 %v2165_v32  ;;  %v2158_v49 = vld [vmem:[%s14206_s0 + $0x40] sm:$0xff]  ;;  %v2268_v32 = vld [vmem:[%s14207_s8 + $0x70] sm:$0xff] }
 0x76e   : > { %2109 = vmatprep.subr.mxu1 %v2072_v52  ;;  %6307 = vmatprep.subr.mxu0 %v2180_v33  ;;  %v2173_v52 = vld [vmem:[%s14206_s0 + $0xb8] sm:$0xff]  ;;  %v2267_v33 = vld [vmem:[%s14207_s8 + $0x68] sm:$0xff] }
 0x76f   : > { %2110 = vmatpush2.msra.mxu1 %v2071_v53  ;;  %6308 = vmatpush3.msra.mxu0 %v2164_v34  ;;  %v2157_v53 = vld [vmem:[%s14206_s0 + $0x38] sm:$0xff]  ;;  %v2266_v34 = vld [vmem:[%s14207_s8 + $0x60] sm:$0xff] }
 0x770   : > { %2111 = vmatprep.subr.mxu1 %v2070_v54  ;;  %6309 = vmatprep.subr.mxu0 %v2179_v36  ;;  %v2172_v54 = vld [vmem:[%s14206_s0 + $0xb0] sm:$0xff]  ;;  %v2261_v36 = vld [vmem:[%s14207_s8 + $0x38] sm:$0xff] }
 0x771   : > { %2112 = vmatpush2.msra.mxu1 %v2069_v55  ;;  %6310 = vmatpush3.msra.mxu0 %v2163_v37  ;;  %v2156_v55 = vld [vmem:[%s14206_s0 + $0x30] sm:$0xff] }
 0x772   : > { %2113 = vmatprep.subr.mxu1 %v2068_v56  ;;  %6311 = vmatprep.subr.mxu0 %v2178_v39  ;;  %v2171_v56 = vld [vmem:[%s14206_s0 + $0xa8] sm:$0xff]  ;;  %v2260_v37 = vld [vmem:[%s14207_s8 + $0x30] sm:$0xff] }
 0x773   : > { %2114 = vmatpush2.msra.mxu1 %v2067_v57  ;;  %6312 = vmatpush3.msra.mxu0 %v2162_v40  ;;  %v2155_v57 = vld [vmem:[%s14206_s0 + $0x28] sm:$0xff]  ;;  %v2258_v40 = vld [vmem:[%s14207_s8 + $0x20] sm:$0xff] }
 0x774   : > { %2115 = vmatprep.subr.mxu1 %v2066_v58  ;;  %6313 = vmatprep.subr.mxu0 %v2177_v42  ;;  %v2170_v58 = vld [vmem:[%s14206_s0 + $0xa0] sm:$0xff]  ;;  %v2259_v39 = vld [vmem:[%s14207_s8 + $0x28] sm:$0xff]  ;;  %v2257_v42 = vld [vmem:[%s14207_s8 + $0x18] sm:$0xff] }
 0x775   : > { %2116 = vmatpush2.msra.mxu1 %v2065_v59  ;;  %6314 = vmatpush3.msra.mxu0 %v2161_v43  ;;  %v2154_v59 = vld [vmem:[%s14206_s0 + $0x20] sm:$0xff]  ;;  %v2256_v43 = vld [vmem:[%s14207_s8 + $0x10] sm:$0xff] }
 0x776   : > { %2117 = vmatprep.subr.mxu1 %v2064_v60  ;;  %6315 = vmatprep.subr.mxu0 %v2176_v44  ;;  %v2169_v60 = vld [vmem:[%s14206_s0 + $0x98] sm:$0xff]  ;;  %v2255_v44 = vld [vmem:[%s14207_s8 + $0x8] sm:$0xff] }
 0x777   : > { %2118 = vmatpush2.msra.mxu1 %v2063_v61  ;;  %6316 = vmatpush3.msra.mxu0 %v2160_v45  ;;  %v2153_v61 = vld [vmem:[%s14206_s0 + $0x18] sm:$0xff]  ;;  %v2254_v45 = vld [vmem:[%s14207_s8] sm:$0xff] }
 0x778   : > { %2119 = vmatprep.subr.mxu1 %v2062_v62  ;;  %6317 = vmatprep.subr.mxu0 %v2175_v46  ;;  %v2168_v62 = vld [vmem:[%s14206_s0 + $0x90] sm:$0xff]  ;;  %v2377_v46 = vld [vmem:[%s14208_s9 + $0xf8] sm:$0xff] }
 0x779   : > { %2120 = vmatpush2.msra.mxu1 %v2061_v63  ;;  %6318 = vmatpush3.msra.mxu0 %v2159_v47  ;;  %v2152_v63 = vld [vmem:[%s14206_s0 + $0x10] sm:$0xff] }
 0x77a   : > { %2121 = vmatprep.subr.mxu1 %v2060_v8  ;;  %6319 = vmatprep.subr.mxu0 %v2174_v48  ;;  %v2167_v8 = vld [vmem:[%s14206_s0 + $0x88] sm:$0xff]  ;;  %v2376_v47 = vld [vmem:[%s14208_s9 + $0xf0] sm:$0xff] }
 0x77b   : > { %2122 = vmatpush2.msra.mxu1 %v2059_v9  ;;  %6320 = vmatpush3.msra.mxu0 %v2158_v49  ;;  %v2375_v48 = vld [vmem:[%s14208_s9 + $0xe8] sm:$0xff]  ;;  %v2374_v49 = vld [vmem:[%s14208_s9 + $0xe0] sm:$0xff] }
 0x77c   : > { %2123 = vmatprep.subr.mxu1 %v2058_v10  ;;  %6321 = vmatprep.subr.mxu0 %v2173_v52  ;;  %v2373_v52 = vld [vmem:[%s14208_s9 + $0xd8] sm:$0xff] }
 0x77d   : > { %2124 = vmatpush2.msra.mxu1 %v2057_v11  ;;  %6322 = vmatpush3.msra.mxu0 %v2157_v53  ;;  %v2372_v53 = vld [vmem:[%s14208_s9 + $0xd0] sm:$0xff] }
 0x77e   : > { %2125 = vmatprep.subr.mxu1 %v2056_v12  ;;  %6323 = vmatprep.subr.mxu0 %v2172_v54  ;;  %v2371_v54 = vld [vmem:[%s14208_s9 + $0xc8] sm:$0xff] }
 0x77f   : > { %2126 = vmatpush2.msra.mxu1 %v2055_v13  ;;  %6324 = vmatpush3.msra.mxu0 %v2156_v55  ;;  %v2370_v55 = vld [vmem:[%s14208_s9 + $0xc0] sm:$0xff] }
 0x780   : > { %2127 = vmatprep.subr.mxu1 %v2054_v14  ;;  %6325 = vmatprep.subr.mxu0 %v2171_v56  ;;  %v2369_v56 = vld [vmem:[%s14208_s9 + $0xb8] sm:$0xff] }
 0x781   : > { %2128 = vmatpush2.msra.mxu1 %v2053_v15  ;;  %6326 = vmatpush3.msra.mxu0 %v2155_v57  ;;  %v2368_v57 = vld [vmem:[%s14208_s9 + $0xb0] sm:$0xff] }
 0x782   : > { %2129 = vmatprep.subr.mxu1 %v2052_v16  ;;  %6327 = vmatprep.subr.mxu0 %v2170_v58  ;;  %v2367_v58 = vld [vmem:[%s14208_s9 + $0xa8] sm:$0xff] }
 0x783   : > { %2130 = vmatpush2.msra.mxu1 %v2051_v17  ;;  %6328 = vmatpush3.msra.mxu0 %v2154_v59  ;;  %v2366_v59 = vld [vmem:[%s14208_s9 + $0xa0] sm:$0xff] }
 0x784   : > { %2131 = vmatprep.subr.mxu1 %v2050_v22  ;;  %6329 = vmatprep.subr.mxu0 %v2169_v60  ;;  %v2365_v60 = vld [vmem:[%s14208_s9 + $0x98] sm:$0xff] }
 0x785   : > { %2132 = vmatpush2.msra.mxu1 %v2049_v23  ;;  %6330 = vmatpush3.msra.mxu0 %v2153_v61  ;;  %v2364_v61 = vld [vmem:[%s14208_s9 + $0x90] sm:$0xff] }
 0x786   : > { %2133 = vmatprep.subr.mxu1 %v2048_v25  ;;  %6331 = vmatprep.subr.mxu0 %v2168_v62  ;;  %v2363_v62 = vld [vmem:[%s14208_s9 + $0x88] sm:$0xff] }
 0x787   : > { %2134 = vmatpush2.msra.mxu1 %v2047_v26  ;;  %6332 = vmatpush3.msra.mxu0 %v2152_v63  ;;  %v2362_v63 = vld [vmem:[%s14208_s9 + $0x80] sm:$0xff] }
 0x788   : > { %2135 = vmatprep.subr.mxu1 %v2046_v27  ;;  %6333 = vmatprep.subr.mxu0 %v2167_v8  ;;  %v2361_v8 = vld [vmem:[%s14208_s9 + $0x78] sm:$0xff] }
 0x789   : > { %2136 = vmatpush2.msra.mxu1 %v2045_v28  ;;  %v2151_v28 = vld [vmem:[%s14206_s0 + $0x8] sm:$0xff] }
 0x78a   : > { %2137 = vmatprep.subr.mxu1 %v2044_v29  ;;  %6334 = vmatpush3.msra.mxu0 %v2151_v28  ;;  %v2166_v29 = vld [vmem:[%s14206_s0 + $0x80] sm:$0xff] }
 0x78b   : > { %2138 = vmatpush2.msra.mxu1 %v2043_v30  ;;  %6335 = vmatprep.subr.mxu0 %v2166_v29  ;;  %v2150_v30 = vld [vmem:[%s14206_s0] sm:$0xff]  ;;  %v2409_v29 = vld [vmem:[%s14208_s9 + $0x1f8] sm:$0xff] }
 0x78c   : > { %6336 = vmatpush3.msra.mxu0 %v2150_v30  ;;  %v2346_v28 = vld [vmem:[%s14208_s9] sm:$0xff]  ;;  %v2408_v30 = vld [vmem:[%s14208_s9 + $0x1f0] sm:$0xff] }
 0x78d   : > { %2289 = vmatprep.subr.mxu0 %v2269_v50  ;;  %v2407_v50 = vld [vmem:[%s14208_s9 + $0x1e8] sm:$0xff] }
 0x7ea   : > { %v1789_v9 = vpop.f32.mrf.mxu0  ;;  %v1860_v10 = vpop.f32.mrf.mxu1 }
 0x7eb   : > { %v1861_v13 = vadd.f32 %v1860_v10, %v1789_v9  ;;  %v2360_v9 = vld [vmem:[%s14208_s9 + $0x70] sm:$0xff]  ;;  %v2359_v10 = vld [vmem:[%s14208_s9 + $0x68] sm:$0xff] }
 0x7ec   : > { %v1791_v11 = vpop.f32.mrf.mxu0  ;;  %v1862_v12 = vpop.f32.mrf.mxu1 }
 0x7ed   : > { %v1863_v16 = vadd.f32 %v1862_v12, %v1791_v11  ;;  %v2358_v11 = vld [vmem:[%s14208_s9 + $0x60] sm:$0xff]  ;;  %v2357_v12 = vld [vmem:[%s14208_s9 + $0x58] sm:$0xff] }
 0x80c   : > { %v2002_v14 = vpop.f32.mrf.mxu1 }
 0x80e   : > { %v2004_v25 = vpop.f32.mrf.mxu1 }
 0x82b   : > { %v1931_v15 = vpop.f32.mrf.mxu0 }
 0x82c   : > { %v1932_v17 = vadd.f32 %v1931_v15, %v1861_v13  ;;  %v2356_v13 = vld [vmem:[%s14208_s9 + $0x50] sm:$0xff]  ;;  %v2354_v15 = vld [vmem:[%s14208_s9 + $0x40] sm:$0xff] }
 0x82d   : > { %v1933_v22 = vpop.f32.mrf.mxu0 }
 0x82e   : > { %v1934_v23 = vadd.f32 %v1933_v22, %v1863_v16  ;;  %v2003_v27 = vadd.f32 %v2002_v14, %v1932_v17  ;;  %v2355_v14 = vld [vmem:[%s14208_s9 + $0x48] sm:$0xff]  ;;  %v2353_v16 = vld [vmem:[%s14208_s9 + $0x38] sm:$0xff]  ;;  %v2352_v17 = vld [vmem:[%s14208_s9 + $0x30] sm:$0xff] }
 0x82f   : > { %v2351_v22 = vld [vmem:[%s14208_s9 + $0x28] sm:$0xff] }
 0x830   : > { %v2005_v26 = vadd.f32 %v2004_v25, %v1934_v23  ;;  %v2350_v23 = vld [vmem:[%s14208_s9 + $0x20] sm:$0xff]  ;;  %v2349_v25 = vld [vmem:[%s14208_s9 + $0x18] sm:$0xff] }
 0x832   : > { %6179 = vmatprep.mubr.msk.f32.mxu1 %vm2008_vm1, %v2005_v26  ;;  %v2348_v26 = vld [vmem:[%s14208_s9 + $0x10] sm:$0xff] }
 0x833   : > { %6180 = vmatmul.mubr.msk.f32.vlgmr.msra.gmra.mxu1 %vm2007_vm2, %v2003_v27  ;;  %v2347_v27 = vld [vmem:[%s14208_s9 + $0x8] sm:$0xff] }
 0x8f3   : > { %v2141_v51 = vpop.f32.mrf.mxu1 }
 0x8f5   : > { %v2143_v31 = vpop.f32.mrf.mxu1 }
 0x8f6   : > { %6181 = vmatprep.mubr.msk.f32.mxu0 %vm2147_vm3, %v2143_v31  ;;  %v2405_v31 = vld [vmem:[%s14208_s9 + $0x1d8] sm:$0xff] }
 0x8f7   : > { %6182 = vmatmul.mubr.msk.f32.vlgmr.msra.gmra.mxu0 %vm2146_vm4, %v2141_v51  ;;  %v2406_v51 = vld [vmem:[%s14208_s9 + $0x1e0] sm:$0xff] }
 0x8f8   : > { %2290 = vmatpush1.msra.mxu0 %v2268_v32  ;;  %2337 = vmatprep.mubr.f32.mxu0 %v6879_v41  ;;  %v2404_v32 = vld [vmem:[%s14208_s9 + $0x1d0] sm:$0xff] }
 0x8f9   : > { %2291 = vmatprep.subr.mxu0 %v2267_v33  ;;  %v2403_v33 = vld [vmem:[%s14208_s9 + $0x1c8] sm:$0xff] }
 0x8fa   : > { %2292 = vmatpush1.msra.mxu0 %v2266_v34  ;;  %v2402_v34 = vld [vmem:[%s14208_s9 + $0x1c0] sm:$0xff] }
 0x8fb   : > { %2293 = vmatprep.subr.mxu0 %v2265_v19  ;;  %v2401_v19 = vld [vmem:[%s14208_s9 + $0x1b8] sm:$0xff] }
 0x8fc   : > { %2294 = vmatpush1.msra.mxu0 %v2264_v18  ;;  %v2400_v18 = vld [vmem:[%s14208_s9 + $0x1b0] sm:$0xff] }
 0x8fd   : > { %2295 = vmatprep.subr.mxu0 %v2263_v20  ;;  %v2399_v20 = vld [vmem:[%s14208_s9 + $0x1a8] sm:$0xff] }
 0x8fe   : > { %2296 = vmatpush1.msra.mxu0 %v2262_v21  ;;  %v2398_v21 = vld [vmem:[%s14208_s9 + $0x1a0] sm:$0xff] }
 0x8ff   : > { %2297 = vmatprep.subr.mxu0 %v2261_v36  ;;  %v2397_v36 = vld [vmem:[%s14208_s9 + $0x198] sm:$0xff] }
 0x900   : > { %2298 = vmatpush1.msra.mxu0 %v2260_v37  ;;  %v2396_v37 = vld [vmem:[%s14208_s9 + $0x190] sm:$0xff] }
 0x901   : > { %2299 = vmatprep.subr.mxu0 %v2259_v39  ;;  %v2395_v39 = vld [vmem:[%s14208_s9 + $0x188] sm:$0xff] }
 0x902   : > { %2300 = vmatpush1.msra.mxu0 %v2258_v40  ;;  %v2394_v40 = vld [vmem:[%s14208_s9 + $0x180] sm:$0xff] }
 0x903   : > { %2301 = vmatprep.subr.mxu0 %v2257_v42  ;;  %v2393_v42 = vld [vmem:[%s14208_s9 + $0x178] sm:$0xff] }
 0x904   : > { %2302 = vmatpush1.msra.mxu0 %v2256_v43  ;;  %v2392_v43 = vld [vmem:[%s14208_s9 + $0x170] sm:$0xff] }
 0x905   : > { %2303 = vmatprep.subr.mxu0 %v2255_v44  ;;  %v2391_v44 = vld [vmem:[%s14208_s9 + $0x168] sm:$0xff] }
 0x906   : > { %2304 = vmatpush1.msra.mxu0 %v2254_v45  ;;  %v2390_v45 = vld [vmem:[%s14208_s9 + $0x160] sm:$0xff] }
 0x907   : > { %6183 = vmatmul.mubr.msk.f32.vlgmr.msra.gmra.mxu0 %vm100_vm0, %v6868_v38  ;;  %2410 = vmatprep.subr.mxu0 %v2377_v46  ;;  %v2389_v46 = vld [vmem:[%s14208_s9 + $0x158] sm:$0xff] }
 0x908   : > { %2411 = vmatpush1.msra.mxu0 %v2376_v47  ;;  %v2388_v47 = vld [vmem:[%s14208_s9 + $0x150] sm:$0xff] }
 0x909   : > { %2412 = vmatprep.subr.mxu0 %v2375_v48  ;;  %v2387_v48 = vld [vmem:[%s14208_s9 + $0x148] sm:$0xff] }
 0x90a   : > { %2413 = vmatpush1.msra.mxu0 %v2374_v49  ;;  %v2386_v49 = vld [vmem:[%s14208_s9 + $0x140] sm:$0xff] }
 0x90b   : > { %2414 = vmatprep.subr.mxu0 %v2373_v52  ;;  %v2385_v52 = vld [vmem:[%s14208_s9 + $0x138] sm:$0xff] }
 0x90c   : > { %2415 = vmatpush1.msra.mxu0 %v2372_v53  ;;  %v2384_v53 = vld [vmem:[%s14208_s9 + $0x130] sm:$0xff] }
 0x90d   : > { %2416 = vmatprep.subr.mxu0 %v2371_v54  ;;  %v2383_v54 = vld [vmem:[%s14208_s9 + $0x128] sm:$0xff] }
 0x90e   : > { %2417 = vmatpush1.msra.mxu0 %v2370_v55  ;;  %v2382_v55 = vld [vmem:[%s14208_s9 + $0x120] sm:$0xff] }
 0x90f   : > { %2418 = vmatprep.subr.mxu0 %v2369_v56  ;;  %v2381_v56 = vld [vmem:[%s14208_s9 + $0x118] sm:$0xff] }
 0x910   : > { %2419 = vmatpush1.msra.mxu0 %v2368_v57  ;;  %v2380_v57 = vld [vmem:[%s14208_s9 + $0x110] sm:$0xff] }
 0x911   : > { %2420 = vmatprep.subr.mxu0 %v2367_v58  ;;  %v2379_v58 = vld [vmem:[%s14208_s9 + $0x108] sm:$0xff] }
 0x912   : > { %2421 = vmatpush1.msra.mxu0 %v2366_v59  ;;  %v2378_v59 = vld [vmem:[%s14208_s9 + $0x100] sm:$0xff] }
 0x913   : > { %2422 = vmatprep.subr.mxu0 %v2365_v60  ;;  %v2514_v60 = vld [vmem:[%s14209_s28 + $0xf8] sm:$0xff] }
 0x914   : > { %2423 = vmatpush1.msra.mxu0 %v2364_v61  ;;  %v2498_v61 = vld [vmem:[%s14209_s28 + $0x78] sm:$0xff]  ;;  %6340 = vmatprep.subr.mxu1 %v2514_v60  ;;  %v2592_v60 = vld [vmem:[%s14113_s13 + $0x30] sm:$0xff] }
 0x915   : > { %2424 = vmatprep.subr.mxu0 %v2363_v62  ;;  %v2513_v62 = vld [vmem:[%s14209_s28 + $0xf0] sm:$0xff]  ;;  %6341 = vmatpush3.msra.mxu1 %v2498_v61  ;;  %v2591_v61 = vld [vmem:[%s14113_s13 + $0x28] sm:$0xff] }
 0x916   : > { %2425 = vmatpush1.msra.mxu0 %v2362_v63  ;;  %v2497_v63 = vld [vmem:[%s14209_s28 + $0x70] sm:$0xff]  ;;  %6342 = vmatprep.subr.mxu1 %v2513_v62  ;;  %v2590_v62 = vld [vmem:[%s14113_s13 + $0x20] sm:$0xff] }
 0x917   : > { %2426 = vmatprep.subr.mxu0 %v2361_v8  ;;  %v2512_v8 = vld [vmem:[%s14209_s28 + $0xe8] sm:$0xff]  ;;  %6343 = vmatpush3.msra.mxu1 %v2497_v63  ;;  %v2589_v63 = vld [vmem:[%s14113_s13 + $0x18] sm:$0xff] }
 0x918   : > { %2427 = vmatpush1.msra.mxu0 %v2360_v9  ;;  %v2496_v9 = vld [vmem:[%s14209_s28 + $0x68] sm:$0xff]  ;;  %6344 = vmatprep.subr.mxu1 %v2512_v8  ;;  %v2588_v8 = vld [vmem:[%s14113_s13 + $0x10] sm:$0xff] }
 0x919   : > { %2428 = vmatprep.subr.mxu0 %v2359_v10  ;;  %v2511_v10 = vld [vmem:[%s14209_s28 + $0xe0] sm:$0xff]  ;;  %6345 = vmatpush3.msra.mxu1 %v2496_v9  ;;  %v2587_v9 = vld [vmem:[%s14113_s13 + $0x8] sm:$0xff] }
 0x91a   : > { %2429 = vmatpush1.msra.mxu0 %v2358_v11  ;;  %v2495_v11 = vld [vmem:[%s14209_s28 + $0x60] sm:$0xff]  ;;  %6346 = vmatprep.subr.mxu1 %v2511_v10 }
 0x91b   : > { %2430 = vmatprep.subr.mxu0 %v2357_v12  ;;  %v2510_v12 = vld [vmem:[%s14209_s28 + $0xd8] sm:$0xff]  ;;  %6347 = vmatpush3.msra.mxu1 %v2495_v11  ;;  %v2586_v10 = vld [vmem:[%s14113_s13] sm:$0xff] }
 0x91c   : > { %2431 = vmatpush1.msra.mxu0 %v2356_v13  ;;  %v2494_v13 = vld [vmem:[%s14209_s28 + $0x58] sm:$0xff]  ;;  %6348 = vmatprep.subr.mxu1 %v2510_v12 }
 0x91d   : > { %2432 = vmatprep.subr.mxu0 %v2355_v14  ;;  %v2509_v14 = vld [vmem:[%s14209_s28 + $0xd0] sm:$0xff]  ;;  %6349 = vmatpush3.msra.mxu1 %v2494_v13  ;;  %v2711_v11 = vld [vmem:[%s14112_s12 + $0xf8] sm:$0xff] }
 0x91e   : > { %2433 = vmatpush1.msra.mxu0 %v2354_v15  ;;  %v2493_v15 = vld [vmem:[%s14209_s28 + $0x50] sm:$0xff]  ;;  %6350 = vmatprep.subr.mxu1 %v2509_v14 }
 0x91f   : > { %2434 = vmatprep.subr.mxu0 %v2353_v16  ;;  %v2508_v16 = vld [vmem:[%s14209_s28 + $0xc8] sm:$0xff]  ;;  %6351 = vmatpush3.msra.mxu1 %v2493_v15 }
 0x920   : > { %2435 = vmatpush1.msra.mxu0 %v2352_v17  ;;  %v2492_v17 = vld [vmem:[%s14209_s28 + $0x48] sm:$0xff]  ;;  %6352 = vmatprep.subr.mxu1 %v2508_v16 }
 0x921   : > { %2436 = vmatprep.subr.mxu0 %v2351_v22  ;;  %v2507_v22 = vld [vmem:[%s14209_s28 + $0xc0] sm:$0xff]  ;;  %6353 = vmatpush3.msra.mxu1 %v2492_v17 }
 0x922   : > { %2437 = vmatpush1.msra.mxu0 %v2350_v23  ;;  %v2491_v23 = vld [vmem:[%s14209_s28 + $0x40] sm:$0xff]  ;;  %6354 = vmatprep.subr.mxu1 %v2507_v22  ;;  %v2710_v22 = vld [vmem:[%s14112_s12 + $0xf0] sm:$0xff] }
 0x923   : > { %2438 = vmatprep.subr.mxu0 %v2349_v25  ;;  %v2506_v25 = vld [vmem:[%s14209_s28 + $0xb8] sm:$0xff]  ;;  %6355 = vmatpush3.msra.mxu1 %v2491_v23  ;;  %v2709_v23 = vld [vmem:[%s14112_s12 + $0xe8] sm:$0xff] }
 0x924   : > { %2439 = vmatpush1.msra.mxu0 %v2348_v26  ;;  %v2490_v26 = vld [vmem:[%s14209_s28 + $0x38] sm:$0xff]  ;;  %6356 = vmatprep.subr.mxu1 %v2506_v25  ;;  %v2708_v25 = vld [vmem:[%s14112_s12 + $0xe0] sm:$0xff] }
 0x925   : > { %2440 = vmatprep.subr.mxu0 %v2347_v27  ;;  %v2505_v27 = vld [vmem:[%s14209_s28 + $0xb0] sm:$0xff]  ;;  %6357 = vmatpush3.msra.mxu1 %v2490_v26 }
 0x926   : > { %2441 = vmatpush1.msra.mxu0 %v2346_v28  ;;  %v2489_v28 = vld [vmem:[%s14209_s28 + $0x30] sm:$0xff]  ;;  %6358 = vmatprep.subr.mxu1 %v2505_v27  ;;  %v2705_v27 = vld [vmem:[%s14112_s12 + $0xc8] sm:$0xff] }
 0x927   : > { %2442 = vmatprep.subr.mxu0 %v2409_v29  ;;  %v2504_v29 = vld [vmem:[%s14209_s28 + $0xa8] sm:$0xff]  ;;  %6359 = vmatpush3.msra.mxu1 %v2489_v28  ;;  %v2706_v26 = vld [vmem:[%s14112_s12 + $0xd0] sm:$0xff]  ;;  %v2704_v28 = vld [vmem:[%s14112_s12 + $0xc0] sm:$0xff] }
 0x928   : > { %2443 = vmatpush2.msra.mxu0 %v2408_v30  ;;  %v2488_v30 = vld [vmem:[%s14209_s28 + $0x28] sm:$0xff]  ;;  %6360 = vmatprep.subr.mxu1 %v2504_v29  ;;  %v2703_v29 = vld [vmem:[%s14112_s12 + $0xb8] sm:$0xff] }
 0x929   : > { %2444 = vmatprep.subr.mxu0 %v2407_v50  ;;  %v2503_v50 = vld [vmem:[%s14209_s28 + $0xa0] sm:$0xff]  ;;  %6361 = vmatpush3.msra.mxu1 %v2488_v30  ;;  %v2702_v30 = vld [vmem:[%s14112_s12 + $0xb0] sm:$0xff] }
 0x92a   : > { %2445 = vmatpush2.msra.mxu0 %v2406_v51  ;;  %v2487_v51 = vld [vmem:[%s14209_s28 + $0x20] sm:$0xff]  ;;  %6362 = vmatprep.subr.mxu1 %v2503_v50  ;;  %v2701_v50 = vld [vmem:[%s14112_s12 + $0xa8] sm:$0xff] }
 0x92b   : > { %2446 = vmatprep.subr.mxu0 %v2405_v31  ;;  %v2502_v31 = vld [vmem:[%s14209_s28 + $0x98] sm:$0xff]  ;;  %6363 = vmatpush3.msra.mxu1 %v2487_v51  ;;  %v2700_v51 = vld [vmem:[%s14112_s12 + $0xa0] sm:$0xff] }
 0x92c   : > { %2447 = vmatpush2.msra.mxu0 %v2404_v32  ;;  %v2486_v32 = vld [vmem:[%s14209_s28 + $0x18] sm:$0xff]  ;;  %6364 = vmatprep.subr.mxu1 %v2502_v31 }
 0x92d   : > { %2448 = vmatprep.subr.mxu0 %v2403_v33  ;;  %6365 = vmatpush3.msra.mxu1 %v2486_v32  ;;  %v2699_v31 = vld [vmem:[%s14112_s12 + $0x98] sm:$0xff]  ;;  %v2698_v32 = vld [vmem:[%s14112_s12 + $0x90] sm:$0xff] }
 0x92e   : > { %2449 = vmatpush2.msra.mxu0 %v2402_v34 }
 0x92f   : > { %2450 = vmatprep.subr.mxu0 %v2401_v19 }
 0x930   : > { %2451 = vmatpush2.msra.mxu0 %v2400_v18 }
 0x931   : > { %2452 = vmatprep.subr.mxu0 %v2399_v20 }
 0x932   : > { %2453 = vmatpush2.msra.mxu0 %v2398_v21 }
 0x933   : > { %2454 = vmatprep.subr.mxu0 %v2397_v36 }
 0x934   : > { %2455 = vmatpush2.msra.mxu0 %v2396_v37  ;;  %v2501_v37 = vld [vmem:[%s14209_s28 + $0x90] sm:$0xff] }
 0x935   : > { %2456 = vmatprep.subr.mxu0 %v2395_v39  ;;  %6366 = vmatprep.subr.mxu1 %v2501_v37  ;;  %v2485_v39 = vld [vmem:[%s14209_s28 + $0x10] sm:$0xff] }
 0x936   : > { %2457 = vmatpush2.msra.mxu0 %v2394_v40  ;;  %6367 = vmatpush3.msra.mxu1 %v2485_v39  ;;  %v2500_v40 = vld [vmem:[%s14209_s28 + $0x88] sm:$0xff]  ;;  %v2694_v37 = vld [vmem:[%s14112_s12 + $0x70] sm:$0xff] }
 0x937   : > { %2458 = vmatprep.subr.mxu0 %v2393_v42  ;;  %6368 = vmatprep.subr.mxu1 %v2500_v40  ;;  %v2484_v42 = vld [vmem:[%s14209_s28 + $0x8] sm:$0xff]  ;;  %v2692_v40 = vld [vmem:[%s14112_s12 + $0x60] sm:$0xff] }
 0x938   : > { %2459 = vmatpush2.msra.mxu0 %v2392_v43  ;;  %6369 = vmatpush3.msra.mxu1 %v2484_v42  ;;  %v2499_v43 = vld [vmem:[%s14209_s28 + $0x80] sm:$0xff]  ;;  %v2693_v39 = vld [vmem:[%s14112_s12 + $0x68] sm:$0xff]  ;;  %v2691_v42 = vld [vmem:[%s14112_s12 + $0x58] sm:$0xff] }
 0x939   : > { %2460 = vmatprep.subr.mxu0 %v2391_v44  ;;  %6370 = vmatprep.subr.mxu1 %v2499_v43  ;;  %v2483_v44 = vld [vmem:[%s14209_s28] sm:$0xff]  ;;  %v2690_v43 = vld [vmem:[%s14112_s12 + $0x50] sm:$0xff] }
 0x93a   : > { %2461 = vmatpush2.msra.mxu0 %v2390_v45  ;;  %6371 = vmatpush3.msra.mxu1 %v2483_v44  ;;  %v2601_v45 = vld [vmem:[%s14113_s13 + $0x78] sm:$0xff]  ;;  %v2689_v44 = vld [vmem:[%s14112_s12 + $0x48] sm:$0xff] }
 0x93b   : > { %2462 = vmatprep.subr.mxu0 %v2389_v46  ;;  %2621 = vmatprep.subr.mxu1 %v2601_v45  ;;  %v2688_v45 = vld [vmem:[%s14112_s12 + $0x40] sm:$0xff] }
 0x93c   : > { %2463 = vmatpush2.msra.mxu0 %v2388_v47 }
 0x93d   : > { %2464 = vmatprep.subr.mxu0 %v2387_v48 }
 0x93e   : > { %2465 = vmatpush2.msra.mxu0 %v2386_v49 }
 0x93f   : > { %2466 = vmatprep.subr.mxu0 %v2385_v52  ;;  %v2600_v52 = vld [vmem:[%s14113_s13 + $0x70] sm:$0xff] }
 0x940   : > { %2467 = vmatpush2.msra.mxu0 %v2384_v53  ;;  %v2599_v53 = vld [vmem:[%s14113_s13 + $0x68] sm:$0xff] }
 0x941   : > { %2468 = vmatprep.subr.mxu0 %v2383_v54  ;;  %v2598_v54 = vld [vmem:[%s14113_s13 + $0x60] sm:$0xff] }
 0x942   : > { %2469 = vmatpush2.msra.mxu0 %v2382_v55  ;;  %v2597_v55 = vld [vmem:[%s14113_s13 + $0x58] sm:$0xff] }
 0x943   : > { %2470 = vmatprep.subr.mxu0 %v2381_v56  ;;  %v2596_v56 = vld [vmem:[%s14113_s13 + $0x50] sm:$0xff] }
 0x944   : > { %2471 = vmatpush2.msra.mxu0 %v2380_v57  ;;  %v2595_v57 = vld [vmem:[%s14113_s13 + $0x48] sm:$0xff] }
 0x945   : > { %2472 = vmatprep.subr.mxu0 %v2379_v58  ;;  %v2594_v58 = vld [vmem:[%s14113_s13 + $0x40] sm:$0xff] }
 0x946   : > { %2473 = vmatpush2.msra.mxu0 %v2378_v59  ;;  %v2593_v59 = vld [vmem:[%s14113_s13 + $0x38] sm:$0xff]  ;;  %s14219_s13 = sld [smem:[#allocation60_spill]] (%p749_p0) }
 0x9b7   : > { %v6337_v33 = vpop.f32.mrf.mxu0 }
 0x9b9   : > { %v6338_v34 = vpop.f32.mrf.mxu0 }
 0x9ba   : > { %v6339_v19 = vadd.f32 %v6338_v34, %v6337_v33  ;;  %v2697_v33 = vld [vmem:[%s14112_s12 + $0x88] sm:$0xff]  ;;  %v2696_v34 = vld [vmem:[%s14112_s12 + $0x80] sm:$0xff] }
 0x9bc   : > { %v2252_v12 = vmul.f32 0.0022959183, %v6339_v19  ;;  %v2695_v19 = vld [vmem:[%s14112_s12 + $0x78] sm:$0xff] }
 0x9be   : > { %v10086_v35 = vsub.f32 %v6872_v35, %v2252_v12   ;;  %v2735_v12 = vld [vmem:[%s14112_s12 + $0x1b8] sm:$0xff] }
 0x9c0   : > { %v14210_v15 = vmov %v10086_v35  ;;  %v2707_v35 = vld [vmem:[%s14112_s12 + $0xd8] sm:$0xff] }
 0x9c1   :  { %3592 = vst.msk [vmem:[#allocation2] sm:$0xff] (%p749_p0), %vm100_vm0, %v14210_v15 }
 0x9c7   : > { %v9995_v18 = vpop.f32.mrf.mxu0 }
 0x9c8   : > { %v2344_v36 = vmax.f32 %v9995_v18, 0.0  ;;  %v2933_v18 = vld [vmem:[%s14114_s14 + $0x50] sm:$0xff] }
 0x9c9   : > { %v9997_v20 = vpop.f32.mrf.mxu0 }
 0x9ca   : > { %v2345_v21 = vmax.f32 %v9997_v20, 0.0  ;;  %vm2815_vm8 = vcmp.gt.f32.partialorder %v2344_v36, 0.0  ;;  %v2934_v20 = vld [vmem:[%s14114_s14 + $0x58] sm:$0xff] }
 0x9cc   : > { %2474 = vmatprep.mubr.f32.mxu0 %v2345_v21  ;;  %vm2816_vm7 = vcmp.gt.f32.partialorder %v2345_v21, 0.0  ;;  %v2932_v21 = vld [vmem:[%s14114_s14 + $0x48] sm:$0xff] }
 0x9cd   : > { %2475 = vmatmul.mubr.f32.vlgmr.msra.gmra.mxu0 %v2344_v36  ;;  %v2931_v36 = vld [vmem:[%s14114_s14 + $0x40] sm:$0xff] }
 0xa8d   : > { %v10026_v46 = vpop.f32.mrf.mxu0 }
 0xa8e   : > { %v2481_v49 = vmax.f32 %v10026_v46, 0.0  ;;  %v2938_v46 = vld [vmem:[%s14114_s14 + $0x78] sm:$0xff] }
 0xa8f   : > { %v10028_v47 = vpop.f32.mrf.mxu0 }
 0xa90   : > { %v2482_v48 = vmax.f32 %v10028_v47, 0.0  ;;  %vm2676_vm6 = vcmp.gt.f32.partialorder %v2481_v49, 0.0  ;;  %v2819_v47 = vld [vmem:[%s14111_s11] sm:$0xff] }
 0xa92   : > { %2579 = vmatprep.mubr.f32.mxu1 %v2482_v48  ;;  %vm2677_vm5 = vcmp.gt.f32.partialorder %v2482_v48, 0.0 }
 0xa93   : > { %2580 = vmatmul.mubr.f32.vlgmr.msra.gmra.mxu1 %v2481_v49 }
 0xa94   : > { %2622 = vmatpush1.msra.mxu1 %v2600_v52  ;;  %2669 = vmatprep.mubr.f32.mxu1 %v6879_v41  ;;  %v2687_v52 = vld [vmem:[%s14112_s12 + $0x38] sm:$0xff] }
 0xa95   : > { %2623 = vmatprep.subr.mxu1 %v2599_v53  ;;  %v2686_v53 = vld [vmem:[%s14112_s12 + $0x30] sm:$0xff] }
 0xa96   : > { %2624 = vmatpush1.msra.mxu1 %v2598_v54  ;;  %v2685_v54 = vld [vmem:[%s14112_s12 + $0x28] sm:$0xff] }
 0xa97   : > { %2625 = vmatprep.subr.mxu1 %v2597_v55  ;;  %v2684_v55 = vld [vmem:[%s14112_s12 + $0x20] sm:$0xff] }
 0xa98   : > { %2626 = vmatpush1.msra.mxu1 %v2596_v56  ;;  %v2683_v56 = vld [vmem:[%s14112_s12 + $0x18] sm:$0xff] }
 0xa99   : > { %2627 = vmatprep.subr.mxu1 %v2595_v57  ;;  %v2682_v57 = vld [vmem:[%s14112_s12 + $0x10] sm:$0xff] }
 0xa9a   : > { %2628 = vmatpush1.msra.mxu1 %v2594_v58  ;;  %v2681_v58 = vld [vmem:[%s14112_s12 + $0x8] sm:$0xff] }
 0xa9b   : > { %2629 = vmatprep.subr.mxu1 %v2593_v59  ;;  %v2680_v59 = vld [vmem:[%s14112_s12] sm:$0xff] }
 0xa9c   : > { %2630 = vmatpush1.msra.mxu1 %v2592_v60  ;;  %v2743_v60 = vld [vmem:[%s14112_s12 + $0x1f8] sm:$0xff] }
 0xa9d   : > { %2631 = vmatprep.subr.mxu1 %v2591_v61  ;;  %v2742_v61 = vld [vmem:[%s14112_s12 + $0x1f0] sm:$0xff] }
 0xa9e   : > { %2632 = vmatpush1.msra.mxu1 %v2590_v62  ;;  %v2741_v62 = vld [vmem:[%s14112_s12 + $0x1e8] sm:$0xff] }
 0xa9f   : > { %2633 = vmatprep.subr.mxu1 %v2589_v63  ;;  %v2740_v63 = vld [vmem:[%s14112_s12 + $0x1e0] sm:$0xff] }
 0xaa0   : > { %2634 = vmatpush1.msra.mxu1 %v2588_v8  ;;  %v2739_v8 = vld [vmem:[%s14112_s12 + $0x1d8] sm:$0xff] }
 0xaa1   : > { %2635 = vmatprep.subr.mxu1 %v2587_v9  ;;  %v2738_v9 = vld [vmem:[%s14112_s12 + $0x1d0] sm:$0xff] }
 0xaa2   : > { %2636 = vmatpush1.msra.mxu1 %v2586_v10  ;;  %v2737_v10 = vld [vmem:[%s14112_s12 + $0x1c8] sm:$0xff] }
 0xaa3   : > { %2744 = vmatprep.subr.mxu1 %v2711_v11  ;;  %v2736_v11 = vld [vmem:[%s14112_s12 + $0x1c0] sm:$0xff] }
 0xb53   : > { %v6372_v13 = vpop.f32.mrf.mxu1 }
 0xb55   : > { %v6373_v14 = vpop.f32.mrf.mxu1 }
 0xb56   : > { %v6374_v16 = vadd.f32 %v6373_v14, %v6372_v13  ;;  %v2734_v13 = vld [vmem:[%s14112_s12 + $0x1b0] sm:$0xff]  ;;  %v2733_v14 = vld [vmem:[%s14112_s12 + $0x1a8] sm:$0xff] }
 0xb58   : > { %v2585_v17 = vsub.f32 %v6374_v16, %v14210_v15  ;;  %v2732_v16 = vld [vmem:[%s14112_s12 + $0x1a0] sm:$0xff] }
 0xb5a   : > { %6184 = vmatmul.mubr.msk.f32.vlgmr.msra.gmra.mxu1 %vm100_vm0, %v2585_v17  ;;  %v2731_v17 = vld [vmem:[%s14112_s12 + $0x198] sm:$0xff] }
 0xb5b   : > { %2745 = vmatpush1.msra.mxu1 %v2710_v22  ;;  %v2730_v22 = vld [vmem:[%s14112_s12 + $0x190] sm:$0xff] }
 0xb5c   : > { %2746 = vmatprep.subr.mxu1 %v2709_v23  ;;  %v2729_v23 = vld [vmem:[%s14112_s12 + $0x188] sm:$0xff] }
 0xb5d   : > { %2747 = vmatpush1.msra.mxu1 %v2708_v25  ;;  %v2728_v25 = vld [vmem:[%s14112_s12 + $0x180] sm:$0xff] }
 0xb5e   : > { %2748 = vmatprep.subr.mxu1 %v2707_v35  ;;  %v2727_v35 = vld [vmem:[%s14112_s12 + $0x178] sm:$0xff] }
 0xb5f   : > { %2749 = vmatpush1.msra.mxu1 %v2706_v26  ;;  %v2726_v26 = vld [vmem:[%s14112_s12 + $0x170] sm:$0xff] }
 0xb60   : > { %2750 = vmatprep.subr.mxu1 %v2705_v27  ;;  %v2725_v27 = vld [vmem:[%s14112_s12 + $0x168] sm:$0xff] }
 0xb61   : > { %2751 = vmatpush1.msra.mxu1 %v2704_v28  ;;  %v2724_v28 = vld [vmem:[%s14112_s12 + $0x160] sm:$0xff] }
 0xb62   : > { %2752 = vmatprep.subr.mxu1 %v2703_v29  ;;  %v2723_v29 = vld [vmem:[%s14112_s12 + $0x158] sm:$0xff] }
 0xb63   : > { %2753 = vmatpush1.msra.mxu1 %v2702_v30  ;;  %v2722_v30 = vld [vmem:[%s14112_s12 + $0x150] sm:$0xff] }
 0xb64   : > { %2754 = vmatprep.subr.mxu1 %v2701_v50  ;;  %v2721_v50 = vld [vmem:[%s14112_s12 + $0x148] sm:$0xff] }
 0xb65   : > { %2755 = vmatpush1.msra.mxu1 %v2700_v51  ;;  %v2720_v51 = vld [vmem:[%s14112_s12 + $0x140] sm:$0xff] }
 0xb66   : > { %2756 = vmatprep.subr.mxu1 %v2699_v31  ;;  %v2719_v31 = vld [vmem:[%s14112_s12 + $0x138] sm:$0xff] }
 0xb67   : > { %2757 = vmatpush1.msra.mxu1 %v2698_v32  ;;  %v2718_v32 = vld [vmem:[%s14112_s12 + $0x130] sm:$0xff] }
 0xb68   : > { %2758 = vmatprep.subr.mxu1 %v2697_v33  ;;  %v2717_v33 = vld [vmem:[%s14112_s12 + $0x128] sm:$0xff] }
 0xb69   : > { %2759 = vmatpush1.msra.mxu1 %v2696_v34  ;;  %v2716_v34 = vld [vmem:[%s14112_s12 + $0x120] sm:$0xff] }
 0xb6a   : > { %2760 = vmatprep.subr.mxu1 %v2695_v19  ;;  %v2715_v19 = vld [vmem:[%s14112_s12 + $0x118] sm:$0xff] }
 0xb6b   : > { %2761 = vmatpush1.msra.mxu1 %v2694_v37  ;;  %v2714_v37 = vld [vmem:[%s14112_s12 + $0x110] sm:$0xff] }
 0xb6c   : > { %2762 = vmatprep.subr.mxu1 %v2693_v39  ;;  %v2713_v39 = vld [vmem:[%s14112_s12 + $0x108] sm:$0xff] }
 0xb6d   : > { %2763 = vmatpush1.msra.mxu1 %v2692_v40  ;;  %v2712_v40 = vld [vmem:[%s14112_s12 + $0x100] sm:$0xff]  ;;  %s14257_s12 = sld [smem:[#allocation62_spill]] (%p749_p0) }
 0xb6e   : > { %2764 = vmatprep.subr.mxu1 %v2691_v42  ;;  %v2850_v42 = vld [vmem:[%s14111_s11 + $0xf8] sm:$0xff] }
 0xb6f   : > { %2765 = vmatpush1.msra.mxu1 %v2690_v43  ;;  %v2834_v43 = vld [vmem:[%s14111_s11 + $0x78] sm:$0xff]  ;;  %6375 = vmatprep.subr.mxu0 %v2850_v42 }
 0xb70   : > { %2766 = vmatprep.subr.mxu1 %v2689_v44  ;;  %v2849_v44 = vld [vmem:[%s14111_s11 + $0xf0] sm:$0xff]  ;;  %6376 = vmatpush3.msra.mxu0 %v2834_v43  ;;  %v3046_v42 = vld [vmem:[%s14115_s15 + $0xf8] sm:$0xff] }
 0xb71   : > { %2767 = vmatpush1.msra.mxu1 %v2688_v45  ;;  %v2833_v45 = vld [vmem:[%s14111_s11 + $0x70] sm:$0xff]  ;;  %6377 = vmatprep.subr.mxu0 %v2849_v44  ;;  %v3044_v44 = vld [vmem:[%s14115_s15 + $0xe8] sm:$0xff] }
 0xb72   : > { %2768 = vmatprep.subr.mxu1 %v2687_v52  ;;  %v2848_v52 = vld [vmem:[%s14111_s11 + $0xe8] sm:$0xff]  ;;  %6378 = vmatpush3.msra.mxu0 %v2833_v45  ;;  %v3045_v43 = vld [vmem:[%s14115_s15 + $0xf0] sm:$0xff]  ;;  %v3043_v45 = vld [vmem:[%s14115_s15 + $0xe0] sm:$0xff] }
 0xb73   : > { %2769 = vmatpush1.msra.mxu1 %v2686_v53  ;;  %v2832_v53 = vld [vmem:[%s14111_s11 + $0x68] sm:$0xff]  ;;  %6379 = vmatprep.subr.mxu0 %v2848_v52  ;;  %v3042_v52 = vld [vmem:[%s14115_s15 + $0xd8] sm:$0xff] }
 0xb74   : > { %2770 = vmatprep.subr.mxu1 %v2685_v54  ;;  %v2847_v54 = vld [vmem:[%s14111_s11 + $0xe0] sm:$0xff]  ;;  %6380 = vmatpush3.msra.mxu0 %v2832_v53  ;;  %v3041_v53 = vld [vmem:[%s14115_s15 + $0xd0] sm:$0xff] }
 0xb75   : > { %2771 = vmatpush1.msra.mxu1 %v2684_v55  ;;  %v2831_v55 = vld [vmem:[%s14111_s11 + $0x60] sm:$0xff]  ;;  %6381 = vmatprep.subr.mxu0 %v2847_v54  ;;  %v3040_v54 = vld [vmem:[%s14115_s15 + $0xc8] sm:$0xff] }
 0xb76   : > { %2772 = vmatprep.subr.mxu1 %v2683_v56  ;;  %v2846_v56 = vld [vmem:[%s14111_s11 + $0xd8] sm:$0xff]  ;;  %6382 = vmatpush3.msra.mxu0 %v2831_v55  ;;  %v3039_v55 = vld [vmem:[%s14115_s15 + $0xc0] sm:$0xff] }
 0xb77   : > { %2773 = vmatpush1.msra.mxu1 %v2682_v57  ;;  %v2830_v57 = vld [vmem:[%s14111_s11 + $0x58] sm:$0xff]  ;;  %6383 = vmatprep.subr.mxu0 %v2846_v56 }
 0xb78   : > { %2774 = vmatprep.subr.mxu1 %v2681_v58  ;;  %v2845_v58 = vld [vmem:[%s14111_s11 + $0xd0] sm:$0xff]  ;;  %6384 = vmatpush3.msra.mxu0 %v2830_v57  ;;  %v3038_v56 = vld [vmem:[%s14115_s15 + $0xb8] sm:$0xff] }
 0xb79   : > { %2775 = vmatpush1.msra.mxu1 %v2680_v59  ;;  %v2829_v59 = vld [vmem:[%s14111_s11 + $0x50] sm:$0xff]  ;;  %6385 = vmatprep.subr.mxu0 %v2845_v58  ;;  %v3036_v58 = vld [vmem:[%s14115_s15 + $0xa8] sm:$0xff] }
 0xb7a   : > { %2776 = vmatprep.subr.mxu1 %v2743_v60  ;;  %v2844_v60 = vld [vmem:[%s14111_s11 + $0xc8] sm:$0xff]  ;;  %6386 = vmatpush3.msra.mxu0 %v2829_v59  ;;  %v3037_v57 = vld [vmem:[%s14115_s15 + $0xb0] sm:$0xff]  ;;  %v3035_v59 = vld [vmem:[%s14115_s15 + $0xa0] sm:$0xff] }
 0xb7b   : > { %2777 = vmatpush2.msra.mxu1 %v2742_v61  ;;  %v2828_v61 = vld [vmem:[%s14111_s11 + $0x48] sm:$0xff]  ;;  %6387 = vmatprep.subr.mxu0 %v2844_v60  ;;  %v3034_v60 = vld [vmem:[%s14115_s15 + $0x98] sm:$0xff] }
 0xb7c   : > { %2778 = vmatprep.subr.mxu1 %v2741_v62  ;;  %v2843_v62 = vld [vmem:[%s14111_s11 + $0xc0] sm:$0xff]  ;;  %6388 = vmatpush3.msra.mxu0 %v2828_v61  ;;  %v3033_v61 = vld [vmem:[%s14115_s15 + $0x90] sm:$0xff] }
 0xb7d   : > { %2779 = vmatpush2.msra.mxu1 %v2740_v63  ;;  %v2827_v63 = vld [vmem:[%s14111_s11 + $0x40] sm:$0xff]  ;;  %6389 = vmatprep.subr.mxu0 %v2843_v62  ;;  %v3032_v62 = vld [vmem:[%s14115_s15 + $0x88] sm:$0xff] }
 0xb7e   : > { %2780 = vmatprep.subr.mxu1 %v2739_v8  ;;  %v2842_v8 = vld [vmem:[%s14111_s11 + $0xb8] sm:$0xff]  ;;  %6390 = vmatpush3.msra.mxu0 %v2827_v63  ;;  %v3031_v63 = vld [vmem:[%s14115_s15 + $0x80] sm:$0xff] }
 0xb7f   : > { %2781 = vmatpush2.msra.mxu1 %v2738_v9  ;;  %v2826_v9 = vld [vmem:[%s14111_s11 + $0x38] sm:$0xff]  ;;  %6391 = vmatprep.subr.mxu0 %v2842_v8 }
 0xb80   : > { %2782 = vmatprep.subr.mxu1 %v2737_v10  ;;  %v2841_v10 = vld [vmem:[%s14111_s11 + $0xb0] sm:$0xff]  ;;  %6392 = vmatpush3.msra.mxu0 %v2826_v9  ;;  %v3030_v8 = vld [vmem:[%s14115_s15 + $0x78] sm:$0xff] }
 0xb81   : > { %2783 = vmatpush2.msra.mxu1 %v2736_v11  ;;  %v2825_v11 = vld [vmem:[%s14111_s11 + $0x30] sm:$0xff]  ;;  %6393 = vmatprep.subr.mxu0 %v2841_v10  ;;  %v3028_v10 = vld [vmem:[%s14115_s15 + $0x68] sm:$0xff] }
 0xb82   : > { %2784 = vmatprep.subr.mxu1 %v2735_v12  ;;  %v2840_v12 = vld [vmem:[%s14111_s11 + $0xa8] sm:$0xff]  ;;  %6394 = vmatpush3.msra.mxu0 %v2825_v11  ;;  %v3029_v9 = vld [vmem:[%s14115_s15 + $0x70] sm:$0xff]  ;;  %v3027_v11 = vld [vmem:[%s14115_s15 + $0x60] sm:$0xff] }
 0xb83   : > { %2785 = vmatpush2.msra.mxu1 %v2734_v13  ;;  %v2824_v13 = vld [vmem:[%s14111_s11 + $0x28] sm:$0xff]  ;;  %6395 = vmatprep.subr.mxu0 %v2840_v12  ;;  %v3026_v12 = vld [vmem:[%s14115_s15 + $0x58] sm:$0xff] }
 0xb84   : > { %2786 = vmatprep.subr.mxu1 %v2733_v14  ;;  %v2839_v14 = vld [vmem:[%s14111_s11 + $0xa0] sm:$0xff]  ;;  %6396 = vmatpush3.msra.mxu0 %v2824_v13  ;;  %v3025_v13 = vld [vmem:[%s14115_s15 + $0x50] sm:$0xff] }
 0xb85   : > { %2787 = vmatpush2.msra.mxu1 %v2732_v16  ;;  %v2823_v16 = vld [vmem:[%s14111_s11 + $0x20] sm:$0xff]  ;;  %6397 = vmatprep.subr.mxu0 %v2839_v14  ;;  %v3024_v14 = vld [vmem:[%s14115_s15 + $0x48] sm:$0xff] }
 0xb86   : > { %2788 = vmatprep.subr.mxu1 %v2731_v17  ;;  %v2838_v17 = vld [vmem:[%s14111_s11 + $0x98] sm:$0xff]  ;;  %6398 = vmatpush3.msra.mxu0 %v2823_v16  ;;  %v3023_v16 = vld [vmem:[%s14115_s15 + $0x40] sm:$0xff] }
 0xb87   : > { %2789 = vmatpush2.msra.mxu1 %v2730_v22  ;;  %v2822_v22 = vld [vmem:[%s14111_s11 + $0x18] sm:$0xff]  ;;  %6399 = vmatprep.subr.mxu0 %v2838_v17 }
 0xb88   : > { %2790 = vmatprep.subr.mxu1 %v2729_v23  ;;  %v2837_v23 = vld [vmem:[%s14111_s11 + $0x90] sm:$0xff]  ;;  %6400 = vmatpush3.msra.mxu0 %v2822_v22  ;;  %v3022_v17 = vld [vmem:[%s14115_s15 + $0x38] sm:$0xff] }
 0xb89   : > { %2791 = vmatpush2.msra.mxu1 %v2728_v25  ;;  %v2821_v25 = vld [vmem:[%s14111_s11 + $0x10] sm:$0xff]  ;;  %6401 = vmatprep.subr.mxu0 %v2837_v23  ;;  %v3020_v23 = vld [vmem:[%s14115_s15 + $0x28] sm:$0xff] }
 0xb8a   : > { %2792 = vmatprep.subr.mxu1 %v2727_v35  ;;  %v2836_v35 = vld [vmem:[%s14111_s11 + $0x88] sm:$0xff]  ;;  %6402 = vmatpush3.msra.mxu0 %v2821_v25  ;;  %v3021_v22 = vld [vmem:[%s14115_s15 + $0x30] sm:$0xff]  ;;  %v3019_v25 = vld [vmem:[%s14115_s15 + $0x20] sm:$0xff] }
 0xb8b   : > { %2793 = vmatpush2.msra.mxu1 %v2726_v26  ;;  %6403 = vmatprep.subr.mxu0 %v2836_v35  ;;  %v3018_v35 = vld [vmem:[%s14115_s15 + $0x18] sm:$0xff] }
 0xb8c   : > { %2794 = vmatprep.subr.mxu1 %v2725_v27 }
 0xb8d   : > { %2795 = vmatpush2.msra.mxu1 %v2724_v28  ;;  %v2820_v28 = vld [vmem:[%s14111_s11 + $0x8] sm:$0xff] }
 0xb8e   : > { %2796 = vmatprep.subr.mxu1 %v2723_v29  ;;  %6404 = vmatpush3.msra.mxu0 %v2820_v28  ;;  %v2835_v29 = vld [vmem:[%s14111_s11 + $0x80] sm:$0xff]  ;;  %s14220_s11 = sld [smem:[#allocation61_spill]] (%p749_p0) }
 0xb8f   : > { %2797 = vmatpush2.msra.mxu1 %v2722_v30  ;;  %6405 = vmatprep.subr.mxu0 %v2835_v29  ;;  %v2937_v30 = vld [vmem:[%s14114_s14 + $0x70] sm:$0xff]  ;;  %v3015_v28 = vld [vmem:[%s14115_s15] sm:$0xff]  ;;  %v3078_v29 = vld [vmem:[%s14115_s15 + $0x1f8] sm:$0xff] }
 0xb90   : > { %2798 = vmatprep.subr.mxu1 %v2721_v50  ;;  %6406 = vmatpush3.msra.mxu0 %v2819_v47  ;;  %v2936_v50 = vld [vmem:[%s14114_s14 + $0x68] sm:$0xff]  ;;  %v3077_v47 = vld [vmem:[%s14115_s15 + $0x1f0] sm:$0xff] }
 0xb91   : > { %2799 = vmatpush2.msra.mxu1 %v2720_v51  ;;  %2958 = vmatprep.subr.mxu0 %v2938_v46  ;;  %v2935_v51 = vld [vmem:[%s14114_s14 + $0x60] sm:$0xff]  ;;  %v3076_v46 = vld [vmem:[%s14115_s15 + $0x1e8] sm:$0xff] }
 0xb92   : > { %2800 = vmatprep.subr.mxu1 %v2719_v31  ;;  %v2930_v31 = vld [vmem:[%s14114_s14 + $0x38] sm:$0xff] }
 0xb93   : > { %2801 = vmatpush2.msra.mxu1 %v2718_v32  ;;  %v2929_v32 = vld [vmem:[%s14114_s14 + $0x30] sm:$0xff] }
 0xb94   : > { %2802 = vmatprep.subr.mxu1 %v2717_v33  ;;  %v2928_v33 = vld [vmem:[%s14114_s14 + $0x28] sm:$0xff] }
 0xb95   : > { %2803 = vmatpush2.msra.mxu1 %v2716_v34  ;;  %v2927_v34 = vld [vmem:[%s14114_s14 + $0x20] sm:$0xff] }
 0xb96   : > { %2804 = vmatprep.subr.mxu1 %v2715_v19  ;;  %v2926_v19 = vld [vmem:[%s14114_s14 + $0x18] sm:$0xff] }
 0xb97   : > { %2805 = vmatpush2.msra.mxu1 %v2714_v37  ;;  %v2925_v37 = vld [vmem:[%s14114_s14 + $0x10] sm:$0xff] }
 0xb98   : > { %2806 = vmatprep.subr.mxu1 %v2713_v39  ;;  %v2924_v39 = vld [vmem:[%s14114_s14 + $0x8] sm:$0xff] }
 0xb99   : > { %2807 = vmatpush2.msra.mxu1 %v2712_v40  ;;  %v2923_v40 = vld [vmem:[%s14114_s14] sm:$0xff] }
 0xc1a   : > { %v2671_v26 = vpop.f32.mrf.mxu1 }
 0xc1c   : > { %v2673_v27 = vpop.f32.mrf.mxu1 }
 0xc1d   : > { %6185 = vmatprep.mubr.msk.f32.mxu1 %vm2677_vm5, %v2673_v27  ;;  %v3016_v27 = vld [vmem:[%s14115_s15 + $0x8] sm:$0xff] }
 0xc1e   : > { %6186 = vmatmul.mubr.msk.f32.vlgmr.msra.gmra.mxu1 %vm2676_vm6, %v2671_v26  ;;  %v3017_v26 = vld [vmem:[%s14115_s15 + $0x10] sm:$0xff] }
 0xcde   : > { %v2810_v48 = vpop.f32.mrf.mxu1 }
 0xce0   : > { %v2812_v49 = vpop.f32.mrf.mxu1 }
 0xce1   : > { %6187 = vmatprep.mubr.msk.f32.mxu0 %vm2816_vm7, %v2812_v49  ;;  %v3074_v49 = vld [vmem:[%s14115_s15 + $0x1d8] sm:$0xff] }
 0xce2   : > { %6188 = vmatmul.mubr.msk.f32.vlgmr.msra.gmra.mxu0 %vm2815_vm8, %v2810_v48  ;;  %v3075_v48 = vld [vmem:[%s14115_s15 + $0x1e0] sm:$0xff] }
 0xce3   : > { %2959 = vmatpush1.msra.mxu0 %v2937_v30  ;;  %3006 = vmatprep.mubr.f32.mxu0 %v6879_v41  ;;  %v3073_v30 = vld [vmem:[%s14115_s15 + $0x1d0] sm:$0xff] }
 0xce4   : > { %2960 = vmatprep.subr.mxu0 %v2936_v50  ;;  %v3072_v50 = vld [vmem:[%s14115_s15 + $0x1c8] sm:$0xff] }
 0xce5   : > { %2961 = vmatpush1.msra.mxu0 %v2935_v51  ;;  %v3071_v51 = vld [vmem:[%s14115_s15 + $0x1c0] sm:$0xff] }
 0xce6   : > { %2962 = vmatprep.subr.mxu0 %v2934_v20  ;;  %v3070_v20 = vld [vmem:[%s14115_s15 + $0x1b8] sm:$0xff] }
 0xce7   : > { %2963 = vmatpush1.msra.mxu0 %v2933_v18  ;;  %v3069_v18 = vld [vmem:[%s14115_s15 + $0x1b0] sm:$0xff] }
 0xce8   : > { %2964 = vmatprep.subr.mxu0 %v2932_v21  ;;  %v3068_v21 = vld [vmem:[%s14115_s15 + $0x1a8] sm:$0xff] }
 0xce9   : > { %2965 = vmatpush1.msra.mxu0 %v2931_v36  ;;  %v3067_v36 = vld [vmem:[%s14115_s15 + $0x1a0] sm:$0xff] }
 0xcea   : > { %2966 = vmatprep.subr.mxu0 %v2930_v31  ;;  %v3066_v31 = vld [vmem:[%s14115_s15 + $0x198] sm:$0xff] }
 0xceb   : > { %2967 = vmatpush1.msra.mxu0 %v2929_v32  ;;  %v3065_v32 = vld [vmem:[%s14115_s15 + $0x190] sm:$0xff] }
 0xcec   : > { %2968 = vmatprep.subr.mxu0 %v2928_v33  ;;  %v3064_v33 = vld [vmem:[%s14115_s15 + $0x188] sm:$0xff] }
 0xced   : > { %2969 = vmatpush1.msra.mxu0 %v2927_v34  ;;  %v3063_v34 = vld [vmem:[%s14115_s15 + $0x180] sm:$0xff] }
 0xcee   : > { %2970 = vmatprep.subr.mxu0 %v2926_v19  ;;  %v3062_v19 = vld [vmem:[%s14115_s15 + $0x178] sm:$0xff] }
 0xcef   : > { %2971 = vmatpush1.msra.mxu0 %v2925_v37  ;;  %v3061_v37 = vld [vmem:[%s14115_s15 + $0x170] sm:$0xff] }
 0xcf0   : > { %2972 = vmatprep.subr.mxu0 %v2924_v39  ;;  %v3060_v39 = vld [vmem:[%s14115_s15 + $0x168] sm:$0xff] }
 0xcf1   : > { %2973 = vmatpush1.msra.mxu0 %v2923_v40  ;;  %v3059_v40 = vld [vmem:[%s14115_s15 + $0x160] sm:$0xff] }
 0xcf2   : > { %6189 = vmatmul.mubr.msk.f32.vlgmr.msra.gmra.mxu0 %vm100_vm0, %v6864_v24  ;;  %3079 = vmatprep.subr.mxu0 %v3046_v42  ;;  %v3058_v42 = vld [vmem:[%s14115_s15 + $0x158] sm:$0xff] }
 0xcf3   : > { %3080 = vmatpush1.msra.mxu0 %v3045_v43  ;;  %v3057_v43 = vld [vmem:[%s14115_s15 + $0x150] sm:$0xff] }
 0xcf4   : > { %3081 = vmatprep.subr.mxu0 %v3044_v44  ;;  %v3056_v44 = vld [vmem:[%s14115_s15 + $0x148] sm:$0xff] }
 0xcf5   : > { %3082 = vmatpush1.msra.mxu0 %v3043_v45  ;;  %v3055_v45 = vld [vmem:[%s14115_s15 + $0x140] sm:$0xff] }
 0xcf6   : > { %3083 = vmatprep.subr.mxu0 %v3042_v52  ;;  %v3054_v52 = vld [vmem:[%s14115_s15 + $0x138] sm:$0xff] }
 0xcf7   : > { %3084 = vmatpush1.msra.mxu0 %v3041_v53  ;;  %v3053_v53 = vld [vmem:[%s14115_s15 + $0x130] sm:$0xff] }
 0xcf8   : > { %3085 = vmatprep.subr.mxu0 %v3040_v54  ;;  %v3052_v54 = vld [vmem:[%s14115_s15 + $0x128] sm:$0xff] }
 0xcf9   : > { %3086 = vmatpush1.msra.mxu0 %v3039_v55  ;;  %v3051_v55 = vld [vmem:[%s14115_s15 + $0x120] sm:$0xff] }
 0xcfa   : > { %3087 = vmatprep.subr.mxu0 %v3038_v56  ;;  %v3050_v56 = vld [vmem:[%s14115_s15 + $0x118] sm:$0xff] }
 0xcfb   : > { %3088 = vmatpush1.msra.mxu0 %v3037_v57  ;;  %v3049_v57 = vld [vmem:[%s14115_s15 + $0x110] sm:$0xff] }
 0xcfc   : > { %3089 = vmatprep.subr.mxu0 %v3036_v58  ;;  %v3048_v58 = vld [vmem:[%s14115_s15 + $0x108] sm:$0xff] }
 0xcfd   : > { %3090 = vmatpush1.msra.mxu0 %v3035_v59  ;;  %v3047_v59 = vld [vmem:[%s14115_s15 + $0x100] sm:$0xff] }
 0xcfe   : > { %3091 = vmatprep.subr.mxu0 %v3034_v60  ;;  %v3183_v60 = vld [vmem:[%s14116_s16 + $0xf8] sm:$0xff] }
 0xcff   : > { %3092 = vmatpush1.msra.mxu0 %v3033_v61  ;;  %v3167_v61 = vld [vmem:[%s14116_s16 + $0x78] sm:$0xff]  ;;  %6410 = vmatprep.subr.mxu1 %v3183_v60  ;;  %v3260_v60 = vld [vmem:[%s14119_s19 + $0x28] sm:$0xff] }
 0xd00   : > { %3093 = vmatprep.subr.mxu0 %v3032_v62  ;;  %v3182_v62 = vld [vmem:[%s14116_s16 + $0xf0] sm:$0xff]  ;;  %6411 = vmatpush3.msra.mxu1 %v3167_v61  ;;  %v3259_v61 = vld [vmem:[%s14119_s19 + $0x20] sm:$0xff] }
 0xd01   : > { %3094 = vmatpush1.msra.mxu0 %v3031_v63  ;;  %v3166_v63 = vld [vmem:[%s14116_s16 + $0x70] sm:$0xff]  ;;  %6412 = vmatprep.subr.mxu1 %v3182_v62  ;;  %v3258_v62 = vld [vmem:[%s14119_s19 + $0x18] sm:$0xff] }
 0xd02   : > { %3095 = vmatprep.subr.mxu0 %v3030_v8  ;;  %v3181_v8 = vld [vmem:[%s14116_s16 + $0xe8] sm:$0xff]  ;;  %6413 = vmatpush3.msra.mxu1 %v3166_v63  ;;  %v3257_v63 = vld [vmem:[%s14119_s19 + $0x10] sm:$0xff] }
 0xd03   : > { %3096 = vmatpush1.msra.mxu0 %v3029_v9  ;;  %v3165_v9 = vld [vmem:[%s14116_s16 + $0x68] sm:$0xff]  ;;  %6414 = vmatprep.subr.mxu1 %v3181_v8 }
 0xd04   : > { %3097 = vmatprep.subr.mxu0 %v3028_v10  ;;  %v3180_v10 = vld [vmem:[%s14116_s16 + $0xe0] sm:$0xff]  ;;  %6415 = vmatpush3.msra.mxu1 %v3165_v9  ;;  %v3256_v8 = vld [vmem:[%s14119_s19 + $0x8] sm:$0xff] }
 0xd05   : > { %3098 = vmatpush1.msra.mxu0 %v3027_v11  ;;  %v3164_v11 = vld [vmem:[%s14116_s16 + $0x60] sm:$0xff]  ;;  %6416 = vmatprep.subr.mxu1 %v3180_v10  ;;  %v3380_v10 = vld [vmem:[%s14118_s18 + $0xf8] sm:$0xff] }
 0xd06   : > { %3099 = vmatprep.subr.mxu0 %v3026_v12  ;;  %v3179_v12 = vld [vmem:[%s14116_s16 + $0xd8] sm:$0xff]  ;;  %6417 = vmatpush3.msra.mxu1 %v3164_v11  ;;  %v3255_v9 = vld [vmem:[%s14119_s19] sm:$0xff] }
 0xd07   : > { %3100 = vmatpush1.msra.mxu0 %v3025_v13  ;;  %v3163_v13 = vld [vmem:[%s14116_s16 + $0x58] sm:$0xff]  ;;  %6418 = vmatprep.subr.mxu1 %v3179_v12 }
 0xd08   : > { %3101 = vmatprep.subr.mxu0 %v3024_v14  ;;  %v3178_v14 = vld [vmem:[%s14116_s16 + $0xd0] sm:$0xff]  ;;  %6419 = vmatpush3.msra.mxu1 %v3163_v13 }
 0xd09   : > { %3102 = vmatpush1.msra.mxu0 %v3023_v16  ;;  %v3162_v16 = vld [vmem:[%s14116_s16 + $0x50] sm:$0xff]  ;;  %6420 = vmatprep.subr.mxu1 %v3178_v14 }
 0xd0a   : > { %3103 = vmatprep.subr.mxu0 %v3022_v17  ;;  %v3177_v17 = vld [vmem:[%s14116_s16 + $0xc8] sm:$0xff]  ;;  %6421 = vmatpush3.msra.mxu1 %v3162_v16 }
 0xd0b   : > { %3104 = vmatpush1.msra.mxu0 %v3021_v22  ;;  %v3161_v22 = vld [vmem:[%s14116_s16 + $0x48] sm:$0xff]  ;;  %6422 = vmatprep.subr.mxu1 %v3177_v17 }
 0xd0c   : > { %3105 = vmatprep.subr.mxu0 %v3020_v23  ;;  %v3176_v23 = vld [vmem:[%s14116_s16 + $0xc0] sm:$0xff]  ;;  %6423 = vmatpush3.msra.mxu1 %v3161_v22  ;;  %v3379_v22 = vld [vmem:[%s14118_s18 + $0xf0] sm:$0xff] }
 0xd0d   : > { %3106 = vmatpush1.msra.mxu0 %v3019_v25  ;;  %v3160_v25 = vld [vmem:[%s14116_s16 + $0x40] sm:$0xff]  ;;  %6424 = vmatprep.subr.mxu1 %v3176_v23  ;;  %v3378_v23 = vld [vmem:[%s14118_s18 + $0xe8] sm:$0xff] }
 0xd0e   : > { %3107 = vmatprep.subr.mxu0 %v3018_v35  ;;  %v3175_v35 = vld [vmem:[%s14116_s16 + $0xb8] sm:$0xff]  ;;  %6425 = vmatpush3.msra.mxu1 %v3160_v25  ;;  %v3377_v25 = vld [vmem:[%s14118_s18 + $0xe0] sm:$0xff] }
 0xd0f   : > { %3108 = vmatpush1.msra.mxu0 %v3017_v26  ;;  %v3159_v26 = vld [vmem:[%s14116_s16 + $0x38] sm:$0xff]  ;;  %6426 = vmatprep.subr.mxu1 %v3175_v35  ;;  %v3375_v35 = vld [vmem:[%s14118_s18 + $0xd0] sm:$0xff] }
 0xd10   : > { %3109 = vmatprep.subr.mxu0 %v3016_v27  ;;  %v3174_v27 = vld [vmem:[%s14116_s16 + $0xb0] sm:$0xff]  ;;  %6427 = vmatpush3.msra.mxu1 %v3159_v26  ;;  %v3374_v26 = vld [vmem:[%s14118_s18 + $0xc8] sm:$0xff] }
 0xd11   : > { %3110 = vmatpush1.msra.mxu0 %v3015_v28  ;;  %v3158_v28 = vld [vmem:[%s14116_s16 + $0x30] sm:$0xff]  ;;  %6428 = vmatprep.subr.mxu1 %v3174_v27  ;;  %v3373_v27 = vld [vmem:[%s14118_s18 + $0xc0] sm:$0xff] }
 0xd12   : > { %3111 = vmatprep.subr.mxu0 %v3078_v29  ;;  %v3173_v29 = vld [vmem:[%s14116_s16 + $0xa8] sm:$0xff]  ;;  %6429 = vmatpush3.msra.mxu1 %v3158_v28  ;;  %v3372_v28 = vld [vmem:[%s14118_s18 + $0xb8] sm:$0xff] }
 0xd13   : > { %3112 = vmatpush2.msra.mxu0 %v3077_v47  ;;  %v3157_v47 = vld [vmem:[%s14116_s16 + $0x28] sm:$0xff]  ;;  %6430 = vmatprep.subr.mxu1 %v3173_v29  ;;  %v3371_v29 = vld [vmem:[%s14118_s18 + $0xb0] sm:$0xff] }
 0xd14   : > { %3113 = vmatprep.subr.mxu0 %v3076_v46  ;;  %v3172_v46 = vld [vmem:[%s14116_s16 + $0xa0] sm:$0xff]  ;;  %6431 = vmatpush3.msra.mxu1 %v3157_v47  ;;  %v3370_v47 = vld [vmem:[%s14118_s18 + $0xa8] sm:$0xff] }
 0xd15   : > { %3114 = vmatpush2.msra.mxu0 %v3075_v48  ;;  %v3156_v48 = vld [vmem:[%s14116_s16 + $0x20] sm:$0xff]  ;;  %6432 = vmatprep.subr.mxu1 %v3172_v46 }
 0xd16   : > { %3115 = vmatprep.subr.mxu0 %v3074_v49  ;;  %v3171_v49 = vld [vmem:[%s14116_s16 + $0x98] sm:$0xff]  ;;  %6433 = vmatpush3.msra.mxu1 %v3156_v48  ;;  %v3369_v46 = vld [vmem:[%s14118_s18 + $0xa0] sm:$0xff] }
 0xd17   : > { %3116 = vmatpush2.msra.mxu0 %v3073_v30  ;;  %v3155_v30 = vld [vmem:[%s14116_s16 + $0x18] sm:$0xff]  ;;  %6434 = vmatprep.subr.mxu1 %v3171_v49  ;;  %v3367_v49 = vld [vmem:[%s14118_s18 + $0x90] sm:$0xff] }
 0xd18   : > { %3117 = vmatprep.subr.mxu0 %v3072_v50  ;;  %6435 = vmatpush3.msra.mxu1 %v3155_v30  ;;  %v3368_v48 = vld [vmem:[%s14118_s18 + $0x98] sm:$0xff]  ;;  %v3366_v30 = vld [vmem:[%s14118_s18 + $0x88] sm:$0xff] }
 0xd19   : > { %3118 = vmatpush2.msra.mxu0 %v3071_v51 }
 0xd1a   : > { %3119 = vmatprep.subr.mxu0 %v3070_v20 }
 0xd1b   : > { %3120 = vmatpush2.msra.mxu0 %v3069_v18 }
 0xd1c   : > { %3121 = vmatprep.subr.mxu0 %v3068_v21 }
 0xd1d   : > { %3122 = vmatpush2.msra.mxu0 %v3067_v36 }
 0xd1e   : > { %3123 = vmatprep.subr.mxu0 %v3066_v31 }
 0xd1f   : > { %3124 = vmatpush2.msra.mxu0 %v3065_v32  ;;  %v3170_v32 = vld [vmem:[%s14116_s16 + $0x90] sm:$0xff] }
 0xd20   : > { %3125 = vmatprep.subr.mxu0 %v3064_v33  ;;  %6436 = vmatprep.subr.mxu1 %v3170_v32  ;;  %v3154_v33 = vld [vmem:[%s14116_s16 + $0x10] sm:$0xff]  ;;  %v3362_v32 = vld [vmem:[%s14118_s18 + $0x68] sm:$0xff] }
 0xd21   : > { %3126 = vmatpush2.msra.mxu0 %v3063_v34  ;;  %6437 = vmatpush3.msra.mxu1 %v3154_v33  ;;  %v3169_v34 = vld [vmem:[%s14116_s16 + $0x88] sm:$0xff]  ;;  %v3361_v33 = vld [vmem:[%s14118_s18 + $0x60] sm:$0xff] }
 0xd22   : > { %3127 = vmatprep.subr.mxu0 %v3062_v19  ;;  %6438 = vmatprep.subr.mxu1 %v3169_v34  ;;  %v3153_v19 = vld [vmem:[%s14116_s16 + $0x8] sm:$0xff]  ;;  %v3360_v34 = vld [vmem:[%s14118_s18 + $0x58] sm:$0xff] }
 0xd23   : > { %3128 = vmatpush2.msra.mxu0 %v3061_v37  ;;  %6439 = vmatpush3.msra.mxu1 %v3153_v19  ;;  %v3168_v37 = vld [vmem:[%s14116_s16 + $0x80] sm:$0xff]  ;;  %v3359_v19 = vld [vmem:[%s14118_s18 + $0x50] sm:$0xff] }
 0xd24   : > { %3129 = vmatprep.subr.mxu0 %v3060_v39  ;;  %6440 = vmatprep.subr.mxu1 %v3168_v37  ;;  %v3152_v39 = vld [vmem:[%s14116_s16] sm:$0xff]  ;;  %v3358_v37 = vld [vmem:[%s14118_s18 + $0x48] sm:$0xff] }
 0xd25   : > { %3130 = vmatpush2.msra.mxu0 %v3059_v40  ;;  %6441 = vmatpush3.msra.mxu1 %v3152_v39  ;;  %v3270_v40 = vld [vmem:[%s14119_s19 + $0x78] sm:$0xff]  ;;  %v3357_v39 = vld [vmem:[%s14118_s18 + $0x40] sm:$0xff] }
 0xd26   : > { %3131 = vmatprep.subr.mxu0 %v3058_v42  ;;  %3290 = vmatprep.subr.mxu1 %v3270_v40  ;;  %v3356_v40 = vld [vmem:[%s14118_s18 + $0x38] sm:$0xff] }
 0xd27   : > { %3132 = vmatpush2.msra.mxu0 %v3057_v43 }
 0xd28   : > { %3133 = vmatprep.subr.mxu0 %v3056_v44 }
 0xd29   : > { %3134 = vmatpush2.msra.mxu0 %v3055_v45 }
 0xd2a   : > { %3135 = vmatprep.subr.mxu0 %v3054_v52  ;;  %v3269_v52 = vld [vmem:[%s14119_s19 + $0x70] sm:$0xff] }
 0xd2b   : > { %3136 = vmatpush2.msra.mxu0 %v3053_v53  ;;  %v3268_v53 = vld [vmem:[%s14119_s19 + $0x68] sm:$0xff] }
 0xd2c   : > { %3137 = vmatprep.subr.mxu0 %v3052_v54  ;;  %v3267_v54 = vld [vmem:[%s14119_s19 + $0x60] sm:$0xff] }
 0xd2d   : > { %3138 = vmatpush2.msra.mxu0 %v3051_v55  ;;  %v3266_v55 = vld [vmem:[%s14119_s19 + $0x58] sm:$0xff] }
 0xd2e   : > { %3139 = vmatprep.subr.mxu0 %v3050_v56  ;;  %v3265_v56 = vld [vmem:[%s14119_s19 + $0x50] sm:$0xff] }
 0xd2f   : > { %3140 = vmatpush2.msra.mxu0 %v3049_v57  ;;  %v3264_v57 = vld [vmem:[%s14119_s19 + $0x48] sm:$0xff] }
 0xd30   : > { %3141 = vmatprep.subr.mxu0 %v3048_v58  ;;  %v3263_v58 = vld [vmem:[%s14119_s19 + $0x40] sm:$0xff] }
 0xd31   : > { %3142 = vmatpush2.msra.mxu0 %v3047_v59  ;;  %v3261_v59 = vld [vmem:[%s14119_s19 + $0x30] sm:$0xff] }
 0xda2   : > { %v6407_v50 = vpop.f32.mrf.mxu0 }
 0xda4   : > { %v6408_v51 = vpop.f32.mrf.mxu0 }
 0xda5   : > { %v6409_v20 = vadd.f32 %v6408_v51, %v6407_v50  ;;  %v3365_v50 = vld [vmem:[%s14118_s18 + $0x80] sm:$0xff]  ;;  %v3364_v51 = vld [vmem:[%s14118_s18 + $0x78] sm:$0xff] }
 0xda7   : > { %v2921_v11 = vmul.f32 0.028125, %v6409_v20  ;;  %v3363_v20 = vld [vmem:[%s14118_s18 + $0x70] sm:$0xff] }
 0xda9   : > { %v10795_v38 = vsub.f32 %v6868_v38, %v2921_v11   ;;  %v3403_v11 = vld [vmem:[%s14118_s18 + $0x1b0] sm:$0xff] }
 0xdab   : > { %v14211_v14 = vmov %v10795_v38  ;;  %v3376_v38 = vld [vmem:[%s14118_s18 + $0xd8] sm:$0xff] }
 0xdac   :  { %3593 = vst.msk [vmem:[#allocation4] sm:$0xff] (%p749_p0), %vm100_vm0, %v14211_v14 }
 0xdb2   : > { %v10704_v18 = vpop.f32.mrf.mxu0 }
 0xdb3   : > { %v3013_v31 = vmax.f32 %v10704_v18, 0.0  ;;  %v3610_v18 = vld [vmem:[%s14216_s27 + $0x78] sm:$0xff] (%p749_p0) }
 0xdb4   : > { %v10706_v21 = vpop.f32.mrf.mxu0 }
 0xdb5   : > { %v3014_v36 = vmax.f32 %v10706_v21, 0.0  ;;  %vm3484_vm12 = vcmp.gt.f32.partialorder %v3013_v31, 0.0  ;;  %v3609_v21 = vld [vmem:[%s14216_s27 + $0x70] sm:$0xff] (%p749_p0) }
 0xdb7   : > { %3143 = vmatprep.mubr.f32.mxu0 %v3014_v36  ;;  %vm3485_vm11 = vcmp.gt.f32.partialorder %v3014_v36, 0.0  ;;  %v3608_v36 = vld [vmem:[%s14216_s27 + $0x68] sm:$0xff] (%p749_p0) }
 0xdb8   : > { %3144 = vmatmul.mubr.f32.vlgmr.msra.gmra.mxu0 %v3013_v31  ;;  %v3716_v31 = vld [vmem:[%s14217_s6 + $0xe8] sm:$0xff] (%p749_p0) }
 0xe78   : > { %v10735_v42 = vpop.f32.mrf.mxu0 }
 0xe79   : > { %v3150_v45 = vmax.f32 %v10735_v42, 0.0  ;;  %v3488_v42 = vld [vmem:[%s14117_s17] sm:$0xff] }
 0xe7a   : > { %v10737_v43 = vpop.f32.mrf.mxu0 }
 0xe7b   : > { %v3151_v44 = vmax.f32 %v10737_v43, 0.0  ;;  %vm3345_vm10 = vcmp.gt.f32.partialorder %v3150_v45, 0.0  ;;  %v3504_v43 = vld [vmem:[%s14117_s17 + $0x80] sm:$0xff] }
 0xe7d   : > { %3248 = vmatprep.mubr.f32.mxu1 %v3151_v44  ;;  %vm3346_vm9 = vcmp.gt.f32.partialorder %v3151_v44, 0.0 }
 0xe7e   : > { %3249 = vmatmul.mubr.f32.vlgmr.msra.gmra.mxu1 %v3150_v45 }
 0xe7f   : > { %3291 = vmatpush1.msra.mxu1 %v3269_v52  ;;  %3338 = vmatprep.mubr.f32.mxu1 %v6879_v41  ;;  %v3262_v41 = vld [vmem:[%s14119_s19 + $0x38] sm:$0xff]  ;;  %v3355_v52 = vld [vmem:[%s14118_s18 + $0x30] sm:$0xff] }
 0xe80   : > { %3292 = vmatprep.subr.mxu1 %v3268_v53  ;;  %v3354_v53 = vld [vmem:[%s14118_s18 + $0x28] sm:$0xff] }
 0xe81   : > { %3293 = vmatpush1.msra.mxu1 %v3267_v54  ;;  %v3353_v54 = vld [vmem:[%s14118_s18 + $0x20] sm:$0xff] }
 0xe82   : > { %3294 = vmatprep.subr.mxu1 %v3266_v55  ;;  %v3352_v55 = vld [vmem:[%s14118_s18 + $0x18] sm:$0xff] }
 0xe83   : > { %3295 = vmatpush1.msra.mxu1 %v3265_v56  ;;  %v3351_v56 = vld [vmem:[%s14118_s18 + $0x10] sm:$0xff] }
 0xe84   : > { %3296 = vmatprep.subr.mxu1 %v3264_v57  ;;  %v3350_v57 = vld [vmem:[%s14118_s18 + $0x8] sm:$0xff] }
 0xe85   : > { %3297 = vmatpush1.msra.mxu1 %v3263_v58  ;;  %v3349_v58 = vld [vmem:[%s14118_s18] sm:$0xff] }
 0xe86   : > { %3298 = vmatprep.subr.mxu1 %v3262_v41  ;;  %v3412_v41 = vld [vmem:[%s14118_s18 + $0x1f8] sm:$0xff] }
 0xe87   : > { %3299 = vmatpush1.msra.mxu1 %v3261_v59  ;;  %v3411_v59 = vld [vmem:[%s14118_s18 + $0x1f0] sm:$0xff] }
 0xe88   : > { %3300 = vmatprep.subr.mxu1 %v3260_v60  ;;  %v3410_v60 = vld [vmem:[%s14118_s18 + $0x1e8] sm:$0xff] }
 0xe89   : > { %3301 = vmatpush1.msra.mxu1 %v3259_v61  ;;  %v3409_v61 = vld [vmem:[%s14118_s18 + $0x1e0] sm:$0xff] }
 0xe8a   : > { %3302 = vmatprep.subr.mxu1 %v3258_v62  ;;  %v3408_v62 = vld [vmem:[%s14118_s18 + $0x1d8] sm:$0xff] }
 0xe8b   : > { %3303 = vmatpush1.msra.mxu1 %v3257_v63  ;;  %v3407_v63 = vld [vmem:[%s14118_s18 + $0x1d0] sm:$0xff] }
 0xe8c   : > { %3304 = vmatprep.subr.mxu1 %v3256_v8  ;;  %v3406_v8 = vld [vmem:[%s14118_s18 + $0x1c8] sm:$0xff] }
 0xe8d   : > { %3305 = vmatpush1.msra.mxu1 %v3255_v9  ;;  %v3405_v9 = vld [vmem:[%s14118_s18 + $0x1c0] sm:$0xff] }
 0xe8e   : > { %3413 = vmatprep.subr.mxu1 %v3380_v10  ;;  %v3404_v10 = vld [vmem:[%s14118_s18 + $0x1b8] sm:$0xff] }
 0xf3e   : > { %v6442_v12 = vpop.f32.mrf.mxu1 }
 0xf40   : > { %v6443_v13 = vpop.f32.mrf.mxu1 }
 0xf41   : > { %v6444_v16 = vadd.f32 %v6443_v13, %v6442_v12  ;;  %v3402_v12 = vld [vmem:[%s14118_s18 + $0x1a8] sm:$0xff]  ;;  %v3401_v13 = vld [vmem:[%s14118_s18 + $0x1a0] sm:$0xff] }
 0xf43   : > { %v3254_v17 = vsub.f32 %v6444_v16, %v14211_v14  ;;  %v3400_v16 = vld [vmem:[%s14118_s18 + $0x198] sm:$0xff] }
 0xf45   : > { %6190 = vmatmul.mubr.msk.f32.vlgmr.msra.gmra.mxu1 %vm100_vm0, %v3254_v17  ;;  %v3399_v17 = vld [vmem:[%s14118_s18 + $0x190] sm:$0xff] }
 0xf46   : > { %3414 = vmatpush1.msra.mxu1 %v3379_v22  ;;  %v3398_v22 = vld [vmem:[%s14118_s18 + $0x188] sm:$0xff] }
 0xf47   : > { %3415 = vmatprep.subr.mxu1 %v3378_v23  ;;  %v3397_v23 = vld [vmem:[%s14118_s18 + $0x180] sm:$0xff] }
 0xf48   : > { %3416 = vmatpush1.msra.mxu1 %v3377_v25  ;;  %v3396_v25 = vld [vmem:[%s14118_s18 + $0x178] sm:$0xff] }
 0xf49   : > { %3417 = vmatprep.subr.mxu1 %v3376_v38  ;;  %v3395_v38 = vld [vmem:[%s14118_s18 + $0x170] sm:$0xff] }
 0xf4a   : > { %3418 = vmatpush1.msra.mxu1 %v3375_v35  ;;  %v3394_v35 = vld [vmem:[%s14118_s18 + $0x168] sm:$0xff] }
 0xf4b   : > { %3419 = vmatprep.subr.mxu1 %v3374_v26  ;;  %v3393_v26 = vld [vmem:[%s14118_s18 + $0x160] sm:$0xff] }
 0xf4c   : > { %3420 = vmatpush1.msra.mxu1 %v3373_v27  ;;  %v3392_v27 = vld [vmem:[%s14118_s18 + $0x158] sm:$0xff] }
 0xf4d   : > { %3421 = vmatprep.subr.mxu1 %v3372_v28  ;;  %v3391_v28 = vld [vmem:[%s14118_s18 + $0x150] sm:$0xff] }
 0xf4e   : > { %3422 = vmatpush1.msra.mxu1 %v3371_v29  ;;  %v3390_v29 = vld [vmem:[%s14118_s18 + $0x148] sm:$0xff] }
 0xf4f   : > { %3423 = vmatprep.subr.mxu1 %v3370_v47  ;;  %v3389_v47 = vld [vmem:[%s14118_s18 + $0x140] sm:$0xff] }
 0xf50   : > { %3424 = vmatpush1.msra.mxu1 %v3369_v46  ;;  %v3388_v46 = vld [vmem:[%s14118_s18 + $0x138] sm:$0xff] }
 0xf51   : > { %3425 = vmatprep.subr.mxu1 %v3368_v48  ;;  %v3387_v48 = vld [vmem:[%s14118_s18 + $0x130] sm:$0xff] }
 0xf52   : > { %3426 = vmatpush1.msra.mxu1 %v3367_v49  ;;  %v3386_v49 = vld [vmem:[%s14118_s18 + $0x128] sm:$0xff] }
 0xf53   : > { %3427 = vmatprep.subr.mxu1 %v3366_v30  ;;  %v3385_v30 = vld [vmem:[%s14118_s18 + $0x120] sm:$0xff] }
 0xf54   : > { %3428 = vmatpush1.msra.mxu1 %v3365_v50  ;;  %v3384_v50 = vld [vmem:[%s14118_s18 + $0x118] sm:$0xff] }
 0xf55   : > { %3429 = vmatprep.subr.mxu1 %v3364_v51  ;;  %v3383_v51 = vld [vmem:[%s14118_s18 + $0x110] sm:$0xff] }
 0xf56   : > { %3430 = vmatpush1.msra.mxu1 %v3363_v20  ;;  %v3382_v20 = vld [vmem:[%s14118_s18 + $0x108] sm:$0xff] }
 0xf57   : > { %3431 = vmatprep.subr.mxu1 %v3362_v32  ;;  %v3381_v32 = vld [vmem:[%s14118_s18 + $0x100] sm:$0xff]  ;;  %s14218_s18 = sld [smem:[#allocation56_spill]] (%p749_p0) }
 0xf58   : > { %3432 = vmatpush1.msra.mxu1 %v3361_v33  ;;  %v3519_v33 = vld [vmem:[%s14117_s17 + $0xf8] sm:$0xff] }
 0xf59   : > { %3433 = vmatprep.subr.mxu1 %v3360_v34  ;;  %v3503_v34 = vld [vmem:[%s14117_s17 + $0x78] sm:$0xff]  ;;  %6445 = vmatprep.subr.mxu0 %v3519_v33  ;;  %v3711_v33 = vld [vmem:[%s14217_s6 + $0xc0] sm:$0xff] (%p749_p0) }
 0xf5a   : > { %3434 = vmatpush1.msra.mxu1 %v3359_v19  ;;  %v3518_v19 = vld [vmem:[%s14117_s17 + $0xf0] sm:$0xff]  ;;  %6446 = vmatpush3.msra.mxu0 %v3503_v34 }
 0xf5b   : > { %3435 = vmatprep.subr.mxu1 %v3358_v37  ;;  %v3502_v37 = vld [vmem:[%s14117_s17 + $0x70] sm:$0xff]  ;;  %6447 = vmatprep.subr.mxu0 %v3518_v19  ;;  %v3710_v19 = vld [vmem:[%s14217_s6 + $0xb8] sm:$0xff] (%p749_p0) }
 0xf5c   : > { %3436 = vmatpush1.msra.mxu1 %v3357_v39  ;;  %v3517_v39 = vld [vmem:[%s14117_s17 + $0xe8] sm:$0xff]  ;;  %6448 = vmatpush3.msra.mxu0 %v3502_v37  ;;  %v3597_v34 = vld [vmem:[%s14216_s27 + $0x10] sm:$0xff] (%p749_p0) }
 0xf5d   : > { %3437 = vmatprep.subr.mxu1 %v3356_v40  ;;  %v3501_v40 = vld [vmem:[%s14117_s17 + $0x68] sm:$0xff]  ;;  %6449 = vmatprep.subr.mxu0 %v3517_v39  ;;  %v3709_v39 = vld [vmem:[%s14217_s6 + $0xb0] sm:$0xff] (%p749_p0) }
 0xf5e   : > { %3438 = vmatpush1.msra.mxu1 %v3355_v52  ;;  %v3516_v52 = vld [vmem:[%s14117_s17 + $0xe0] sm:$0xff]  ;;  %6450 = vmatpush3.msra.mxu0 %v3501_v40  ;;  %v3596_v37 = vld [vmem:[%s14216_s27 + $0x8] sm:$0xff] (%p749_p0) }
 0xf5f   : > { %3439 = vmatprep.subr.mxu1 %v3354_v53  ;;  %v3500_v53 = vld [vmem:[%s14117_s17 + $0x60] sm:$0xff]  ;;  %6451 = vmatprep.subr.mxu0 %v3516_v52  ;;  %v3708_v52 = vld [vmem:[%s14217_s6 + $0xa8] sm:$0xff] (%p749_p0) }
 0xf60   : > { %3440 = vmatpush1.msra.mxu1 %v3353_v54  ;;  %v3515_v54 = vld [vmem:[%s14117_s17 + $0xd8] sm:$0xff]  ;;  %6452 = vmatpush3.msra.mxu0 %v3500_v53  ;;  %v3595_v40 = vld [vmem:[%s14216_s27] sm:$0xff] (%p749_p0) }
 0xf61   : > { %3441 = vmatprep.subr.mxu1 %v3352_v55  ;;  %v3499_v55 = vld [vmem:[%s14117_s17 + $0x58] sm:$0xff]  ;;  %6453 = vmatprep.subr.mxu0 %v3515_v54  ;;  %v3707_v53 = vld [vmem:[%s14217_s6 + $0xa0] sm:$0xff] (%p749_p0) }
 0xf62   : > { %3442 = vmatpush1.msra.mxu1 %v3351_v56  ;;  %v3514_v56 = vld [vmem:[%s14117_s17 + $0xd0] sm:$0xff]  ;;  %6454 = vmatpush3.msra.mxu0 %v3499_v55  ;;  %v3706_v54 = vld [vmem:[%s14217_s6 + $0x98] sm:$0xff] (%p749_p0) }
 0xf63   : > { %3443 = vmatprep.subr.mxu1 %v3350_v57  ;;  %v3498_v57 = vld [vmem:[%s14117_s17 + $0x50] sm:$0xff]  ;;  %6455 = vmatprep.subr.mxu0 %v3514_v56  ;;  %v3704_v56 = vld [vmem:[%s14217_s6 + $0x88] sm:$0xff] (%p749_p0) }
 0xf64   : > { %3444 = vmatpush1.msra.mxu1 %v3349_v58  ;;  %v3513_v58 = vld [vmem:[%s14117_s17 + $0xc8] sm:$0xff]  ;;  %6456 = vmatpush3.msra.mxu0 %v3498_v57  ;;  %v3705_v55 = vld [vmem:[%s14217_s6 + $0x90] sm:$0xff] (%p749_p0)  ;;  %v3703_v57 = vld [vmem:[%s14217_s6 + $0x80] sm:$0xff] (%p749_p0) }
 0xf65   : > { %3445 = vmatprep.subr.mxu1 %v3412_v41  ;;  %v3497_v41 = vld [vmem:[%s14117_s17 + $0x48] sm:$0xff]  ;;  %6457 = vmatprep.subr.mxu0 %v3513_v58  ;;  %v3702_v58 = vld [vmem:[%s14217_s6 + $0x78] sm:$0xff] (%p749_p0) }
 0xf66   : > { %3446 = vmatpush2.msra.mxu1 %v3411_v59  ;;  %v3512_v59 = vld [vmem:[%s14117_s17 + $0xc0] sm:$0xff]  ;;  %6458 = vmatpush3.msra.mxu0 %v3497_v41  ;;  %v3700_v41 = vld [vmem:[%s14217_s6 + $0x68] sm:$0xff] (%p749_p0) }
 0xf67   : > { %3447 = vmatprep.subr.mxu1 %v3410_v60  ;;  %v3496_v60 = vld [vmem:[%s14117_s17 + $0x40] sm:$0xff]  ;;  %6459 = vmatprep.subr.mxu0 %v3512_v59 }
 0xf68   : > { %3448 = vmatpush2.msra.mxu1 %v3409_v61  ;;  %v3511_v61 = vld [vmem:[%s14117_s17 + $0xb8] sm:$0xff]  ;;  %6460 = vmatpush3.msra.mxu0 %v3496_v60  ;;  %v3699_v59 = vld [vmem:[%s14217_s6 + $0x60] sm:$0xff] (%p749_p0) }
 0xf69   : > { %3449 = vmatprep.subr.mxu1 %v3408_v62  ;;  %v3495_v62 = vld [vmem:[%s14117_s17 + $0x38] sm:$0xff]  ;;  %6461 = vmatprep.subr.mxu0 %v3511_v61  ;;  %v3697_v61 = vld [vmem:[%s14217_s6 + $0x50] sm:$0xff] (%p749_p0) }
 0xf6a   : > { %3450 = vmatpush2.msra.mxu1 %v3407_v63  ;;  %v3510_v63 = vld [vmem:[%s14117_s17 + $0xb0] sm:$0xff]  ;;  %6462 = vmatpush3.msra.mxu0 %v3495_v62  ;;  %v3698_v60 = vld [vmem:[%s14217_s6 + $0x58] sm:$0xff] (%p749_p0)  ;;  %v3696_v62 = vld [vmem:[%s14217_s6 + $0x48] sm:$0xff] (%p749_p0) }
 0xf6b   : > { %3451 = vmatprep.subr.mxu1 %v3406_v8  ;;  %v3494_v8 = vld [vmem:[%s14117_s17 + $0x30] sm:$0xff]  ;;  %6463 = vmatprep.subr.mxu0 %v3510_v63  ;;  %v3695_v63 = vld [vmem:[%s14217_s6 + $0x40] sm:$0xff] (%p749_p0) }
 0xf6c   : > { %3452 = vmatpush2.msra.mxu1 %v3405_v9  ;;  %v3509_v9 = vld [vmem:[%s14117_s17 + $0xa8] sm:$0xff]  ;;  %6464 = vmatpush3.msra.mxu0 %v3494_v8  ;;  %v3694_v8 = vld [vmem:[%s14217_s6 + $0x38] sm:$0xff] (%p749_p0) }
 0xf6d   : > { %3453 = vmatprep.subr.mxu1 %v3404_v10  ;;  %v3493_v10 = vld [vmem:[%s14117_s17 + $0x28] sm:$0xff]  ;;  %6465 = vmatprep.subr.mxu0 %v3509_v9  ;;  %v3693_v9 = vld [vmem:[%s14217_s6 + $0x30] sm:$0xff] (%p749_p0) }
 0xf6e   : > { %3454 = vmatpush2.msra.mxu1 %v3403_v11  ;;  %v3508_v11 = vld [vmem:[%s14117_s17 + $0xa0] sm:$0xff]  ;;  %6466 = vmatpush3.msra.mxu0 %v3493_v10  ;;  %v3692_v10 = vld [vmem:[%s14217_s6 + $0x28] sm:$0xff] (%p749_p0) }
 0xf6f   : > { %3455 = vmatprep.subr.mxu1 %v3402_v12  ;;  %v3492_v12 = vld [vmem:[%s14117_s17 + $0x20] sm:$0xff]  ;;  %6467 = vmatprep.subr.mxu0 %v3508_v11 }
 0xf70   : > { %3456 = vmatpush2.msra.mxu1 %v3401_v13  ;;  %v3507_v13 = vld [vmem:[%s14117_s17 + $0x98] sm:$0xff]  ;;  %6468 = vmatpush3.msra.mxu0 %v3492_v12  ;;  %v3691_v11 = vld [vmem:[%s14217_s6 + $0x20] sm:$0xff] (%p749_p0) }
 0xf71   : > { %3457 = vmatprep.subr.mxu1 %v3400_v16  ;;  %v3491_v16 = vld [vmem:[%s14117_s17 + $0x18] sm:$0xff]  ;;  %6469 = vmatprep.subr.mxu0 %v3507_v13  ;;  %v3689_v13 = vld [vmem:[%s14217_s6 + $0x10] sm:$0xff] (%p749_p0) }
 0xf72   : > { %3458 = vmatpush2.msra.mxu1 %v3399_v17  ;;  %v3506_v17 = vld [vmem:[%s14117_s17 + $0x90] sm:$0xff]  ;;  %6470 = vmatpush3.msra.mxu0 %v3491_v16  ;;  %v3690_v12 = vld [vmem:[%s14217_s6 + $0x18] sm:$0xff] (%p749_p0)  ;;  %v3688_v16 = vld [vmem:[%s14217_s6 + $0x8] sm:$0xff] (%p749_p0) }
 0xf73   : > { %3459 = vmatprep.subr.mxu1 %v3398_v22  ;;  %v3490_v22 = vld [vmem:[%s14117_s17 + $0x10] sm:$0xff]  ;;  %6471 = vmatprep.subr.mxu0 %v3506_v17  ;;  %v3687_v17 = vld [vmem:[%s14217_s6] sm:$0xff] (%p749_p0) }
 0xf74   : > { %3460 = vmatpush2.msra.mxu1 %v3397_v23  ;;  %6472 = vmatpush3.msra.mxu0 %v3490_v22  ;;  %v3750_v22 = vld [vmem:[%s14217_s6 + $0x1f8] sm:$0xff] (%p749_p0) }
 0xf75   : > { %3461 = vmatprep.subr.mxu1 %v3396_v25 }
 0xf76   : > { %3462 = vmatpush2.msra.mxu1 %v3395_v38  ;;  %v3505_v38 = vld [vmem:[%s14117_s17 + $0x88] sm:$0xff] }
 0xf77   : > { %3463 = vmatprep.subr.mxu1 %v3394_v35  ;;  %6473 = vmatprep.subr.mxu0 %v3505_v38  ;;  %v3489_v35 = vld [vmem:[%s14117_s17 + $0x8] sm:$0xff]  ;;  %v14214_v38 = vmov %v14211_v14 }
 0xf78   : > { %3464 = vmatpush2.msra.mxu1 %v3393_v26  ;;  %6474 = vmatpush3.msra.mxu0 %v3489_v35  ;;  %v14215_v35 = vmov %v14210_v15  ;;  %v3747_v38 = vld [vmem:[%s14217_s6 + $0x1e0] sm:$0xff] (%p749_p0) }
 0xf79   : > { %3465 = vmatprep.subr.mxu1 %v3392_v27  ;;  %6475 = vmatprep.subr.mxu0 %v3504_v43  ;;  %v3746_v35 = vld [vmem:[%s14217_s6 + $0x1d8] sm:$0xff] (%p749_p0)  ;;  %v3745_v43 = vld [vmem:[%s14217_s6 + $0x1d0] sm:$0xff] (%p749_p0) }
 0xf7a   : > { %3466 = vmatpush2.msra.mxu1 %v3391_v28  ;;  %6476 = vmatpush3.msra.mxu0 %v3488_v42  ;;  %v3744_v42 = vld [vmem:[%s14217_s6 + $0x1c8] sm:$0xff] (%p749_p0) }
 0xf7b   : > { %3467 = vmatprep.subr.mxu1 %v3390_v29  ;;  %3630 = vmatprep.subr.mxu0 (%p749_p0), %v3610_v18  ;;  %v3737_v18 = vld [vmem:[%s14217_s6 + $0x190] sm:$0xff] (%p749_p0) }
 0xf7c   : > { %3468 = vmatpush2.msra.mxu1 %v3389_v47 }
 0xf7d   : > { %3469 = vmatprep.subr.mxu1 %v3388_v46  ;;  %v3715_v46 = vld [vmem:[%s14217_s6 + $0xe0] sm:$0xff] (%p749_p0) }
 0xf7e   : > { %3470 = vmatpush2.msra.mxu1 %v3387_v48  ;;  %v3601_v48 = vld [vmem:[%s14216_s27 + $0x30] sm:$0xff] (%p749_p0) }
 0xf7f   : > { %3471 = vmatprep.subr.mxu1 %v3386_v49  ;;  %v3714_v49 = vld [vmem:[%s14217_s6 + $0xd8] sm:$0xff] (%p749_p0) }
 0xf80   : > { %3472 = vmatpush2.msra.mxu1 %v3385_v30  ;;  %v3600_v30 = vld [vmem:[%s14216_s27 + $0x28] sm:$0xff] (%p749_p0) }
 0xf81   : > { %3473 = vmatprep.subr.mxu1 %v3384_v50  ;;  %v3713_v50 = vld [vmem:[%s14217_s6 + $0xd0] sm:$0xff] (%p749_p0) }
 0xf82   : > { %3474 = vmatpush2.msra.mxu1 %v3383_v51  ;;  %v3599_v51 = vld [vmem:[%s14216_s27 + $0x20] sm:$0xff] (%p749_p0) }
 0xf83   : > { %3475 = vmatprep.subr.mxu1 %v3382_v20  ;;  %v3712_v20 = vld [vmem:[%s14217_s6 + $0xc8] sm:$0xff] (%p749_p0) }
 0xf84   : > { %3476 = vmatpush2.msra.mxu1 %v3381_v32  ;;  %v3598_v32 = vld [vmem:[%s14216_s27 + $0x18] sm:$0xff] (%p749_p0) }
 0xf85   :  { %3751 = vmatprep.subr.mxu1 (%p749_p0), %v3718_v6  ;;  %v3729_v6 = vld [vmem:[%s14217_s6 + $0x150] sm:$0xff] (%p749_p0) }
0x1005   : > { %v3340_v23 = vpop.f32.mrf.mxu1 }
0x1007   : > { %v3342_v25 = vpop.f32.mrf.mxu1 }
0x1008   : > { %6191 = vmatprep.mubr.msk.f32.mxu1 %vm3346_vm9, %v3342_v25  ;;  %v3748_v25 = vld [vmem:[%s14217_s6 + $0x1e8] sm:$0xff] (%p749_p0) }
0x1009   : > { %6192 = vmatmul.mubr.msk.f32.vlgmr.msra.gmra.mxu1 %vm3345_vm10, %v3340_v23  ;;  %v3749_v23 = vld [vmem:[%s14217_s6 + $0x1f0] sm:$0xff] (%p749_p0) }
0x100a   :  { %3752 = vmatpush1.msra.mxu1 (%p749_p0), %v3717_v7  ;;  %v3728_v7 = vld [vmem:[%s14217_s6 + $0x148] sm:$0xff] (%p749_p0) }
0x100b   :  { %3753 = vmatprep.subr.mxu1 (%p749_p0), %v3716_v31  ;;  %v3726_v31 = vld [vmem:[%s14217_s6 + $0x138] sm:$0xff] (%p749_p0) }
0x100c   :  { %3754 = vmatpush1.msra.mxu1 (%p749_p0), %v3715_v46  ;;  %v3725_v46 = vld [vmem:[%s14217_s6 + $0x130] sm:$0xff] (%p749_p0) }
0x100d   :  { %3755 = vmatprep.subr.mxu1 (%p749_p0), %v3714_v49  ;;  %v3723_v49 = vld [vmem:[%s14217_s6 + $0x120] sm:$0xff] (%p749_p0) }
0x100e   :  { %3756 = vmatpush1.msra.mxu1 (%p749_p0), %v3713_v50  ;;  %v3721_v50 = vld [vmem:[%s14217_s6 + $0x110] sm:$0xff] (%p749_p0) }
0x100f   :  { %3757 = vmatprep.subr.mxu1 (%p749_p0), %v3712_v20  ;;  %v3719_v20 = vld [vmem:[%s14217_s6 + $0x100] sm:$0xff] (%p749_p0) }
0x1010   :  { %3758 = vmatpush1.msra.mxu1 (%p749_p0), %v3711_v33  ;;  %v3932_v33 = vld [vmem:[%s14218_s18 + $0x360] sm:$0xff] (%p749_p0) }
0x1011   :  { %3759 = vmatprep.subr.mxu1 (%p749_p0), %v3710_v19  ;;  %v3923_v19 = vld [vmem:[%s14218_s18 + $0x318] sm:$0xff] (%p749_p0) }
0x1012   :  { %3760 = vmatpush1.msra.mxu1 (%p749_p0), %v3709_v39  ;;  %v3916_v39 = vld [vmem:[%s14218_s18 + $0x2e0] sm:$0xff] (%p749_p0) }
0x1013   :  { %3761 = vmatprep.subr.mxu1 (%p749_p0), %v3708_v52  ;;  %v3909_v52 = vld [vmem:[%s14218_s18 + $0x2a8] sm:$0xff] (%p749_p0) }
0x1014   :  { %3762 = vmatpush1.msra.mxu1 (%p749_p0), %v3707_v53  ;;  %v3908_v53 = vld [vmem:[%s14218_s18 + $0x2a0] sm:$0xff] (%p749_p0) }
0x1015   :  { %3763 = vmatprep.subr.mxu1 (%p749_p0), %v3706_v54  ;;  %v3902_v54 = vld [vmem:[%s14218_s18 + $0x270] sm:$0xff] (%p749_p0) }
0x1016   :  { %3764 = vmatpush1.msra.mxu1 (%p749_p0), %v3705_v55  ;;  %v3901_v55 = vld [vmem:[%s14218_s18 + $0x268] sm:$0xff] (%p749_p0) }
0x1017   :  { %3765 = vmatprep.subr.mxu1 (%p749_p0), %v3704_v56  ;;  %v3895_v56 = vld [vmem:[%s14218_s18 + $0x238] sm:$0xff] (%p749_p0) }
0x1018   :  { %3766 = vmatpush1.msra.mxu1 (%p749_p0), %v3703_v57  ;;  %v3894_v57 = vld [vmem:[%s14218_s18 + $0x230] sm:$0xff] (%p749_p0) }
0x1019   :  { %3767 = vmatprep.subr.mxu1 (%p749_p0), %v3702_v58  ;;  %v3888_v58 = vld [vmem:[%s14218_s18 + $0x200] sm:$0xff] (%p749_p0) }
0x10c9   : > { %v3479_v44 = vpop.f32.mrf.mxu1 }
0x10cb   : > { %v3481_v45 = vpop.f32.mrf.mxu1 }
0x10cc   : > { %6193 = vmatprep.mubr.msk.f32.mxu0 %vm3485_vm11, %v3481_v45  ;;  %v3742_v45 = vld [vmem:[%s14217_s6 + $0x1b8] sm:$0xff] (%p749_p0) }
0x10cd   : > { %6194 = vmatmul.mubr.msk.f32.vlgmr.msra.gmra.mxu0 %vm3484_vm12, %v3479_v44  ;;  %v3743_v44 = vld [vmem:[%s14217_s6 + $0x1c0] sm:$0xff] (%p749_p0) }
0x10ce   :  { %3678 = vmatprep.mubr.f32.mxu0 (%p749_p0), %v14147_v5  ;;  %3631 = vmatpush1.msra.mxu0 (%p749_p0), %v3609_v21  ;;  %v3736_v21 = vld [vmem:[%s14217_s6 + $0x188] sm:$0xff] (%p749_p0) }
0x10cf   :  { %3632 = vmatprep.subr.mxu0 (%p749_p0), %v3608_v36  ;;  %v3735_v36 = vld [vmem:[%s14217_s6 + $0x180] sm:$0xff] (%p749_p0) }
0x10d0   :  { %3633 = vmatpush1.msra.mxu0 (%p749_p0), %v3607_v0  ;;  %v3734_v0 = vld [vmem:[%s14217_s6 + $0x178] sm:$0xff] (%p749_p0) }
0x10d1   :  { %3634 = vmatprep.subr.mxu0 (%p749_p0), %v3606_v1  ;;  %v3733_v1 = vld [vmem:[%s14217_s6 + $0x170] sm:$0xff] (%p749_p0) }
0x10d2   :  { %3635 = vmatpush1.msra.mxu0 (%p749_p0), %v3605_v2  ;;  %v3732_v2 = vld [vmem:[%s14217_s6 + $0x168] sm:$0xff] (%p749_p0) }
0x10d3   :  { %3636 = vmatprep.subr.mxu0 (%p749_p0), %v3604_v3  ;;  %v3731_v3 = vld [vmem:[%s14217_s6 + $0x160] sm:$0xff] (%p749_p0) }
0x10d4   :  { %3637 = vmatpush1.msra.mxu0 (%p749_p0), %v3603_v4  ;;  %v3730_v4 = vld [vmem:[%s14217_s6 + $0x158] sm:$0xff] (%p749_p0) }
0x118d   : > { %v6477_v26 = vpop.f32.mrf.mxu0 }
0x118f   : > { %v6478_v27 = vpop.f32.mrf.mxu0 }
0x1190   : > { %v6479_v28 = vadd.f32 %v6478_v27, %v6477_v26  ;;  %v3741_v26 = vld [vmem:[%s14217_s6 + $0x1b0] sm:$0xff] (%p749_p0)  ;;  %v3740_v27 = vld [vmem:[%s14217_s6 + $0x1a8] sm:$0xff] (%p749_p0) }
0x1192   : > { %v3590_v29 = vmul.f32 0.028125, %v6479_v28  ;;  %v3739_v28 = vld [vmem:[%s14217_s6 + $0x1a0] sm:$0xff] (%p749_p0) }
0x1193   :  { %751 = sbr.rel (!%p749_p0) target bundleno = 1217 (0x4c1), region = 155 }
0x1194   : > { %v11093_v24 = vsub.f32 %v6864_v24, %v3590_v29   ;;  %v3738_v29 = vld [vmem:[%s14217_s6 + $0x198] sm:$0xff] (%p749_p0) }
0x1196   : > { %v14212_v47 = vmov %v11093_v24 }
0x1197   : > { %v14213_v24 = vmov %v14212_v47  ;;  %3594 = vst.msk [vmem:[#allocation6] sm:$0xff] (%p749_p0), %vm100_vm0, %v14212_v47 }
0x1198   :  { %v3602_v24 = vld [vmem:[%s14216_s27 + $0x38] sm:$0xff] }
0x1199   :  { %3638 = vmatprep.subr.mxu0 %v3602_v24  ;;  %v3727_v24 = vld [vmem:[%s14217_s6 + $0x140] sm:$0xff] }
0x119a   :  { %3639 = vmatpush1.msra.mxu0 %v3601_v48  ;;  %v3724_v48 = vld [vmem:[%s14217_s6 + $0x128] sm:$0xff] }
0x119b   :  { %3640 = vmatprep.subr.mxu0 %v3600_v30  ;;  %v3722_v30 = vld [vmem:[%s14217_s6 + $0x118] sm:$0xff] }
0x119c   :  { %3641 = vmatpush1.msra.mxu0 %v3599_v51  ;;  %v3720_v51 = vld [vmem:[%s14217_s6 + $0x108] sm:$0xff] }
0x119d   :  { %3642 = vmatprep.subr.mxu0 %v3598_v32  ;;  %v3930_v32 = vld [vmem:[%s14218_s18 + $0x350] sm:$0xff] }
0x119e   :  { %3643 = vmatpush1.msra.mxu0 %v3597_v34  ;;  %v3929_v34 = vld [vmem:[%s14218_s18 + $0x348] sm:$0xff] }
0x119f   :  { %3644 = vmatprep.subr.mxu0 %v3596_v37  ;;  %v3922_v37 = vld [vmem:[%s14218_s18 + $0x310] sm:$0xff] }
0x11a0   :  { %3645 = vmatpush1.msra.mxu0 %v3595_v40  ;;  %v3915_v40 = vld [vmem:[%s14218_s18 + $0x2d8] sm:$0xff] }
0x11a1   :  { %6195 = vmatmul.mubr.msk.f32.vlgmr.msra.gmra.mxu0 %vm100_vm0, %v14210_v15  ;;  %v3701_v15 = vld [vmem:[%s14217_s6 + $0x70] sm:$0xff]  ;;  %4048 = vmatprep.subr.mxu0 %v3930_v32 }
0x11a2   :  { %3768 = vmatpush1.msra.mxu1 %v3701_v15  ;;  %4049 = vmatpush1.msra.mxu0 %v3929_v34  ;;  %v3887_v15 = vld [vmem:[%s14218_s18 + $0x1f8] sm:$0xff] }
0x11a3   :  { %3769 = vmatprep.subr.mxu1 %v3700_v41  ;;  %4050 = vmatprep.subr.mxu0 %v3923_v19  ;;  %v3881_v41 = vld [vmem:[%s14218_s18 + $0x1c8] sm:$0xff]  ;;  %v3931_v19 = vld [vmem:[%s14218_s18 + $0x358] sm:$0xff] }
0x11a4   :  { %3770 = vmatpush1.msra.mxu1 %v3699_v59  ;;  %4051 = vmatpush1.msra.mxu0 %v3922_v37  ;;  %v3880_v59 = vld [vmem:[%s14218_s18 + $0x1c0] sm:$0xff]  ;;  %v3925_v37 = vld [vmem:[%s14218_s18 + $0x328] sm:$0xff] }
0x11a5   :  { %3771 = vmatprep.subr.mxu1 %v3698_v60  ;;  %4052 = vmatprep.subr.mxu0 %v3916_v39  ;;  %v3874_v60 = vld [vmem:[%s14218_s18 + $0x190] sm:$0xff]  ;;  %v3924_v39 = vld [vmem:[%s14218_s18 + $0x320] sm:$0xff] }
0x11a6   :  { %3772 = vmatpush1.msra.mxu1 %v3697_v61  ;;  %4053 = vmatpush1.msra.mxu0 %v3915_v40  ;;  %v3873_v61 = vld [vmem:[%s14218_s18 + $0x188] sm:$0xff]  ;;  %v3918_v40 = vld [vmem:[%s14218_s18 + $0x2f0] sm:$0xff] }
0x11a7   :  { %3773 = vmatprep.subr.mxu1 %v3696_v62  ;;  %4054 = vmatprep.subr.mxu0 %v3909_v52  ;;  %v3867_v62 = vld [vmem:[%s14218_s18 + $0x158] sm:$0xff]  ;;  %v3917_v52 = vld [vmem:[%s14218_s18 + $0x2e8] sm:$0xff] }
0x11a8   :  { %3774 = vmatpush1.msra.mxu1 %v3695_v63  ;;  %4055 = vmatpush1.msra.mxu0 %v3908_v53  ;;  %v3866_v63 = vld [vmem:[%s14218_s18 + $0x150] sm:$0xff]  ;;  %v3911_v53 = vld [vmem:[%s14218_s18 + $0x2b8] sm:$0xff] }
0x11a9   :  { %3775 = vmatprep.subr.mxu1 %v3694_v8  ;;  %4056 = vmatprep.subr.mxu0 %v3902_v54  ;;  %v3860_v8 = vld [vmem:[%s14218_s18 + $0x120] sm:$0xff]  ;;  %v3910_v54 = vld [vmem:[%s14218_s18 + $0x2b0] sm:$0xff] }
0x11aa   :  { %3776 = vmatpush1.msra.mxu1 %v3693_v9  ;;  %4057 = vmatpush1.msra.mxu0 %v3901_v55  ;;  %v3859_v9 = vld [vmem:[%s14218_s18 + $0x118] sm:$0xff]  ;;  %v3904_v55 = vld [vmem:[%s14218_s18 + $0x280] sm:$0xff] }
0x11ab   :  { %3777 = vmatprep.subr.mxu1 %v3692_v10  ;;  %4058 = vmatprep.subr.mxu0 %v3895_v56  ;;  %v3853_v10 = vld [vmem:[%s14218_s18 + $0xe8] sm:$0xff]  ;;  %v3903_v56 = vld [vmem:[%s14218_s18 + $0x278] sm:$0xff] }
0x11ac   :  { %3778 = vmatpush1.msra.mxu1 %v3691_v11  ;;  %4059 = vmatpush1.msra.mxu0 %v3894_v57  ;;  %v3852_v11 = vld [vmem:[%s14218_s18 + $0xe0] sm:$0xff]  ;;  %v3897_v57 = vld [vmem:[%s14218_s18 + $0x248] sm:$0xff] }
0x11ad   :  { %3779 = vmatprep.subr.mxu1 %v3690_v12  ;;  %4060 = vmatprep.subr.mxu0 %v3888_v58  ;;  %v3846_v12 = vld [vmem:[%s14218_s18 + $0xb0] sm:$0xff]  ;;  %v3896_v58 = vld [vmem:[%s14218_s18 + $0x240] sm:$0xff] }
0x11ae   :  { %3780 = vmatpush1.msra.mxu1 %v3689_v13  ;;  %4061 = vmatpush1.msra.mxu0 %v3887_v15  ;;  %v3845_v13 = vld [vmem:[%s14218_s18 + $0xa8] sm:$0xff]  ;;  %v3890_v15 = vld [vmem:[%s14218_s18 + $0x210] sm:$0xff] }
0x11af   :  { %3781 = vmatprep.subr.mxu1 %v3688_v16  ;;  %4062 = vmatprep.subr.mxu0 %v3881_v41  ;;  %v3839_v16 = vld [vmem:[%s14218_s18 + $0x78] sm:$0xff]  ;;  %v3889_v41 = vld [vmem:[%s14218_s18 + $0x208] sm:$0xff] }
0x11b0   :  { %3782 = vmatpush1.msra.mxu1 %v3687_v17  ;;  %4063 = vmatpush1.msra.mxu0 %v3880_v59  ;;  %v3838_v17 = vld [vmem:[%s14218_s18 + $0x70] sm:$0xff]  ;;  %v3883_v59 = vld [vmem:[%s14218_s18 + $0x1d8] sm:$0xff] }
0x11b1   :  { %3783 = vmatprep.subr.mxu1 %v3750_v22  ;;  %4064 = vmatprep.subr.mxu0 %v3874_v60  ;;  %v3832_v22 = vld [vmem:[%s14218_s18 + $0x40] sm:$0xff]  ;;  %v3882_v60 = vld [vmem:[%s14218_s18 + $0x1d0] sm:$0xff] }
0x11b2   :  { %3784 = vmatpush2.msra.mxu1 %v3749_v23  ;;  %4065 = vmatpush1.msra.mxu0 %v3873_v61  ;;  %v3831_v23 = vld [vmem:[%s14218_s18 + $0x38] sm:$0xff]  ;;  %v3876_v61 = vld [vmem:[%s14218_s18 + $0x1a0] sm:$0xff] }
0x11b3   :  { %3785 = vmatprep.subr.mxu1 %v3748_v25  ;;  %4066 = vmatprep.subr.mxu0 %v3867_v62  ;;  %v3825_v25 = vld [vmem:[%s14218_s18 + $0x8] sm:$0xff]  ;;  %v3875_v62 = vld [vmem:[%s14218_s18 + $0x198] sm:$0xff] }
0x11b4   :  { %3786 = vmatpush2.msra.mxu1 %v3747_v38  ;;  %4067 = vmatpush1.msra.mxu0 %v3866_v63  ;;  %v3824_v38 = vld [vmem:[%s14218_s18] sm:$0xff]  ;;  %v3869_v63 = vld [vmem:[%s14218_s18 + $0x168] sm:$0xff] }
0x11b5   :  { %3787 = vmatprep.subr.mxu1 %v3746_v35  ;;  %4068 = vmatprep.subr.mxu0 %v3860_v8  ;;  %v4042_v35 = vld [vmem:[%s14218_s18 + $0x6d0] sm:$0xff]  ;;  %v3868_v8 = vld [vmem:[%s14218_s18 + $0x160] sm:$0xff] }
0x11b6   :  { %3788 = vmatpush2.msra.mxu1 %v3745_v43  ;;  %4069 = vmatpush1.msra.mxu0 %v3859_v9  ;;  %v4041_v43 = vld [vmem:[%s14218_s18 + $0x6c8] sm:$0xff]  ;;  %v3862_v9 = vld [vmem:[%s14218_s18 + $0x130] sm:$0xff] }
0x11b7   :  { %3789 = vmatprep.subr.mxu1 %v3744_v42  ;;  %4070 = vmatprep.subr.mxu0 %v3853_v10  ;;  %v4035_v42 = vld [vmem:[%s14218_s18 + $0x698] sm:$0xff]  ;;  %v3861_v10 = vld [vmem:[%s14218_s18 + $0x128] sm:$0xff] }
0x11b8   :  { %3790 = vmatpush2.msra.mxu1 %v3743_v44  ;;  %4071 = vmatpush1.msra.mxu0 %v3852_v11  ;;  %v4034_v44 = vld [vmem:[%s14218_s18 + $0x690] sm:$0xff]  ;;  %v3855_v11 = vld [vmem:[%s14218_s18 + $0xf8] sm:$0xff] }
0x11b9   :  { %3791 = vmatprep.subr.mxu1 %v3742_v45  ;;  %4072 = vmatprep.subr.mxu0 %v3846_v12  ;;  %v4028_v45 = vld [vmem:[%s14218_s18 + $0x660] sm:$0xff]  ;;  %v3854_v12 = vld [vmem:[%s14218_s18 + $0xf0] sm:$0xff] }
0x11ba   :  { %3792 = vmatpush2.msra.mxu1 %v3741_v26  ;;  %4073 = vmatpush1.msra.mxu0 %v3845_v13  ;;  %v4027_v26 = vld [vmem:[%s14218_s18 + $0x658] sm:$0xff]  ;;  %v3848_v13 = vld [vmem:[%s14218_s18 + $0xc0] sm:$0xff] }
0x11bb   :  { %3793 = vmatprep.subr.mxu1 %v3740_v27  ;;  %4074 = vmatprep.subr.mxu0 %v3839_v16  ;;  %v4021_v27 = vld [vmem:[%s14218_s18 + $0x628] sm:$0xff]  ;;  %v3847_v16 = vld [vmem:[%s14218_s18 + $0xb8] sm:$0xff] }
0x11bc   :  { %3794 = vmatpush2.msra.mxu1 %v3739_v28  ;;  %4075 = vmatpush1.msra.mxu0 %v3838_v17  ;;  %v4020_v28 = vld [vmem:[%s14218_s18 + $0x620] sm:$0xff]  ;;  %v3841_v17 = vld [vmem:[%s14218_s18 + $0x88] sm:$0xff] }
0x11bd   :  { %3795 = vmatprep.subr.mxu1 %v3738_v29  ;;  %4076 = vmatprep.subr.mxu0 %v3832_v22  ;;  %v4014_v29 = vld [vmem:[%s14218_s18 + $0x5f0] sm:$0xff]  ;;  %v3840_v22 = vld [vmem:[%s14218_s18 + $0x80] sm:$0xff] }
0x11be   :  { %3796 = vmatpush2.msra.mxu1 %v3737_v18  ;;  %4077 = vmatpush1.msra.mxu0 %v3831_v23  ;;  %v4013_v18 = vld [vmem:[%s14218_s18 + $0x5e8] sm:$0xff]  ;;  %v3834_v23 = vld [vmem:[%s14218_s18 + $0x50] sm:$0xff] }
0x11bf   :  { %3797 = vmatprep.subr.mxu1 %v3736_v21  ;;  %4078 = vmatprep.subr.mxu0 %v3825_v25  ;;  %v4007_v21 = vld [vmem:[%s14218_s18 + $0x5b8] sm:$0xff]  ;;  %v3833_v25 = vld [vmem:[%s14218_s18 + $0x48] sm:$0xff] }
0x11c0   :  { %3798 = vmatpush2.msra.mxu1 %v3735_v36  ;;  %4079 = vmatpush1.msra.mxu0 %v3824_v38  ;;  %v4006_v36 = vld [vmem:[%s14218_s18 + $0x5b0] sm:$0xff]  ;;  %v3827_v38 = vld [vmem:[%s14218_s18 + $0x18] sm:$0xff] }
0x11c1   :  { %3799 = vmatprep.subr.mxu1 %v3734_v0  ;;  %4080 = vmatprep.subr.mxu0 %v4042_v35  ;;  %v4000_v0 = vld [vmem:[%s14218_s18 + $0x580] sm:$0xff]  ;;  %v3826_v35 = vld [vmem:[%s14218_s18 + $0x10] sm:$0xff] }
0x11c2   :  { %3800 = vmatpush2.msra.mxu1 %v3733_v1  ;;  %4081 = vmatpush2.msra.mxu0 %v4041_v43  ;;  %v3999_v1 = vld [vmem:[%s14218_s18 + $0x578] sm:$0xff]  ;;  %v4044_v43 = vld [vmem:[%s14218_s18 + $0x6e0] sm:$0xff] }
0x11c3   :  { %3801 = vmatprep.subr.mxu1 %v3732_v2  ;;  %4082 = vmatprep.subr.mxu0 %v4035_v42  ;;  %v3993_v2 = vld [vmem:[%s14218_s18 + $0x548] sm:$0xff]  ;;  %v4043_v42 = vld [vmem:[%s14218_s18 + $0x6d8] sm:$0xff] }
0x11c4   :  { %3802 = vmatpush2.msra.mxu1 %v3731_v3  ;;  %4083 = vmatpush2.msra.mxu0 %v4034_v44  ;;  %v3992_v3 = vld [vmem:[%s14218_s18 + $0x540] sm:$0xff]  ;;  %v4037_v44 = vld [vmem:[%s14218_s18 + $0x6a8] sm:$0xff] }
0x11c5   :  { %3803 = vmatprep.subr.mxu1 %v3730_v4  ;;  %4084 = vmatprep.subr.mxu0 %v4028_v45  ;;  %v3986_v4 = vld [vmem:[%s14218_s18 + $0x510] sm:$0xff]  ;;  %v4036_v45 = vld [vmem:[%s14218_s18 + $0x6a0] sm:$0xff] }
0x11c6   :  { %3804 = vmatpush2.msra.mxu1 %v3729_v6  ;;  %4085 = vmatpush2.msra.mxu0 %v4027_v26  ;;  %v3985_v6 = vld [vmem:[%s14218_s18 + $0x508] sm:$0xff]  ;;  %v4030_v26 = vld [vmem:[%s14218_s18 + $0x670] sm:$0xff] }
0x11c7   :  { %3805 = vmatprep.subr.mxu1 %v3728_v7  ;;  %4086 = vmatprep.subr.mxu0 %v4021_v27  ;;  %v3979_v7 = vld [vmem:[%s14218_s18 + $0x4d8] sm:$0xff]  ;;  %v4029_v27 = vld [vmem:[%s14218_s18 + $0x668] sm:$0xff] }
0x11c8   :  { %3806 = vmatpush2.msra.mxu1 %v3727_v24  ;;  %4087 = vmatpush2.msra.mxu0 %v4020_v28  ;;  %v3978_v24 = vld [vmem:[%s14218_s18 + $0x4d0] sm:$0xff]  ;;  %v4023_v28 = vld [vmem:[%s14218_s18 + $0x638] sm:$0xff] }
0x11c9   :  { %3807 = vmatprep.subr.mxu1 %v3726_v31  ;;  %4088 = vmatprep.subr.mxu0 %v4014_v29  ;;  %v3972_v31 = vld [vmem:[%s14218_s18 + $0x4a0] sm:$0xff]  ;;  %v4022_v29 = vld [vmem:[%s14218_s18 + $0x630] sm:$0xff] }
0x11ca   :  { %3808 = vmatpush2.msra.mxu1 %v3725_v46  ;;  %4089 = vmatpush2.msra.mxu0 %v4013_v18  ;;  %v3971_v46 = vld [vmem:[%s14218_s18 + $0x498] sm:$0xff]  ;;  %v4016_v18 = vld [vmem:[%s14218_s18 + $0x600] sm:$0xff] }
0x11cb   :  { %3809 = vmatprep.subr.mxu1 %v3724_v48  ;;  %4090 = vmatprep.subr.mxu0 %v4007_v21  ;;  %v3965_v48 = vld [vmem:[%s14218_s18 + $0x468] sm:$0xff]  ;;  %v4015_v21 = vld [vmem:[%s14218_s18 + $0x5f8] sm:$0xff] }
0x11cc   :  { %3810 = vmatpush2.msra.mxu1 %v3723_v49  ;;  %4091 = vmatpush2.msra.mxu0 %v4006_v36  ;;  %v3964_v49 = vld [vmem:[%s14218_s18 + $0x460] sm:$0xff]  ;;  %v4009_v36 = vld [vmem:[%s14218_s18 + $0x5c8] sm:$0xff] }
0x11cd   :  { %3811 = vmatprep.subr.mxu1 %v3722_v30  ;;  %4092 = vmatprep.subr.mxu0 %v4000_v0  ;;  %v3958_v30 = vld [vmem:[%s14218_s18 + $0x430] sm:$0xff]  ;;  %v4008_v0 = vld [vmem:[%s14218_s18 + $0x5c0] sm:$0xff] }
0x11ce   :  { %3812 = vmatpush2.msra.mxu1 %v3721_v50  ;;  %4093 = vmatpush2.msra.mxu0 %v3999_v1  ;;  %v3957_v50 = vld [vmem:[%s14218_s18 + $0x428] sm:$0xff]  ;;  %v4002_v1 = vld [vmem:[%s14218_s18 + $0x590] sm:$0xff] }
0x11cf   :  { %3813 = vmatprep.subr.mxu1 %v3720_v51  ;;  %4094 = vmatprep.subr.mxu0 %v3993_v2  ;;  %v3951_v51 = vld [vmem:[%s14218_s18 + $0x3f8] sm:$0xff]  ;;  %v4001_v2 = vld [vmem:[%s14218_s18 + $0x588] sm:$0xff] }
0x11d0   :  { %3814 = vmatpush2.msra.mxu1 %v3719_v20  ;;  %4095 = vmatpush2.msra.mxu0 %v3992_v3  ;;  %v3995_v3 = vld [vmem:[%s14218_s18 + $0x558] sm:$0xff] }
0x11d1   :  { %4119 = vmatprep.subr.mxu1 %v3932_v33  ;;  %4096 = vmatprep.subr.mxu0 %v3986_v4  ;;  %v3994_v4 = vld [vmem:[%s14218_s18 + $0x550] sm:$0xff] }
0x11d2   :  { %4097 = vmatpush2.msra.mxu0 %v3985_v6  ;;  %v3988_v6 = vld [vmem:[%s14218_s18 + $0x520] sm:$0xff] }
0x11d3   :  { %4098 = vmatprep.subr.mxu0 %v3979_v7  ;;  %v3987_v7 = vld [vmem:[%s14218_s18 + $0x518] sm:$0xff] }
0x11d4   :  { %4099 = vmatpush2.msra.mxu0 %v3978_v24  ;;  %v3981_v24 = vld [vmem:[%s14218_s18 + $0x4e8] sm:$0xff] }
0x11d5   :  { %4100 = vmatprep.subr.mxu0 %v3972_v31  ;;  %v3980_v31 = vld [vmem:[%s14218_s18 + $0x4e0] sm:$0xff] }
0x11d6   :  { %4101 = vmatpush2.msra.mxu0 %v3971_v46  ;;  %v3974_v46 = vld [vmem:[%s14218_s18 + $0x4b0] sm:$0xff] }
0x11d7   :  { %4102 = vmatprep.subr.mxu0 %v3965_v48  ;;  %v3973_v48 = vld [vmem:[%s14218_s18 + $0x4a8] sm:$0xff] }
0x11d8   :  { %4103 = vmatpush2.msra.mxu0 %v3964_v49  ;;  %v3967_v49 = vld [vmem:[%s14218_s18 + $0x478] sm:$0xff] }
0x11d9   :  { %4104 = vmatprep.subr.mxu0 %v3958_v30  ;;  %v3966_v30 = vld [vmem:[%s14218_s18 + $0x470] sm:$0xff] }
0x11da   :  { %4105 = vmatpush2.msra.mxu0 %v3957_v50  ;;  %v3960_v50 = vld [vmem:[%s14218_s18 + $0x440] sm:$0xff] }
0x11db   :  { %4106 = vmatprep.subr.mxu0 %v3951_v51  ;;  %v3959_v51 = vld [vmem:[%s14218_s18 + $0x438] sm:$0xff] }
0x1261   :  { %v3680_v20 = vpop.f32.mrf.mxu0 }
0x1262   :  { %v3685_v34 = vmax.f32 %v3680_v20, 0.0  ;;  %v3953_v20 = vld [vmem:[%s14218_s18 + $0x408] sm:$0xff] }
0x1263   :  { %v3682_v32 = vpop.f32.mrf.mxu0 }
0x1264   :  { %v3686_v33 = vmax.f32 %v3682_v32, 0.0  ;;  %v3950_v32 = vld [vmem:[%s14218_s18 + $0x3f0] sm:$0xff] }
0x1265   :  { %4107 = vmatpush2.msra.mxu0 %v3950_v32  ;;  %v3858_v32 = vld [vmem:[%s14218_s18 + $0x110] sm:$0xff] }
0x1266   :  { %3815 = vmatprep.mubr.f32.mxu1 %v3686_v33  ;;  %v3952_v33 = vld [vmem:[%s14218_s18 + $0x400] sm:$0xff] }
0x1267   :  { %3816 = vmatmul.mubr.f32.vlgmr.msra.gmra.mxu1 %v3685_v34  ;;  %v3944_v34 = vld [vmem:[%s14218_s18 + $0x3c0] sm:$0xff] }
0x1268   :  { %4120 = vmatpush1.msra.mxu1 %v3931_v19  ;;  %v3946_v19 = vld [vmem:[%s14218_s18 + $0x3d0] sm:$0xff]  ;;  %4108 = vmatprep.subr.mxu0 %v3944_v34  ;;  %v3963_v34 = vld [vmem:[%s14218_s18 + $0x458] sm:$0xff] }
0x1269   :  { %4121 = vmatprep.subr.mxu1 %v3925_v37  ;;  %v3943_v37 = vld [vmem:[%s14218_s18 + $0x3b8] sm:$0xff] }
0x126a   :  { %4122 = vmatpush1.msra.mxu1 %v3924_v39  ;;  %v3945_v39 = vld [vmem:[%s14218_s18 + $0x3c8] sm:$0xff]  ;;  %4109 = vmatpush2.msra.mxu0 %v3943_v37  ;;  %v3851_v37 = vld [vmem:[%s14218_s18 + $0xd8] sm:$0xff] }
0x126b   :  { %4123 = vmatprep.subr.mxu1 %v3918_v40  ;;  %v3937_v40 = vld [vmem:[%s14218_s18 + $0x388] sm:$0xff] }
0x126c   :  { %4124 = vmatpush1.msra.mxu1 %v3917_v52  ;;  %v3939_v52 = vld [vmem:[%s14218_s18 + $0x398] sm:$0xff]  ;;  %4110 = vmatprep.subr.mxu0 %v3937_v40  ;;  %v3956_v40 = vld [vmem:[%s14218_s18 + $0x420] sm:$0xff] }
0x126d   :  { %4125 = vmatprep.subr.mxu1 %v3911_v53  ;;  %v3936_v53 = vld [vmem:[%s14218_s18 + $0x380] sm:$0xff] }
0x126e   :  { %4126 = vmatpush1.msra.mxu1 %v3910_v54  ;;  %v3938_v54 = vld [vmem:[%s14218_s18 + $0x390] sm:$0xff]  ;;  %4111 = vmatpush2.msra.mxu0 %v3936_v53  ;;  %v3844_v53 = vld [vmem:[%s14218_s18 + $0xa0] sm:$0xff] }
0x126f   :  { %4127 = vmatprep.subr.mxu1 %v3904_v55  ;;  %v3934_v55 = vld [vmem:[%s14218_s18 + $0x370] sm:$0xff] }
0x1270   :  { %4128 = vmatpush1.msra.mxu1 %v3903_v56  ;;  %v4047_v56 = vld [vmem:[%s14218_s18 + $0x6f8] sm:$0xff]  ;;  %4190 = vmatprep.subr.mxu0 %v3934_v55  ;;  %v3949_v55 = vld [vmem:[%s14218_s18 + $0x3e8] sm:$0xff] }
0x1271   :  { %4129 = vmatprep.subr.mxu1 %v3897_v57 }
0x1272   :  { %4130 = vmatpush1.msra.mxu1 %v3896_v58 }
0x1273   :  { %4131 = vmatprep.subr.mxu1 %v3890_v15 }
0x1274   :  { %4132 = vmatpush1.msra.mxu1 %v3889_v41 }
0x1275   :  { %4133 = vmatprep.subr.mxu1 %v3883_v59  ;;  %v3933_v59 = vld [vmem:[%s14218_s18 + $0x368] sm:$0xff] }
0x1276   :  { %4134 = vmatpush1.msra.mxu1 %v3882_v60  ;;  %v3935_v60 = vld [vmem:[%s14218_s18 + $0x378] sm:$0xff] }
0x1277   :  { %4135 = vmatprep.subr.mxu1 %v3876_v61  ;;  %v3927_v61 = vld [vmem:[%s14218_s18 + $0x338] sm:$0xff] }
0x1278   :  { %4136 = vmatpush1.msra.mxu1 %v3875_v62  ;;  %v4040_v62 = vld [vmem:[%s14218_s18 + $0x6c0] sm:$0xff] }
0x1279   :  { %4137 = vmatprep.subr.mxu1 %v3869_v63  ;;  %v3926_v63 = vld [vmem:[%s14218_s18 + $0x330] sm:$0xff] }
0x127a   :  { %4138 = vmatpush1.msra.mxu1 %v3868_v8  ;;  %v3928_v8 = vld [vmem:[%s14218_s18 + $0x340] sm:$0xff] }
0x127b   :  { %4139 = vmatprep.subr.mxu1 %v3862_v9  ;;  %v3920_v9 = vld [vmem:[%s14218_s18 + $0x300] sm:$0xff] }
0x127c   :  { %4140 = vmatpush1.msra.mxu1 %v3861_v10  ;;  %v4033_v10 = vld [vmem:[%s14218_s18 + $0x688] sm:$0xff] }
0x127d   :  { %4141 = vmatprep.subr.mxu1 %v3855_v11  ;;  %v3919_v11 = vld [vmem:[%s14218_s18 + $0x2f8] sm:$0xff] }
0x127e   :  { %4142 = vmatpush1.msra.mxu1 %v3854_v12  ;;  %v3921_v12 = vld [vmem:[%s14218_s18 + $0x308] sm:$0xff] }
0x127f   :  { %4143 = vmatprep.subr.mxu1 %v3848_v13  ;;  %v3913_v13 = vld [vmem:[%s14218_s18 + $0x2c8] sm:$0xff] }
0x1280   :  { %4144 = vmatpush1.msra.mxu1 %v3847_v16  ;;  %v4026_v16 = vld [vmem:[%s14218_s18 + $0x650] sm:$0xff] }
0x1281   :  { %4145 = vmatprep.subr.mxu1 %v3841_v17  ;;  %v3912_v17 = vld [vmem:[%s14218_s18 + $0x2c0] sm:$0xff] }
0x1282   :  { %4146 = vmatpush1.msra.mxu1 %v3840_v22  ;;  %v3914_v22 = vld [vmem:[%s14218_s18 + $0x2d0] sm:$0xff] }
0x1283   :  { %4147 = vmatprep.subr.mxu1 %v3834_v23  ;;  %v3906_v23 = vld [vmem:[%s14218_s18 + $0x290] sm:$0xff] }
0x1284   :  { %4148 = vmatpush1.msra.mxu1 %v3833_v25  ;;  %v4019_v25 = vld [vmem:[%s14218_s18 + $0x618] sm:$0xff] }
0x1285   :  { %4149 = vmatprep.subr.mxu1 %v3827_v38  ;;  %v3905_v38 = vld [vmem:[%s14218_s18 + $0x288] sm:$0xff] }
0x1286   :  { %4150 = vmatpush1.msra.mxu1 %v3826_v35  ;;  %v3907_v35 = vld [vmem:[%s14218_s18 + $0x298] sm:$0xff] }
0x1287   :  { %4151 = vmatprep.subr.mxu1 %v4044_v43  ;;  %v3899_v43 = vld [vmem:[%s14218_s18 + $0x258] sm:$0xff] }
0x1288   :  { %4152 = vmatpush2.msra.mxu1 %v4043_v42  ;;  %v4012_v42 = vld [vmem:[%s14218_s18 + $0x5e0] sm:$0xff] }
0x1289   :  { %4153 = vmatprep.subr.mxu1 %v4037_v44  ;;  %v3898_v44 = vld [vmem:[%s14218_s18 + $0x250] sm:$0xff] }
0x128a   :  { %4154 = vmatpush2.msra.mxu1 %v4036_v45  ;;  %v3900_v45 = vld [vmem:[%s14218_s18 + $0x260] sm:$0xff] }
0x128b   :  { %4155 = vmatprep.subr.mxu1 %v4030_v26  ;;  %v3892_v26 = vld [vmem:[%s14218_s18 + $0x220] sm:$0xff] }
0x128c   :  { %4156 = vmatpush2.msra.mxu1 %v4029_v27  ;;  %v4005_v27 = vld [vmem:[%s14218_s18 + $0x5a8] sm:$0xff] }
0x128d   :  { %4157 = vmatprep.subr.mxu1 %v4023_v28  ;;  %v3891_v28 = vld [vmem:[%s14218_s18 + $0x218] sm:$0xff] }
0x128e   :  { %4158 = vmatpush2.msra.mxu1 %v4022_v29  ;;  %v3893_v29 = vld [vmem:[%s14218_s18 + $0x228] sm:$0xff] }
0x128f   :  { %4159 = vmatprep.subr.mxu1 %v4016_v18  ;;  %v3885_v18 = vld [vmem:[%s14218_s18 + $0x1e8] sm:$0xff] }
0x1290   :  { %4160 = vmatpush2.msra.mxu1 %v4015_v21  ;;  %v3998_v21 = vld [vmem:[%s14218_s18 + $0x570] sm:$0xff] }
0x1291   :  { %4161 = vmatprep.subr.mxu1 %v4009_v36  ;;  %v3884_v36 = vld [vmem:[%s14218_s18 + $0x1e0] sm:$0xff] }
0x1292   :  { %4162 = vmatpush2.msra.mxu1 %v4008_v0  ;;  %v3886_v0 = vld [vmem:[%s14218_s18 + $0x1f0] sm:$0xff] }
0x1293   :  { %4163 = vmatprep.subr.mxu1 %v4002_v1  ;;  %v3878_v1 = vld [vmem:[%s14218_s18 + $0x1b0] sm:$0xff] }
0x1294   :  { %4164 = vmatpush2.msra.mxu1 %v4001_v2  ;;  %v3991_v2 = vld [vmem:[%s14218_s18 + $0x538] sm:$0xff] }
0x1295   :  { %4165 = vmatprep.subr.mxu1 %v3995_v3  ;;  %v3877_v3 = vld [vmem:[%s14218_s18 + $0x1a8] sm:$0xff] }
0x1296   :  { %4166 = vmatpush2.msra.mxu1 %v3994_v4  ;;  %v3879_v4 = vld [vmem:[%s14218_s18 + $0x1b8] sm:$0xff] }
0x1297   :  { %4167 = vmatprep.subr.mxu1 %v3988_v6  ;;  %v3871_v6 = vld [vmem:[%s14218_s18 + $0x178] sm:$0xff] }
0x1298   :  { %4168 = vmatpush2.msra.mxu1 %v3987_v7  ;;  %v3984_v7 = vld [vmem:[%s14218_s18 + $0x500] sm:$0xff] }
0x1299   :  { %4169 = vmatprep.subr.mxu1 %v3981_v24  ;;  %v3870_v24 = vld [vmem:[%s14218_s18 + $0x170] sm:$0xff] }
0x129a   :  { %4170 = vmatpush2.msra.mxu1 %v3980_v31  ;;  %v3872_v31 = vld [vmem:[%s14218_s18 + $0x180] sm:$0xff] }
0x129b   :  { %4171 = vmatprep.subr.mxu1 %v3974_v46  ;;  %v3864_v46 = vld [vmem:[%s14218_s18 + $0x140] sm:$0xff] }
0x129c   :  { %4172 = vmatpush2.msra.mxu1 %v3973_v48  ;;  %v3977_v48 = vld [vmem:[%s14218_s18 + $0x4c8] sm:$0xff] }
0x129d   :  { %4173 = vmatprep.subr.mxu1 %v3967_v49  ;;  %v3863_v49 = vld [vmem:[%s14218_s18 + $0x138] sm:$0xff] }
0x129e   :  { %4174 = vmatpush2.msra.mxu1 %v3966_v30  ;;  %v3865_v30 = vld [vmem:[%s14218_s18 + $0x148] sm:$0xff] }
0x129f   :  { %4175 = vmatprep.subr.mxu1 %v3960_v50  ;;  %v3857_v50 = vld [vmem:[%s14218_s18 + $0x108] sm:$0xff] }
0x12a0   :  { %4176 = vmatpush2.msra.mxu1 %v3959_v51  ;;  %v3970_v51 = vld [vmem:[%s14218_s18 + $0x490] sm:$0xff] }
0x12a1   :  { %4177 = vmatprep.subr.mxu1 %v3953_v20  ;;  %v3856_v20 = vld [vmem:[%s14218_s18 + $0x100] sm:$0xff] }
0x12a2   :  { %4178 = vmatpush2.msra.mxu1 %v3952_v33  ;;  %v3850_v33 = vld [vmem:[%s14218_s18 + $0xd0] sm:$0xff] }
0x12a3   :  { %4179 = vmatprep.subr.mxu1 %v3946_v19  ;;  %v3849_v19 = vld [vmem:[%s14218_s18 + $0xc8] sm:$0xff] }
0x12a4   :  { %4180 = vmatpush2.msra.mxu1 %v3945_v39  ;;  %v3843_v39 = vld [vmem:[%s14218_s18 + $0x98] sm:$0xff] }
0x12a5   :  { %4181 = vmatprep.subr.mxu1 %v3939_v52  ;;  %v3842_v52 = vld [vmem:[%s14218_s18 + $0x90] sm:$0xff] }
0x12a6   :  { %4182 = vmatpush2.msra.mxu1 %v3938_v54  ;;  %v3836_v54 = vld [vmem:[%s14218_s18 + $0x60] sm:$0xff] }
0x12a7   :  { %6480 = vmatprep.subr.mxu1 %v4047_v56  ;;  %v3835_v56 = vld [vmem:[%s14218_s18 + $0x58] sm:$0xff] }
0x1327   :  { %v3817_v57 = vpop.f32.mrf.mxu1 }
0x1328   :  { %v11746_v41 = vmax.f32 %v3817_v57, 0.0  ;;  %v3837_v57 = vld [vmem:[%s14218_s18 + $0x68] sm:$0xff] }
0x1329   :  { %v3819_v58 = vpop.f32.mrf.mxu1 }
0x132a   :  { %v3823_v15 = vmax.f32 %v3819_v58, 0.0  ;;  %v3829_v58 = vld [vmem:[%s14218_s18 + $0x28] sm:$0xff] }
0x132c   :  { %4112 = vmatprep.mubr.f32.mxu0 %v3823_v15  ;;  %4183 = vmatprep.mubr.f32.mxu1 %v3823_v15 }
0x132d   :  { %4113 = vmatmul.mubr.f32.vlgmr.msra.gmra.mxu0 %v11746_v41  ;;  %4184 = vmatmul.mubr.f32.vlgmr.msra.gmra.mxu1 %v11746_v41 }
0x132e   :  { %4191 = vmatpush1.msra.mxu0 %v3933_v59  ;;  %6481 = vmatpush3.msra.mxu1 %v3935_v60  ;;  %v3828_v59 = vld [vmem:[%s14218_s18 + $0x20] sm:$0xff]  ;;  %v3830_v60 = vld [vmem:[%s14218_s18 + $0x30] sm:$0xff] }
0x132f   :  { %4192 = vmatprep.subr.mxu0 %v3927_v61  ;;  %4254 = vmatprep.mubr.f32.mxu0 %v3823_v15  ;;  %v4046_v61 = vld [vmem:[%s14218_s18 + $0x6f0] sm:$0xff] }
0x1330   :  { %6482 = vmatprep.subr.mxu1 %v4040_v62  ;;  %4325 = vmatprep.mubr.f32.mxu1 %v3823_v15  ;;  %v3942_v15 = vld [vmem:[%s14218_s18 + $0x3b0] sm:$0xff]  ;;  %v4045_v62 = vld [vmem:[%s14218_s18 + $0x6e8] sm:$0xff] }
0x1331   :  { %4193 = vmatpush1.msra.mxu0 %v3926_v63  ;;  %6483 = vmatpush3.msra.mxu1 %v3928_v8  ;;  %v4039_v63 = vld [vmem:[%s14218_s18 + $0x6b8] sm:$0xff]  ;;  %v4038_v8 = vld [vmem:[%s14218_s18 + $0x6b0] sm:$0xff] }
0x1332   :  { %4194 = vmatprep.subr.mxu0 %v3920_v9  ;;  %6484 = vmatprep.subr.mxu1 %v4033_v10  ;;  %v4032_v9 = vld [vmem:[%s14218_s18 + $0x680] sm:$0xff]  ;;  %v4031_v10 = vld [vmem:[%s14218_s18 + $0x678] sm:$0xff] }
0x1333   :  { %4195 = vmatpush1.msra.mxu0 %v3919_v11  ;;  %6485 = vmatpush3.msra.mxu1 %v3921_v12  ;;  %v4025_v11 = vld [vmem:[%s14218_s18 + $0x648] sm:$0xff]  ;;  %v4024_v12 = vld [vmem:[%s14218_s18 + $0x640] sm:$0xff] }
0x1334   :  { %4196 = vmatprep.subr.mxu0 %v3913_v13  ;;  %6486 = vmatprep.subr.mxu1 %v4026_v16  ;;  %v4018_v13 = vld [vmem:[%s14218_s18 + $0x610] sm:$0xff]  ;;  %v4017_v16 = vld [vmem:[%s14218_s18 + $0x608] sm:$0xff] }
0x1335   :  { %4197 = vmatpush1.msra.mxu0 %v3912_v17  ;;  %6487 = vmatpush3.msra.mxu1 %v3914_v22  ;;  %v4011_v17 = vld [vmem:[%s14218_s18 + $0x5d8] sm:$0xff]  ;;  %v4010_v22 = vld [vmem:[%s14218_s18 + $0x5d0] sm:$0xff] }
0x1336   :  { %4198 = vmatprep.subr.mxu0 %v3906_v23  ;;  %6488 = vmatprep.subr.mxu1 %v4019_v25  ;;  %v4004_v23 = vld [vmem:[%s14218_s18 + $0x5a0] sm:$0xff]  ;;  %v4003_v25 = vld [vmem:[%s14218_s18 + $0x598] sm:$0xff] }
0x1337   :  { %4199 = vmatpush1.msra.mxu0 %v3905_v38  ;;  %6489 = vmatpush3.msra.mxu1 %v3907_v35  ;;  %v3997_v38 = vld [vmem:[%s14218_s18 + $0x568] sm:$0xff]  ;;  %v3996_v35 = vld [vmem:[%s14218_s18 + $0x560] sm:$0xff] }
0x1338   :  { %4200 = vmatprep.subr.mxu0 %v3899_v43  ;;  %6490 = vmatprep.subr.mxu1 %v4012_v42  ;;  %v3990_v43 = vld [vmem:[%s14218_s18 + $0x530] sm:$0xff]  ;;  %v3989_v42 = vld [vmem:[%s14218_s18 + $0x528] sm:$0xff] }
0x1339   :  { %4201 = vmatpush1.msra.mxu0 %v3898_v44  ;;  %6491 = vmatpush3.msra.mxu1 %v3900_v45  ;;  %v3983_v44 = vld [vmem:[%s14218_s18 + $0x4f8] sm:$0xff]  ;;  %v3982_v45 = vld [vmem:[%s14218_s18 + $0x4f0] sm:$0xff] }
0x133a   :  { %4202 = vmatprep.subr.mxu0 %v3892_v26  ;;  %6492 = vmatprep.subr.mxu1 %v4005_v27  ;;  %v3976_v26 = vld [vmem:[%s14218_s18 + $0x4c0] sm:$0xff]  ;;  %v3975_v27 = vld [vmem:[%s14218_s18 + $0x4b8] sm:$0xff] }
0x133b   :  { %4203 = vmatpush1.msra.mxu0 %v3891_v28  ;;  %6493 = vmatpush3.msra.mxu1 %v3893_v29  ;;  %v3969_v28 = vld [vmem:[%s14218_s18 + $0x488] sm:$0xff]  ;;  %v3968_v29 = vld [vmem:[%s14218_s18 + $0x480] sm:$0xff] }
0x133c   :  { %4204 = vmatprep.subr.mxu0 %v3885_v18  ;;  %6494 = vmatprep.subr.mxu1 %v3998_v21  ;;  %v3962_v18 = vld [vmem:[%s14218_s18 + $0x450] sm:$0xff]  ;;  %v3961_v21 = vld [vmem:[%s14218_s18 + $0x448] sm:$0xff] }
0x133d   :  { %4205 = vmatpush1.msra.mxu0 %v3884_v36  ;;  %6495 = vmatpush3.msra.mxu1 %v3886_v0  ;;  %v3955_v36 = vld [vmem:[%s14218_s18 + $0x418] sm:$0xff]  ;;  %v3954_v0 = vld [vmem:[%s14218_s18 + $0x410] sm:$0xff] }
0x133e   :  { %4206 = vmatprep.subr.mxu0 %v3878_v1  ;;  %6496 = vmatprep.subr.mxu1 %v3991_v2  ;;  %v3948_v1 = vld [vmem:[%s14218_s18 + $0x3e0] sm:$0xff]  ;;  %v3947_v2 = vld [vmem:[%s14218_s18 + $0x3d8] sm:$0xff] }
0x133f   :  { %4207 = vmatpush1.msra.mxu0 %v3877_v3  ;;  %6497 = vmatpush3.msra.mxu1 %v3879_v4  ;;  %v3941_v3 = vld [vmem:[%s14218_s18 + $0x3a8] sm:$0xff]  ;;  %v3940_v4 = vld [vmem:[%s14218_s18 + $0x3a0] sm:$0xff] }
0x1340   :  { %4208 = vmatprep.subr.mxu0 %v3871_v6  ;;  %6498 = vmatprep.subr.mxu1 %v3984_v7  ;;  %v4353_v6 = vld [vmem:[%s14219_s13 + $0x78] sm:$0xff]  ;;  %v4352_v7 = vld [vmem:[%s14219_s13 + $0x70] sm:$0xff] }
0x1341   :  { %4209 = vmatpush1.msra.mxu0 %v3870_v24  ;;  %6499 = vmatpush3.msra.mxu1 %v3872_v31  ;;  %v4351_v24 = vld [vmem:[%s14219_s13 + $0x68] sm:$0xff]  ;;  %v4350_v31 = vld [vmem:[%s14219_s13 + $0x60] sm:$0xff] }
0x1342   :  { %4210 = vmatprep.subr.mxu0 %v3864_v46  ;;  %6500 = vmatprep.subr.mxu1 %v3977_v48  ;;  %v4349_v46 = vld [vmem:[%s14219_s13 + $0x58] sm:$0xff]  ;;  %v4348_v48 = vld [vmem:[%s14219_s13 + $0x50] sm:$0xff] }
0x1343   :  { %4211 = vmatpush1.msra.mxu0 %v3863_v49  ;;  %6501 = vmatpush3.msra.mxu1 %v3865_v30  ;;  %v4346_v49 = vld [vmem:[%s14219_s13 + $0x40] sm:$0xff]  ;;  %v4345_v30 = vld [vmem:[%s14219_s13 + $0x38] sm:$0xff] }
0x1344   :  { %4212 = vmatprep.subr.mxu0 %v3857_v50  ;;  %6502 = vmatprep.subr.mxu1 %v3970_v51  ;;  %v4344_v50 = vld [vmem:[%s14219_s13 + $0x30] sm:$0xff]  ;;  %v4343_v51 = vld [vmem:[%s14219_s13 + $0x28] sm:$0xff] }
0x1345   :  { %4213 = vmatpush1.msra.mxu0 %v3856_v20  ;;  %6503 = vmatpush3.msra.mxu1 %v3858_v32  ;;  %v4342_v20 = vld [vmem:[%s14219_s13 + $0x20] sm:$0xff]  ;;  %v4341_v32 = vld [vmem:[%s14219_s13 + $0x18] sm:$0xff] }
0x1346   :  { %4214 = vmatprep.subr.mxu0 %v3850_v33  ;;  %6504 = vmatprep.subr.mxu1 %v3963_v34  ;;  %v4340_v33 = vld [vmem:[%s14219_s13 + $0x10] sm:$0xff]  ;;  %v4339_v34 = vld [vmem:[%s14219_s13 + $0x8] sm:$0xff] }
0x1347   :  { %4215 = vmatpush1.msra.mxu0 %v3849_v19  ;;  %6505 = vmatpush3.msra.mxu1 %v3851_v37  ;;  %v4338_v19 = vld [vmem:[%s14219_s13] sm:$0xff]  ;;  %v4461_v37 = vld [vmem:[%s14220_s11 + $0xf8] sm:$0xff] }
0x1348   :  { %4216 = vmatprep.subr.mxu0 %v3843_v39  ;;  %6506 = vmatprep.subr.mxu1 %v3956_v40  ;;  %v4460_v39 = vld [vmem:[%s14220_s11 + $0xf0] sm:$0xff]  ;;  %v4459_v40 = vld [vmem:[%s14220_s11 + $0xe8] sm:$0xff] }
0x1349   :  { %4217 = vmatpush1.msra.mxu0 %v3842_v52  ;;  %6507 = vmatpush3.msra.mxu1 %v3844_v53  ;;  %v4458_v52 = vld [vmem:[%s14220_s11 + $0xe0] sm:$0xff]  ;;  %v4457_v53 = vld [vmem:[%s14220_s11 + $0xd8] sm:$0xff] }
0x134a   :  { %4218 = vmatprep.subr.mxu0 %v3836_v54  ;;  %6508 = vmatprep.subr.mxu1 %v3949_v55  ;;  %v4456_v54 = vld [vmem:[%s14220_s11 + $0xd0] sm:$0xff]  ;;  %v12109_v55 = vld [vmem:[%s14220_s11 + $0xc0] sm:$0xff] }
0x134b   :  { %4219 = vmatpush1.msra.mxu0 %v3835_v56  ;;  %6509 = vmatpush3.msra.mxu1 %v3837_v57  ;;  %v12114_v56 = vld [vmem:[%s14220_s11 + $0xb8] sm:$0xff]  ;;  %v12119_v57 = vld [vmem:[%s14220_s11 + $0xb0] sm:$0xff] }
0x134c   :  { %4220 = vmatprep.subr.mxu0 %v3829_v58  ;;  %6510 = vmatprep.subr.mxu1 %v3942_v15  ;;  %v12127_v58 = vld [vmem:[%s14220_s11 + $0xa8] sm:$0xff]  ;;  %v12133_v15 = vld [vmem:[%s14220_s11 + $0xa0] sm:$0xff] }
0x134d   :  { %4221 = vmatpush1.msra.mxu0 %v3828_v59  ;;  %6511 = vmatpush3.msra.mxu1 %v3830_v60  ;;  %v12139_v59 = vld [vmem:[%s14220_s11 + $0x98] sm:$0xff]  ;;  %v12145_v60 = vld [vmem:[%s14220_s11 + $0x90] sm:$0xff] }
0x134e   :  { %4222 = vmatprep.subr.mxu0 %v4046_v61  ;;  %4326 = vmatmul.mubr.f32.vlgmr.msra.gmra.mxu1 %v11746_v41  ;;  %v12151_v61 = vld [vmem:[%s14220_s11 + $0x88] sm:$0xff] }
0x134f   :  { %4223 = vmatpush2.msra.mxu0 %v4045_v62  ;;  %v12157_v62 = vld [vmem:[%s14220_s11 + $0x80] sm:$0xff] }
0x1350   :  { %4224 = vmatprep.subr.mxu0 %v4039_v63  ;;  %v12163_v63 = vld [vmem:[%s14220_s11 + $0x78] sm:$0xff] }
0x1351   :  { %4225 = vmatpush2.msra.mxu0 %v4038_v8  ;;  %v12168_v8 = vld [vmem:[%s14220_s11 + $0x70] sm:$0xff] }
0x1352   :  { %4226 = vmatprep.subr.mxu0 %v4032_v9  ;;  %v12173_v9 = vld [vmem:[%s14220_s11 + $0x68] sm:$0xff] }
0x1353   :  { %4227 = vmatpush2.msra.mxu0 %v4031_v10  ;;  %v12179_v10 = vld [vmem:[%s14220_s11 + $0x60] sm:$0xff] }
0x1354   :  { %4228 = vmatprep.subr.mxu0 %v4025_v11  ;;  %v12185_v11 = vld [vmem:[%s14220_s11 + $0x58] sm:$0xff] }
0x1355   :  { %4229 = vmatpush2.msra.mxu0 %v4024_v12  ;;  %v12191_v12 = vld [vmem:[%s14220_s11 + $0x50] sm:$0xff] }
0x1356   :  { %4230 = vmatprep.subr.mxu0 %v4018_v13  ;;  %v12197_v13 = vld [vmem:[%s14220_s11 + $0x48] sm:$0xff] }
0x1357   :  { %4231 = vmatpush2.msra.mxu0 %v4017_v16  ;;  %v12203_v16 = vld [vmem:[%s14220_s11 + $0x40] sm:$0xff] }
0x1358   :  { %4232 = vmatprep.subr.mxu0 %v4011_v17  ;;  %v12209_v17 = vld [vmem:[%s14220_s11 + $0x38] sm:$0xff] }
0x1359   :  { %4233 = vmatpush2.msra.mxu0 %v4010_v22  ;;  %v12215_v22 = vld [vmem:[%s14220_s11 + $0x30] sm:$0xff] }
0x135a   :  { %4234 = vmatprep.subr.mxu0 %v4004_v23  ;;  %v12221_v23 = vld [vmem:[%s14220_s11 + $0x28] sm:$0xff] }
0x135b   :  { %4235 = vmatpush2.msra.mxu0 %v4003_v25  ;;  %v12227_v25 = vld [vmem:[%s14220_s11 + $0x20] sm:$0xff] }
0x135c   :  { %4236 = vmatprep.subr.mxu0 %v3997_v38  ;;  %v12233_v38 = vld [vmem:[%s14220_s11 + $0x18] sm:$0xff] }
0x135d   :  { %4237 = vmatpush2.msra.mxu0 %v3996_v35  ;;  %14221 = vst [vmem:[#allocation16_spill] sm:$0xff] %v12233_v38  ;;  %v12239_v35 = vld [vmem:[%s14220_s11 + $0x10] sm:$0xff] }
0x135e   :  { %4238 = vmatprep.subr.mxu0 %v3990_v43  ;;  %14222 = vst [vmem:[#allocation17_spill] sm:$0xff] %v12239_v35  ;;  %v12245_v43 = vld [vmem:[%s14220_s11 + $0x8] sm:$0xff] }
0x135f   :  { %4239 = vmatpush2.msra.mxu0 %v3989_v42  ;;  %14223 = vst [vmem:[#allocation18_spill] sm:$0xff] %v12245_v43  ;;  %v12251_v42 = vld [vmem:[%s14220_s11] sm:$0xff] }
0x1360   :  { %4240 = vmatprep.subr.mxu0 %v3983_v44  ;;  %14224 = vst [vmem:[#allocation19_spill] sm:$0xff] %v12251_v42  ;;  %v12257_v44 = vld [vmem:[%s14220_s11 + $0x1f8] sm:$0xff] }
0x1361   :  { %4241 = vmatpush2.msra.mxu0 %v3982_v45  ;;  %14225 = vst [vmem:[#allocation20_spill] sm:$0xff] %v12257_v44  ;;  %v12263_v45 = vld [vmem:[%s14220_s11 + $0x1f0] sm:$0xff] }
0x1362   :  { %4242 = vmatprep.subr.mxu0 %v3976_v26  ;;  %14226 = vst [vmem:[#allocation21_spill] sm:$0xff] %v12263_v45  ;;  %v12269_v26 = vld [vmem:[%s14220_s11 + $0x1e8] sm:$0xff] }
0x1363   :  { %4243 = vmatpush2.msra.mxu0 %v3975_v27  ;;  %14227 = vst [vmem:[#allocation22_spill] sm:$0xff] %v12269_v26  ;;  %v12275_v27 = vld [vmem:[%s14220_s11 + $0x1e0] sm:$0xff] }
0x1364   :  { %4244 = vmatprep.subr.mxu0 %v3969_v28  ;;  %14228 = vst [vmem:[#allocation23_spill] sm:$0xff] %v12275_v27  ;;  %v12281_v28 = vld [vmem:[%s14220_s11 + $0x1d8] sm:$0xff] }
0x1365   :  { %4245 = vmatpush2.msra.mxu0 %v3968_v29  ;;  %14229 = vst [vmem:[#allocation24_spill] sm:$0xff] %v12281_v28  ;;  %v12287_v29 = vld [vmem:[%s14220_s11 + $0x1d0] sm:$0xff] }
0x1366   :  { %4246 = vmatprep.subr.mxu0 %v3962_v18  ;;  %14230 = vst [vmem:[#allocation25_spill] sm:$0xff] %v12287_v29  ;;  %v12293_v18 = vld [vmem:[%s14220_s11 + $0x1c8] sm:$0xff] }
0x1367   :  { %4247 = vmatpush2.msra.mxu0 %v3961_v21  ;;  %14231 = vst [vmem:[#allocation26_spill] sm:$0xff] %v12293_v18  ;;  %v12299_v21 = vld [vmem:[%s14220_s11 + $0x1c0] sm:$0xff] }
0x1368   :  { %4248 = vmatprep.subr.mxu0 %v3955_v36  ;;  %14232 = vst [vmem:[#allocation27_spill] sm:$0xff] %v12299_v21  ;;  %v12305_v36 = vld [vmem:[%s14220_s11 + $0x1b8] sm:$0xff] }
0x1369   :  { %4249 = vmatpush2.msra.mxu0 %v3954_v0  ;;  %14233 = vst [vmem:[#allocation28_spill] sm:$0xff] %v12305_v36  ;;  %v12311_v0 = vld [vmem:[%s14220_s11 + $0x1b0] sm:$0xff] }
0x136a   :  { %4250 = vmatprep.subr.mxu0 %v3948_v1  ;;  %14234 = vst [vmem:[#allocation29_spill] sm:$0xff] %v12311_v0  ;;  %v12319_v1 = vld [vmem:[%s14220_s11 + $0x1a8] sm:$0xff] }
0x136b   :  { %4251 = vmatpush2.msra.mxu0 %v3947_v2  ;;  %14235 = vst [vmem:[#allocation30_spill] sm:$0xff] %v12319_v1  ;;  %v12325_v2 = vld [vmem:[%s14220_s11 + $0x1a0] sm:$0xff] }
0x136c   :  { %4252 = vmatprep.subr.mxu0 %v3941_v3  ;;  %14236 = vst [vmem:[#allocation31_spill] sm:$0xff] %v12325_v2  ;;  %v12331_v3 = vld [vmem:[%s14220_s11 + $0x198] sm:$0xff] }
0x136d   :  { %4253 = vmatpush2.msra.mxu0 %v3940_v4  ;;  %14237 = vst [vmem:[#allocation32_spill] sm:$0xff] %v12331_v3  ;;  %v12337_v4 = vld [vmem:[%s14220_s11 + $0x190] sm:$0xff] }
0x136e   :  { %4255 = vmatmul.mubr.f32.vlgmr.msra.gmra.mxu0 %v11746_v41  ;;  %4373 = vmatprep.subr.mxu0 %v4353_v6  ;;  %v4347_v41 = vld [vmem:[%s14219_s13 + $0x48] sm:$0xff]  ;;  %14238 = vst [vmem:[#allocation33_spill] sm:$0xff] %v12337_v4 }
0x136f   :  { %4374 = vmatpush1.msra.mxu0 %v4352_v7  ;;  %4421 = vmatprep.mubr.f32.mxu0 %v14147_v5  ;;  %v12343_v6 = vld [vmem:[%s14220_s11 + $0x188] sm:$0xff]  ;;  %v12348_v7 = vld [vmem:[%s14220_s11 + $0x180] sm:$0xff] }
0x1370   :  { %4375 = vmatprep.subr.mxu0 %v4351_v24  ;;  %14239 = vst [vmem:[#allocation34_spill] sm:$0xff] %v12343_v6  ;;  %14240 = vst [vmem:[#allocation35_spill] sm:$0xff] %v12348_v7  ;;  %v12353_v24 = vld [vmem:[%s14220_s11 + $0x178] sm:$0xff]  ;;  %v12479_v5 = vld [vmem:[%s14257_s12 + $0x68] sm:$0xff] }
0x1371   :  { %4376 = vmatpush1.msra.mxu0 %v4350_v31  ;;  %14241 = vst [vmem:[#allocation36_spill] sm:$0xff] %v12353_v24  ;;  %v12359_v31 = vld [vmem:[%s14220_s11 + $0x170] sm:$0xff] }
0x1372   :  { %4377 = vmatprep.subr.mxu0 %v4349_v46  ;;  %14242 = vst [vmem:[#allocation37_spill] sm:$0xff] %v12359_v31  ;;  %v12365_v46 = vld [vmem:[%s14220_s11 + $0x168] sm:$0xff] }
0x1373   :  { %4378 = vmatpush1.msra.mxu0 %v4348_v48  ;;  %14243 = vst [vmem:[#allocation38_spill] sm:$0xff] %v12365_v46  ;;  %v12371_v48 = vld [vmem:[%s14220_s11 + $0x160] sm:$0xff] }
0x1374   :  { %4379 = vmatprep.subr.mxu0 %v4347_v41  ;;  %14244 = vst [vmem:[#allocation39_spill] sm:$0xff] %v12371_v48  ;;  %v12377_v41 = vld [vmem:[%s14220_s11 + $0x158] sm:$0xff] }
0x1375   :  { %4380 = vmatpush1.msra.mxu0 %v4346_v49  ;;  %14245 = vst [vmem:[#allocation40_spill] sm:$0xff] %v12377_v41  ;;  %v12383_v49 = vld [vmem:[%s14220_s11 + $0x150] sm:$0xff] }
0x1376   :  { %4381 = vmatprep.subr.mxu0 %v4345_v30  ;;  %14246 = vst [vmem:[#allocation41_spill] sm:$0xff] %v12383_v49  ;;  %v12389_v30 = vld [vmem:[%s14220_s11 + $0x148] sm:$0xff] }
0x1377   :  { %4382 = vmatpush1.msra.mxu0 %v4344_v50  ;;  %14247 = vst [vmem:[#allocation42_spill] sm:$0xff] %v12389_v30  ;;  %v12395_v50 = vld [vmem:[%s14220_s11 + $0x140] sm:$0xff] }
0x1378   :  { %4383 = vmatprep.subr.mxu0 %v4343_v51  ;;  %14248 = vst [vmem:[#allocation43_spill] sm:$0xff] %v12395_v50  ;;  %v12401_v51 = vld [vmem:[%s14220_s11 + $0x138] sm:$0xff] }
0x1379   :  { %4384 = vmatpush1.msra.mxu0 %v4342_v20  ;;  %14249 = vst [vmem:[#allocation44_spill] sm:$0xff] %v12401_v51  ;;  %v12407_v20 = vld [vmem:[%s14220_s11 + $0x130] sm:$0xff] }
0x137a   :  { %4385 = vmatprep.subr.mxu0 %v4341_v32  ;;  %14250 = vst [vmem:[#allocation45_spill] sm:$0xff] %v12407_v20  ;;  %v12415_v32 = vld [vmem:[%s14220_s11 + $0x128] sm:$0xff] }
0x137b   :  { %4386 = vmatpush1.msra.mxu0 %v4340_v33  ;;  %14251 = vst [vmem:[#allocation46_spill] sm:$0xff] %v12415_v32  ;;  %v12421_v33 = vld [vmem:[%s14220_s11 + $0x120] sm:$0xff] }
0x137c   :  { %4387 = vmatprep.subr.mxu0 %v4339_v34  ;;  %14252 = vst [vmem:[#allocation47_spill] sm:$0xff] %v12421_v33  ;;  %v12427_v34 = vld [vmem:[%s14220_s11 + $0x118] sm:$0xff] }
0x137d   :  { %4388 = vmatpush1.msra.mxu0 %v4338_v19  ;;  %14253 = vst [vmem:[#allocation48_spill] sm:$0xff] %v12427_v34  ;;  %v12433_v19 = vld [vmem:[%s14220_s11 + $0x110] sm:$0xff] }
0x137e   :  { %6196 = vmatmul.mubr.msk.f32.vlgmr.msra.gmra.mxu0 %vm100_vm0, %v14211_v14  ;;  %4494 = vmatprep.subr.mxu0 %v4461_v37  ;;  %v4455_v14 = vld [vmem:[%s14220_s11 + $0xc8] sm:$0xff]  ;;  %14254 = vst [vmem:[#allocation49_spill] sm:$0xff] %v12433_v19 }
0x137f   :  { %4495 = vmatpush1.msra.mxu0 %v4460_v39  ;;  %v12439_v37 = vld [vmem:[%s14220_s11 + $0x108] sm:$0xff]  ;;  %v12444_v39 = vld [vmem:[%s14220_s11 + $0x100] sm:$0xff] }
0x1380   :  { %4496 = vmatprep.subr.mxu0 %v4459_v40  ;;  %14255 = vst [vmem:[#allocation50_spill] sm:$0xff] %v12439_v37  ;;  %14256 = vst [vmem:[#allocation51_spill] sm:$0xff] %v12444_v39  ;;  %v12451_v40 = vld [vmem:[%s14257_s12 + $0xf8] sm:$0xff] }
0x1381   :  { %4497 = vmatpush1.msra.mxu0 %v4458_v52  ;;  %v12456_v52 = vld [vmem:[%s14257_s12 + $0x78] sm:$0xff]  ;;  %6515 = vmatprep.subr.mxu1 %v12451_v40 }
0x1382   :  { %4498 = vmatprep.subr.mxu0 %v4457_v53  ;;  %v12461_v53 = vld [vmem:[%s14257_s12 + $0xf0] sm:$0xff]  ;;  %6516 = vmatpush3.msra.mxu1 %v12456_v52 }
0x1383   :  { %4499 = vmatpush1.msra.mxu0 %v4456_v54  ;;  %v12467_v54 = vld [vmem:[%s14257_s12 + $0x70] sm:$0xff]  ;;  %6517 = vmatprep.subr.mxu1 %v12461_v53 }
0x1384   :  { %4500 = vmatprep.subr.mxu0 %v4455_v14  ;;  %v12473_v14 = vld [vmem:[%s14257_s12 + $0xe8] sm:$0xff]  ;;  %6518 = vmatpush3.msra.mxu1 %v12467_v54 }
0x1385   :  { %4501 = vmatpush1.msra.mxu0 %v12109_v55  ;;  %6519 = vmatprep.subr.mxu1 %v12473_v14 }
0x1386   :  { %4502 = vmatprep.subr.mxu0 %v12114_v56  ;;  %6520 = vmatpush3.msra.mxu1 %v12479_v5 }
0x1387   :  { %4503 = vmatpush1.msra.mxu0 %v12119_v57 }
0x1388   :  { %4504 = vmatprep.subr.mxu0 %v12127_v58 }
0x1389   :  { %4505 = vmatpush1.msra.mxu0 %v12133_v15 }
0x138a   :  { %4506 = vmatprep.subr.mxu0 %v12139_v59 }
0x138b   :  { %4507 = vmatpush1.msra.mxu0 %v12145_v60 }
0x138c   :  { %4508 = vmatprep.subr.mxu0 %v12151_v61 }
0x138d   :  { %4509 = vmatpush1.msra.mxu0 %v12157_v62 }
0x138e   :  { %4510 = vmatprep.subr.mxu0 %v12163_v63 }
0x138f   :  { %4511 = vmatpush1.msra.mxu0 %v12168_v8 }
0x1390   :  { %4512 = vmatprep.subr.mxu0 %v12173_v9 }
0x1391   :  { %4513 = vmatpush1.msra.mxu0 %v12179_v10 }
0x1392   :  { %4514 = vmatprep.subr.mxu0 %v12185_v11 }
0x1393   :  { %4515 = vmatpush1.msra.mxu0 %v12191_v12 }
0x1394   :  { %4516 = vmatprep.subr.mxu0 %v12197_v13 }
0x1395   :  { %4517 = vmatpush1.msra.mxu0 %v12203_v16 }
0x1396   :  { %4518 = vmatprep.subr.mxu0 %v12209_v17 }
0x1397   :  { %4519 = vmatpush1.msra.mxu0 %v12215_v22 }
0x1398   :  { %4520 = vmatprep.subr.mxu0 %v12221_v23 }
0x1399   :  { %4521 = vmatpush1.msra.mxu0 %v12227_v25 }
0x139a   :  { %4522 = vmatprep.subr.mxu0 %v12233_v38 }
0x139b   :  { %4523 = vmatpush1.msra.mxu0 %v12239_v35 }
0x139c   :  { %4524 = vmatprep.subr.mxu0 %v12245_v43  ;;  %v4682_v43 = vld [vmem:[%s14114_s14 + $0x60] sm:$0xff] }
0x139d   :  { %4525 = vmatpush1.msra.mxu0 %v12251_v42  ;;  %v4683_v42 = vld [vmem:[%s14114_s14 + $0x68] sm:$0xff] }
0x139e   :  { %4526 = vmatprep.subr.mxu0 %v12257_v44  ;;  %v4684_v44 = vld [vmem:[%s14114_s14 + $0x70] sm:$0xff] }
0x139f   :  { %4527 = vmatpush2.msra.mxu0 %v12263_v45 }
0x13a0   :  { %4528 = vmatprep.subr.mxu0 %v12269_v26 }
0x13a1   :  { %4529 = vmatpush2.msra.mxu0 %v12275_v27 }
0x13a2   :  { %4530 = vmatprep.subr.mxu0 %v12281_v28 }
0x13a3   :  { %4531 = vmatpush2.msra.mxu0 %v12287_v29 }
0x13a4   :  { %4532 = vmatprep.subr.mxu0 %v12293_v18 }
0x13a5   :  { %4533 = vmatpush2.msra.mxu0 %v12299_v21 }
0x13a6   :  { %4534 = vmatprep.subr.mxu0 %v12305_v36 }
0x13a7   :  { %4535 = vmatpush2.msra.mxu0 %v12311_v0 }
0x13a8   :  { %4536 = vmatprep.subr.mxu0 %v12319_v1 }
0x13a9   :  { %4537 = vmatpush2.msra.mxu0 %v12325_v2  ;;  %v12605_v2 = vld [vmem:[%s14257_s12 + $0x90] sm:$0xff] }
0x13aa   :  { %4538 = vmatprep.subr.mxu0 %v12331_v3  ;;  %v12599_v3 = vld [vmem:[%s14257_s12 + $0x18] sm:$0xff] }
0x13ab   :  { %4539 = vmatpush2.msra.mxu0 %v12337_v4  ;;  %v12593_v4 = vld [vmem:[%s14257_s12 + $0x98] sm:$0xff] }
0x13ac   :  { %4540 = vmatprep.subr.mxu0 %v12343_v6  ;;  %v12587_v6 = vld [vmem:[%s14257_s12 + $0x20] sm:$0xff] }
0x13ad   :  { %4541 = vmatpush2.msra.mxu0 %v12348_v7  ;;  %v12581_v7 = vld [vmem:[%s14257_s12 + $0xa0] sm:$0xff] }
0x13ae   :  { %4542 = vmatprep.subr.mxu0 %v12353_v24  ;;  %v12575_v24 = vld [vmem:[%s14257_s12 + $0x28] sm:$0xff] }
0x13af   :  { %4543 = vmatpush2.msra.mxu0 %v12359_v31  ;;  %v12569_v31 = vld [vmem:[%s14257_s12 + $0xa8] sm:$0xff] }
0x13b0   :  { %4544 = vmatprep.subr.mxu0 %v12365_v46  ;;  %v12563_v46 = vld [vmem:[%s14257_s12 + $0x30] sm:$0xff] }
0x13b1   :  { %4545 = vmatpush2.msra.mxu0 %v12371_v48  ;;  %v12557_v48 = vld [vmem:[%s14257_s12 + $0xb0] sm:$0xff] }
0x13b2   :  { %4546 = vmatprep.subr.mxu0 %v12377_v41  ;;  %v12551_v41 = vld [vmem:[%s14257_s12 + $0x38] sm:$0xff] }
0x13b3   :  { %4547 = vmatpush2.msra.mxu0 %v12383_v49  ;;  %v12545_v49 = vld [vmem:[%s14257_s12 + $0xb8] sm:$0xff] }
0x13b4   :  { %4548 = vmatprep.subr.mxu0 %v12389_v30  ;;  %v12539_v30 = vld [vmem:[%s14257_s12 + $0x40] sm:$0xff] }
0x13b5   :  { %4549 = vmatpush2.msra.mxu0 %v12395_v50  ;;  %v12533_v50 = vld [vmem:[%s14257_s12 + $0xc0] sm:$0xff] }
0x13b6   :  { %4550 = vmatprep.subr.mxu0 %v12401_v51  ;;  %v12527_v51 = vld [vmem:[%s14257_s12 + $0x48] sm:$0xff] }
0x13b7   :  { %4551 = vmatpush2.msra.mxu0 %v12407_v20  ;;  %v12521_v20 = vld [vmem:[%s14257_s12 + $0xc8] sm:$0xff] }
0x13b8   :  { %4552 = vmatprep.subr.mxu0 %v12415_v32  ;;  %v12515_v32 = vld [vmem:[%s14257_s12 + $0x50] sm:$0xff] }
0x13b9   :  { %4553 = vmatpush2.msra.mxu0 %v12421_v33  ;;  %v12509_v33 = vld [vmem:[%s14257_s12 + $0xd0] sm:$0xff] }
0x13ba   :  { %4554 = vmatprep.subr.mxu0 %v12427_v34  ;;  %v12503_v34 = vld [vmem:[%s14257_s12 + $0x58] sm:$0xff] }
0x13bb   :  { %4555 = vmatpush2.msra.mxu0 %v12433_v19  ;;  %v12497_v19 = vld [vmem:[%s14257_s12 + $0xd8] sm:$0xff] }
0x13bc   :  { %4556 = vmatprep.subr.mxu0 %v12439_v37  ;;  %v12491_v37 = vld [vmem:[%s14257_s12 + $0x60] sm:$0xff] }
0x13bd   :  { %4557 = vmatpush2.msra.mxu0 %v12444_v39  ;;  %v12485_v39 = vld [vmem:[%s14257_s12 + $0xe0] sm:$0xff] }
0x13be   :  { %6521 = vmatprep.subr.mxu1 %v12485_v39 }
0x13bf   :  { %6522 = vmatpush3.msra.mxu1 %v12491_v37 }
0x13c0   :  { %6523 = vmatprep.subr.mxu1 %v12497_v19 }
0x13c1   :  { %6524 = vmatpush3.msra.mxu1 %v12503_v34 }
0x13c2   :  { %6525 = vmatprep.subr.mxu1 %v12509_v33 }
0x13c3   :  { %6526 = vmatpush3.msra.mxu1 %v12515_v32 }
0x13c4   :  { %6527 = vmatprep.subr.mxu1 %v12521_v20 }
0x13c5   :  { %6528 = vmatpush3.msra.mxu1 %v12527_v51 }
0x13c6   :  { %6529 = vmatprep.subr.mxu1 %v12533_v50 }
0x13c7   :  { %6530 = vmatpush3.msra.mxu1 %v12539_v30 }
0x13c8   :  { %6531 = vmatprep.subr.mxu1 %v12545_v49 }
0x13c9   :  { %6532 = vmatpush3.msra.mxu1 %v12551_v41 }
0x13ca   :  { %6533 = vmatprep.subr.mxu1 %v12557_v48 }
0x13cb   :  { %6534 = vmatpush3.msra.mxu1 %v12563_v46 }
0x13cc   :  { %6535 = vmatprep.subr.mxu1 %v12569_v31 }
0x13cd   :  { %6536 = vmatpush3.msra.mxu1 %v12575_v24 }
0x13ce   :  { %6537 = vmatprep.subr.mxu1 %v12581_v7 }
0x13cf   :  { %6538 = vmatpush3.msra.mxu1 %v12587_v6 }
0x13d0   :  { %6539 = vmatprep.subr.mxu1 %v12593_v4 }
0x13d1   :  { %6540 = vmatpush3.msra.mxu1 %v12599_v3 }
0x13d2   :  { %6541 = vmatprep.subr.mxu1 %v12605_v2 }
0x13ed   :  { %v4114_v1 = vpop.f32.mrf.mxu0  ;;  %v4185_v0 = vpop.f32.mrf.mxu1 }
0x13ee   :  { %4331 = vst [vmem:[%s14123_s23] sm:$0xff] %v4114_v1  ;;  %4333 = vst [vmem:[%s14123_s23 + $0x10] sm:$0xff] %v4185_v0 }
0x13ef   :  { %v4116_v36 = vpop.f32.mrf.mxu0  ;;  %v4187_v21 = vpop.f32.mrf.mxu1 }
0x13f0   :  { %4332 = vst [vmem:[%s14123_s23 + $0x8] sm:$0xff] %v4116_v36  ;;  %4334 = vst [vmem:[%s14123_s23 + $0x18] sm:$0xff] %v4187_v21 }
0x140e   :  { %v6512_v18 = vpop.f32.mrf.mxu1 }
0x1410   :  { %v6513_v29 = vpop.f32.mrf.mxu1 }
0x1411   :  { %v6514_v28 = vadd.f32 %v6513_v29, %v6512_v18  ;;  %v12640_v29 = vld [vmem:[%s14257_s12 + $0x88] sm:$0xff]  ;;  %v12658_v18 = vld [vmem:[%s14257_s12] sm:$0xff] }
0x1413   :  { %4337 = vst [vmem:[%s14123_s23 + $0x30] sm:$0xff] %v6514_v28  ;;  %v12634_v28 = vld [vmem:[%s14257_s12 + $0x10] sm:$0xff] }
0x1414   :  { %6542 = vmatpush3.msra.mxu1 %v12634_v28 }
0x1415   :  { %6543 = vmatprep.subr.mxu1 %v12640_v29 }
0x142e   :  { %v4256_v1 = vpop.f32.mrf.mxu0 }
0x142f   :  { %4335 = vst [vmem:[%s14123_s23 + $0x20] sm:$0xff] %v4256_v1  ;;  %v4685_v1 = vld [vmem:[%s14114_s14 + $0x78] sm:$0xff] }
0x1430   :  { %v4258_v0 = vpop.f32.mrf.mxu0 }
0x1431   :  { %4336 = vst [vmem:[%s14123_s23 + $0x28] sm:$0xff] %v4258_v0 }
0x143e   :  { %v4423_v36 = vpop.f32.mrf.mxu0 }
0x143f   :  { %v4428_v26 = vmax.f32 %v4423_v36, 0.0 }
0x1440   :  { %v4425_v27 = vpop.f32.mrf.mxu0 }
0x1441   :  { %v4429_v21 = vmax.f32 %v4425_v27, 0.0  ;;  %v12646_v27 = vld [vmem:[%s14257_s12 + $0x8] sm:$0xff] }
0x1442   :  { %6544 = vmatpush3.msra.mxu1 %v12646_v27 }
0x1443   :  { %4558 = vmatprep.mubr.f32.mxu0 %v4429_v21 }
0x1444   :  { %4559 = vmatmul.mubr.f32.vlgmr.msra.gmra.mxu0 %v4428_v26  ;;  %v12652_v26 = vld [vmem:[%s14257_s12 + $0x80] sm:$0xff]  ;;  %s6114_s12 = sshll.u32 %s6881_s29, 4  ;;  %s6115_s12 = int_to_ptr.vmem [resolvable:$true] %s6114_s12 }
0x1445   :  { %6545 = vmatprep.subr.mxu1 %v12652_v26 }
0x1446   :  { %6546 = vmatpush3.msra.mxu1 %v12658_v18 }
0x1447   :  { %4705 = vmatprep.subr.mxu1 %v4685_v1  ;;  %v4681_v1 = vld [vmem:[%s14114_s14 + $0x58] sm:$0xff] }
0x1504   :  { %v4560_v0 = vpop.f32.mrf.mxu0 }
0x1505   :  { %v4565_v45 = vmax.f32 %v4560_v0, 0.0  ;;  %v14258_v0 = vmov 0.0  }
0x1506   :  { %v4562_v36 = vpop.f32.mrf.mxu0 }
0x1507   :  { %v4566_v21 = vmax.f32 %v4562_v36, 0.0  ;;  %v4680_v36 = vld [vmem:[%s14114_s14 + $0x50] sm:$0xff] }
0x1509   :  { %4663 = vmatprep.mubr.f32.mxu1 %v4566_v21  ;;  %v4677_v21 = vld [vmem:[%s14114_s14 + $0x38] sm:$0xff] }
0x150a   :  { %4664 = vmatmul.mubr.f32.vlgmr.msra.gmra.mxu1 %v4565_v45  ;;  %v4679_v45 = vld [vmem:[%s14114_s14 + $0x48] sm:$0xff] }
0x150b   :  { %4706 = vmatpush1.msra.mxu1 %v4684_v44  ;;  %4753 = vmatprep.mubr.f32.mxu1 %v14258_v0  ;;  %v4678_v44 = vld [vmem:[%s14114_s14 + $0x40] sm:$0xff] }
0x150c   :  { %4707 = vmatprep.subr.mxu1 %v4683_v42  ;;  %v4676_v42 = vld [vmem:[%s14114_s14 + $0x30] sm:$0xff] }
0x150d   :  { %4708 = vmatpush1.msra.mxu1 %v4682_v43  ;;  %v4675_v43 = vld [vmem:[%s14114_s14 + $0x28] sm:$0xff] }
0x150e   :  { %4709 = vmatprep.subr.mxu1 %v4681_v1  ;;  %v4674_v1 = vld [vmem:[%s14114_s14 + $0x20] sm:$0xff] }
0x150f   :  { %4710 = vmatpush1.msra.mxu1 %v4680_v36  ;;  %v4673_v36 = vld [vmem:[%s14114_s14 + $0x18] sm:$0xff] }
0x1510   :  { %4711 = vmatprep.subr.mxu1 %v4679_v45  ;;  %v4672_v45 = vld [vmem:[%s14114_s14 + $0x10] sm:$0xff] }
0x1511   :  { %4712 = vmatpush1.msra.mxu1 %v4678_v44  ;;  %v4671_v44 = vld [vmem:[%s14114_s14 + $0x8] sm:$0xff] }
0x1512   :  { %4713 = vmatprep.subr.mxu1 %v4677_v21  ;;  %v4670_v21 = vld [vmem:[%s14114_s14] sm:$0xff] }
0x1513   :  { %4714 = vmatpush1.msra.mxu1 %v4676_v42  ;;  %v4793_v42 = vld [vmem:[%s14115_s15 + $0xf8] sm:$0xff] }
0x1514   :  { %4715 = vmatprep.subr.mxu1 %v4675_v43  ;;  %v4792_v43 = vld [vmem:[%s14115_s15 + $0xf0] sm:$0xff] }
0x1515   :  { %4716 = vmatpush1.msra.mxu1 %v4674_v1  ;;  %v4791_v1 = vld [vmem:[%s14115_s15 + $0xe8] sm:$0xff] }
0x1516   :  { %4717 = vmatprep.subr.mxu1 %v4673_v36  ;;  %v4790_v36 = vld [vmem:[%s14115_s15 + $0xe0] sm:$0xff] }
0x1517   :  { %4718 = vmatpush1.msra.mxu1 %v4672_v45  ;;  %v4789_v45 = vld [vmem:[%s14115_s15 + $0xd8] sm:$0xff] }
0x1518   :  { %4719 = vmatprep.subr.mxu1 %v4671_v44  ;;  %v4788_v44 = vld [vmem:[%s14115_s15 + $0xd0] sm:$0xff] }
0x1519   :  { %4720 = vmatpush1.msra.mxu1 %v4670_v21  ;;  %v4786_v21 = vld [vmem:[%s14115_s15 + $0xc0] sm:$0xff] }
0x151a   :  { %6197 = vmatmul.mubr.msk.f32.vlgmr.msra.gmra.mxu1 %vm100_vm0, %v14212_v47  ;;  %4826 = vmatprep.subr.mxu1 %v4793_v42  ;;  %v4787_v47 = vld [vmem:[%s14115_s15 + $0xc8] sm:$0xff]  ;;  %v4785_v42 = vld [vmem:[%s14115_s15 + $0xb8] sm:$0xff] }
0x151b   :  { %4827 = vmatpush1.msra.mxu1 %v4792_v43  ;;  %v4784_v43 = vld [vmem:[%s14115_s15 + $0xb0] sm:$0xff] }
0x151c   :  { %4828 = vmatprep.subr.mxu1 %v4791_v1  ;;  %v4783_v1 = vld [vmem:[%s14115_s15 + $0xa8] sm:$0xff] }
0x151d   :  { %4829 = vmatpush1.msra.mxu1 %v4790_v36  ;;  %v4782_v36 = vld [vmem:[%s14115_s15 + $0xa0] sm:$0xff] }
0x151e   :  { %4830 = vmatprep.subr.mxu1 %v4789_v45  ;;  %v4781_v45 = vld [vmem:[%s14115_s15 + $0x98] sm:$0xff] }
0x151f   :  { %4831 = vmatpush1.msra.mxu1 %v4788_v44  ;;  %v4780_v44 = vld [vmem:[%s14115_s15 + $0x90] sm:$0xff] }
0x1520   :  { %4832 = vmatprep.subr.mxu1 %v4787_v47  ;;  %v4779_v47 = vld [vmem:[%s14115_s15 + $0x88] sm:$0xff] }
0x1521   :  { %4833 = vmatpush1.msra.mxu1 %v4786_v21  ;;  %v4778_v21 = vld [vmem:[%s14115_s15 + $0x80] sm:$0xff] }
0x1522   :  { %4834 = vmatprep.subr.mxu1 %v4785_v42  ;;  %v4777_v42 = vld [vmem:[%s14115_s15 + $0x78] sm:$0xff] }
0x1523   :  { %4835 = vmatpush1.msra.mxu1 %v4784_v43  ;;  %v4776_v43 = vld [vmem:[%s14115_s15 + $0x70] sm:$0xff] }
0x1524   :  { %4836 = vmatprep.subr.mxu1 %v4783_v1  ;;  %v4775_v1 = vld [vmem:[%s14115_s15 + $0x68] sm:$0xff] }
0x1525   :  { %4837 = vmatpush1.msra.mxu1 %v4782_v36  ;;  %v4774_v36 = vld [vmem:[%s14115_s15 + $0x60] sm:$0xff] }
0x1526   :  { %4838 = vmatprep.subr.mxu1 %v4781_v45  ;;  %v4773_v45 = vld [vmem:[%s14115_s15 + $0x58] sm:$0xff] }
0x1527   :  { %4839 = vmatpush1.msra.mxu1 %v4780_v44  ;;  %v4772_v44 = vld [vmem:[%s14115_s15 + $0x50] sm:$0xff] }
0x1528   :  { %4840 = vmatprep.subr.mxu1 %v4779_v47  ;;  %v4771_v47 = vld [vmem:[%s14115_s15 + $0x48] sm:$0xff] }
0x1529   :  { %4841 = vmatpush1.msra.mxu1 %v4778_v21  ;;  %v4770_v21 = vld [vmem:[%s14115_s15 + $0x40] sm:$0xff] }
0x152a   :  { %4842 = vmatprep.subr.mxu1 %v4777_v42  ;;  %v4769_v42 = vld [vmem:[%s14115_s15 + $0x38] sm:$0xff] }
0x152b   :  { %4843 = vmatpush1.msra.mxu1 %v4776_v43  ;;  %v4768_v43 = vld [vmem:[%s14115_s15 + $0x30] sm:$0xff] }
0x152c   :  { %4844 = vmatprep.subr.mxu1 %v4775_v1  ;;  %v4767_v1 = vld [vmem:[%s14115_s15 + $0x28] sm:$0xff] }
0x152d   :  { %4845 = vmatpush1.msra.mxu1 %v4774_v36  ;;  %v4766_v36 = vld [vmem:[%s14115_s15 + $0x20] sm:$0xff] }
0x152e   :  { %4846 = vmatprep.subr.mxu1 %v4773_v45  ;;  %v4765_v45 = vld [vmem:[%s14115_s15 + $0x18] sm:$0xff] }
0x152f   :  { %4847 = vmatpush1.msra.mxu1 %v4772_v44  ;;  %v4764_v44 = vld [vmem:[%s14115_s15 + $0x10] sm:$0xff] }
0x1530   :  { %4848 = vmatprep.subr.mxu1 %v4771_v47  ;;  %v4763_v47 = vld [vmem:[%s14115_s15 + $0x8] sm:$0xff] }
0x1531   :  { %4849 = vmatpush1.msra.mxu1 %v4770_v21  ;;  %v4762_v21 = vld [vmem:[%s14115_s15] sm:$0xff] }
0x1532   :  { %4850 = vmatprep.subr.mxu1 %v4769_v42  ;;  %v4825_v42 = vld [vmem:[%s14115_s15 + $0x1f8] sm:$0xff] }
0x1533   :  { %4851 = vmatpush1.msra.mxu1 %v4768_v43  ;;  %v4824_v43 = vld [vmem:[%s14115_s15 + $0x1f0] sm:$0xff] }
0x1534   :  { %4852 = vmatprep.subr.mxu1 %v4767_v1  ;;  %v4823_v1 = vld [vmem:[%s14115_s15 + $0x1e8] sm:$0xff] }
0x1535   :  { %4853 = vmatpush1.msra.mxu1 %v4766_v36  ;;  %v4822_v36 = vld [vmem:[%s14115_s15 + $0x1e0] sm:$0xff] }
0x1536   :  { %4854 = vmatprep.subr.mxu1 %v4765_v45  ;;  %v4821_v45 = vld [vmem:[%s14115_s15 + $0x1d8] sm:$0xff] }
0x1537   :  { %4855 = vmatpush1.msra.mxu1 %v4764_v44  ;;  %v4820_v44 = vld [vmem:[%s14115_s15 + $0x1d0] sm:$0xff] }
0x1538   :  { %4856 = vmatprep.subr.mxu1 %v4763_v47  ;;  %v4819_v47 = vld [vmem:[%s14115_s15 + $0x1c8] sm:$0xff] }
0x1539   :  { %4857 = vmatpush1.msra.mxu1 %v4762_v21  ;;  %v4818_v21 = vld [vmem:[%s14115_s15 + $0x1c0] sm:$0xff] }
0x153a   :  { %4858 = vmatprep.subr.mxu1 %v4825_v42  ;;  %v4817_v42 = vld [vmem:[%s14115_s15 + $0x1b8] sm:$0xff] }
0x153b   :  { %4859 = vmatpush2.msra.mxu1 %v4824_v43  ;;  %v4816_v43 = vld [vmem:[%s14115_s15 + $0x1b0] sm:$0xff] }
0x153c   :  { %4860 = vmatprep.subr.mxu1 %v4823_v1  ;;  %v4815_v1 = vld [vmem:[%s14115_s15 + $0x1a8] sm:$0xff] }
0x153d   :  { %4861 = vmatpush2.msra.mxu1 %v4822_v36  ;;  %v4814_v36 = vld [vmem:[%s14115_s15 + $0x1a0] sm:$0xff] }
0x153e   :  { %4862 = vmatprep.subr.mxu1 %v4821_v45  ;;  %v4813_v45 = vld [vmem:[%s14115_s15 + $0x198] sm:$0xff] }
0x153f   :  { %4863 = vmatpush2.msra.mxu1 %v4820_v44  ;;  %v4812_v44 = vld [vmem:[%s14115_s15 + $0x190] sm:$0xff] }
0x1540   :  { %4864 = vmatprep.subr.mxu1 %v4819_v47  ;;  %v4811_v47 = vld [vmem:[%s14115_s15 + $0x188] sm:$0xff] }
0x1541   :  { %4865 = vmatpush2.msra.mxu1 %v4818_v21  ;;  %v4810_v21 = vld [vmem:[%s14115_s15 + $0x180] sm:$0xff] }
0x1542   :  { %4866 = vmatprep.subr.mxu1 %v4817_v42  ;;  %v4809_v42 = vld [vmem:[%s14115_s15 + $0x178] sm:$0xff] }
0x1543   :  { %4867 = vmatpush2.msra.mxu1 %v4816_v43  ;;  %v4808_v43 = vld [vmem:[%s14115_s15 + $0x170] sm:$0xff] }
0x1544   :  { %4868 = vmatprep.subr.mxu1 %v4815_v1  ;;  %v4807_v1 = vld [vmem:[%s14115_s15 + $0x168] sm:$0xff] }
0x1545   :  { %4869 = vmatpush2.msra.mxu1 %v4814_v36  ;;  %v4806_v36 = vld [vmem:[%s14115_s15 + $0x160] sm:$0xff] }
0x1546   :  { %4870 = vmatprep.subr.mxu1 %v4813_v45  ;;  %v4805_v45 = vld [vmem:[%s14115_s15 + $0x158] sm:$0xff] }
0x1547   :  { %4871 = vmatpush2.msra.mxu1 %v4812_v44  ;;  %v4804_v44 = vld [vmem:[%s14115_s15 + $0x150] sm:$0xff] }
0x1548   :  { %4872 = vmatprep.subr.mxu1 %v4811_v47  ;;  %v4803_v47 = vld [vmem:[%s14115_s15 + $0x148] sm:$0xff] }
0x1549   :  { %4873 = vmatpush2.msra.mxu1 %v4810_v21  ;;  %v4802_v21 = vld [vmem:[%s14115_s15 + $0x140] sm:$0xff] }
0x154a   :  { %4874 = vmatprep.subr.mxu1 %v4809_v42  ;;  %v4801_v42 = vld [vmem:[%s14115_s15 + $0x138] sm:$0xff] }
0x154b   :  { %4875 = vmatpush2.msra.mxu1 %v4808_v43  ;;  %v4800_v43 = vld [vmem:[%s14115_s15 + $0x130] sm:$0xff] }
0x154c   :  { %4876 = vmatprep.subr.mxu1 %v4807_v1  ;;  %v4799_v1 = vld [vmem:[%s14115_s15 + $0x128] sm:$0xff] }
0x154d   :  { %4877 = vmatpush2.msra.mxu1 %v4806_v36  ;;  %v4798_v36 = vld [vmem:[%s14115_s15 + $0x120] sm:$0xff] }
0x154e   :  { %4878 = vmatprep.subr.mxu1 %v4805_v45  ;;  %v4797_v45 = vld [vmem:[%s14115_s15 + $0x118] sm:$0xff] }
0x154f   :  { %4879 = vmatpush2.msra.mxu1 %v4804_v44  ;;  %v4796_v44 = vld [vmem:[%s14115_s15 + $0x110] sm:$0xff] }
0x1550   :  { %4880 = vmatprep.subr.mxu1 %v4803_v47  ;;  %v4795_v47 = vld [vmem:[%s14115_s15 + $0x108] sm:$0xff] }
0x1551   :  { %4881 = vmatpush2.msra.mxu1 %v4802_v21  ;;  %v4794_v21 = vld [vmem:[%s14115_s15 + $0x100] sm:$0xff] }
0x1552   :  { %4882 = vmatprep.subr.mxu1 %v4801_v42  ;;  %v4930_v42 = vld [vmem:[%s14116_s16 + $0xf8] sm:$0xff] }
0x1553   :  { %4883 = vmatpush2.msra.mxu1 %v4800_v43  ;;  %v4914_v43 = vld [vmem:[%s14116_s16 + $0x78] sm:$0xff]  ;;  %6550 = vmatprep.subr.mxu0 %v4930_v42 }
0x1554   :  { %4884 = vmatprep.subr.mxu1 %v4799_v1  ;;  %v4929_v1 = vld [vmem:[%s14116_s16 + $0xf0] sm:$0xff]  ;;  %6551 = vmatpush3.msra.mxu0 %v4914_v43  ;;  %v4910_v42 = vld [vmem:[%s14116_s16 + $0x58] sm:$0xff] }
0x1555   :  { %4885 = vmatpush2.msra.mxu1 %v4798_v36  ;;  %v4913_v36 = vld [vmem:[%s14116_s16 + $0x70] sm:$0xff]  ;;  %6552 = vmatprep.subr.mxu0 %v4929_v1 }
0x1556   :  { %4886 = vmatprep.subr.mxu1 %v4797_v45  ;;  %v4928_v45 = vld [vmem:[%s14116_s16 + $0xe8] sm:$0xff]  ;;  %6553 = vmatpush3.msra.mxu0 %v4913_v36  ;;  %v4925_v43 = vld [vmem:[%s14116_s16 + $0xd0] sm:$0xff] }
0x1557   :  { %4887 = vmatpush2.msra.mxu1 %v4796_v44  ;;  %v4912_v44 = vld [vmem:[%s14116_s16 + $0x68] sm:$0xff]  ;;  %6554 = vmatprep.subr.mxu0 %v4928_v45  ;;  %v4909_v1 = vld [vmem:[%s14116_s16 + $0x50] sm:$0xff] }
0x1558   :  { %4888 = vmatprep.subr.mxu1 %v4795_v47  ;;  %v4911_v47 = vld [vmem:[%s14116_s16 + $0x60] sm:$0xff]  ;;  %6555 = vmatpush3.msra.mxu0 %v4912_v44  ;;  %v4924_v36 = vld [vmem:[%s14116_s16 + $0xc8] sm:$0xff] }
0x1559   :  { %4889 = vmatpush2.msra.mxu1 %v4794_v21  ;;  %v4926_v21 = vld [vmem:[%s14116_s16 + $0xd8] sm:$0xff]  ;;  %v4908_v45 = vld [vmem:[%s14116_s16 + $0x48] sm:$0xff]  ;;  %v4923_v44 = vld [vmem:[%s14116_s16 + $0xc0] sm:$0xff] }
0x155a   :  { %6585 = vmatprep.subr.mxu1 %v12451_v40  ;;  %v4927_v40 = vld [vmem:[%s14116_s16 + $0xe0] sm:$0xff] }
0x155b   :  { %6556 = vmatprep.subr.mxu0 %v4927_v40  ;;  %v4907_v40 = vld [vmem:[%s14116_s16 + $0x40] sm:$0xff] }
0x155c   :  { %6557 = vmatpush3.msra.mxu0 %v4911_v47  ;;  %v4922_v47 = vld [vmem:[%s14116_s16 + $0xb8] sm:$0xff] }
0x155d   :  { %6558 = vmatprep.subr.mxu0 %v4926_v21  ;;  %v4906_v21 = vld [vmem:[%s14116_s16 + $0x38] sm:$0xff] }
0x155e   :  { %6559 = vmatpush3.msra.mxu0 %v4910_v42  ;;  %v4921_v42 = vld [vmem:[%s14116_s16 + $0xb0] sm:$0xff] }
0x155f   :  { %6560 = vmatprep.subr.mxu0 %v4925_v43  ;;  %v4905_v43 = vld [vmem:[%s14116_s16 + $0x30] sm:$0xff] }
0x1560   :  { %6561 = vmatpush3.msra.mxu0 %v4909_v1  ;;  %v4920_v1 = vld [vmem:[%s14116_s16 + $0xa8] sm:$0xff] }
0x1561   :  { %6562 = vmatprep.subr.mxu0 %v4924_v36  ;;  %v4904_v36 = vld [vmem:[%s14116_s16 + $0x28] sm:$0xff] }
0x1562   :  { %6563 = vmatpush3.msra.mxu0 %v4908_v45  ;;  %v4919_v45 = vld [vmem:[%s14116_s16 + $0xa0] sm:$0xff] }
0x1563   :  { %6564 = vmatprep.subr.mxu0 %v4923_v44  ;;  %v4903_v44 = vld [vmem:[%s14116_s16 + $0x20] sm:$0xff] }
0x1564   :  { %6565 = vmatpush3.msra.mxu0 %v4907_v40  ;;  %v4918_v40 = vld [vmem:[%s14116_s16 + $0x98] sm:$0xff] }
0x1565   :  { %6566 = vmatprep.subr.mxu0 %v4922_v47  ;;  %v4902_v47 = vld [vmem:[%s14116_s16 + $0x18] sm:$0xff] }
0x1566   :  { %6567 = vmatpush3.msra.mxu0 %v4906_v21 }
0x1567   :  { %6568 = vmatprep.subr.mxu0 %v4921_v42 }
0x1568   :  { %6569 = vmatpush3.msra.mxu0 %v4905_v43 }
0x1569   :  { %6570 = vmatprep.subr.mxu0 %v4920_v1 }
0x156a   :  { %6571 = vmatpush3.msra.mxu0 %v4904_v36 }
0x156b   :  { %6572 = vmatprep.subr.mxu0 %v4919_v45  ;;  %v6715_v45 = vld [vmem:[%s14220_s11 + $0xd8] sm:$0xff] }
0x156c   :  { %6573 = vmatpush3.msra.mxu0 %v4903_v44  ;;  %v6716_v44 = vld [vmem:[%s14220_s11 + $0xd0] sm:$0xff] }
0x156d   :  { %6574 = vmatprep.subr.mxu0 %v4918_v40  ;;  %v6717_v40 = vld [vmem:[%s14220_s11 + $0xc8] sm:$0xff] }
0x156e   :  { %6575 = vmatpush3.msra.mxu0 %v4902_v47  ;;  %v14280_v47 = vld [vmem:[#allocation37_spill] sm:$0xff] }
0x15ca   :  { %v6547_v21 = vpop.f32.mrf.mxu1 }
0x15cc   :  { %v6548_v42 = vpop.f32.mrf.mxu1 }
0x15cd   :  { %v6549_v43 = vadd.f32 %v6548_v42, %v6547_v21  ;;  %v14281_v21 = vld [vmem:[#allocation38_spill] sm:$0xff]  ;;  %v14282_v42 = vld [vmem:[#allocation39_spill] sm:$0xff] }
0x15cf   :  { %4669 = vst.msk [vmem:[#allocation7] sm:$0xff] %vm100_vm0, %v6549_v43  ;;  %v14283_v43 = vld [vmem:[#allocation40_spill] sm:$0xff] }
0x15da   :  { %v4755_v1 = vpop.f32.mrf.mxu1 }
0x15db   :  { %v4760_v38 = vmax.f32 %v4755_v1, 0.0  ;;  %v14284_v1 = vld [vmem:[#allocation41_spill] sm:$0xff] }
0x15dc   :  { %v4757_v35 = vpop.f32.mrf.mxu1 }
0x15dd   :  { %v4761_v36 = vmax.f32 %v4757_v35, 0.0  ;;  %v4916_v35 = vld [vmem:[%s14116_s16 + $0x88] sm:$0xff] }
0x15df   :  { %4890 = vmatprep.mubr.f32.mxu1 %v4761_v36  ;;  %v14285_v36 = vld [vmem:[#allocation42_spill] sm:$0xff] }
0x15e0   :  { %4891 = vmatmul.mubr.f32.vlgmr.msra.gmra.mxu1 %v4760_v38  ;;  %v4901_v38 = vld [vmem:[%s14116_s16 + $0x10] sm:$0xff] }
0x15e1   :  { %6586 = vmatpush3.msra.mxu1 %v12456_v52  ;;  %v6709_v52 = vld [vmem:[%s14219_s13 + $0x8] sm:$0xff] }
0x15e2   :  { %6587 = vmatprep.subr.mxu1 %v12461_v53  ;;  %v6710_v53 = vld [vmem:[%s14219_s13] sm:$0xff] }
0x15e3   :  { %6588 = vmatpush3.msra.mxu1 %v12467_v54  ;;  %v6711_v54 = vld [vmem:[%s14220_s11 + $0xf8] sm:$0xff] }
0x15e4   :  { %6589 = vmatprep.subr.mxu1 %v12473_v14 }
0x15e5   :  { %6590 = vmatpush3.msra.mxu1 %v12479_v5  ;;  %v4917_v5 = vld [vmem:[%s14116_s16 + $0x90] sm:$0xff] }
0x15e6   :  { %6591 = vmatprep.subr.mxu1 %v12485_v39  ;;  %6576 = vmatprep.subr.mxu0 %v4917_v5  ;;  %v6708_v39 = vld [vmem:[%s14219_s13 + $0x10] sm:$0xff]  ;;  %v14286_v5 = vld [vmem:[#allocation43_spill] sm:$0xff] }
0x15e7   :  { %6592 = vmatpush3.msra.mxu1 %v12491_v37  ;;  %6577 = vmatpush3.msra.mxu0 %v4901_v38  ;;  %v6707_v37 = vld [vmem:[%s14219_s13 + $0x18] sm:$0xff]  ;;  %v14287_v38 = vld [vmem:[#allocation44_spill] sm:$0xff] }
0x15e8   :  { %6593 = vmatprep.subr.mxu1 %v12497_v19  ;;  %6578 = vmatprep.subr.mxu0 %v4916_v35  ;;  %v6706_v19 = vld [vmem:[%s14219_s13 + $0x20] sm:$0xff]  ;;  %v14288_v35 = vld [vmem:[#allocation45_spill] sm:$0xff] }
0x15e9   :  { %6594 = vmatpush3.msra.mxu1 %v12503_v34  ;;  %v6705_v34 = vld [vmem:[%s14219_s13 + $0x28] sm:$0xff] }
0x15ea   :  { %6595 = vmatprep.subr.mxu1 %v12509_v33  ;;  %v6704_v33 = vld [vmem:[%s14219_s13 + $0x30] sm:$0xff] }
0x15eb   :  { %6596 = vmatpush3.msra.mxu1 %v12515_v32  ;;  %v6703_v32 = vld [vmem:[%s14219_s13 + $0x38] sm:$0xff] }
0x15ec   :  { %6597 = vmatprep.subr.mxu1 %v12521_v20  ;;  %v6702_v20 = vld [vmem:[%s14219_s13 + $0x40] sm:$0xff] }
0x15ed   :  { %6598 = vmatpush3.msra.mxu1 %v12527_v51  ;;  %v6701_v51 = vld [vmem:[%s14219_s13 + $0x48] sm:$0xff] }
0x15ee   :  { %6599 = vmatprep.subr.mxu1 %v12533_v50  ;;  %v6700_v50 = vld [vmem:[%s14219_s13 + $0x50] sm:$0xff] }
0x15ef   :  { %6600 = vmatpush3.msra.mxu1 %v12539_v30  ;;  %v6699_v30 = vld [vmem:[%s14219_s13 + $0x58] sm:$0xff] }
0x15f0   :  { %6601 = vmatprep.subr.mxu1 %v12545_v49  ;;  %v6698_v49 = vld [vmem:[%s14219_s13 + $0x60] sm:$0xff] }
0x15f1   :  { %6602 = vmatpush3.msra.mxu1 %v12551_v41  ;;  %v6697_v41 = vld [vmem:[%s14219_s13 + $0x68] sm:$0xff] }
0x15f2   :  { %6603 = vmatprep.subr.mxu1 %v12557_v48  ;;  %v6696_v48 = vld [vmem:[%s14219_s13 + $0x70] sm:$0xff] }
0x15f3   :  { %6604 = vmatpush3.msra.mxu1 %v12563_v46 }
0x15f4   :  { %6605 = vmatprep.subr.mxu1 %v12569_v31 }
0x15f5   :  { %6606 = vmatpush3.msra.mxu1 %v12575_v24 }
0x15f6   :  { %6607 = vmatprep.subr.mxu1 %v12581_v7 }
0x15f7   :  { %6608 = vmatpush3.msra.mxu1 %v12587_v6  ;;  %v6695_v6 = vld [vmem:[%s14219_s13 + $0x78] sm:$0xff] }
0x15f8   :  { %6609 = vmatprep.subr.mxu1 %v12593_v4  ;;  %v4899_v4 = vld [vmem:[%s14116_s16] sm:$0xff] }
0x15f9   :  { %6610 = vmatpush3.msra.mxu1 %v12599_v3  ;;  %v4915_v3 = vld [vmem:[%s14116_s16 + $0x80] sm:$0xff] }
0x15fa   :  { %6611 = vmatprep.subr.mxu1 %v12605_v2  ;;  %v4900_v2 = vld [vmem:[%s14116_s16 + $0x8] sm:$0xff] }
0x15fb   :  { %6612 = vmatpush3.msra.mxu1 %v12634_v28  ;;  %6579 = vmatpush3.msra.mxu0 %v4900_v2  ;;  %v14289_v2 = vld [vmem:[#allocation46_spill] sm:$0xff] }
0x15fc   :  { %6613 = vmatprep.subr.mxu1 %v12640_v29  ;;  %6580 = vmatprep.subr.mxu0 %v4915_v3  ;;  %v14290_v3 = vld [vmem:[#allocation47_spill] sm:$0xff] }
0x15fd   :  { %6614 = vmatpush3.msra.mxu1 %v12646_v27  ;;  %6581 = vmatpush3.msra.mxu0 %v4899_v4  ;;  %v6712_v27 = vld [vmem:[%s14220_s11 + $0xf0] sm:$0xff]  ;;  %v14291_v4 = vld [vmem:[#allocation48_spill] sm:$0xff] }
0x15fe   :  { %6615 = vmatprep.subr.mxu1 %v12652_v26  ;;  %5037 = vmatprep.subr.mxu0 %v6695_v6  ;;  %v6713_v26 = vld [vmem:[%s14220_s11 + $0xe8] sm:$0xff] }
0x15ff   :  { %6616 = vmatpush3.msra.mxu1 %v12658_v18  ;;  %v6714_v18 = vld [vmem:[%s14220_s11 + $0xe0] sm:$0xff]  ;;  %v14292_v6 = vld [vmem:[#allocation49_spill] sm:$0xff] }
0x16a0   :  { %v4892_v7 = vpop.f32.mrf.mxu1 }
0x16a1   :  { %v4897_v46 = vmax.f32 %v4892_v7, 0.0  ;;  %v14293_v7 = vld [vmem:[#allocation50_spill] sm:$0xff] }
0x16a2   :  { %v4894_v24 = vpop.f32.mrf.mxu1 }
0x16a3   :  { %v4898_v31 = vmax.f32 %v4894_v24, 0.0  ;;  %v14294_v24 = vld [vmem:[#allocation51_spill] sm:$0xff] }
0x16a5   :  { %4995 = vmatprep.mubr.f32.mxu0 %v4898_v31 }
0x16a6   :  { %4996 = vmatmul.mubr.f32.vlgmr.msra.gmra.mxu0 %v4897_v46 }
0x16a7   :  { %5038 = vmatpush1.msra.mxu0 %v6696_v48  ;;  %5085 = vmatprep.mubr.f32.mxu0 %v14258_v0 }
0x16a8   :  { %5039 = vmatprep.subr.mxu0 %v6697_v41 }
0x16a9   :  { %5040 = vmatpush1.msra.mxu0 %v6698_v49  ;;  %v5348_v49 = vld [vmem:[%s14216_s27 + $0x78] sm:$0xff] }
0x16aa   :  { %5041 = vmatprep.subr.mxu0 %v6699_v30  ;;  %5368 = vmatprep.subr.mxu1 %v5348_v49  ;;  %v5479_v49 = vld [vmem:[%s14217_s6 + $0x1b0] sm:$0xff] }
0x16ab   :  { %5042 = vmatpush1.msra.mxu0 %v6700_v50 }
0x16ac   :  { %5043 = vmatprep.subr.mxu0 %v6701_v51 }
0x16ad   :  { %5044 = vmatpush1.msra.mxu0 %v6702_v20 }
0x16ae   :  { %5045 = vmatprep.subr.mxu0 %v6703_v32  ;;  %v5347_v32 = vld [vmem:[%s14216_s27 + $0x70] sm:$0xff] }
0x16af   :  { %5046 = vmatpush1.msra.mxu0 %v6704_v33  ;;  %v5346_v33 = vld [vmem:[%s14216_s27 + $0x68] sm:$0xff] }
0x16b0   :  { %5047 = vmatprep.subr.mxu0 %v6705_v34  ;;  %v5345_v34 = vld [vmem:[%s14216_s27 + $0x60] sm:$0xff] }
0x16b1   :  { %5048 = vmatpush1.msra.mxu0 %v6706_v19  ;;  %v5344_v19 = vld [vmem:[%s14216_s27 + $0x58] sm:$0xff] }
0x16b2   :  { %5049 = vmatprep.subr.mxu0 %v6707_v37  ;;  %v5343_v37 = vld [vmem:[%s14216_s27 + $0x50] sm:$0xff] }
0x16b3   :  { %5050 = vmatpush1.msra.mxu0 %v6708_v39  ;;  %v5342_v39 = vld [vmem:[%s14216_s27 + $0x48] sm:$0xff] }
0x16b4   :  { %5051 = vmatprep.subr.mxu0 %v6709_v52  ;;  %v5341_v52 = vld [vmem:[%s14216_s27 + $0x40] sm:$0xff] }
0x16b5   :  { %5052 = vmatpush1.msra.mxu0 %v6710_v53  ;;  %v5339_v53 = vld [vmem:[%s14216_s27 + $0x30] sm:$0xff] }
0x16b6   :  { %5158 = vmatprep.subr.mxu0 %v6711_v54  ;;  %v5338_v54 = vld [vmem:[%s14216_s27 + $0x28] sm:$0xff] }
0x1766   :  { %v6582_v14 = vpop.f32.mrf.mxu0 }
0x1768   :  { %v6583_v28 = vpop.f32.mrf.mxu0 }
0x1769   :  { %v6584_v29 = vadd.f32 %v6583_v28, %v6582_v14  ;;  %v5337_v14 = vld [vmem:[%s14216_s27 + $0x20] sm:$0xff]  ;;  %v5336_v28 = vld [vmem:[%s14216_s27 + $0x18] sm:$0xff] }
0x176b   :  { %5001 = vst.msk [vmem:[#allocation9] sm:$0xff] %vm100_vm0, %v6584_v29  ;;  %6198 = vmatmul.mubr.msk.f32.vlgmr.msra.gmra.mxu0 %vm100_vm0, %v6584_v29  ;;  %v5335_v29 = vld [vmem:[%s14216_s27 + $0x10] sm:$0xff] }
0x176c   :  { %5159 = vmatpush1.msra.mxu0 %v6712_v27  ;;  %v5334_v27 = vld [vmem:[%s14216_s27 + $0x8] sm:$0xff] }
0x176d   :  { %5160 = vmatprep.subr.mxu0 %v6713_v26  ;;  %v5333_v26 = vld [vmem:[%s14216_s27] sm:$0xff] }
0x176e   :  { %5161 = vmatpush1.msra.mxu0 %v6714_v18  ;;  %v5456_v18 = vld [vmem:[%s14217_s6 + $0xf8] sm:$0xff] }
0x176f   :  { %5162 = vmatprep.subr.mxu0 %v6715_v45 }
0x1770   :  { %5163 = vmatpush1.msra.mxu0 %v6716_v44 }
0x1771   :  { %5164 = vmatprep.subr.mxu0 %v6717_v40 }
0x1772   :  { %5165 = vmatpush1.msra.mxu0 %v12109_v55  ;;  %v14259_v55 = vld [vmem:[#allocation16_spill] sm:$0xff] }
0x1773   :  { %5166 = vmatprep.subr.mxu0 %v12114_v56  ;;  %v14260_v56 = vld [vmem:[#allocation17_spill] sm:$0xff] }
0x1774   :  { %5167 = vmatpush1.msra.mxu0 %v12119_v57  ;;  %v14261_v57 = vld [vmem:[#allocation18_spill] sm:$0xff] }
0x1775   :  { %5168 = vmatprep.subr.mxu0 %v12127_v58  ;;  %v14262_v58 = vld [vmem:[#allocation19_spill] sm:$0xff] }
0x1776   :  { %5169 = vmatpush1.msra.mxu0 %v12133_v15  ;;  %v14263_v15 = vld [vmem:[#allocation20_spill] sm:$0xff] }
0x1777   :  { %5170 = vmatprep.subr.mxu0 %v12139_v59  ;;  %v14264_v59 = vld [vmem:[#allocation21_spill] sm:$0xff] }
0x1778   :  { %5171 = vmatpush1.msra.mxu0 %v12145_v60  ;;  %v14265_v60 = vld [vmem:[#allocation22_spill] sm:$0xff] }
0x1779   :  { %5172 = vmatprep.subr.mxu0 %v12151_v61  ;;  %v14266_v61 = vld [vmem:[#allocation23_spill] sm:$0xff] }
0x177a   :  { %5173 = vmatpush1.msra.mxu0 %v12157_v62  ;;  %v14267_v62 = vld [vmem:[#allocation24_spill] sm:$0xff] }
0x177b   :  { %5174 = vmatprep.subr.mxu0 %v12163_v63  ;;  %v14268_v63 = vld [vmem:[#allocation25_spill] sm:$0xff] }
0x177c   :  { %5175 = vmatpush1.msra.mxu0 %v12168_v8  ;;  %v14269_v8 = vld [vmem:[#allocation26_spill] sm:$0xff] }
0x177d   :  { %5176 = vmatprep.subr.mxu0 %v12173_v9  ;;  %v14270_v9 = vld [vmem:[#allocation27_spill] sm:$0xff] }
0x177e   :  { %5177 = vmatpush1.msra.mxu0 %v12179_v10  ;;  %v14271_v10 = vld [vmem:[#allocation28_spill] sm:$0xff] }
0x177f   :  { %5178 = vmatprep.subr.mxu0 %v12185_v11  ;;  %v14272_v11 = vld [vmem:[#allocation29_spill] sm:$0xff] }
0x1780   :  { %5179 = vmatpush1.msra.mxu0 %v12191_v12  ;;  %v14273_v12 = vld [vmem:[#allocation30_spill] sm:$0xff] }
0x1781   :  { %5180 = vmatprep.subr.mxu0 %v12197_v13  ;;  %v14274_v13 = vld [vmem:[#allocation31_spill] sm:$0xff] }
0x1782   :  { %5181 = vmatpush1.msra.mxu0 %v12203_v16  ;;  %v14275_v16 = vld [vmem:[#allocation32_spill] sm:$0xff] }
0x1783   :  { %5182 = vmatprep.subr.mxu0 %v12209_v17  ;;  %v14276_v17 = vld [vmem:[#allocation33_spill] sm:$0xff] }
0x1784   :  { %5183 = vmatpush1.msra.mxu0 %v12215_v22  ;;  %v14277_v22 = vld [vmem:[#allocation34_spill] sm:$0xff] }
0x1785   :  { %5184 = vmatprep.subr.mxu0 %v12221_v23  ;;  %v14278_v23 = vld [vmem:[#allocation35_spill] sm:$0xff] }
0x1786   :  { %5185 = vmatpush1.msra.mxu0 %v12227_v25  ;;  %v14279_v25 = vld [vmem:[#allocation36_spill] sm:$0xff] }
0x1787   :  { %5186 = vmatprep.subr.mxu0 %v14259_v55  ;;  %v5455_v55 = vld [vmem:[%s14217_s6 + $0xf0] sm:$0xff] }
0x1788   :  { %5187 = vmatpush1.msra.mxu0 %v14260_v56  ;;  %v5454_v56 = vld [vmem:[%s14217_s6 + $0xe8] sm:$0xff] }
0x1789   :  { %5188 = vmatprep.subr.mxu0 %v14261_v57  ;;  %v5453_v57 = vld [vmem:[%s14217_s6 + $0xe0] sm:$0xff] }
0x178a   :  { %5189 = vmatpush1.msra.mxu0 %v14262_v58  ;;  %v5452_v58 = vld [vmem:[%s14217_s6 + $0xd8] sm:$0xff] }
0x178b   :  { %5190 = vmatprep.subr.mxu0 %v14263_v15  ;;  %v5451_v15 = vld [vmem:[%s14217_s6 + $0xd0] sm:$0xff] }
0x178c   :  { %5191 = vmatpush2.msra.mxu0 %v14264_v59  ;;  %v5450_v59 = vld [vmem:[%s14217_s6 + $0xc8] sm:$0xff] }
0x178d   :  { %5192 = vmatprep.subr.mxu0 %v14265_v60  ;;  %v5449_v60 = vld [vmem:[%s14217_s6 + $0xc0] sm:$0xff] }
0x178e   :  { %5193 = vmatpush2.msra.mxu0 %v14266_v61  ;;  %v5448_v61 = vld [vmem:[%s14217_s6 + $0xb8] sm:$0xff] }
0x178f   :  { %5194 = vmatprep.subr.mxu0 %v14267_v62  ;;  %v5447_v62 = vld [vmem:[%s14217_s6 + $0xb0] sm:$0xff] }
0x1790   :  { %5195 = vmatpush2.msra.mxu0 %v14268_v63  ;;  %v5446_v63 = vld [vmem:[%s14217_s6 + $0xa8] sm:$0xff] }
0x1791   :  { %5196 = vmatprep.subr.mxu0 %v14269_v8  ;;  %v5445_v8 = vld [vmem:[%s14217_s6 + $0xa0] sm:$0xff] }
0x1792   :  { %5197 = vmatpush2.msra.mxu0 %v14270_v9  ;;  %v5444_v9 = vld [vmem:[%s14217_s6 + $0x98] sm:$0xff] }
0x1793   :  { %5198 = vmatprep.subr.mxu0 %v14271_v10  ;;  %v5443_v10 = vld [vmem:[%s14217_s6 + $0x90] sm:$0xff] }
0x1794   :  { %5199 = vmatpush2.msra.mxu0 %v14272_v11  ;;  %v5442_v11 = vld [vmem:[%s14217_s6 + $0x88] sm:$0xff] }
0x1795   :  { %5200 = vmatprep.subr.mxu0 %v14273_v12  ;;  %v5441_v12 = vld [vmem:[%s14217_s6 + $0x80] sm:$0xff] }
0x1796   :  { %5201 = vmatpush2.msra.mxu0 %v14274_v13  ;;  %v5440_v13 = vld [vmem:[%s14217_s6 + $0x78] sm:$0xff] }
0x1797   :  { %5202 = vmatprep.subr.mxu0 %v14275_v16  ;;  %v5439_v16 = vld [vmem:[%s14217_s6 + $0x70] sm:$0xff] }
0x1798   :  { %5203 = vmatpush2.msra.mxu0 %v14276_v17  ;;  %v5438_v17 = vld [vmem:[%s14217_s6 + $0x68] sm:$0xff] }
0x1799   :  { %5204 = vmatprep.subr.mxu0 %v14277_v22  ;;  %v5437_v22 = vld [vmem:[%s14217_s6 + $0x60] sm:$0xff] }
0x179a   :  { %5205 = vmatpush2.msra.mxu0 %v14278_v23  ;;  %v5436_v23 = vld [vmem:[%s14217_s6 + $0x58] sm:$0xff] }
0x179b   :  { %5206 = vmatprep.subr.mxu0 %v14279_v25  ;;  %v5435_v25 = vld [vmem:[%s14217_s6 + $0x50] sm:$0xff] }
0x179c   :  { %5207 = vmatpush2.msra.mxu0 %v14280_v47  ;;  %v5434_v47 = vld [vmem:[%s14217_s6 + $0x48] sm:$0xff] }
0x179d   :  { %5208 = vmatprep.subr.mxu0 %v14281_v21  ;;  %v5433_v21 = vld [vmem:[%s14217_s6 + $0x40] sm:$0xff] }
0x179e   :  { %5209 = vmatpush2.msra.mxu0 %v14282_v42  ;;  %v5432_v42 = vld [vmem:[%s14217_s6 + $0x38] sm:$0xff] }
0x179f   :  { %5210 = vmatprep.subr.mxu0 %v14283_v43  ;;  %v5431_v43 = vld [vmem:[%s14217_s6 + $0x30] sm:$0xff] }
0x17a0   :  { %5211 = vmatpush2.msra.mxu0 %v14284_v1  ;;  %v5430_v1 = vld [vmem:[%s14217_s6 + $0x28] sm:$0xff] }
0x17a1   :  { %5212 = vmatprep.subr.mxu0 %v14285_v36  ;;  %v5429_v36 = vld [vmem:[%s14217_s6 + $0x20] sm:$0xff] }
0x17a2   :  { %5213 = vmatpush2.msra.mxu0 %v14286_v5  ;;  %v5428_v5 = vld [vmem:[%s14217_s6 + $0x18] sm:$0xff] }
0x17a3   :  { %5214 = vmatprep.subr.mxu0 %v14287_v38  ;;  %v5427_v38 = vld [vmem:[%s14217_s6 + $0x10] sm:$0xff] }
0x17a4   :  { %5215 = vmatpush2.msra.mxu0 %v14288_v35  ;;  %v5426_v35 = vld [vmem:[%s14217_s6 + $0x8] sm:$0xff] }
0x17a5   :  { %5216 = vmatprep.subr.mxu0 %v14289_v2  ;;  %v5425_v2 = vld [vmem:[%s14217_s6] sm:$0xff] }
0x17a6   :  { %5217 = vmatpush2.msra.mxu0 %v14290_v3  ;;  %v5488_v3 = vld [vmem:[%s14217_s6 + $0x1f8] sm:$0xff] }
0x17a7   :  { %5218 = vmatprep.subr.mxu0 %v14291_v4  ;;  %v5487_v4 = vld [vmem:[%s14217_s6 + $0x1f0] sm:$0xff] }
0x17a8   :  { %5219 = vmatpush2.msra.mxu0 %v14292_v6  ;;  %v5486_v6 = vld [vmem:[%s14217_s6 + $0x1e8] sm:$0xff] }
0x17a9   :  { %5220 = vmatprep.subr.mxu0 %v14293_v7  ;;  %v5485_v7 = vld [vmem:[%s14217_s6 + $0x1e0] sm:$0xff] }
0x17aa   :  { %5221 = vmatpush2.msra.mxu0 %v14294_v24  ;;  %v5484_v24 = vld [vmem:[%s14217_s6 + $0x1d8] sm:$0xff] }
0x182b   :  { %v5087_v31 = vpop.f32.mrf.mxu0 }
0x182c   :  { %v5092_v41 = vmax.f32 %v5087_v31, 0.0  ;;  %v5483_v31 = vld [vmem:[%s14217_s6 + $0x1d0] sm:$0xff] }
0x182d   :  { %v5089_v46 = vpop.f32.mrf.mxu0 }
0x182e   :  { %v5093_v48 = vmax.f32 %v5089_v46, 0.0  ;;  %v5482_v46 = vld [vmem:[%s14217_s6 + $0x1c8] sm:$0xff] }
0x1830   :  { %5222 = vmatprep.mubr.f32.mxu0 %v5093_v48  ;;  %v5481_v48 = vld [vmem:[%s14217_s6 + $0x1c0] sm:$0xff] }
0x1831   :  { %5223 = vmatmul.mubr.f32.vlgmr.msra.gmra.mxu0 %v5092_v41  ;;  %v5480_v41 = vld [vmem:[%s14217_s6 + $0x1b8] sm:$0xff] }
0x18f1   :  { %v5224_v30 = vpop.f32.mrf.mxu0 }
0x18f2   :  { %v5229_v20 = vmax.f32 %v5224_v30, 0.0  ;;  %v5478_v30 = vld [vmem:[%s14217_s6 + $0x1a8] sm:$0xff] }
0x18f3   :  { %v5226_v50 = vpop.f32.mrf.mxu0 }
0x18f4   :  { %v5230_v51 = vmax.f32 %v5226_v50, 0.0  ;;  %v5477_v50 = vld [vmem:[%s14217_s6 + $0x1a0] sm:$0xff] }
0x18f6   :  { %5327 = vmatprep.mubr.f32.mxu1 %v5230_v51  ;;  %v5476_v51 = vld [vmem:[%s14217_s6 + $0x198] sm:$0xff] }
0x18f7   :  { %5328 = vmatmul.mubr.f32.vlgmr.msra.gmra.mxu1 %v5229_v20  ;;  %v5475_v20 = vld [vmem:[%s14217_s6 + $0x190] sm:$0xff] }
0x18f8   :  { %5369 = vmatpush1.msra.mxu1 %v5347_v32  ;;  %5416 = vmatprep.mubr.f32.mxu1 %v14258_v0  ;;  %v5340_v0 = vld [vmem:[%s14216_s27 + $0x38] sm:$0xff]  ;;  %v5474_v32 = vld [vmem:[%s14217_s6 + $0x188] sm:$0xff]  ;;  %s6092_s27 = sshll.u32 %s6880_s5, 4  ;;  %s6093_s27 = int_to_ptr.vmem [resolvable:$true] %s6092_s27 }
0x18f9   :  { %5370 = vmatprep.subr.mxu1 %v5346_v33  ;;  %v5473_v33 = vld [vmem:[%s14217_s6 + $0x180] sm:$0xff]  ;;  %s6718_s15 = scalar_lea.vmem %s6093_s27, 128  ;;  %p6723_p2 = scmp.lt.s32.totalorder %s6093_s27, %s6093_s27 }
0x18fa   :  { %5371 = vmatpush1.msra.mxu1 %v5345_v34  ;;  %v5472_v34 = vld [vmem:[%s14217_s6 + $0x178] sm:$0xff]  ;;  %p6719_p1 = scmp.ne.s32.totalorder %s6093_s27, %s6718_s15  ;;  %p6724_p3 = scmp.lt.s32.totalorder %s6718_s15, %s6718_s15 }
0x18fb   :  { %5372 = vmatprep.subr.mxu1 %v5344_v19  ;;  %v5471_v19 = vld [vmem:[%s14217_s6 + $0x170] sm:$0xff] }
0x18fc   :  { %5373 = vmatpush1.msra.mxu1 %v5343_v37  ;;  %v5470_v37 = vld [vmem:[%s14217_s6 + $0x168] sm:$0xff]  ;;  %p6725_p4 = por %p6724_p3, %p6723_p2 }
0x18fd   :  { %5374 = vmatprep.subr.mxu1 %v5342_v39  ;;  %v5469_v39 = vld [vmem:[%s14217_s6 + $0x160] sm:$0xff] }
0x18fe   :  { %5375 = vmatpush1.msra.mxu1 %v5341_v52  ;;  %v5468_v52 = vld [vmem:[%s14217_s6 + $0x158] sm:$0xff]  ;;  %p6726_p5 = pnand %p6725_p4, %p6719_p1 }
0x18ff   :  { %5376 = vmatprep.subr.mxu1 %v5340_v0  ;;  %v5467_v0 = vld [vmem:[%s14217_s6 + $0x150] sm:$0xff] }
0x1900   :  { %5377 = vmatpush1.msra.mxu1 %v5339_v53  ;;  %v5466_v53 = vld [vmem:[%s14217_s6 + $0x148] sm:$0xff] }
0x1901   :  { %5378 = vmatprep.subr.mxu1 %v5338_v54  ;;  %v5465_v54 = vld [vmem:[%s14217_s6 + $0x140] sm:$0xff] }
0x1902   :  { %5379 = vmatpush1.msra.mxu1 %v5337_v14  ;;  %v5464_v14 = vld [vmem:[%s14217_s6 + $0x138] sm:$0xff] }
0x1903   :  { %5380 = vmatprep.subr.mxu1 %v5336_v28  ;;  %v5463_v28 = vld [vmem:[%s14217_s6 + $0x130] sm:$0xff] }
0x1904   :  { %5381 = vmatpush1.msra.mxu1 %v5335_v29  ;;  %v5462_v29 = vld [vmem:[%s14217_s6 + $0x128] sm:$0xff] }
0x1905   :  { %5382 = vmatprep.subr.mxu1 %v5334_v27  ;;  %v5461_v27 = vld [vmem:[%s14217_s6 + $0x120] sm:$0xff] }
0x1906   :  { %5383 = vmatpush1.msra.mxu1 %v5333_v26  ;;  %v5460_v26 = vld [vmem:[%s14217_s6 + $0x118] sm:$0xff] }
0x1907   :  { %5489 = vmatprep.subr.mxu1 %v5456_v18  ;;  %v5459_v18 = vld [vmem:[%s14217_s6 + $0x110] sm:$0xff] }
0x19b7   :  { %v6617_v45 = vpop.f32.mrf.mxu1 }
0x19b9   :  { %v6618_v44 = vpop.f32.mrf.mxu1 }
0x19ba   :  { %v6619_v40 = vadd.f32 %v6618_v44, %v6617_v45  ;;  %v5458_v45 = vld [vmem:[%s14217_s6 + $0x108] sm:$0xff]  ;;  %v5457_v44 = vld [vmem:[%s14217_s6 + $0x100] sm:$0xff] }
0x19bc   :  { %6199 = vmatmul.mubr.msk.f32.vlgmr.msra.gmra.mxu1 %vm100_vm0, %v6619_v40  ;;  %v5668_v40 = vld [vmem:[%s14218_s18 + $0x350] sm:$0xff] }
0x19bd   :  { %5490 = vmatpush1.msra.mxu1 %v5455_v55  ;;  %v5670_v55 = vld [vmem:[%s14218_s18 + $0x360] sm:$0xff]  ;;  %5786 = vmatprep.subr.mxu0 %v5668_v40  ;;  %v5669_v40 = vld [vmem:[%s14218_s18 + $0x358] sm:$0xff] }
0x19be   :  { %5491 = vmatprep.subr.mxu1 %v5454_v56  ;;  %v5667_v56 = vld [vmem:[%s14218_s18 + $0x348] sm:$0xff] }
0x19bf   :  { %5492 = vmatpush1.msra.mxu1 %v5453_v57  ;;  %v5661_v57 = vld [vmem:[%s14218_s18 + $0x318] sm:$0xff]  ;;  %5787 = vmatpush1.msra.mxu0 %v5667_v56  ;;  %v5662_v56 = vld [vmem:[%s14218_s18 + $0x320] sm:$0xff] }
0x19c0   :  { %5493 = vmatprep.subr.mxu1 %v5452_v58  ;;  %v5660_v58 = vld [vmem:[%s14218_s18 + $0x310] sm:$0xff]  ;;  %5788 = vmatprep.subr.mxu0 %v5661_v57 }
0x19c1   :  { %5494 = vmatpush1.msra.mxu1 %v5451_v15  ;;  %v5654_v15 = vld [vmem:[%s14218_s18 + $0x2e0] sm:$0xff]  ;;  %5789 = vmatpush1.msra.mxu0 %v5660_v58  ;;  %v5656_v57 = vld [vmem:[%s14218_s18 + $0x2f0] sm:$0xff]  ;;  %v5655_v58 = vld [vmem:[%s14218_s18 + $0x2e8] sm:$0xff] }
0x19c2   :  { %5495 = vmatprep.subr.mxu1 %v5450_v59  ;;  %v5653_v59 = vld [vmem:[%s14218_s18 + $0x2d8] sm:$0xff]  ;;  %5790 = vmatprep.subr.mxu0 %v5654_v15 }
0x19c3   :  { %5496 = vmatpush1.msra.mxu1 %v5449_v60  ;;  %v5647_v60 = vld [vmem:[%s14218_s18 + $0x2a8] sm:$0xff]  ;;  %5791 = vmatpush1.msra.mxu0 %v5653_v59  ;;  %v5649_v15 = vld [vmem:[%s14218_s18 + $0x2b8] sm:$0xff]  ;;  %v5648_v59 = vld [vmem:[%s14218_s18 + $0x2b0] sm:$0xff] }
0x19c4   :  { %5497 = vmatprep.subr.mxu1 %v5448_v61  ;;  %v5646_v61 = vld [vmem:[%s14218_s18 + $0x2a0] sm:$0xff]  ;;  %5792 = vmatprep.subr.mxu0 %v5647_v60 }
0x19c5   :  { %5498 = vmatpush1.msra.mxu1 %v5447_v62  ;;  %v5640_v62 = vld [vmem:[%s14218_s18 + $0x270] sm:$0xff]  ;;  %5793 = vmatpush1.msra.mxu0 %v5646_v61  ;;  %v5642_v60 = vld [vmem:[%s14218_s18 + $0x280] sm:$0xff]  ;;  %v5641_v61 = vld [vmem:[%s14218_s18 + $0x278] sm:$0xff] }
0x19c6   :  { %5499 = vmatprep.subr.mxu1 %v5446_v63  ;;  %v5639_v63 = vld [vmem:[%s14218_s18 + $0x268] sm:$0xff]  ;;  %5794 = vmatprep.subr.mxu0 %v5640_v62 }
0x19c7   :  { %5500 = vmatpush1.msra.mxu1 %v5445_v8  ;;  %v5633_v8 = vld [vmem:[%s14218_s18 + $0x238] sm:$0xff]  ;;  %5795 = vmatpush1.msra.mxu0 %v5639_v63  ;;  %v5635_v62 = vld [vmem:[%s14218_s18 + $0x248] sm:$0xff]  ;;  %v5634_v63 = vld [vmem:[%s14218_s18 + $0x240] sm:$0xff] }
0x19c8   :  { %5501 = vmatprep.subr.mxu1 %v5444_v9  ;;  %v5632_v9 = vld [vmem:[%s14218_s18 + $0x230] sm:$0xff]  ;;  %5796 = vmatprep.subr.mxu0 %v5633_v8 }
0x19c9   :  { %5502 = vmatpush1.msra.mxu1 %v5443_v10  ;;  %v5626_v10 = vld [vmem:[%s14218_s18 + $0x200] sm:$0xff]  ;;  %5797 = vmatpush1.msra.mxu0 %v5632_v9  ;;  %v5628_v8 = vld [vmem:[%s14218_s18 + $0x210] sm:$0xff]  ;;  %v5627_v9 = vld [vmem:[%s14218_s18 + $0x208] sm:$0xff] }
0x19ca   :  { %5503 = vmatprep.subr.mxu1 %v5442_v11  ;;  %v5625_v11 = vld [vmem:[%s14218_s18 + $0x1f8] sm:$0xff]  ;;  %5798 = vmatprep.subr.mxu0 %v5626_v10 }
0x19cb   :  { %5504 = vmatpush1.msra.mxu1 %v5441_v12  ;;  %v5619_v12 = vld [vmem:[%s14218_s18 + $0x1c8] sm:$0xff]  ;;  %5799 = vmatpush1.msra.mxu0 %v5625_v11  ;;  %v5621_v10 = vld [vmem:[%s14218_s18 + $0x1d8] sm:$0xff]  ;;  %v5620_v11 = vld [vmem:[%s14218_s18 + $0x1d0] sm:$0xff] }
0x19cc   :  { %5505 = vmatprep.subr.mxu1 %v5440_v13  ;;  %v5618_v13 = vld [vmem:[%s14218_s18 + $0x1c0] sm:$0xff]  ;;  %5800 = vmatprep.subr.mxu0 %v5619_v12 }
0x19cd   :  { %5506 = vmatpush1.msra.mxu1 %v5439_v16  ;;  %v5612_v16 = vld [vmem:[%s14218_s18 + $0x190] sm:$0xff]  ;;  %5801 = vmatpush1.msra.mxu0 %v5618_v13  ;;  %v5614_v12 = vld [vmem:[%s14218_s18 + $0x1a0] sm:$0xff]  ;;  %v5613_v13 = vld [vmem:[%s14218_s18 + $0x198] sm:$0xff] }
0x19ce   :  { %5507 = vmatprep.subr.mxu1 %v5438_v17  ;;  %v5611_v17 = vld [vmem:[%s14218_s18 + $0x188] sm:$0xff]  ;;  %5802 = vmatprep.subr.mxu0 %v5612_v16 }
0x19cf   :  { %5508 = vmatpush1.msra.mxu1 %v5437_v22  ;;  %v5605_v22 = vld [vmem:[%s14218_s18 + $0x158] sm:$0xff]  ;;  %5803 = vmatpush1.msra.mxu0 %v5611_v17  ;;  %v5607_v16 = vld [vmem:[%s14218_s18 + $0x168] sm:$0xff]  ;;  %v5606_v17 = vld [vmem:[%s14218_s18 + $0x160] sm:$0xff] }
0x19d0   :  { %5509 = vmatprep.subr.mxu1 %v5436_v23  ;;  %v5604_v23 = vld [vmem:[%s14218_s18 + $0x150] sm:$0xff]  ;;  %5804 = vmatprep.subr.mxu0 %v5605_v22 }
0x19d1   :  { %5510 = vmatpush1.msra.mxu1 %v5435_v25  ;;  %v5598_v25 = vld [vmem:[%s14218_s18 + $0x120] sm:$0xff]  ;;  %5805 = vmatpush1.msra.mxu0 %v5604_v23  ;;  %v5600_v22 = vld [vmem:[%s14218_s18 + $0x130] sm:$0xff]  ;;  %v5599_v23 = vld [vmem:[%s14218_s18 + $0x128] sm:$0xff] }
0x19d2   :  { %5511 = vmatprep.subr.mxu1 %v5434_v47  ;;  %v5597_v47 = vld [vmem:[%s14218_s18 + $0x118] sm:$0xff]  ;;  %5806 = vmatprep.subr.mxu0 %v5598_v25 }
0x19d3   :  { %5512 = vmatpush1.msra.mxu1 %v5433_v21  ;;  %v5591_v21 = vld [vmem:[%s14218_s18 + $0xe8] sm:$0xff]  ;;  %5807 = vmatpush1.msra.mxu0 %v5597_v47  ;;  %v5593_v25 = vld [vmem:[%s14218_s18 + $0xf8] sm:$0xff]  ;;  %v5592_v47 = vld [vmem:[%s14218_s18 + $0xf0] sm:$0xff] }
0x19d4   :  { %5513 = vmatprep.subr.mxu1 %v5432_v42  ;;  %v5590_v42 = vld [vmem:[%s14218_s18 + $0xe0] sm:$0xff]  ;;  %5808 = vmatprep.subr.mxu0 %v5591_v21 }
0x19d5   :  { %5514 = vmatpush1.msra.mxu1 %v5431_v43  ;;  %v5584_v43 = vld [vmem:[%s14218_s18 + $0xb0] sm:$0xff]  ;;  %5809 = vmatpush1.msra.mxu0 %v5590_v42  ;;  %v5586_v21 = vld [vmem:[%s14218_s18 + $0xc0] sm:$0xff]  ;;  %v5585_v42 = vld [vmem:[%s14218_s18 + $0xb8] sm:$0xff] }
0x19d6   :  { %5515 = vmatprep.subr.mxu1 %v5430_v1  ;;  %v5583_v1 = vld [vmem:[%s14218_s18 + $0xa8] sm:$0xff]  ;;  %5810 = vmatprep.subr.mxu0 %v5584_v43 }
0x19d7   :  { %5516 = vmatpush1.msra.mxu1 %v5429_v36  ;;  %v5577_v36 = vld [vmem:[%s14218_s18 + $0x78] sm:$0xff]  ;;  %5811 = vmatpush1.msra.mxu0 %v5583_v1  ;;  %v5579_v43 = vld [vmem:[%s14218_s18 + $0x88] sm:$0xff]  ;;  %v5578_v1 = vld [vmem:[%s14218_s18 + $0x80] sm:$0xff] }
0x19d8   :  { %5517 = vmatprep.subr.mxu1 %v5428_v5  ;;  %v5576_v5 = vld [vmem:[%s14218_s18 + $0x70] sm:$0xff]  ;;  %5812 = vmatprep.subr.mxu0 %v5577_v36 }
0x19d9   :  { %5518 = vmatpush1.msra.mxu1 %v5427_v38  ;;  %v5570_v38 = vld [vmem:[%s14218_s18 + $0x40] sm:$0xff]  ;;  %5813 = vmatpush1.msra.mxu0 %v5576_v5  ;;  %v5572_v36 = vld [vmem:[%s14218_s18 + $0x50] sm:$0xff]  ;;  %v5571_v5 = vld [vmem:[%s14218_s18 + $0x48] sm:$0xff] }
0x19da   :  { %5519 = vmatprep.subr.mxu1 %v5426_v35  ;;  %v5569_v35 = vld [vmem:[%s14218_s18 + $0x38] sm:$0xff]  ;;  %5814 = vmatprep.subr.mxu0 %v5570_v38 }
0x19db   :  { %5520 = vmatpush1.msra.mxu1 %v5425_v2  ;;  %v5563_v2 = vld [vmem:[%s14218_s18 + $0x8] sm:$0xff]  ;;  %5815 = vmatpush1.msra.mxu0 %v5569_v35  ;;  %v5565_v38 = vld [vmem:[%s14218_s18 + $0x18] sm:$0xff]  ;;  %v5564_v35 = vld [vmem:[%s14218_s18 + $0x10] sm:$0xff] }
0x19dc   :  { %5521 = vmatprep.subr.mxu1 %v5488_v3  ;;  %v5562_v3 = vld [vmem:[%s14218_s18] sm:$0xff]  ;;  %5816 = vmatprep.subr.mxu0 %v5563_v2 }
0x19dd   :  { %5522 = vmatpush2.msra.mxu1 %v5487_v4  ;;  %v5780_v4 = vld [vmem:[%s14218_s18 + $0x6d0] sm:$0xff]  ;;  %5817 = vmatpush1.msra.mxu0 %v5562_v3  ;;  %v5782_v2 = vld [vmem:[%s14218_s18 + $0x6e0] sm:$0xff]  ;;  %v5781_v3 = vld [vmem:[%s14218_s18 + $0x6d8] sm:$0xff] }
0x19de   :  { %5523 = vmatprep.subr.mxu1 %v5486_v6  ;;  %v5779_v6 = vld [vmem:[%s14218_s18 + $0x6c8] sm:$0xff]  ;;  %5818 = vmatprep.subr.mxu0 %v5780_v4 }
0x19df   :  { %5524 = vmatpush2.msra.mxu1 %v5485_v7  ;;  %v5773_v7 = vld [vmem:[%s14218_s18 + $0x698] sm:$0xff]  ;;  %5819 = vmatpush2.msra.mxu0 %v5779_v6  ;;  %v5775_v4 = vld [vmem:[%s14218_s18 + $0x6a8] sm:$0xff]  ;;  %v5774_v6 = vld [vmem:[%s14218_s18 + $0x6a0] sm:$0xff] }
0x19e0   :  { %5525 = vmatprep.subr.mxu1 %v5484_v24  ;;  %v5772_v24 = vld [vmem:[%s14218_s18 + $0x690] sm:$0xff]  ;;  %5820 = vmatprep.subr.mxu0 %v5773_v7 }
0x19e1   :  { %5526 = vmatpush2.msra.mxu1 %v5483_v31  ;;  %v5766_v31 = vld [vmem:[%s14218_s18 + $0x660] sm:$0xff]  ;;  %5821 = vmatpush2.msra.mxu0 %v5772_v24  ;;  %v5768_v7 = vld [vmem:[%s14218_s18 + $0x670] sm:$0xff]  ;;  %v5767_v24 = vld [vmem:[%s14218_s18 + $0x668] sm:$0xff] }
0x19e2   :  { %5527 = vmatprep.subr.mxu1 %v5482_v46  ;;  %v5765_v46 = vld [vmem:[%s14218_s18 + $0x658] sm:$0xff]  ;;  %5822 = vmatprep.subr.mxu0 %v5766_v31 }
0x19e3   :  { %5528 = vmatpush2.msra.mxu1 %v5481_v48  ;;  %v5759_v48 = vld [vmem:[%s14218_s18 + $0x628] sm:$0xff]  ;;  %5823 = vmatpush2.msra.mxu0 %v5765_v46  ;;  %v5761_v31 = vld [vmem:[%s14218_s18 + $0x638] sm:$0xff]  ;;  %v5760_v46 = vld [vmem:[%s14218_s18 + $0x630] sm:$0xff] }
0x19e4   :  { %5529 = vmatprep.subr.mxu1 %v5480_v41  ;;  %v5758_v41 = vld [vmem:[%s14218_s18 + $0x620] sm:$0xff]  ;;  %5824 = vmatprep.subr.mxu0 %v5759_v48 }
0x19e5   :  { %5530 = vmatpush2.msra.mxu1 %v5479_v49  ;;  %v5752_v49 = vld [vmem:[%s14218_s18 + $0x5f0] sm:$0xff]  ;;  %5825 = vmatpush2.msra.mxu0 %v5758_v41  ;;  %v5754_v48 = vld [vmem:[%s14218_s18 + $0x600] sm:$0xff]  ;;  %v5753_v41 = vld [vmem:[%s14218_s18 + $0x5f8] sm:$0xff] }
0x19e6   :  { %5531 = vmatprep.subr.mxu1 %v5478_v30  ;;  %v5751_v30 = vld [vmem:[%s14218_s18 + $0x5e8] sm:$0xff]  ;;  %5826 = vmatprep.subr.mxu0 %v5752_v49 }
0x19e7   :  { %5532 = vmatpush2.msra.mxu1 %v5477_v50  ;;  %v5745_v50 = vld [vmem:[%s14218_s18 + $0x5b8] sm:$0xff]  ;;  %5827 = vmatpush2.msra.mxu0 %v5751_v30  ;;  %v5747_v49 = vld [vmem:[%s14218_s18 + $0x5c8] sm:$0xff]  ;;  %v5746_v30 = vld [vmem:[%s14218_s18 + $0x5c0] sm:$0xff] }
0x19e8   :  { %5533 = vmatprep.subr.mxu1 %v5476_v51  ;;  %v5744_v51 = vld [vmem:[%s14218_s18 + $0x5b0] sm:$0xff]  ;;  %5828 = vmatprep.subr.mxu0 %v5745_v50 }
0x19e9   :  { %5534 = vmatpush2.msra.mxu1 %v5475_v20  ;;  %v5738_v20 = vld [vmem:[%s14218_s18 + $0x580] sm:$0xff]  ;;  %5829 = vmatpush2.msra.mxu0 %v5744_v51  ;;  %v5740_v50 = vld [vmem:[%s14218_s18 + $0x590] sm:$0xff]  ;;  %v5739_v51 = vld [vmem:[%s14218_s18 + $0x588] sm:$0xff] }
0x19ea   :  { %5535 = vmatprep.subr.mxu1 %v5474_v32  ;;  %v5737_v32 = vld [vmem:[%s14218_s18 + $0x578] sm:$0xff]  ;;  %5830 = vmatprep.subr.mxu0 %v5738_v20 }
0x19eb   :  { %5536 = vmatpush2.msra.mxu1 %v5473_v33  ;;  %v5731_v33 = vld [vmem:[%s14218_s18 + $0x548] sm:$0xff]  ;;  %5831 = vmatpush2.msra.mxu0 %v5737_v32  ;;  %v5733_v20 = vld [vmem:[%s14218_s18 + $0x558] sm:$0xff]  ;;  %v5732_v32 = vld [vmem:[%s14218_s18 + $0x550] sm:$0xff] }
0x19ec   :  { %5537 = vmatprep.subr.mxu1 %v5472_v34  ;;  %v5730_v34 = vld [vmem:[%s14218_s18 + $0x540] sm:$0xff]  ;;  %5832 = vmatprep.subr.mxu0 %v5731_v33 }
0x19ed   :  { %5538 = vmatpush2.msra.mxu1 %v5471_v19  ;;  %v5724_v19 = vld [vmem:[%s14218_s18 + $0x510] sm:$0xff]  ;;  %5833 = vmatpush2.msra.mxu0 %v5730_v34  ;;  %v5726_v33 = vld [vmem:[%s14218_s18 + $0x520] sm:$0xff]  ;;  %v5725_v34 = vld [vmem:[%s14218_s18 + $0x518] sm:$0xff] }
0x19ee   :  { %5539 = vmatprep.subr.mxu1 %v5470_v37  ;;  %v5723_v37 = vld [vmem:[%s14218_s18 + $0x508] sm:$0xff]  ;;  %5834 = vmatprep.subr.mxu0 %v5724_v19 }
0x19ef   :  { %5540 = vmatpush2.msra.mxu1 %v5469_v39  ;;  %v5717_v39 = vld [vmem:[%s14218_s18 + $0x4d8] sm:$0xff]  ;;  %5835 = vmatpush2.msra.mxu0 %v5723_v37  ;;  %v5719_v19 = vld [vmem:[%s14218_s18 + $0x4e8] sm:$0xff]  ;;  %v5718_v37 = vld [vmem:[%s14218_s18 + $0x4e0] sm:$0xff] }
0x19f0   :  { %5541 = vmatprep.subr.mxu1 %v5468_v52  ;;  %v5716_v52 = vld [vmem:[%s14218_s18 + $0x4d0] sm:$0xff]  ;;  %5836 = vmatprep.subr.mxu0 %v5717_v39 }
0x19f1   :  { %5542 = vmatpush2.msra.mxu1 %v5467_v0  ;;  %v5710_v0 = vld [vmem:[%s14218_s18 + $0x4a0] sm:$0xff]  ;;  %5837 = vmatpush2.msra.mxu0 %v5716_v52  ;;  %v5712_v39 = vld [vmem:[%s14218_s18 + $0x4b0] sm:$0xff]  ;;  %v5711_v52 = vld [vmem:[%s14218_s18 + $0x4a8] sm:$0xff] }
0x19f2   :  { %5543 = vmatprep.subr.mxu1 %v5466_v53  ;;  %v5709_v53 = vld [vmem:[%s14218_s18 + $0x498] sm:$0xff]  ;;  %5838 = vmatprep.subr.mxu0 %v5710_v0 }
0x19f3   :  { %5544 = vmatpush2.msra.mxu1 %v5465_v54  ;;  %v5703_v54 = vld [vmem:[%s14218_s18 + $0x468] sm:$0xff]  ;;  %5839 = vmatpush2.msra.mxu0 %v5709_v53  ;;  %v5705_v0 = vld [vmem:[%s14218_s18 + $0x478] sm:$0xff]  ;;  %v5704_v53 = vld [vmem:[%s14218_s18 + $0x470] sm:$0xff] }
0x19f4   :  { %5545 = vmatprep.subr.mxu1 %v5464_v14  ;;  %v5702_v14 = vld [vmem:[%s14218_s18 + $0x460] sm:$0xff]  ;;  %5840 = vmatprep.subr.mxu0 %v5703_v54 }
0x19f5   :  { %5546 = vmatpush2.msra.mxu1 %v5463_v28  ;;  %v5696_v28 = vld [vmem:[%s14218_s18 + $0x430] sm:$0xff]  ;;  %5841 = vmatpush2.msra.mxu0 %v5702_v14  ;;  %v5698_v54 = vld [vmem:[%s14218_s18 + $0x440] sm:$0xff]  ;;  %v5697_v14 = vld [vmem:[%s14218_s18 + $0x438] sm:$0xff] }
0x19f6   :  { %5547 = vmatprep.subr.mxu1 %v5462_v29  ;;  %v5695_v29 = vld [vmem:[%s14218_s18 + $0x428] sm:$0xff]  ;;  %5842 = vmatprep.subr.mxu0 %v5696_v28 }
0x19f7   :  { %5548 = vmatpush2.msra.mxu1 %v5461_v27  ;;  %v5689_v27 = vld [vmem:[%s14218_s18 + $0x3f8] sm:$0xff]  ;;  %5843 = vmatpush2.msra.mxu0 %v5695_v29  ;;  %v5691_v28 = vld [vmem:[%s14218_s18 + $0x408] sm:$0xff]  ;;  %v5688_v29 = vld [vmem:[%s14218_s18 + $0x3f0] sm:$0xff] }
0x19f8   :  { %5549 = vmatprep.subr.mxu1 %v5460_v26  ;;  %5844 = vmatprep.subr.mxu0 %v5689_v27  ;;  %v5690_v27 = vld [vmem:[%s14218_s18 + $0x400] sm:$0xff] }
0x19f9   :  { %5550 = vmatpush2.msra.mxu1 %v5459_v18  ;;  %5845 = vmatpush2.msra.mxu0 %v5688_v29  ;;  %v5587_v29 = vld [vmem:[%s14218_s18 + $0xc8] sm:$0xff] }
0x19fa   :  { %5551 = vmatprep.subr.mxu1 %v5458_v45 }
0x19fb   :  { %5552 = vmatpush2.msra.mxu1 %v5457_v44 }
0x19fc   :  { %5857 = vmatprep.subr.mxu1 %v5670_v55  ;;  %v5663_v55 = vld [vmem:[%s14218_s18 + $0x328] sm:$0xff] }
0x1a7c   :  { %v5418_v26 = vpop.f32.mrf.mxu1 }
0x1a7d   :  { %v5423_v44 = vmax.f32 %v5418_v26, 0.0  ;;  %v5682_v26 = vld [vmem:[%s14218_s18 + $0x3c0] sm:$0xff] }
0x1a7e   :  { %v5420_v18 = vpop.f32.mrf.mxu1  ;;  %5846 = vmatprep.subr.mxu0 %v5682_v26  ;;  %v5581_v26 = vld [vmem:[%s14218_s18 + $0x98] sm:$0xff] }
0x1a7f   :  { %v5424_v45 = vmax.f32 %v5420_v18, 0.0  ;;  %v5684_v18 = vld [vmem:[%s14218_s18 + $0x3d0] sm:$0xff] }
0x1a81   :  { %5553 = vmatprep.mubr.f32.mxu1 %v5424_v45  ;;  %v5681_v45 = vld [vmem:[%s14218_s18 + $0x3b8] sm:$0xff] }
0x1a82   :  { %5554 = vmatmul.mubr.f32.vlgmr.msra.gmra.mxu1 %v5423_v44  ;;  %v5683_v44 = vld [vmem:[%s14218_s18 + $0x3c8] sm:$0xff]  ;;  %5847 = vmatpush2.msra.mxu0 %v5681_v45  ;;  %v5580_v45 = vld [vmem:[%s14218_s18 + $0x90] sm:$0xff] }
0x1a83   :  { %5858 = vmatpush1.msra.mxu1 %v5669_v40  ;;  %v5675_v40 = vld [vmem:[%s14218_s18 + $0x388] sm:$0xff] }
0x1a84   :  { %5859 = vmatprep.subr.mxu1 %v5663_v55  ;;  %v5677_v55 = vld [vmem:[%s14218_s18 + $0x398] sm:$0xff]  ;;  %5848 = vmatprep.subr.mxu0 %v5675_v40  ;;  %v5574_v40 = vld [vmem:[%s14218_s18 + $0x60] sm:$0xff] }
0x1a85   :  { %5860 = vmatpush1.msra.mxu1 %v5662_v56  ;;  %v5674_v56 = vld [vmem:[%s14218_s18 + $0x380] sm:$0xff] }
0x1a86   :  { %5861 = vmatprep.subr.mxu1 %v5656_v57  ;;  %v5676_v57 = vld [vmem:[%s14218_s18 + $0x390] sm:$0xff]  ;;  %5849 = vmatpush2.msra.mxu0 %v5674_v56  ;;  %v5573_v56 = vld [vmem:[%s14218_s18 + $0x58] sm:$0xff] }
0x1a87   :  { %5862 = vmatpush1.msra.mxu1 %v5655_v58  ;;  %v5672_v58 = vld [vmem:[%s14218_s18 + $0x370] sm:$0xff] }
0x1a88   :  { %5863 = vmatprep.subr.mxu1 %v5649_v15  ;;  %v5785_v15 = vld [vmem:[%s14218_s18 + $0x6f8] sm:$0xff]  ;;  %5928 = vmatprep.subr.mxu0 %v5672_v58  ;;  %v5567_v58 = vld [vmem:[%s14218_s18 + $0x28] sm:$0xff] }
0x1a89   :  { %5864 = vmatpush1.msra.mxu1 %v5648_v59 }
0x1a8a   :  { %5865 = vmatprep.subr.mxu1 %v5642_v60 }
0x1a8b   :  { %5866 = vmatpush1.msra.mxu1 %v5641_v61 }
0x1a8c   :  { %5867 = vmatprep.subr.mxu1 %v5635_v62 }
0x1a8d   :  { %5868 = vmatpush1.msra.mxu1 %v5634_v63  ;;  %v5671_v63 = vld [vmem:[%s14218_s18 + $0x368] sm:$0xff] }
0x1a8e   :  { %5869 = vmatprep.subr.mxu1 %v5628_v8  ;;  %v5673_v8 = vld [vmem:[%s14218_s18 + $0x378] sm:$0xff] }
0x1a8f   :  { %5870 = vmatpush1.msra.mxu1 %v5627_v9  ;;  %v5665_v9 = vld [vmem:[%s14218_s18 + $0x338] sm:$0xff] }
0x1a90   :  { %5871 = vmatprep.subr.mxu1 %v5621_v10  ;;  %v5778_v10 = vld [vmem:[%s14218_s18 + $0x6c0] sm:$0xff] }
0x1a91   :  { %5872 = vmatpush1.msra.mxu1 %v5620_v11  ;;  %v5664_v11 = vld [vmem:[%s14218_s18 + $0x330] sm:$0xff] }
0x1a92   :  { %5873 = vmatprep.subr.mxu1 %v5614_v12  ;;  %v5666_v12 = vld [vmem:[%s14218_s18 + $0x340] sm:$0xff] }
0x1a93   :  { %5874 = vmatpush1.msra.mxu1 %v5613_v13  ;;  %v5658_v13 = vld [vmem:[%s14218_s18 + $0x300] sm:$0xff] }
0x1a94   :  { %5875 = vmatprep.subr.mxu1 %v5607_v16  ;;  %v5771_v16 = vld [vmem:[%s14218_s18 + $0x688] sm:$0xff] }
0x1a95   :  { %5876 = vmatpush1.msra.mxu1 %v5606_v17  ;;  %v5657_v17 = vld [vmem:[%s14218_s18 + $0x2f8] sm:$0xff] }
0x1a96   :  { %5877 = vmatprep.subr.mxu1 %v5600_v22  ;;  %v5659_v22 = vld [vmem:[%s14218_s18 + $0x308] sm:$0xff] }
0x1a97   :  { %5878 = vmatpush1.msra.mxu1 %v5599_v23  ;;  %v5651_v23 = vld [vmem:[%s14218_s18 + $0x2c8] sm:$0xff] }
0x1a98   :  { %5879 = vmatprep.subr.mxu1 %v5593_v25  ;;  %v5764_v25 = vld [vmem:[%s14218_s18 + $0x650] sm:$0xff] }
0x1a99   :  { %5880 = vmatpush1.msra.mxu1 %v5592_v47  ;;  %v5650_v47 = vld [vmem:[%s14218_s18 + $0x2c0] sm:$0xff] }
0x1a9a   :  { %5881 = vmatprep.subr.mxu1 %v5586_v21  ;;  %v5652_v21 = vld [vmem:[%s14218_s18 + $0x2d0] sm:$0xff] }
0x1a9b   :  { %5882 = vmatpush1.msra.mxu1 %v5585_v42  ;;  %v5644_v42 = vld [vmem:[%s14218_s18 + $0x290] sm:$0xff] }
0x1a9c   :  { %5883 = vmatprep.subr.mxu1 %v5579_v43  ;;  %v5757_v43 = vld [vmem:[%s14218_s18 + $0x618] sm:$0xff] }
0x1a9d   :  { %5884 = vmatpush1.msra.mxu1 %v5578_v1  ;;  %v5643_v1 = vld [vmem:[%s14218_s18 + $0x288] sm:$0xff] }
0x1a9e   :  { %5885 = vmatprep.subr.mxu1 %v5572_v36  ;;  %v5645_v36 = vld [vmem:[%s14218_s18 + $0x298] sm:$0xff] }
0x1a9f   :  { %5886 = vmatpush1.msra.mxu1 %v5571_v5  ;;  %v5637_v5 = vld [vmem:[%s14218_s18 + $0x258] sm:$0xff] }
0x1aa0   :  { %5887 = vmatprep.subr.mxu1 %v5565_v38  ;;  %v5750_v38 = vld [vmem:[%s14218_s18 + $0x5e0] sm:$0xff] }
0x1aa1   :  { %5888 = vmatpush1.msra.mxu1 %v5564_v35  ;;  %v5636_v35 = vld [vmem:[%s14218_s18 + $0x250] sm:$0xff] }
0x1aa2   :  { %5889 = vmatprep.subr.mxu1 %v5782_v2  ;;  %v5638_v2 = vld [vmem:[%s14218_s18 + $0x260] sm:$0xff] }
0x1aa3   :  { %5890 = vmatpush2.msra.mxu1 %v5781_v3  ;;  %v5630_v3 = vld [vmem:[%s14218_s18 + $0x220] sm:$0xff] }
0x1aa4   :  { %5891 = vmatprep.subr.mxu1 %v5775_v4  ;;  %v5743_v4 = vld [vmem:[%s14218_s18 + $0x5a8] sm:$0xff] }
0x1aa5   :  { %5892 = vmatpush2.msra.mxu1 %v5774_v6  ;;  %v5629_v6 = vld [vmem:[%s14218_s18 + $0x218] sm:$0xff] }
0x1aa6   :  { %5893 = vmatprep.subr.mxu1 %v5768_v7  ;;  %v5631_v7 = vld [vmem:[%s14218_s18 + $0x228] sm:$0xff] }
0x1aa7   :  { %5894 = vmatpush2.msra.mxu1 %v5767_v24  ;;  %v5623_v24 = vld [vmem:[%s14218_s18 + $0x1e8] sm:$0xff] }
0x1aa8   :  { %5895 = vmatprep.subr.mxu1 %v5761_v31  ;;  %v5736_v31 = vld [vmem:[%s14218_s18 + $0x570] sm:$0xff] }
0x1aa9   :  { %5896 = vmatpush2.msra.mxu1 %v5760_v46  ;;  %v5622_v46 = vld [vmem:[%s14218_s18 + $0x1e0] sm:$0xff] }
0x1aaa   :  { %5897 = vmatprep.subr.mxu1 %v5754_v48  ;;  %v5624_v48 = vld [vmem:[%s14218_s18 + $0x1f0] sm:$0xff] }
0x1aab   :  { %5898 = vmatpush2.msra.mxu1 %v5753_v41  ;;  %v5616_v41 = vld [vmem:[%s14218_s18 + $0x1b0] sm:$0xff] }
0x1aac   :  { %5899 = vmatprep.subr.mxu1 %v5747_v49  ;;  %v5729_v49 = vld [vmem:[%s14218_s18 + $0x538] sm:$0xff] }
0x1aad   :  { %5900 = vmatpush2.msra.mxu1 %v5746_v30  ;;  %v5615_v30 = vld [vmem:[%s14218_s18 + $0x1a8] sm:$0xff] }
0x1aae   :  { %5901 = vmatprep.subr.mxu1 %v5740_v50  ;;  %v5617_v50 = vld [vmem:[%s14218_s18 + $0x1b8] sm:$0xff] }
0x1aaf   :  { %5902 = vmatpush2.msra.mxu1 %v5739_v51  ;;  %v5609_v51 = vld [vmem:[%s14218_s18 + $0x178] sm:$0xff] }
0x1ab0   :  { %5903 = vmatprep.subr.mxu1 %v5733_v20  ;;  %v5722_v20 = vld [vmem:[%s14218_s18 + $0x500] sm:$0xff] }
0x1ab1   :  { %5904 = vmatpush2.msra.mxu1 %v5732_v32  ;;  %v5608_v32 = vld [vmem:[%s14218_s18 + $0x170] sm:$0xff] }
0x1ab2   :  { %5905 = vmatprep.subr.mxu1 %v5726_v33  ;;  %v5610_v33 = vld [vmem:[%s14218_s18 + $0x180] sm:$0xff] }
0x1ab3   :  { %5906 = vmatpush2.msra.mxu1 %v5725_v34  ;;  %v5602_v34 = vld [vmem:[%s14218_s18 + $0x140] sm:$0xff] }
0x1ab4   :  { %5907 = vmatprep.subr.mxu1 %v5719_v19  ;;  %v5715_v19 = vld [vmem:[%s14218_s18 + $0x4c8] sm:$0xff] }
0x1ab5   :  { %5908 = vmatpush2.msra.mxu1 %v5718_v37  ;;  %v5601_v37 = vld [vmem:[%s14218_s18 + $0x138] sm:$0xff] }
0x1ab6   :  { %5909 = vmatprep.subr.mxu1 %v5712_v39  ;;  %v5603_v39 = vld [vmem:[%s14218_s18 + $0x148] sm:$0xff] }
0x1ab7   :  { %5910 = vmatpush2.msra.mxu1 %v5711_v52  ;;  %v5595_v52 = vld [vmem:[%s14218_s18 + $0x108] sm:$0xff] }
0x1ab8   :  { %5911 = vmatprep.subr.mxu1 %v5705_v0  ;;  %v5708_v0 = vld [vmem:[%s14218_s18 + $0x490] sm:$0xff] }
0x1ab9   :  { %5912 = vmatpush2.msra.mxu1 %v5704_v53  ;;  %v5594_v53 = vld [vmem:[%s14218_s18 + $0x100] sm:$0xff] }
0x1aba   :  { %5913 = vmatprep.subr.mxu1 %v5698_v54  ;;  %v5596_v54 = vld [vmem:[%s14218_s18 + $0x110] sm:$0xff] }
0x1abb   :  { %5914 = vmatpush2.msra.mxu1 %v5697_v14  ;;  %v5588_v14 = vld [vmem:[%s14218_s18 + $0xd0] sm:$0xff] }
0x1abc   :  { %5915 = vmatprep.subr.mxu1 %v5691_v28  ;;  %v5701_v28 = vld [vmem:[%s14218_s18 + $0x458] sm:$0xff] }
0x1abd   :  { %5916 = vmatpush2.msra.mxu1 %v5690_v27  ;;  %v5589_v27 = vld [vmem:[%s14218_s18 + $0xd8] sm:$0xff] }
0x1abe   :  { %5917 = vmatprep.subr.mxu1 %v5684_v18  ;;  %v5694_v18 = vld [vmem:[%s14218_s18 + $0x420] sm:$0xff] }
0x1abf   :  { %5918 = vmatpush2.msra.mxu1 %v5683_v44  ;;  %v5582_v44 = vld [vmem:[%s14218_s18 + $0xa0] sm:$0xff] }
0x1ac0   :  { %5919 = vmatprep.subr.mxu1 %v5677_v55  ;;  %v5687_v55 = vld [vmem:[%s14218_s18 + $0x3e8] sm:$0xff] }
0x1ac1   :  { %5920 = vmatpush2.msra.mxu1 %v5676_v57  ;;  %v5575_v57 = vld [vmem:[%s14218_s18 + $0x68] sm:$0xff] }
0x1ac2   :  { %6620 = vmatprep.subr.mxu1 %v5785_v15  ;;  %v5680_v15 = vld [vmem:[%s14218_s18 + $0x3b0] sm:$0xff] }
0x1b42   :  { %v5555_v59 = vpop.f32.mrf.mxu1 }
0x1b43   :  { %v13794_v62 = vmax.f32 %v5555_v59, 0.0  ;;  %v5566_v59 = vld [vmem:[%s14218_s18 + $0x20] sm:$0xff] }
0x1b44   :  { %v5557_v60 = vpop.f32.mrf.mxu1 }
0x1b45   :  { %v5561_v61 = vmax.f32 %v5557_v60, 0.0  ;;  %v5568_v60 = vld [vmem:[%s14218_s18 + $0x30] sm:$0xff] }
0x1b47   :  { %5850 = vmatprep.mubr.f32.mxu0 %v5561_v61  ;;  %5921 = vmatprep.mubr.f32.mxu1 %v5561_v61 }
0x1b48   :  { %5851 = vmatmul.mubr.f32.vlgmr.msra.gmra.mxu0 %v13794_v62  ;;  %5922 = vmatmul.mubr.f32.vlgmr.msra.gmra.mxu1 %v13794_v62 }
0x1b49   :  { %5929 = vmatpush1.msra.mxu0 %v5671_v63  ;;  %6621 = vmatpush3.msra.mxu1 %v5673_v8  ;;  %v5783_v63 = vld [vmem:[%s14218_s18 + $0x6e8] sm:$0xff]  ;;  %v5777_v8 = vld [vmem:[%s14218_s18 + $0x6b8] sm:$0xff] }
0x1b4a   :  { %5930 = vmatprep.subr.mxu0 %v5665_v9  ;;  %5992 = vmatprep.mubr.f32.mxu0 %v5561_v61  ;;  %v5776_v9 = vld [vmem:[%s14218_s18 + $0x6b0] sm:$0xff] }
0x1b4b   :  { %6622 = vmatprep.subr.mxu1 %v5778_v10  ;;  %6063 = vmatprep.mubr.f32.mxu1 %v5561_v61  ;;  %v5784_v61 = vld [vmem:[%s14218_s18 + $0x6f0] sm:$0xff]  ;;  %v5770_v10 = vld [vmem:[%s14218_s18 + $0x680] sm:$0xff] }
0x1b4c   :  { %5931 = vmatpush1.msra.mxu0 %v5664_v11  ;;  %6623 = vmatpush3.msra.mxu1 %v5666_v12  ;;  %v5769_v11 = vld [vmem:[%s14218_s18 + $0x678] sm:$0xff]  ;;  %v5763_v12 = vld [vmem:[%s14218_s18 + $0x648] sm:$0xff] }
0x1b4d   :  { %5932 = vmatprep.subr.mxu0 %v5658_v13  ;;  %6624 = vmatprep.subr.mxu1 %v5771_v16  ;;  %v5762_v13 = vld [vmem:[%s14218_s18 + $0x640] sm:$0xff]  ;;  %v5756_v16 = vld [vmem:[%s14218_s18 + $0x610] sm:$0xff] }
0x1b4e   :  { %5933 = vmatpush1.msra.mxu0 %v5657_v17  ;;  %6625 = vmatpush3.msra.mxu1 %v5659_v22  ;;  %v5755_v17 = vld [vmem:[%s14218_s18 + $0x608] sm:$0xff]  ;;  %v5749_v22 = vld [vmem:[%s14218_s18 + $0x5d8] sm:$0xff] }
0x1b4f   :  { %5934 = vmatprep.subr.mxu0 %v5651_v23  ;;  %6626 = vmatprep.subr.mxu1 %v5764_v25  ;;  %v5748_v23 = vld [vmem:[%s14218_s18 + $0x5d0] sm:$0xff]  ;;  %v5742_v25 = vld [vmem:[%s14218_s18 + $0x5a0] sm:$0xff] }
0x1b50   :  { %5935 = vmatpush1.msra.mxu0 %v5650_v47  ;;  %6627 = vmatpush3.msra.mxu1 %v5652_v21  ;;  %v5741_v47 = vld [vmem:[%s14218_s18 + $0x598] sm:$0xff]  ;;  %v5735_v21 = vld [vmem:[%s14218_s18 + $0x568] sm:$0xff] }
0x1b51   :  { %5936 = vmatprep.subr.mxu0 %v5644_v42  ;;  %6628 = vmatprep.subr.mxu1 %v5757_v43  ;;  %v5734_v42 = vld [vmem:[%s14218_s18 + $0x560] sm:$0xff]  ;;  %v5728_v43 = vld [vmem:[%s14218_s18 + $0x530] sm:$0xff] }
0x1b52   :  { %5937 = vmatpush1.msra.mxu0 %v5643_v1  ;;  %6629 = vmatpush3.msra.mxu1 %v5645_v36  ;;  %v5727_v1 = vld [vmem:[%s14218_s18 + $0x528] sm:$0xff]  ;;  %v5721_v36 = vld [vmem:[%s14218_s18 + $0x4f8] sm:$0xff] }
0x1b53   :  { %5938 = vmatprep.subr.mxu0 %v5637_v5  ;;  %6630 = vmatprep.subr.mxu1 %v5750_v38  ;;  %v5720_v5 = vld [vmem:[%s14218_s18 + $0x4f0] sm:$0xff]  ;;  %v5714_v38 = vld [vmem:[%s14218_s18 + $0x4c0] sm:$0xff] }
0x1b54   :  { %5939 = vmatpush1.msra.mxu0 %v5636_v35  ;;  %6631 = vmatpush3.msra.mxu1 %v5638_v2  ;;  %v5713_v35 = vld [vmem:[%s14218_s18 + $0x4b8] sm:$0xff]  ;;  %v5707_v2 = vld [vmem:[%s14218_s18 + $0x488] sm:$0xff] }
0x1b55   :  { %5940 = vmatprep.subr.mxu0 %v5630_v3  ;;  %6632 = vmatprep.subr.mxu1 %v5743_v4  ;;  %v5706_v3 = vld [vmem:[%s14218_s18 + $0x480] sm:$0xff]  ;;  %v5700_v4 = vld [vmem:[%s14218_s18 + $0x450] sm:$0xff] }
0x1b56   :  { %5941 = vmatpush1.msra.mxu0 %v5629_v6  ;;  %6633 = vmatpush3.msra.mxu1 %v5631_v7  ;;  %v5699_v6 = vld [vmem:[%s14218_s18 + $0x448] sm:$0xff]  ;;  %v5693_v7 = vld [vmem:[%s14218_s18 + $0x418] sm:$0xff] }
0x1b57   :  { %5942 = vmatprep.subr.mxu0 %v5623_v24  ;;  %6634 = vmatprep.subr.mxu1 %v5736_v31  ;;  %v5692_v24 = vld [vmem:[%s14218_s18 + $0x410] sm:$0xff]  ;;  %v5686_v31 = vld [vmem:[%s14218_s18 + $0x3e0] sm:$0xff] }
0x1b58   :  { %5943 = vmatpush1.msra.mxu0 %v5622_v46  ;;  %6635 = vmatpush3.msra.mxu1 %v5624_v48  ;;  %v5685_v46 = vld [vmem:[%s14218_s18 + $0x3d8] sm:$0xff]  ;;  %v5679_v48 = vld [vmem:[%s14218_s18 + $0x3a8] sm:$0xff] }
0x1b59   :  { %5944 = vmatprep.subr.mxu0 %v5616_v41  ;;  %6636 = vmatprep.subr.mxu1 %v5729_v49  ;;  %v5678_v41 = vld [vmem:[%s14218_s18 + $0x3a0] sm:$0xff] }
0x1b5a   :  { %5945 = vmatpush1.msra.mxu0 %v5615_v30  ;;  %6637 = vmatpush3.msra.mxu1 %v5617_v50 }
0x1b5b   :  { %5946 = vmatprep.subr.mxu0 %v5609_v51  ;;  %6638 = vmatprep.subr.mxu1 %v5722_v20 }
0x1b5c   :  { %5947 = vmatpush1.msra.mxu0 %v5608_v32  ;;  %6639 = vmatpush3.msra.mxu1 %v5610_v33 }
0x1b5d   :  { %5948 = vmatprep.subr.mxu0 %v5602_v34  ;;  %6640 = vmatprep.subr.mxu1 %v5715_v19 }
0x1b5e   :  { %5949 = vmatpush1.msra.mxu0 %v5601_v37  ;;  %6641 = vmatpush3.msra.mxu1 %v5603_v39 }
0x1b5f   :  { %5950 = vmatprep.subr.mxu0 %v5595_v52  ;;  %6642 = vmatprep.subr.mxu1 %v5708_v0 }
0x1b60   :  { %5951 = vmatpush1.msra.mxu0 %v5594_v53  ;;  %6643 = vmatpush3.msra.mxu1 %v5596_v54 }
0x1b61   :  { %5952 = vmatprep.subr.mxu0 %v5588_v14  ;;  %6644 = vmatprep.subr.mxu1 %v5701_v28 }
0x1b62   :  { %5953 = vmatpush1.msra.mxu0 %v5587_v29  ;;  %6645 = vmatpush3.msra.mxu1 %v5589_v27 }
0x1b63   :  { %5954 = vmatprep.subr.mxu0 %v5581_v26  ;;  %6646 = vmatprep.subr.mxu1 %v5694_v18 }
0x1b64   :  { %5955 = vmatpush1.msra.mxu0 %v5580_v45  ;;  %6647 = vmatpush3.msra.mxu1 %v5582_v44 }
0x1b65   :  { %5956 = vmatprep.subr.mxu0 %v5574_v40  ;;  %6648 = vmatprep.subr.mxu1 %v5687_v55 }
0x1b66   :  { %5957 = vmatpush1.msra.mxu0 %v5573_v56  ;;  %6649 = vmatpush3.msra.mxu1 %v5575_v57 }
0x1b67   :  { %5958 = vmatprep.subr.mxu0 %v5567_v58  ;;  %6650 = vmatprep.subr.mxu1 %v5680_v15 }
0x1b68   :  { %5959 = vmatpush1.msra.mxu0 %v5566_v59  ;;  %6651 = vmatpush3.msra.mxu1 %v5568_v60 }
0x1b69   :  { %5960 = vmatprep.subr.mxu0 %v5784_v61  ;;  %6064 = vmatmul.mubr.f32.vlgmr.msra.gmra.mxu1 %v13794_v62 }
0x1b6a   :  { %5961 = vmatpush2.msra.mxu0 %v5783_v63 }
0x1b6b   :  { %5962 = vmatprep.subr.mxu0 %v5777_v8 }
0x1b6c   :  { %5963 = vmatpush2.msra.mxu0 %v5776_v9 }
0x1b6d   :  { %5964 = vmatprep.subr.mxu0 %v5770_v10 }
0x1b6e   :  { %5965 = vmatpush2.msra.mxu0 %v5769_v11 }
0x1b6f   :  { %5966 = vmatprep.subr.mxu0 %v5763_v12 }
0x1b70   :  { %5967 = vmatpush2.msra.mxu0 %v5762_v13 }
0x1b71   :  { %5968 = vmatprep.subr.mxu0 %v5756_v16 }
0x1b72   :  { %5969 = vmatpush2.msra.mxu0 %v5755_v17 }
0x1b73   :  { %5970 = vmatprep.subr.mxu0 %v5749_v22 }
0x1b74   :  { %5971 = vmatpush2.msra.mxu0 %v5748_v23 }
0x1b75   :  { %5972 = vmatprep.subr.mxu0 %v5742_v25 }
0x1b76   :  { %5973 = vmatpush2.msra.mxu0 %v5741_v47 }
0x1b77   :  { %5974 = vmatprep.subr.mxu0 %v5735_v21 }
0x1b78   :  { %5975 = vmatpush2.msra.mxu0 %v5734_v42 }
0x1b79   :  { %5976 = vmatprep.subr.mxu0 %v5728_v43 }
0x1b7a   :  { %5977 = vmatpush2.msra.mxu0 %v5727_v1 }
0x1b7b   :  { %5978 = vmatprep.subr.mxu0 %v5721_v36 }
0x1b7c   :  { %5979 = vmatpush2.msra.mxu0 %v5720_v5 }
0x1b7d   :  { %5980 = vmatprep.subr.mxu0 %v5714_v38 }
0x1b7e   :  { %5981 = vmatpush2.msra.mxu0 %v5713_v35 }
0x1b7f   :  { %5982 = vmatprep.subr.mxu0 %v5707_v2 }
0x1b80   :  { %5983 = vmatpush2.msra.mxu0 %v5706_v3 }
0x1b81   :  { %5984 = vmatprep.subr.mxu0 %v5700_v4 }
0x1b82   :  { %5985 = vmatpush2.msra.mxu0 %v5699_v6 }
0x1b83   :  { %5986 = vmatprep.subr.mxu0 %v5693_v7 }
0x1b84   :  { %5987 = vmatpush2.msra.mxu0 %v5692_v24 }
0x1b85   :  { %5988 = vmatprep.subr.mxu0 %v5686_v31 }
0x1b86   :  { %5989 = vmatpush2.msra.mxu0 %v5685_v46 }
0x1b87   :  { %5990 = vmatprep.subr.mxu0 %v5679_v48 }
0x1b88   :  { %5991 = vmatpush2.msra.mxu0 %v5678_v41 }
0x1b89   :  { %5993 = vmatmul.mubr.f32.vlgmr.msra.gmra.mxu0 %v13794_v62 }
0x1b8a   :  { %6729 = shalt.err (!%p6726_p5)
}
0x1b8b   :  { %6095 = dma.vmem_to_hbm [thread:$0]  %s6093_s27, 128, %s14121_s21, [#allocation5]  }
0x1b8c   :  { %s6738_s7 = scalar_lea.vmem %s6115_s12, 128  ;;  %p6743_p7 = scmp.lt.s32.totalorder %s6115_s12, %s6115_s12 }
0x1b8d   :  { %p6739_p6 = scmp.ne.s32.totalorder %s6115_s12, %s6738_s7  ;;  %p6744_p8 = scmp.lt.s32.totalorder %s6738_s7, %s6738_s7 }
0x1b8f   :  { %p6745_p9 = por %p6744_p8, %p6743_p7 }
0x1b91   :  { %p6746_p10 = pnand %p6745_p9, %p6739_p6 }
0x1b93   :  { %6749 = shalt.err (!%p6746_p10)
}
0x1b94   :  { %6117 = dma.vmem_to_hbm [thread:$0]  %s6115_s12, 128, %s14124_s24, [#allocation8]  }
0x1b95   :  { %s6882_s9 = smov [#allocation2]   ;;  %s6883_s23 = smov [#allocation6]  }
0x1b96   :  { %s6082_s1 = sshll.u32 %s6882_s9, 4  ;;  %s6102_s8 = sshll.u32 %s6883_s23, 4  ;;  %s6083_s1 = int_to_ptr.vmem [resolvable:$true] %s6082_s1  ;;  %s6103_s8 = int_to_ptr.vmem [resolvable:$true] %s6102_s8 }
0x1b97   :  { %s6758_s3 = scalar_lea.vmem %s6083_s1, 128  ;;  %p6763_p12 = scmp.lt.s32.totalorder %s6083_s1, %s6083_s1 }
0x1b98   :  { %p6759_p11 = scmp.ne.s32.totalorder %s6083_s1, %s6758_s3  ;;  %p6764_p13 = scmp.lt.s32.totalorder %s6758_s3, %s6758_s3 }
0x1b9a   :  { %p6765_p0 = por %p6764_p13, %p6763_p12 }
0x1b9c   :  { %p6766_p1 = pnand %p6765_p0, %p6759_p11 }
0x1b9e   :  { %6769 = shalt.err (!%p6766_p1)
}
0x1b9f   :  { %6085 = dma.vmem_to_hbm [thread:$0]  %s6083_s1, 128, %s14120_s20, [#allocation3]  }
0x1ba0   :  { %s6778_s0 = scalar_lea.vmem %s6103_s8, 128  ;;  %p6783_p3 = scmp.lt.s32.totalorder %s6103_s8, %s6103_s8 }
0x1ba1   :  { %p6779_p2 = scmp.ne.s32.totalorder %s6103_s8, %s6778_s0  ;;  %p6784_p4 = scmp.lt.s32.totalorder %s6778_s0, %s6778_s0 }
0x1ba3   :  { %p6785_p5 = por %p6784_p4, %p6783_p3 }
0x1ba5   :  { %p6786_p6 = pnand %p6785_p5, %p6779_p2 }
0x1ba7   :  { %6789 = shalt.err (!%p6786_p6)
}
0x1ba8   :  { %6105 = dma.vmem_to_hbm [thread:$0]  %s6103_s8, 128, %s14122_s22, [#allocation5]  }
0x1ba9   :  { %s6884_s30 = smov [#allocation9]  }
0x1baa   :  { %s6124_s17 = sshll.u32 %s6884_s30, 4  ;;  %s6125_s17 = int_to_ptr.vmem [resolvable:$true] %s6124_s17 }
0x1bab   :  { %s6798_s19 = scalar_lea.vmem %s6125_s17, 128  ;;  %p6803_p8 = scmp.lt.s32.totalorder %s6125_s17, %s6125_s17 }
0x1bac   :  { %p6799_p7 = scmp.ne.s32.totalorder %s6125_s17, %s6798_s19  ;;  %p6804_p9 = scmp.lt.s32.totalorder %s6798_s19, %s6798_s19 }
0x1bae   :  { %p6805_p10 = por %p6804_p9, %p6803_p8 }
0x1bb0   :  { %p6806_p11 = pnand %p6805_p10, %p6799_p7 }
0x1bb2   :  { %6809 = shalt.err (!%p6806_p11)
}
0x1bb3   :  { %6127 = dma.vmem_to_hbm [thread:$0]  %s6125_s17, 128, %s14125_s25, [#allocation8]  }
0x1bb4   :  { %s6885_s22 = smov [#allocation10]  }
0x1bb5   :  { %s6134_s4 = sshll.u32 %s6885_s22, 4  ;;  %s6135_s4 = int_to_ptr.vmem [resolvable:$true] %s6134_s4 }
0x1bb6   :  { %s6818_s25 = scalar_lea.vmem %s6135_s4, 896  ;;  %p6823_p13 = scmp.lt.s32.totalorder %s6135_s4, %s6135_s4 }
0x1bb7   :  { %p6819_p12 = scmp.ne.s32.totalorder %s6135_s4, %s6818_s25  ;;  %p6824_p0 = scmp.lt.s32.totalorder %s6818_s25, %s6818_s25 }
0x1bb9   :  { %p6825_p1 = por %p6824_p0, %p6823_p13 }
0x1bbb   :  { %p6826_p2 = pnand %p6825_p1, %p6819_p12 }
0x1c08   :  { %v5852_v62 = vpop.f32.mrf.mxu0  ;;  %v5923_v49 = vpop.f32.mrf.mxu1 }
0x1c09   :  { %6069 = vst [vmem:[#allocation10] sm:$0xff] %v5852_v62  ;;  %6071 = vst [vmem:[#allocation10 + $0x10] sm:$0xff] %v5923_v49 }
0x1c0a   :  { %v5854_v30 = vpop.f32.mrf.mxu0  ;;  %v5925_v50 = vpop.f32.mrf.mxu1 }
0x1c0b   :  { %6070 = vst [vmem:[#allocation10 + $0x8] sm:$0xff] %v5854_v30  ;;  %6072 = vst [vmem:[#allocation10 + $0x18] sm:$0xff] %v5925_v50 }
0x1c29   :  { %v6652_v51 = vpop.f32.mrf.mxu1 }
0x1c2b   :  { %v6653_v20 = vpop.f32.mrf.mxu1 }
0x1c2c   :  { %v6654_v32 = vadd.f32 %v6653_v20, %v6652_v51 }
0x1c2e   :  { %6075 = vst [vmem:[#allocation10 + $0x30] sm:$0xff] %v6654_v32 }
0x1c49   :  { %v5994_v33 = vpop.f32.mrf.mxu0 }
0x1c4a   :  { %6073 = vst [vmem:[#allocation10 + $0x20] sm:$0xff] %v5994_v33 }
0x1c4b   :  { %v5996_v34 = vpop.f32.mrf.mxu0 }
0x1c4c   :  { %6074 = vst [vmem:[#allocation10 + $0x28] sm:$0xff] %v5996_v34 }
0x1c4d   :  { %6829 = shalt.err (!%p6826_p2)
}
0x1c4e   :  { %6137 = dma.vmem_to_hbm [thread:$0]  %s6135_s4, 896, %s14126_s26, [#allocation11]  }
0x1c4f   :  { %6854 = dma.done.wait [#allocation3], 128  }
0x1c50   :  { %6855 = vsyncadd [#allocation3], 4294967168 }
0x1c51   :  { %6856 = dma.done.wait [#allocation5], 256  }
0x1c52   :  { %6857 = vsyncadd [#allocation5], 4294967040 }
0x1c53   :  { %6858 = dma.done.wait [#allocation8], 256  }
0x1c54   :  { %6859 = vsyncadd [#allocation8], 4294967040 }
0x1c55   :  { %6860 = dma.done.wait [#allocation11], 896  }
0x1c56   :  { %6861 = vsyncadd [#allocation11], 4294966400 }
0x1c57   :  { %6158 = vsyncpa [#allocation3], 1 }
0x1c58   :  { %6159 = vsyncpa [#allocation5], 1 }
0x1c59   :  { %6160 = vsyncpa [#allocation8], 1 }
0x1c5a   :  { %6161 = vsyncpa [#allocation11], 1 }

</bundles_post_ra>
